<compile_context>
chip_gen: v7x
topology: tpu7x:2x2x1
jax: 0.10.0
libtpu: 0.0.40
codegen_flags: <defaults>
</compile_context>

<pallas_src>
import math

import numpy as np
import jax
import jax.numpy as jnp
from jax.experimental import pallas as pl
from jax.experimental.pallas import tpu as pltpu

# ----------------------------- hyper-parameters ------------------------------
WIDTH = 32            # conv width
DEPTH = 2             # residual blocks
BATCH = 2
H, W_BOARD = 6, 7     # Connect-4 board
C_IN = 2              # input planes
BN_EPS = 1e-5
N_TAPS = 9            # 3x3 kernel taps
POLICY_DIM = 7
OUT_LANES = 128       # lane-dense output slab width


# ------------------------------ fused kernel ---------------------------------
def fused_forward_kernel(x_ref, s_ref, g_ref, w0_ref, b0_ref, wres_ref, bres_ref,
                         whead_ref, bhead_ref, wpfc_ref, bpfc_ref,
                         w1_ref, b1_ref, w2_ref, b2_ref, out_ref):
    f32, bf16 = jnp.float32, jnp.bfloat16

    def conv3x3(feat_bf, w_ref, base):
        """3x3 same-conv: sum_t (S_t @ feat) @ W[base + t], f32 accumulation."""
        acc = None
        for t in range(N_TAPS):
            if t == N_TAPS // 2:                 # center tap -> S_t is identity
                shifted = feat_bf
            else:
                shifted = jnp.dot(s_ref[t], feat_bf,
                                  preferred_element_type=f32).astype(bf16)
            term = jnp.dot(shifted, w_ref[base + t], preferred_element_type=f32)
            acc = term if acc is None else acc + term
        return acc

    # conv block: Conv3x3 + (folded) BN + ReLU
    feat = jnp.maximum(conv3x3(x_ref[...], w0_ref, 0) + b0_ref[...], 0.0)

    # residual stack: [Conv3x3+BN+ReLU, Conv3x3+BN] + skip, then ReLU
    for d in range(DEPTH):
        inp = feat
        h = jnp.maximum(
            conv3x3(feat.astype(bf16), wres_ref, (2 * d) * N_TAPS)
            + bres_ref[2 * d:2 * d + 1, :], 0.0)
        feat = jnp.maximum(
            conv3x3(h.astype(bf16), wres_ref, (2 * d + 1) * N_TAPS)
            + bres_ref[2 * d + 1:2 * d + 2, :] + inp, 0.0)

    feat_bf = feat.astype(bf16)

    # fused 1x1 head convs (+BN+ReLU): cols [0:2] policy planes, [2:3] value plane
    head = jnp.maximum(
        jnp.dot(feat_bf, whead_ref[...], preferred_element_type=f32)
        + bhead_ref[...], 0.0)                                        # (M, 3) f32

    # policy head Linear(2*6*7 -> 7) via batch-selector matmul (no transposes)
    u = head[:, 0:1] * wpfc_ref[0] + head[:, 1:2] * wpfc_ref[1]       # (M, 7)
    policy = jnp.dot(g_ref[...], u, preferred_element_type=f32) + bpfc_ref[...]

    # value head Linear(42 -> 256)+ReLU, Linear(256 -> 1)+Tanh
    v1 = jnp.maximum(
        jnp.dot(g_ref[...], head[:, 2:3] * w1_ref[...],
                preferred_element_type=f32) + b1_ref[...], 0.0)       # (B, 256)
    value = jnp.tanh(
        jnp.dot(v1, w2_ref[...], preferred_element_type=f32) + b2_ref[...])  # (B, 1)

    # lane-dense output slab: [policy | value | zeros]
    out_ref[...] = jnp.zeros(out_ref.shape, f32)
    out_ref[:, 0:POLICY_DIM] = policy
    out_ref[:, POLICY_DIM:POLICY_DIM + 1] = value


def _full_spec(shape):
    n = len(shape)
    return pl.BlockSpec(shape, lambda i, _n=n: (0,) * _n)


def alpha_connect4_forward(buffers, s_nchw):
    """Fused forward. `buffers` is the tuple returned by prepare_buffers()."""
    B = s_nchw.shape[0]
    M = B * H * W_BOARD
    x2d = (jnp.transpose(s_nchw, (0, 2, 3, 1))           # NCHW -> NHWC
           .reshape(M, C_IN).astype(jnp.bfloat16))       # (M, C_in) bf16
    inputs = (x2d,) + tuple(buffers)
    slab = pl.pallas_call(
        fused_forward_kernel,
        out_shape=jax.ShapeDtypeStruct((B, OUT_LANES), jnp.float32),
        grid=(1,),
        in_specs=[_full_spec(a.shape) for a in inputs],
        out_specs=_full_spec((B, OUT_LANES)),
        compiler_params=pltpu.CompilerParams(dimension_semantics=("arbitrary",)),
    )(*inputs)
    return slab[:, :POLICY_DIM], slab[:, POLICY_DIM:POLICY_DIM + 1]


# --------------------------- parameter construction --------------------------
def _conv_bn_params(key, cin_k, cout):
    """Conv weight in (K, Cout) matmul layout with eval-mode BN scale folded in."""
    k1, k2, k3, k4, k5, k6 = jax.random.split(key, 6)
    w = jax.random.normal(k1, (cin_k, cout), jnp.float32) / math.sqrt(cin_k)
    conv_b = 0.1 * jax.random.normal(k2, (cout,), jnp.float32)
    gamma = 1.0 + 0.1 * jax.random.normal(k3, (cout,), jnp.float32)
    beta = 0.1 * jax.random.normal(k4, (cout,), jnp.float32)
    mean = 0.1 * jax.random.normal(k5, (cout,), jnp.float32)
    var = jax.random.uniform(k6, (cout,), jnp.float32, minval=0.5, maxval=1.5)
    s = gamma / jnp.sqrt(var + BN_EPS)
    return w * s[None, :], s * (conv_b - mean) + beta


def _linear_params(key, fan_in, fan_out):
    k1, k2 = jax.random.split(key)
    w = jax.random.normal(k1, (fan_in, fan_out), jnp.float32) / math.sqrt(fan_in)
    b = 0.1 * jax.random.normal(k2, (fan_out,), jnp.float32)
    return w, b


def init_params(key, width, depth):
    keys = jax.random.split(key, 6 + 2 * depth)
    ki = iter(keys)
    p = {"conv0": _conv_bn_params(next(ki), N_TAPS * C_IN, width)}
    for d in range(depth):
        p[f"res{d}_a"] = _conv_bn_params(next(ki), N_TAPS * width, width)
        p[f"res{d}_b"] = _conv_bn_params(next(ki), N_TAPS * width, width)
    p["pol_conv"] = _conv_bn_params(next(ki), width, 2)       # 1x1 conv
    p["val_conv"] = _conv_bn_params(next(ki), width, 1)       # 1x1 conv
    p["pol_fc"] = _linear_params(next(ki), H * W_BOARD * 2, POLICY_DIM)
    p["val_fc1"] = _linear_params(next(ki), H * W_BOARD, 256)
    p["val_fc2"] = _linear_params(next(ki), 256, 1)
    return p


def _shift_matrices(batch):
    """(9, M, M) 0/1 matrices: S_t @ feat = feature shifted by tap t, zero-padded."""
    hw = H * W_BOARD
    m = batch * hw
    pos = np.arange(m)
    b = pos // hw
    y = (pos % hw) // W_BOARD
    x = pos % W_BOARD
    s = np.zeros((N_TAPS, m, m), np.float32)
    t = 0
    for dy in (-1, 0, 1):
        for dx in (-1, 0, 1):
            yy, xx = y + dy, x + dx
            valid = (yy >= 0) & (yy < H) & (xx >= 0) & (xx < W_BOARD)
            src = b * hw + yy * W_BOARD + xx
            s[t, pos[valid], src[valid]] = 1.0
            t += 1
    return s


def prepare_buffers(params, batch):
    """One-time packing of all kernel operands (bf16 MXU weights, f32 biases)."""
    bf16, f32 = jnp.bfloat16, jnp.float32
    hw = H * W_BOARD

    s_mats = jnp.asarray(_shift_matrices(batch), bf16)                   # (9, M, M)
    g = jnp.kron(jnp.eye(batch, dtype=f32), jnp.ones((1, hw), f32))      # (B, M)

    w0, b0 = params["conv0"]
    w0 = w0.reshape(N_TAPS, C_IN, WIDTH).astype(bf16)
    b0 = b0.reshape(1, WIDTH).astype(f32)

    wres = jnp.concatenate(
        [params[f"res{d}_{ab}"][0].reshape(N_TAPS, WIDTH, WIDTH)
         for d in range(DEPTH) for ab in ("a", "b")], axis=0).astype(bf16)
    bres = jnp.stack(
        [params[f"res{d}_{ab}"][1] for d in range(DEPTH) for ab in ("a", "b")],
        axis=0).astype(f32)                                              # (2*DEPTH, W)

    wp, bp = params["pol_conv"]
    wv, bv = params["val_conv"]
    whead = jnp.concatenate([wp, wv], axis=1).astype(bf16)               # (W, 3)
    bhead = jnp.concatenate([bp, bv], axis=0).reshape(1, 3).astype(f32)

    wpfc, bpfc = params["pol_fc"]                                        # (2*hw, 7)
    wpfc_exp = jnp.stack(
        [jnp.tile(wpfc[c * hw:(c + 1) * hw, :], (batch, 1)) for c in range(2)],
        axis=0).astype(f32)                                              # (2, M, 7)
    bpfc = bpfc.reshape(1, POLICY_DIM).astype(f32)

    w1, b1 = params["val_fc1"]
    w1_exp = jnp.tile(w1, (batch, 1)).astype(f32)                        # (M, 256)
    b1 = b1.reshape(1, -1).astype(f32)
    w2, b2 = params["val_fc2"]
    w2 = w2.astype(f32)
    b2 = b2.reshape(1, 1).astype(f32)

    return (s_mats, g, w0, b0, wres, bres, whead, bhead,
            wpfc_exp, bpfc, w1_exp, b1, w2, b2)


# ------------------------ pure-JAX reference (checking) ----------------------
def _im2col_3x3(x_bhwc):
    b, hh, ww, c = x_bhwc.shape
    xp = jnp.pad(x_bhwc, ((0, 0), (1, 1), (1, 1), (0, 0)))
    cols = [xp[:, dy:dy + hh, dx:dx + ww, :] for dy in range(3) for dx in range(3)]
    return jnp.concatenate(cols, axis=-1).reshape(b * hh * ww, 9 * c)


def reference_forward(params, s_nchw):
    """Same math (bf16 matmuls, f32 epilogue) in plain JAX, for verification."""
    bf16, f32 = jnp.bfloat16, jnp.float32
    hi = jax.lax.Precision.HIGHEST
    b = s_nchw.shape[0]
    x = jnp.transpose(s_nchw, (0, 2, 3, 1)).astype(f32).reshape(b * H * W_BOARD, C_IN)

    def conv3x3(feat2d, w, bias, cin):
        patches = _im2col_3x3(feat2d.reshape(b, H, W_BOARD, cin))
        return jnp.dot(patches.astype(bf16), w.astype(bf16),
                       preferred_element_type=f32) + bias[None, :]

    w0, b0 = params["conv0"]
    feat = jnp.maximum(conv3x3(x, w0, b0, C_IN), 0.0)
    for d in range(DEPTH):
        inp = feat
        wa, ba = params[f"res{d}_a"]
        h = jnp.maximum(conv3x3(feat, wa, ba, WIDTH), 0.0)
        wb, bb = params[f"res{d}_b"]
        feat = jnp.maximum(conv3x3(h, wb, bb, WIDTH) + inp, 0.0)

    wp, bp = params["pol_conv"]
    pfeat = jnp.maximum(jnp.dot(feat.astype(bf16), wp.astype(bf16),
                                preferred_element_type=f32) + bp[None, :], 0.0)
    p_flat = jnp.transpose(pfeat.reshape(b, H * W_BOARD, 2), (0, 2, 1)).reshape(b, -1)
    wfc, bfc = params["pol_fc"]
    policy = jnp.dot(p_flat, wfc, precision=hi) + bfc[None, :]

    wv, bv = params["val_conv"]
    vfeat = jnp.maximum(jnp.dot(feat.astype(bf16), wv.astype(bf16),
                                preferred_element_type=f32) + bv[None, :], 0.0)
    v_flat = vfeat.reshape(b, H * W_BOARD)
    w1, b1 = params["val_fc1"]
    v1 = jnp.maximum(jnp.dot(v_flat, w1, precision=hi) + b1[None, :], 0.0)
    w2, b2 = params["val_fc2"]
    value = jnp.tanh(jnp.dot(v1, w2, precision=hi) + b2[None, :])
    return policy, value


# ----------------------------------- main -------------------------------------
if __name__ == "__main__":
    key = jax.random.PRNGKey(0)
    k_params, k_input = jax.random.split(key)
    params = init_params(k_params, WIDTH, DEPTH)
    buffers = prepare_buffers(params, BATCH)

    # input: (batch=2, channels=2, H=6, W=7) Connect-4 planes
    s = jax.random.normal(k_input, (BATCH, C_IN, H, W_BOARD), jnp.float32)

    forward = jax.jit(alpha_connect4_forward)
    policy, value = forward(buffers, s)
    jax.block_until_ready((policy, value))

    assert policy.shape == (BATCH, POLICY_DIM), policy.shape
    assert value.shape == (BATCH, 1), value.shape
    assert bool(jnp.all(jnp.isfinite(policy))) and bool(jnp.all(jnp.isfinite(value)))
    assert bool(jnp.all(jnp.abs(value) <= 1.0))   # tanh output range

    # numerical check against the pure-JAX reference (same folded parameters)
    ref_policy, ref_value = reference_forward(params, s)
    assert bool(jnp.allclose(policy, ref_policy, atol=2e-2, rtol=2e-2))
    assert bool(jnp.allclose(value, ref_value, atol=2e-2, rtol=2e-2))

    print("KERNEL_OK")
</pallas_src>

<mosaic_0001>
module attributes {stable_mosaic.version = 11 : i64} {
  func.func @fused_forward_kernel(%arg0: i32, %arg1: memref<84x2xbf16, #tpu.memory_space<vmem>>, %arg2: memref<9x84x84xbf16, #tpu.memory_space<vmem>>, %arg3: memref<2x84xf32, #tpu.memory_space<vmem>>, %arg4: memref<9x2x32xbf16, #tpu.memory_space<vmem>>, %arg5: memref<1x32xf32, #tpu.memory_space<vmem>>, %arg6: memref<36x32x32xbf16, #tpu.memory_space<vmem>>, %arg7: memref<4x32xf32, #tpu.memory_space<vmem>>, %arg8: memref<32x3xbf16, #tpu.memory_space<vmem>>, %arg9: memref<1x3xf32, #tpu.memory_space<vmem>>, %arg10: memref<2x84x7xf32, #tpu.memory_space<vmem>>, %arg11: memref<1x7xf32, #tpu.memory_space<vmem>>, %arg12: memref<84x256xf32, #tpu.memory_space<vmem>>, %arg13: memref<1x256xf32, #tpu.memory_space<vmem>>, %arg14: memref<256x1xf32, #tpu.memory_space<vmem>>, %arg15: memref<1x1xf32, #tpu.memory_space<vmem>>, %arg16: memref<2x128xf32, #tpu.memory_space<vmem>>) attributes {dimension_semantics = [#tpu.dimension_semantics<arbitrary>], iteration_bounds = array<i64: 1>, scalar_prefetch = 0 : i64, scratch_operands = 0 : i64, tpu.core_type = #tpu.core_type<tc>, window_params = [{pipeline_mode = #tpu.pipeline_mode<synchronous>, transform_indices = @transform_0, window_bounds = array<i64: 84, 2>}, {pipeline_mode = #tpu.pipeline_mode<synchronous>, transform_indices = @transform_1, window_bounds = array<i64: 9, 84, 84>}, {pipeline_mode = #tpu.pipeline_mode<synchronous>, transform_indices = @transform_2, window_bounds = array<i64: 2, 84>}, {pipeline_mode = #tpu.pipeline_mode<synchronous>, transform_indices = @transform_3, window_bounds = array<i64: 9, 2, 32>}, {pipeline_mode = #tpu.pipeline_mode<synchronous>, transform_indices = @transform_4, window_bounds = array<i64: 1, 32>}, {pipeline_mode = #tpu.pipeline_mode<synchronous>, transform_indices = @transform_5, window_bounds = array<i64: 36, 32, 32>}, {pipeline_mode = #tpu.pipeline_mode<synchronous>, transform_indices = @transform_6, window_bounds = array<i64: 4, 32>}, {pipeline_mode = #tpu.pipeline_mode<synchronous>, transform_indices = @transform_7, window_bounds = array<i64: 32, 3>}, {pipeline_mode = #tpu.pipeline_mode<synchronous>, transform_indices = @transform_8, window_bounds = array<i64: 1, 3>}, {pipeline_mode = #tpu.pipeline_mode<synchronous>, transform_indices = @transform_9, window_bounds = array<i64: 2, 84, 7>}, {pipeline_mode = #tpu.pipeline_mode<synchronous>, transform_indices = @transform_10, window_bounds = array<i64: 1, 7>}, {pipeline_mode = #tpu.pipeline_mode<synchronous>, transform_indices = @transform_11, window_bounds = array<i64: 84, 256>}, {pipeline_mode = #tpu.pipeline_mode<synchronous>, transform_indices = @transform_12, window_bounds = array<i64: 1, 256>}, {pipeline_mode = #tpu.pipeline_mode<synchronous>, transform_indices = @transform_13, window_bounds = array<i64: 256, 1>}, {pipeline_mode = #tpu.pipeline_mode<synchronous>, transform_indices = @transform_14, window_bounds = array<i64: 1, 1>}, {pipeline_mode = #tpu.pipeline_mode<synchronous>, transform_indices = @transform_15, window_bounds = array<i64: 2, 128>}]} {
    %c0 = arith.constant 0 : index
    %c0_0 = arith.constant 0 : index
    %0 = vector.load %arg1[%c0, %c0_0] : memref<84x2xbf16, #tpu.memory_space<vmem>>, vector<84x2xbf16>
    %c0_1 = arith.constant 0 : index
    %c0_2 = arith.constant 0 : index
    %c0_3 = arith.constant 0 : index
    %1 = vector.load %arg2[%c0_1, %c0_2, %c0_3] : memref<9x84x84xbf16, #tpu.memory_space<vmem>>, vector<1x84x84xbf16>
    %2 = vector.shape_cast %1 : vector<1x84x84xbf16> to vector<84x84xbf16>
    %cst = arith.constant dense<0.000000e+00> : vector<84x2xf32>
    %3 = tpu.matmul %2, %0, %cst {dimension_numbers = #tpu.dot_dimension_numbers<[1], [0], [0], [1], [0, 0, 1, 1], [], []>} : vector<84x84xbf16>, vector<84x2xbf16>, vector<84x2xf32> -> vector<84x2xf32>
    %4 = arith.truncf %3 : vector<84x2xf32> to vector<84x2xbf16>
    %c0_4 = arith.constant 0 : index
    %c0_5 = arith.constant 0 : index
    %c0_6 = arith.constant 0 : index
    %5 = vector.load %arg4[%c0_4, %c0_5, %c0_6] : memref<9x2x32xbf16, #tpu.memory_space<vmem>>, vector<1x2x32xbf16>
    %6 = vector.shape_cast %5 : vector<1x2x32xbf16> to vector<2x32xbf16>
    %cst_7 = arith.constant dense<0.000000e+00> : vector<84x32xf32>
    %7 = tpu.matmul %4, %6, %cst_7 {dimension_numbers = #tpu.dot_dimension_numbers<[1], [0], [0], [1], [0, 0, 1, 1], [], []>} : vector<84x2xbf16>, vector<2x32xbf16>, vector<84x32xf32> -> vector<84x32xf32>
    %c1 = arith.constant 1 : index
    %c0_8 = arith.constant 0 : index
    %c0_9 = arith.constant 0 : index
    %8 = vector.load %arg2[%c1, %c0_8, %c0_9] : memref<9x84x84xbf16, #tpu.memory_space<vmem>>, vector<1x84x84xbf16>
    %9 = vector.shape_cast %8 : vector<1x84x84xbf16> to vector<84x84xbf16>
    %cst_10 = arith.constant dense<0.000000e+00> : vector<84x2xf32>
    %10 = tpu.matmul %9, %0, %cst_10 {dimension_numbers = #tpu.dot_dimension_numbers<[1], [0], [0], [1], [0, 0, 1, 1], [], []>} : vector<84x84xbf16>, vector<84x2xbf16>, vector<84x2xf32> -> vector<84x2xf32>
    %11 = arith.truncf %10 : vector<84x2xf32> to vector<84x2xbf16>
    %c1_11 = arith.constant 1 : index
    %c0_12 = arith.constant 0 : index
    %c0_13 = arith.constant 0 : index
    %12 = vector.load %arg4[%c1_11, %c0_12, %c0_13] : memref<9x2x32xbf16, #tpu.memory_space<vmem>>, vector<1x2x32xbf16>
    %13 = vector.shape_cast %12 : vector<1x2x32xbf16> to vector<2x32xbf16>
    %cst_14 = arith.constant dense<0.000000e+00> : vector<84x32xf32>
    %14 = tpu.matmul %11, %13, %cst_14 {dimension_numbers = #tpu.dot_dimension_numbers<[1], [0], [0], [1], [0, 0, 1, 1], [], []>} : vector<84x2xbf16>, vector<2x32xbf16>, vector<84x32xf32> -> vector<84x32xf32>
    %15 = arith.addf %7, %14 : vector<84x32xf32>
    %c2 = arith.constant 2 : index
    %c0_15 = arith.constant 0 : index
    %c0_16 = arith.constant 0 : index
    %16 = vector.load %arg2[%c2, %c0_15, %c0_16] : memref<9x84x84xbf16, #tpu.memory_space<vmem>>, vector<1x84x84xbf16>
    %17 = vector.shape_cast %16 : vector<1x84x84xbf16> to vector<84x84xbf16>
    %cst_17 = arith.constant dense<0.000000e+00> : vector<84x2xf32>
    %18 = tpu.matmul %17, %0, %cst_17 {dimension_numbers = #tpu.dot_dimension_numbers<[1], [0], [0], [1], [0, 0, 1, 1], [], []>} : vector<84x84xbf16>, vector<84x2xbf16>, vector<84x2xf32> -> vector<84x2xf32>
    %19 = arith.truncf %18 : vector<84x2xf32> to vector<84x2xbf16>
    %c2_18 = arith.constant 2 : index
    %c0_19 = arith.constant 0 : index
    %c0_20 = arith.constant 0 : index
    %20 = vector.load %arg4[%c2_18, %c0_19, %c0_20] : memref<9x2x32xbf16, #tpu.memory_space<vmem>>, vector<1x2x32xbf16>
    %21 = vector.shape_cast %20 : vector<1x2x32xbf16> to vector<2x32xbf16>
    %cst_21 = arith.constant dense<0.000000e+00> : vector<84x32xf32>
    %22 = tpu.matmul %19, %21, %cst_21 {dimension_numbers = #tpu.dot_dimension_numbers<[1], [0], [0], [1], [0, 0, 1, 1], [], []>} : vector<84x2xbf16>, vector<2x32xbf16>, vector<84x32xf32> -> vector<84x32xf32>
    %23 = arith.addf %15, %22 : vector<84x32xf32>
    %c3 = arith.constant 3 : index
    %c0_22 = arith.constant 0 : index
    %c0_23 = arith.constant 0 : index
    %24 = vector.load %arg2[%c3, %c0_22, %c0_23] : memref<9x84x84xbf16, #tpu.memory_space<vmem>>, vector<1x84x84xbf16>
    %25 = vector.shape_cast %24 : vector<1x84x84xbf16> to vector<84x84xbf16>
    %cst_24 = arith.constant dense<0.000000e+00> : vector<84x2xf32>
    %26 = tpu.matmul %25, %0, %cst_24 {dimension_numbers = #tpu.dot_dimension_numbers<[1], [0], [0], [1], [0, 0, 1, 1], [], []>} : vector<84x84xbf16>, vector<84x2xbf16>, vector<84x2xf32> -> vector<84x2xf32>
    %27 = arith.truncf %26 : vector<84x2xf32> to vector<84x2xbf16>
    %c3_25 = arith.constant 3 : index
    %c0_26 = arith.constant 0 : index
    %c0_27 = arith.constant 0 : index
    %28 = vector.load %arg4[%c3_25, %c0_26, %c0_27] : memref<9x2x32xbf16, #tpu.memory_space<vmem>>, vector<1x2x32xbf16>
    %29 = vector.shape_cast %28 : vector<1x2x32xbf16> to vector<2x32xbf16>
    %cst_28 = arith.constant dense<0.000000e+00> : vector<84x32xf32>
    %30 = tpu.matmul %27, %29, %cst_28 {dimension_numbers = #tpu.dot_dimension_numbers<[1], [0], [0], [1], [0, 0, 1, 1], [], []>} : vector<84x2xbf16>, vector<2x32xbf16>, vector<84x32xf32> -> vector<84x32xf32>
    %31 = arith.addf %23, %30 : vector<84x32xf32>
    %c4 = arith.constant 4 : index
    %c0_29 = arith.constant 0 : index
    %c0_30 = arith.constant 0 : index
    %32 = vector.load %arg4[%c4, %c0_29, %c0_30] : memref<9x2x32xbf16, #tpu.memory_space<vmem>>, vector<1x2x32xbf16>
    %33 = vector.shape_cast %32 : vector<1x2x32xbf16> to vector<2x32xbf16>
    %cst_31 = arith.constant dense<0.000000e+00> : vector<84x32xf32>
    %34 = tpu.matmul %0, %33, %cst_31 {dimension_numbers = #tpu.dot_dimension_numbers<[1], [0], [0], [1], [0, 0, 1, 1], [], []>} : vector<84x2xbf16>, vector<2x32xbf16>, vector<84x32xf32> -> vector<84x32xf32>
    %35 = arith.addf %31, %34 : vector<84x32xf32>
    %c5 = arith.constant 5 : index
    %c0_32 = arith.constant 0 : index
    %c0_33 = arith.constant 0 : index
    %36 = vector.load %arg2[%c5, %c0_32, %c0_33] : memref<9x84x84xbf16, #tpu.memory_space<vmem>>, vector<1x84x84xbf16>
    %37 = vector.shape_cast %36 : vector<1x84x84xbf16> to vector<84x84xbf16>
    %cst_34 = arith.constant dense<0.000000e+00> : vector<84x2xf32>
    %38 = tpu.matmul %37, %0, %cst_34 {dimension_numbers = #tpu.dot_dimension_numbers<[1], [0], [0], [1], [0, 0, 1, 1], [], []>} : vector<84x84xbf16>, vector<84x2xbf16>, vector<84x2xf32> -> vector<84x2xf32>
    %39 = arith.truncf %38 : vector<84x2xf32> to vector<84x2xbf16>
    %c5_35 = arith.constant 5 : index
    %c0_36 = arith.constant 0 : index
    %c0_37 = arith.constant 0 : index
    %40 = vector.load %arg4[%c5_35, %c0_36, %c0_37] : memref<9x2x32xbf16, #tpu.memory_space<vmem>>, vector<1x2x32xbf16>
    %41 = vector.shape_cast %40 : vector<1x2x32xbf16> to vector<2x32xbf16>
    %cst_38 = arith.constant dense<0.000000e+00> : vector<84x32xf32>
    %42 = tpu.matmul %39, %41, %cst_38 {dimension_numbers = #tpu.dot_dimension_numbers<[1], [0], [0], [1], [0, 0, 1, 1], [], []>} : vector<84x2xbf16>, vector<2x32xbf16>, vector<84x32xf32> -> vector<84x32xf32>
    %43 = arith.addf %35, %42 : vector<84x32xf32>
    %c6 = arith.constant 6 : index
    %c0_39 = arith.constant 0 : index
    %c0_40 = arith.constant 0 : index
    %44 = vector.load %arg2[%c6, %c0_39, %c0_40] : memref<9x84x84xbf16, #tpu.memory_space<vmem>>, vector<1x84x84xbf16>
    %45 = vector.shape_cast %44 : vector<1x84x84xbf16> to vector<84x84xbf16>
    %cst_41 = arith.constant dense<0.000000e+00> : vector<84x2xf32>
    %46 = tpu.matmul %45, %0, %cst_41 {dimension_numbers = #tpu.dot_dimension_numbers<[1], [0], [0], [1], [0, 0, 1, 1], [], []>} : vector<84x84xbf16>, vector<84x2xbf16>, vector<84x2xf32> -> vector<84x2xf32>
    %47 = arith.truncf %46 : vector<84x2xf32> to vector<84x2xbf16>
    %c6_42 = arith.constant 6 : index
    %c0_43 = arith.constant 0 : index
    %c0_44 = arith.constant 0 : index
    %48 = vector.load %arg4[%c6_42, %c0_43, %c0_44] : memref<9x2x32xbf16, #tpu.memory_space<vmem>>, vector<1x2x32xbf16>
    %49 = vector.shape_cast %48 : vector<1x2x32xbf16> to vector<2x32xbf16>
    %cst_45 = arith.constant dense<0.000000e+00> : vector<84x32xf32>
    %50 = tpu.matmul %47, %49, %cst_45 {dimension_numbers = #tpu.dot_dimension_numbers<[1], [0], [0], [1], [0, 0, 1, 1], [], []>} : vector<84x2xbf16>, vector<2x32xbf16>, vector<84x32xf32> -> vector<84x32xf32>
    %51 = arith.addf %43, %50 : vector<84x32xf32>
    %c7 = arith.constant 7 : index
    %c0_46 = arith.constant 0 : index
    %c0_47 = arith.constant 0 : index
    %52 = vector.load %arg2[%c7, %c0_46, %c0_47] : memref<9x84x84xbf16, #tpu.memory_space<vmem>>, vector<1x84x84xbf16>
    %53 = vector.shape_cast %52 : vector<1x84x84xbf16> to vector<84x84xbf16>
    %cst_48 = arith.constant dense<0.000000e+00> : vector<84x2xf32>
    %54 = tpu.matmul %53, %0, %cst_48 {dimension_numbers = #tpu.dot_dimension_numbers<[1], [0], [0], [1], [0, 0, 1, 1], [], []>} : vector<84x84xbf16>, vector<84x2xbf16>, vector<84x2xf32> -> vector<84x2xf32>
    %55 = arith.truncf %54 : vector<84x2xf32> to vector<84x2xbf16>
    %c7_49 = arith.constant 7 : index
    %c0_50 = arith.constant 0 : index
    %c0_51 = arith.constant 0 : index
    %56 = vector.load %arg4[%c7_49, %c0_50, %c0_51] : memref<9x2x32xbf16, #tpu.memory_space<vmem>>, vector<1x2x32xbf16>
    %57 = vector.shape_cast %56 : vector<1x2x32xbf16> to vector<2x32xbf16>
    %cst_52 = arith.constant dense<0.000000e+00> : vector<84x32xf32>
    %58 = tpu.matmul %55, %57, %cst_52 {dimension_numbers = #tpu.dot_dimension_numbers<[1], [0], [0], [1], [0, 0, 1, 1], [], []>} : vector<84x2xbf16>, vector<2x32xbf16>, vector<84x32xf32> -> vector<84x32xf32>
    %59 = arith.addf %51, %58 : vector<84x32xf32>
    %c8 = arith.constant 8 : index
    %c0_53 = arith.constant 0 : index
    %c0_54 = arith.constant 0 : index
    %60 = vector.load %arg2[%c8, %c0_53, %c0_54] : memref<9x84x84xbf16, #tpu.memory_space<vmem>>, vector<1x84x84xbf16>
    %61 = vector.shape_cast %60 : vector<1x84x84xbf16> to vector<84x84xbf16>
    %cst_55 = arith.constant dense<0.000000e+00> : vector<84x2xf32>
    %62 = tpu.matmul %61, %0, %cst_55 {dimension_numbers = #tpu.dot_dimension_numbers<[1], [0], [0], [1], [0, 0, 1, 1], [], []>} : vector<84x84xbf16>, vector<84x2xbf16>, vector<84x2xf32> -> vector<84x2xf32>
    %63 = arith.truncf %62 : vector<84x2xf32> to vector<84x2xbf16>
    %c8_56 = arith.constant 8 : index
    %c0_57 = arith.constant 0 : index
    %c0_58 = arith.constant 0 : index
    %64 = vector.load %arg4[%c8_56, %c0_57, %c0_58] : memref<9x2x32xbf16, #tpu.memory_space<vmem>>, vector<1x2x32xbf16>
    %65 = vector.shape_cast %64 : vector<1x2x32xbf16> to vector<2x32xbf16>
    %cst_59 = arith.constant dense<0.000000e+00> : vector<84x32xf32>
    %66 = tpu.matmul %63, %65, %cst_59 {dimension_numbers = #tpu.dot_dimension_numbers<[1], [0], [0], [1], [0, 0, 1, 1], [], []>} : vector<84x2xbf16>, vector<2x32xbf16>, vector<84x32xf32> -> vector<84x32xf32>
    %67 = arith.addf %59, %66 : vector<84x32xf32>
    %c0_60 = arith.constant 0 : index
    %c0_61 = arith.constant 0 : index
    %68 = vector.load %arg5[%c0_60, %c0_61] : memref<1x32xf32, #tpu.memory_space<vmem>>, vector<1x32xf32>
    %69 = vector.broadcast %68 : vector<1x32xf32> to vector<84x32xf32>
    %70 = arith.addf %67, %69 : vector<84x32xf32>
    %cst_62 = arith.constant 0.000000e+00 : f32
    %71 = vector.broadcast %cst_62 : f32 to vector<84x32xf32>
    %72 = arith.maximumf %70, %71 : vector<84x32xf32>
    %73 = arith.truncf %72 : vector<84x32xf32> to vector<84x32xbf16>
    %c0_63 = arith.constant 0 : index
    %c0_64 = arith.constant 0 : index
    %c0_65 = arith.constant 0 : index
    %74 = vector.load %arg2[%c0_63, %c0_64, %c0_65] : memref<9x84x84xbf16, #tpu.memory_space<vmem>>, vector<1x84x84xbf16>
    %75 = vector.shape_cast %74 : vector<1x84x84xbf16> to vector<84x84xbf16>
    %cst_66 = arith.constant dense<0.000000e+00> : vector<84x32xf32>
    %76 = tpu.matmul %75, %73, %cst_66 {dimension_numbers = #tpu.dot_dimension_numbers<[1], [0], [0], [1], [0, 0, 1, 1], [], []>} : vector<84x84xbf16>, vector<84x32xbf16>, vector<84x32xf32> -> vector<84x32xf32>
    %77 = arith.truncf %76 : vector<84x32xf32> to vector<84x32xbf16>
    %c0_67 = arith.constant 0 : index
    %c0_68 = arith.constant 0 : index
    %c0_69 = arith.constant 0 : index
    %78 = vector.load %arg6[%c0_67, %c0_68, %c0_69] : memref<36x32x32xbf16, #tpu.memory_space<vmem>>, vector<1x32x32xbf16>
    %79 = vector.shape_cast %78 : vector<1x32x32xbf16> to vector<32x32xbf16>
    %cst_70 = arith.constant dense<0.000000e+00> : vector<84x32xf32>
    %80 = tpu.matmul %77, %79, %cst_70 {dimension_numbers = #tpu.dot_dimension_numbers<[1], [0], [0], [1], [0, 0, 1, 1], [], []>} : vector<84x32xbf16>, vector<32x32xbf16>, vector<84x32xf32> -> vector<84x32xf32>
    %c1_71 = arith.constant 1 : index
    %c0_72 = arith.constant 0 : index
    %c0_73 = arith.constant 0 : index
    %81 = vector.load %arg2[%c1_71, %c0_72, %c0_73] : memref<9x84x84xbf16, #tpu.memory_space<vmem>>, vector<1x84x84xbf16>
    %82 = vector.shape_cast %81 : vector<1x84x84xbf16> to vector<84x84xbf16>
    %cst_74 = arith.constant dense<0.000000e+00> : vector<84x32xf32>
    %83 = tpu.matmul %82, %73, %cst_74 {dimension_numbers = #tpu.dot_dimension_numbers<[1], [0], [0], [1], [0, 0, 1, 1], [], []>} : vector<84x84xbf16>, vector<84x32xbf16>, vector<84x32xf32> -> vector<84x32xf32>
    %84 = arith.truncf %83 : vector<84x32xf32> to vector<84x32xbf16>
    %c1_75 = arith.constant 1 : index
    %c0_76 = arith.constant 0 : index
    %c0_77 = arith.constant 0 : index
    %85 = vector.load %arg6[%c1_75, %c0_76, %c0_77] : memref<36x32x32xbf16, #tpu.memory_space<vmem>>, vector<1x32x32xbf16>
    %86 = vector.shape_cast %85 : vector<1x32x32xbf16> to vector<32x32xbf16>
    %cst_78 = arith.constant dense<0.000000e+00> : vector<84x32xf32>
    %87 = tpu.matmul %84, %86, %cst_78 {dimension_numbers = #tpu.dot_dimension_numbers<[1], [0], [0], [1], [0, 0, 1, 1], [], []>} : vector<84x32xbf16>, vector<32x32xbf16>, vector<84x32xf32> -> vector<84x32xf32>
    %88 = arith.addf %80, %87 : vector<84x32xf32>
    %c2_79 = arith.constant 2 : index
    %c0_80 = arith.constant 0 : index
    %c0_81 = arith.constant 0 : index
    %89 = vector.load %arg2[%c2_79, %c0_80, %c0_81] : memref<9x84x84xbf16, #tpu.memory_space<vmem>>, vector<1x84x84xbf16>
    %90 = vector.shape_cast %89 : vector<1x84x84xbf16> to vector<84x84xbf16>
    %cst_82 = arith.constant dense<0.000000e+00> : vector<84x32xf32>
    %91 = tpu.matmul %90, %73, %cst_82 {dimension_numbers = #tpu.dot_dimension_numbers<[1], [0], [0], [1], [0, 0, 1, 1], [], []>} : vector<84x84xbf16>, vector<84x32xbf16>, vector<84x32xf32> -> vector<84x32xf32>
    %92 = arith.truncf %91 : vector<84x32xf32> to vector<84x32xbf16>
    %c2_83 = arith.constant 2 : index
    %c0_84 = arith.constant 0 : index
    %c0_85 = arith.constant 0 : index
    %93 = vector.load %arg6[%c2_83, %c0_84, %c0_85] : memref<36x32x32xbf16, #tpu.memory_space<vmem>>, vector<1x32x32xbf16>
    %94 = vector.shape_cast %93 : vector<1x32x32xbf16> to vector<32x32xbf16>
    %cst_86 = arith.constant dense<0.000000e+00> : vector<84x32xf32>
    %95 = tpu.matmul %92, %94, %cst_86 {dimension_numbers = #tpu.dot_dimension_numbers<[1], [0], [0], [1], [0, 0, 1, 1], [], []>} : vector<84x32xbf16>, vector<32x32xbf16>, vector<84x32xf32> -> vector<84x32xf32>
    %96 = arith.addf %88, %95 : vector<84x32xf32>
    %c3_87 = arith.constant 3 : index
    %c0_88 = arith.constant 0 : index
    %c0_89 = arith.constant 0 : index
    %97 = vector.load %arg2[%c3_87, %c0_88, %c0_89] : memref<9x84x84xbf16, #tpu.memory_space<vmem>>, vector<1x84x84xbf16>
    %98 = vector.shape_cast %97 : vector<1x84x84xbf16> to vector<84x84xbf16>
    %cst_90 = arith.constant dense<0.000000e+00> : vector<84x32xf32>
    %99 = tpu.matmul %98, %73, %cst_90 {dimension_numbers = #tpu.dot_dimension_numbers<[1], [0], [0], [1], [0, 0, 1, 1], [], []>} : vector<84x84xbf16>, vector<84x32xbf16>, vector<84x32xf32> -> vector<84x32xf32>
    %100 = arith.truncf %99 : vector<84x32xf32> to vector<84x32xbf16>
    %c3_91 = arith.constant 3 : index
    %c0_92 = arith.constant 0 : index
    %c0_93 = arith.constant 0 : index
    %101 = vector.load %arg6[%c3_91, %c0_92, %c0_93] : memref<36x32x32xbf16, #tpu.memory_space<vmem>>, vector<1x32x32xbf16>
    %102 = vector.shape_cast %101 : vector<1x32x32xbf16> to vector<32x32xbf16>
    %cst_94 = arith.constant dense<0.000000e+00> : vector<84x32xf32>
    %103 = tpu.matmul %100, %102, %cst_94 {dimension_numbers = #tpu.dot_dimension_numbers<[1], [0], [0], [1], [0, 0, 1, 1], [], []>} : vector<84x32xbf16>, vector<32x32xbf16>, vector<84x32xf32> -> vector<84x32xf32>
    %104 = arith.addf %96, %103 : vector<84x32xf32>
    %c4_95 = arith.constant 4 : index
    %c0_96 = arith.constant 0 : index
    %c0_97 = arith.constant 0 : index
    %105 = vector.load %arg6[%c4_95, %c0_96, %c0_97] : memref<36x32x32xbf16, #tpu.memory_space<vmem>>, vector<1x32x32xbf16>
    %106 = vector.shape_cast %105 : vector<1x32x32xbf16> to vector<32x32xbf16>
    %cst_98 = arith.constant dense<0.000000e+00> : vector<84x32xf32>
    %107 = tpu.matmul %73, %106, %cst_98 {dimension_numbers = #tpu.dot_dimension_numbers<[1], [0], [0], [1], [0, 0, 1, 1], [], []>} : vector<84x32xbf16>, vector<32x32xbf16>, vector<84x32xf32> -> vector<84x32xf32>
    %108 = arith.addf %104, %107 : vector<84x32xf32>
    %c5_99 = arith.constant 5 : index
    %c0_100 = arith.constant 0 : index
    %c0_101 = arith.constant 0 : index
    %109 = vector.load %arg2[%c5_99, %c0_100, %c0_101] : memref<9x84x84xbf16, #tpu.memory_space<vmem>>, vector<1x84x84xbf16>
    %110 = vector.shape_cast %109 : vector<1x84x84xbf16> to vector<84x84xbf16>
    %cst_102 = arith.constant dense<0.000000e+00> : vector<84x32xf32>
    %111 = tpu.matmul %110, %73, %cst_102 {dimension_numbers = #tpu.dot_dimension_numbers<[1], [0], [0], [1], [0, 0, 1, 1], [], []>} : vector<84x84xbf16>, vector<84x32xbf16>, vector<84x32xf32> -> vector<84x32xf32>
    %112 = arith.truncf %111 : vector<84x32xf32> to vector<84x32xbf16>
    %c5_103 = arith.constant 5 : index
    %c0_104 = arith.constant 0 : index
    %c0_105 = arith.constant 0 : index
    %113 = vector.load %arg6[%c5_103, %c0_104, %c0_105] : memref<36x32x32xbf16, #tpu.memory_space<vmem>>, vector<1x32x32xbf16>
    %114 = vector.shape_cast %113 : vector<1x32x32xbf16> to vector<32x32xbf16>
    %cst_106 = arith.constant dense<0.000000e+00> : vector<84x32xf32>
    %115 = tpu.matmul %112, %114, %cst_106 {dimension_numbers = #tpu.dot_dimension_numbers<[1], [0], [0], [1], [0, 0, 1, 1], [], []>} : vector<84x32xbf16>, vector<32x32xbf16>, vector<84x32xf32> -> vector<84x32xf32>
    %116 = arith.addf %108, %115 : vector<84x32xf32>
    %c6_107 = arith.constant 6 : index
    %c0_108 = arith.constant 0 : index
    %c0_109 = arith.constant 0 : index
    %117 = vector.load %arg2[%c6_107, %c0_108, %c0_109] : memref<9x84x84xbf16, #tpu.memory_space<vmem>>, vector<1x84x84xbf16>
    %118 = vector.shape_cast %117 : vector<1x84x84xbf16> to vector<84x84xbf16>
    %cst_110 = arith.constant dense<0.000000e+00> : vector<84x32xf32>
    %119 = tpu.matmul %118, %73, %cst_110 {dimension_numbers = #tpu.dot_dimension_numbers<[1], [0], [0], [1], [0, 0, 1, 1], [], []>} : vector<84x84xbf16>, vector<84x32xbf16>, vector<84x32xf32> -> vector<84x32xf32>
    %120 = arith.truncf %119 : vector<84x32xf32> to vector<84x32xbf16>
    %c6_111 = arith.constant 6 : index
    %c0_112 = arith.constant 0 : index
    %c0_113 = arith.constant 0 : index
    %121 = vector.load %arg6[%c6_111, %c0_112, %c0_113] : memref<36x32x32xbf16, #tpu.memory_space<vmem>>, vector<1x32x32xbf16>
    %122 = vector.shape_cast %121 : vector<1x32x32xbf16> to vector<32x32xbf16>
    %cst_114 = arith.constant dense<0.000000e+00> : vector<84x32xf32>
    %123 = tpu.matmul %120, %122, %cst_114 {dimension_numbers = #tpu.dot_dimension_numbers<[1], [0], [0], [1], [0, 0, 1, 1], [], []>} : vector<84x32xbf16>, vector<32x32xbf16>, vector<84x32xf32> -> vector<84x32xf32>
    %124 = arith.addf %116, %123 : vector<84x32xf32>
    %c7_115 = arith.constant 7 : index
    %c0_116 = arith.constant 0 : index
    %c0_117 = arith.constant 0 : index
    %125 = vector.load %arg2[%c7_115, %c0_116, %c0_117] : memref<9x84x84xbf16, #tpu.memory_space<vmem>>, vector<1x84x84xbf16>
    %126 = vector.shape_cast %125 : vector<1x84x84xbf16> to vector<84x84xbf16>
    %cst_118 = arith.constant dense<0.000000e+00> : vector<84x32xf32>
    %127 = tpu.matmul %126, %73, %cst_118 {dimension_numbers = #tpu.dot_dimension_numbers<[1], [0], [0], [1], [0, 0, 1, 1], [], []>} : vector<84x84xbf16>, vector<84x32xbf16>, vector<84x32xf32> -> vector<84x32xf32>
    %128 = arith.truncf %127 : vector<84x32xf32> to vector<84x32xbf16>
    %c7_119 = arith.constant 7 : index
    %c0_120 = arith.constant 0 : index
    %c0_121 = arith.constant 0 : index
    %129 = vector.load %arg6[%c7_119, %c0_120, %c0_121] : memref<36x32x32xbf16, #tpu.memory_space<vmem>>, vector<1x32x32xbf16>
    %130 = vector.shape_cast %129 : vector<1x32x32xbf16> to vector<32x32xbf16>
    %cst_122 = arith.constant dense<0.000000e+00> : vector<84x32xf32>
    %131 = tpu.matmul %128, %130, %cst_122 {dimension_numbers = #tpu.dot_dimension_numbers<[1], [0], [0], [1], [0, 0, 1, 1], [], []>} : vector<84x32xbf16>, vector<32x32xbf16>, vector<84x32xf32> -> vector<84x32xf32>
    %132 = arith.addf %124, %131 : vector<84x32xf32>
    %c8_123 = arith.constant 8 : index
    %c0_124 = arith.constant 0 : index
    %c0_125 = arith.constant 0 : index
    %133 = vector.load %arg2[%c8_123, %c0_124, %c0_125] : memref<9x84x84xbf16, #tpu.memory_space<vmem>>, vector<1x84x84xbf16>
    %134 = vector.shape_cast %133 : vector<1x84x84xbf16> to vector<84x84xbf16>
    %cst_126 = arith.constant dense<0.000000e+00> : vector<84x32xf32>
    %135 = tpu.matmul %134, %73, %cst_126 {dimension_numbers = #tpu.dot_dimension_numbers<[1], [0], [0], [1], [0, 0, 1, 1], [], []>} : vector<84x84xbf16>, vector<84x32xbf16>, vector<84x32xf32> -> vector<84x32xf32>
    %136 = arith.truncf %135 : vector<84x32xf32> to vector<84x32xbf16>
    %c8_127 = arith.constant 8 : index
    %c0_128 = arith.constant 0 : index
    %c0_129 = arith.constant 0 : index
    %137 = vector.load %arg6[%c8_127, %c0_128, %c0_129] : memref<36x32x32xbf16, #tpu.memory_space<vmem>>, vector<1x32x32xbf16>
    %138 = vector.shape_cast %137 : vector<1x32x32xbf16> to vector<32x32xbf16>
    %cst_130 = arith.constant dense<0.000000e+00> : vector<84x32xf32>
    %139 = tpu.matmul %136, %138, %cst_130 {dimension_numbers = #tpu.dot_dimension_numbers<[1], [0], [0], [1], [0, 0, 1, 1], [], []>} : vector<84x32xbf16>, vector<32x32xbf16>, vector<84x32xf32> -> vector<84x32xf32>
    %140 = arith.addf %132, %139 : vector<84x32xf32>
    %c0_131 = arith.constant 0 : index
    %c0_132 = arith.constant 0 : index
    %141 = vector.load %arg7[%c0_131, %c0_132] : memref<4x32xf32, #tpu.memory_space<vmem>>, vector<1x32xf32>
    %142 = vector.broadcast %141 : vector<1x32xf32> to vector<84x32xf32>
    %143 = arith.addf %140, %142 : vector<84x32xf32>
    %cst_133 = arith.constant 0.000000e+00 : f32
    %144 = vector.broadcast %cst_133 : f32 to vector<84x32xf32>
    %145 = arith.maximumf %143, %144 : vector<84x32xf32>
    %146 = arith.truncf %145 : vector<84x32xf32> to vector<84x32xbf16>
    %c0_134 = arith.constant 0 : index
    %c0_135 = arith.constant 0 : index
    %c0_136 = arith.constant 0 : index
    %147 = vector.load %arg2[%c0_134, %c0_135, %c0_136] : memref<9x84x84xbf16, #tpu.memory_space<vmem>>, vector<1x84x84xbf16>
    %148 = vector.shape_cast %147 : vector<1x84x84xbf16> to vector<84x84xbf16>
    %cst_137 = arith.constant dense<0.000000e+00> : vector<84x32xf32>
    %149 = tpu.matmul %148, %146, %cst_137 {dimension_numbers = #tpu.dot_dimension_numbers<[1], [0], [0], [1], [0, 0, 1, 1], [], []>} : vector<84x84xbf16>, vector<84x32xbf16>, vector<84x32xf32> -> vector<84x32xf32>
    %150 = arith.truncf %149 : vector<84x32xf32> to vector<84x32xbf16>
    %c9 = arith.constant 9 : index
    %c0_138 = arith.constant 0 : index
    %c0_139 = arith.constant 0 : index
    %151 = vector.load %arg6[%c9, %c0_138, %c0_139] : memref<36x32x32xbf16, #tpu.memory_space<vmem>>, vector<1x32x32xbf16>
    %152 = vector.shape_cast %151 : vector<1x32x32xbf16> to vector<32x32xbf16>
    %cst_140 = arith.constant dense<0.000000e+00> : vector<84x32xf32>
    %153 = tpu.matmul %150, %152, %cst_140 {dimension_numbers = #tpu.dot_dimension_numbers<[1], [0], [0], [1], [0, 0, 1, 1], [], []>} : vector<84x32xbf16>, vector<32x32xbf16>, vector<84x32xf32> -> vector<84x32xf32>
    %c1_141 = arith.constant 1 : index
    %c0_142 = arith.constant 0 : index
    %c0_143 = arith.constant 0 : index
    %154 = vector.load %arg2[%c1_141, %c0_142, %c0_143] : memref<9x84x84xbf16, #tpu.memory_space<vmem>>, vector<1x84x84xbf16>
    %155 = vector.shape_cast %154 : vector<1x84x84xbf16> to vector<84x84xbf16>
    %cst_144 = arith.constant dense<0.000000e+00> : vector<84x32xf32>
    %156 = tpu.matmul %155, %146, %cst_144 {dimension_numbers = #tpu.dot_dimension_numbers<[1], [0], [0], [1], [0, 0, 1, 1], [], []>} : vector<84x84xbf16>, vector<84x32xbf16>, vector<84x32xf32> -> vector<84x32xf32>
    %157 = arith.truncf %156 : vector<84x32xf32> to vector<84x32xbf16>
    %c10 = arith.constant 10 : index
    %c0_145 = arith.constant 0 : index
    %c0_146 = arith.constant 0 : index
    %158 = vector.load %arg6[%c10, %c0_145, %c0_146] : memref<36x32x32xbf16, #tpu.memory_space<vmem>>, vector<1x32x32xbf16>
    %159 = vector.shape_cast %158 : vector<1x32x32xbf16> to vector<32x32xbf16>
    %cst_147 = arith.constant dense<0.000000e+00> : vector<84x32xf32>
    %160 = tpu.matmul %157, %159, %cst_147 {dimension_numbers = #tpu.dot_dimension_numbers<[1], [0], [0], [1], [0, 0, 1, 1], [], []>} : vector<84x32xbf16>, vector<32x32xbf16>, vector<84x32xf32> -> vector<84x32xf32>
    %161 = arith.addf %153, %160 : vector<84x32xf32>
    %c2_148 = arith.constant 2 : index
    %c0_149 = arith.constant 0 : index
    %c0_150 = arith.constant 0 : index
    %162 = vector.load %arg2[%c2_148, %c0_149, %c0_150] : memref<9x84x84xbf16, #tpu.memory_space<vmem>>, vector<1x84x84xbf16>
    %163 = vector.shape_cast %162 : vector<1x84x84xbf16> to vector<84x84xbf16>
    %cst_151 = arith.constant dense<0.000000e+00> : vector<84x32xf32>
    %164 = tpu.matmul %163, %146, %cst_151 {dimension_numbers = #tpu.dot_dimension_numbers<[1], [0], [0], [1], [0, 0, 1, 1], [], []>} : vector<84x84xbf16>, vector<84x32xbf16>, vector<84x32xf32> -> vector<84x32xf32>
    %165 = arith.truncf %164 : vector<84x32xf32> to vector<84x32xbf16>
    %c11 = arith.constant 11 : index
    %c0_152 = arith.constant 0 : index
    %c0_153 = arith.constant 0 : index
    %166 = vector.load %arg6[%c11, %c0_152, %c0_153] : memref<36x32x32xbf16, #tpu.memory_space<vmem>>, vector<1x32x32xbf16>
    %167 = vector.shape_cast %166 : vector<1x32x32xbf16> to vector<32x32xbf16>
    %cst_154 = arith.constant dense<0.000000e+00> : vector<84x32xf32>
    %168 = tpu.matmul %165, %167, %cst_154 {dimension_numbers = #tpu.dot_dimension_numbers<[1], [0], [0], [1], [0, 0, 1, 1], [], []>} : vector<84x32xbf16>, vector<32x32xbf16>, vector<84x32xf32> -> vector<84x32xf32>
    %169 = arith.addf %161, %168 : vector<84x32xf32>
    %c3_155 = arith.constant 3 : index
    %c0_156 = arith.constant 0 : index
    %c0_157 = arith.constant 0 : index
    %170 = vector.load %arg2[%c3_155, %c0_156, %c0_157] : memref<9x84x84xbf16, #tpu.memory_space<vmem>>, vector<1x84x84xbf16>
    %171 = vector.shape_cast %170 : vector<1x84x84xbf16> to vector<84x84xbf16>
    %cst_158 = arith.constant dense<0.000000e+00> : vector<84x32xf32>
    %172 = tpu.matmul %171, %146, %cst_158 {dimension_numbers = #tpu.dot_dimension_numbers<[1], [0], [0], [1], [0, 0, 1, 1], [], []>} : vector<84x84xbf16>, vector<84x32xbf16>, vector<84x32xf32> -> vector<84x32xf32>
    %173 = arith.truncf %172 : vector<84x32xf32> to vector<84x32xbf16>
    %c12 = arith.constant 12 : index
    %c0_159 = arith.constant 0 : index
    %c0_160 = arith.constant 0 : index
    %174 = vector.load %arg6[%c12, %c0_159, %c0_160] : memref<36x32x32xbf16, #tpu.memory_space<vmem>>, vector<1x32x32xbf16>
    %175 = vector.shape_cast %174 : vector<1x32x32xbf16> to vector<32x32xbf16>
    %cst_161 = arith.constant dense<0.000000e+00> : vector<84x32xf32>
    %176 = tpu.matmul %173, %175, %cst_161 {dimension_numbers = #tpu.dot_dimension_numbers<[1], [0], [0], [1], [0, 0, 1, 1], [], []>} : vector<84x32xbf16>, vector<32x32xbf16>, vector<84x32xf32> -> vector<84x32xf32>
    %177 = arith.addf %169, %176 : vector<84x32xf32>
    %c13 = arith.constant 13 : index
    %c0_162 = arith.constant 0 : index
    %c0_163 = arith.constant 0 : index
    %178 = vector.load %arg6[%c13, %c0_162, %c0_163] : memref<36x32x32xbf16, #tpu.memory_space<vmem>>, vector<1x32x32xbf16>
    %179 = vector.shape_cast %178 : vector<1x32x32xbf16> to vector<32x32xbf16>
    %cst_164 = arith.constant dense<0.000000e+00> : vector<84x32xf32>
    %180 = tpu.matmul %146, %179, %cst_164 {dimension_numbers = #tpu.dot_dimension_numbers<[1], [0], [0], [1], [0, 0, 1, 1], [], []>} : vector<84x32xbf16>, vector<32x32xbf16>, vector<84x32xf32> -> vector<84x32xf32>
    %181 = arith.addf %177, %180 : vector<84x32xf32>
    %c5_165 = arith.constant 5 : index
    %c0_166 = arith.constant 0 : index
    %c0_167 = arith.constant 0 : index
    %182 = vector.load %arg2[%c5_165, %c0_166, %c0_167] : memref<9x84x84xbf16, #tpu.memory_space<vmem>>, vector<1x84x84xbf16>
    %183 = vector.shape_cast %182 : vector<1x84x84xbf16> to vector<84x84xbf16>
    %cst_168 = arith.constant dense<0.000000e+00> : vector<84x32xf32>
    %184 = tpu.matmul %183, %146, %cst_168 {dimension_numbers = #tpu.dot_dimension_numbers<[1], [0], [0], [1], [0, 0, 1, 1], [], []>} : vector<84x84xbf16>, vector<84x32xbf16>, vector<84x32xf32> -> vector<84x32xf32>
    %185 = arith.truncf %184 : vector<84x32xf32> to vector<84x32xbf16>
    %c14 = arith.constant 14 : index
    %c0_169 = arith.constant 0 : index
    %c0_170 = arith.constant 0 : index
    %186 = vector.load %arg6[%c14, %c0_169, %c0_170] : memref<36x32x32xbf16, #tpu.memory_space<vmem>>, vector<1x32x32xbf16>
    %187 = vector.shape_cast %186 : vector<1x32x32xbf16> to vector<32x32xbf16>
    %cst_171 = arith.constant dense<0.000000e+00> : vector<84x32xf32>
    %188 = tpu.matmul %185, %187, %cst_171 {dimension_numbers = #tpu.dot_dimension_numbers<[1], [0], [0], [1], [0, 0, 1, 1], [], []>} : vector<84x32xbf16>, vector<32x32xbf16>, vector<84x32xf32> -> vector<84x32xf32>
    %189 = arith.addf %181, %188 : vector<84x32xf32>
    %c6_172 = arith.constant 6 : index
    %c0_173 = arith.constant 0 : index
    %c0_174 = arith.constant 0 : index
    %190 = vector.load %arg2[%c6_172, %c0_173, %c0_174] : memref<9x84x84xbf16, #tpu.memory_space<vmem>>, vector<1x84x84xbf16>
    %191 = vector.shape_cast %190 : vector<1x84x84xbf16> to vector<84x84xbf16>
    %cst_175 = arith.constant dense<0.000000e+00> : vector<84x32xf32>
    %192 = tpu.matmul %191, %146, %cst_175 {dimension_numbers = #tpu.dot_dimension_numbers<[1], [0], [0], [1], [0, 0, 1, 1], [], []>} : vector<84x84xbf16>, vector<84x32xbf16>, vector<84x32xf32> -> vector<84x32xf32>
    %193 = arith.truncf %192 : vector<84x32xf32> to vector<84x32xbf16>
    %c15 = arith.constant 15 : index
    %c0_176 = arith.constant 0 : index
    %c0_177 = arith.constant 0 : index
    %194 = vector.load %arg6[%c15, %c0_176, %c0_177] : memref<36x32x32xbf16, #tpu.memory_space<vmem>>, vector<1x32x32xbf16>
    %195 = vector.shape_cast %194 : vector<1x32x32xbf16> to vector<32x32xbf16>
    %cst_178 = arith.constant dense<0.000000e+00> : vector<84x32xf32>
    %196 = tpu.matmul %193, %195, %cst_178 {dimension_numbers = #tpu.dot_dimension_numbers<[1], [0], [0], [1], [0, 0, 1, 1], [], []>} : vector<84x32xbf16>, vector<32x32xbf16>, vector<84x32xf32> -> vector<84x32xf32>
    %197 = arith.addf %189, %196 : vector<84x32xf32>
    %c7_179 = arith.constant 7 : index
    %c0_180 = arith.constant 0 : index
    %c0_181 = arith.constant 0 : index
    %198 = vector.load %arg2[%c7_179, %c0_180, %c0_181] : memref<9x84x84xbf16, #tpu.memory_space<vmem>>, vector<1x84x84xbf16>
    %199 = vector.shape_cast %198 : vector<1x84x84xbf16> to vector<84x84xbf16>
    %cst_182 = arith.constant dense<0.000000e+00> : vector<84x32xf32>
    %200 = tpu.matmul %199, %146, %cst_182 {dimension_numbers = #tpu.dot_dimension_numbers<[1], [0], [0], [1], [0, 0, 1, 1], [], []>} : vector<84x84xbf16>, vector<84x32xbf16>, vector<84x32xf32> -> vector<84x32xf32>
    %201 = arith.truncf %200 : vector<84x32xf32> to vector<84x32xbf16>
    %c16 = arith.constant 16 : index
    %c0_183 = arith.constant 0 : index
    %c0_184 = arith.constant 0 : index
    %202 = vector.load %arg6[%c16, %c0_183, %c0_184] : memref<36x32x32xbf16, #tpu.memory_space<vmem>>, vector<1x32x32xbf16>
    %203 = vector.shape_cast %202 : vector<1x32x32xbf16> to vector<32x32xbf16>
    %cst_185 = arith.constant dense<0.000000e+00> : vector<84x32xf32>
    %204 = tpu.matmul %201, %203, %cst_185 {dimension_numbers = #tpu.dot_dimension_numbers<[1], [0], [0], [1], [0, 0, 1, 1], [], []>} : vector<84x32xbf16>, vector<32x32xbf16>, vector<84x32xf32> -> vector<84x32xf32>
    %205 = arith.addf %197, %204 : vector<84x32xf32>
    %c8_186 = arith.constant 8 : index
    %c0_187 = arith.constant 0 : index
    %c0_188 = arith.constant 0 : index
    %206 = vector.load %arg2[%c8_186, %c0_187, %c0_188] : memref<9x84x84xbf16, #tpu.memory_space<vmem>>, vector<1x84x84xbf16>
    %207 = vector.shape_cast %206 : vector<1x84x84xbf16> to vector<84x84xbf16>
    %cst_189 = arith.constant dense<0.000000e+00> : vector<84x32xf32>
    %208 = tpu.matmul %207, %146, %cst_189 {dimension_numbers = #tpu.dot_dimension_numbers<[1], [0], [0], [1], [0, 0, 1, 1], [], []>} : vector<84x84xbf16>, vector<84x32xbf16>, vector<84x32xf32> -> vector<84x32xf32>
    %209 = arith.truncf %208 : vector<84x32xf32> to vector<84x32xbf16>
    %c17 = arith.constant 17 : index
    %c0_190 = arith.constant 0 : index
    %c0_191 = arith.constant 0 : index
    %210 = vector.load %arg6[%c17, %c0_190, %c0_191] : memref<36x32x32xbf16, #tpu.memory_space<vmem>>, vector<1x32x32xbf16>
    %211 = vector.shape_cast %210 : vector<1x32x32xbf16> to vector<32x32xbf16>
    %cst_192 = arith.constant dense<0.000000e+00> : vector<84x32xf32>
    %212 = tpu.matmul %209, %211, %cst_192 {dimension_numbers = #tpu.dot_dimension_numbers<[1], [0], [0], [1], [0, 0, 1, 1], [], []>} : vector<84x32xbf16>, vector<32x32xbf16>, vector<84x32xf32> -> vector<84x32xf32>
    %213 = arith.addf %205, %212 : vector<84x32xf32>
    %c1_193 = arith.constant 1 : index
    %c0_194 = arith.constant 0 : index
    %214 = vector.load %arg7[%c1_193, %c0_194] : memref<4x32xf32, #tpu.memory_space<vmem>>, vector<1x32xf32>
    %215 = vector.broadcast %214 : vector<1x32xf32> to vector<84x32xf32>
    %216 = arith.addf %213, %215 : vector<84x32xf32>
    %217 = arith.addf %216, %72 : vector<84x32xf32>
    %cst_195 = arith.constant 0.000000e+00 : f32
    %218 = vector.broadcast %cst_195 : f32 to vector<84x32xf32>
    %219 = arith.maximumf %217, %218 : vector<84x32xf32>
    %220 = arith.truncf %219 : vector<84x32xf32> to vector<84x32xbf16>
    %c0_196 = arith.constant 0 : index
    %c0_197 = arith.constant 0 : index
    %c0_198 = arith.constant 0 : index
    %221 = vector.load %arg2[%c0_196, %c0_197, %c0_198] : memref<9x84x84xbf16, #tpu.memory_space<vmem>>, vector<1x84x84xbf16>
    %222 = vector.shape_cast %221 : vector<1x84x84xbf16> to vector<84x84xbf16>
    %cst_199 = arith.constant dense<0.000000e+00> : vector<84x32xf32>
    %223 = tpu.matmul %222, %220, %cst_199 {dimension_numbers = #tpu.dot_dimension_numbers<[1], [0], [0], [1], [0, 0, 1, 1], [], []>} : vector<84x84xbf16>, vector<84x32xbf16>, vector<84x32xf32> -> vector<84x32xf32>
    %224 = arith.truncf %223 : vector<84x32xf32> to vector<84x32xbf16>
    %c18 = arith.constant 18 : index
    %c0_200 = arith.constant 0 : index
    %c0_201 = arith.constant 0 : index
    %225 = vector.load %arg6[%c18, %c0_200, %c0_201] : memref<36x32x32xbf16, #tpu.memory_space<vmem>>, vector<1x32x32xbf16>
    %226 = vector.shape_cast %225 : vector<1x32x32xbf16> to vector<32x32xbf16>
    %cst_202 = arith.constant dense<0.000000e+00> : vector<84x32xf32>
    %227 = tpu.matmul %224, %226, %cst_202 {dimension_numbers = #tpu.dot_dimension_numbers<[1], [0], [0], [1], [0, 0, 1, 1], [], []>} : vector<84x32xbf16>, vector<32x32xbf16>, vector<84x32xf32> -> vector<84x32xf32>
    %c1_203 = arith.constant 1 : index
    %c0_204 = arith.constant 0 : index
    %c0_205 = arith.constant 0 : index
    %228 = vector.load %arg2[%c1_203, %c0_204, %c0_205] : memref<9x84x84xbf16, #tpu.memory_space<vmem>>, vector<1x84x84xbf16>
    %229 = vector.shape_cast %228 : vector<1x84x84xbf16> to vector<84x84xbf16>
    %cst_206 = arith.constant dense<0.000000e+00> : vector<84x32xf32>
    %230 = tpu.matmul %229, %220, %cst_206 {dimension_numbers = #tpu.dot_dimension_numbers<[1], [0], [0], [1], [0, 0, 1, 1], [], []>} : vector<84x84xbf16>, vector<84x32xbf16>, vector<84x32xf32> -> vector<84x32xf32>
    %231 = arith.truncf %230 : vector<84x32xf32> to vector<84x32xbf16>
    %c19 = arith.constant 19 : index
    %c0_207 = arith.constant 0 : index
    %c0_208 = arith.constant 0 : index
    %232 = vector.load %arg6[%c19, %c0_207, %c0_208] : memref<36x32x32xbf16, #tpu.memory_space<vmem>>, vector<1x32x32xbf16>
    %233 = vector.shape_cast %232 : vector<1x32x32xbf16> to vector<32x32xbf16>
    %cst_209 = arith.constant dense<0.000000e+00> : vector<84x32xf32>
    %234 = tpu.matmul %231, %233, %cst_209 {dimension_numbers = #tpu.dot_dimension_numbers<[1], [0], [0], [1], [0, 0, 1, 1], [], []>} : vector<84x32xbf16>, vector<32x32xbf16>, vector<84x32xf32> -> vector<84x32xf32>
    %235 = arith.addf %227, %234 : vector<84x32xf32>
    %c2_210 = arith.constant 2 : index
    %c0_211 = arith.constant 0 : index
    %c0_212 = arith.constant 0 : index
    %236 = vector.load %arg2[%c2_210, %c0_211, %c0_212] : memref<9x84x84xbf16, #tpu.memory_space<vmem>>, vector<1x84x84xbf16>
    %237 = vector.shape_cast %236 : vector<1x84x84xbf16> to vector<84x84xbf16>
    %cst_213 = arith.constant dense<0.000000e+00> : vector<84x32xf32>
    %238 = tpu.matmul %237, %220, %cst_213 {dimension_numbers = #tpu.dot_dimension_numbers<[1], [0], [0], [1], [0, 0, 1, 1], [], []>} : vector<84x84xbf16>, vector<84x32xbf16>, vector<84x32xf32> -> vector<84x32xf32>
    %239 = arith.truncf %238 : vector<84x32xf32> to vector<84x32xbf16>
    %c20 = arith.constant 20 : index
    %c0_214 = arith.constant 0 : index
    %c0_215 = arith.constant 0 : index
    %240 = vector.load %arg6[%c20, %c0_214, %c0_215] : memref<36x32x32xbf16, #tpu.memory_space<vmem>>, vector<1x32x32xbf16>
    %241 = vector.shape_cast %240 : vector<1x32x32xbf16> to vector<32x32xbf16>
    %cst_216 = arith.constant dense<0.000000e+00> : vector<84x32xf32>
    %242 = tpu.matmul %239, %241, %cst_216 {dimension_numbers = #tpu.dot_dimension_numbers<[1], [0], [0], [1], [0, 0, 1, 1], [], []>} : vector<84x32xbf16>, vector<32x32xbf16>, vector<84x32xf32> -> vector<84x32xf32>
    %243 = arith.addf %235, %242 : vector<84x32xf32>
    %c3_217 = arith.constant 3 : index
    %c0_218 = arith.constant 0 : index
    %c0_219 = arith.constant 0 : index
    %244 = vector.load %arg2[%c3_217, %c0_218, %c0_219] : memref<9x84x84xbf16, #tpu.memory_space<vmem>>, vector<1x84x84xbf16>
    %245 = vector.shape_cast %244 : vector<1x84x84xbf16> to vector<84x84xbf16>
    %cst_220 = arith.constant dense<0.000000e+00> : vector<84x32xf32>
    %246 = tpu.matmul %245, %220, %cst_220 {dimension_numbers = #tpu.dot_dimension_numbers<[1], [0], [0], [1], [0, 0, 1, 1], [], []>} : vector<84x84xbf16>, vector<84x32xbf16>, vector<84x32xf32> -> vector<84x32xf32>
    %247 = arith.truncf %246 : vector<84x32xf32> to vector<84x32xbf16>
    %c21 = arith.constant 21 : index
    %c0_221 = arith.constant 0 : index
    %c0_222 = arith.constant 0 : index
    %248 = vector.load %arg6[%c21, %c0_221, %c0_222] : memref<36x32x32xbf16, #tpu.memory_space<vmem>>, vector<1x32x32xbf16>
    %249 = vector.shape_cast %248 : vector<1x32x32xbf16> to vector<32x32xbf16>
    %cst_223 = arith.constant dense<0.000000e+00> : vector<84x32xf32>
    %250 = tpu.matmul %247, %249, %cst_223 {dimension_numbers = #tpu.dot_dimension_numbers<[1], [0], [0], [1], [0, 0, 1, 1], [], []>} : vector<84x32xbf16>, vector<32x32xbf16>, vector<84x32xf32> -> vector<84x32xf32>
    %251 = arith.addf %243, %250 : vector<84x32xf32>
    %c22 = arith.constant 22 : index
    %c0_224 = arith.constant 0 : index
    %c0_225 = arith.constant 0 : index
    %252 = vector.load %arg6[%c22, %c0_224, %c0_225] : memref<36x32x32xbf16, #tpu.memory_space<vmem>>, vector<1x32x32xbf16>
    %253 = vector.shape_cast %252 : vector<1x32x32xbf16> to vector<32x32xbf16>
    %cst_226 = arith.constant dense<0.000000e+00> : vector<84x32xf32>
    %254 = tpu.matmul %220, %253, %cst_226 {dimension_numbers = #tpu.dot_dimension_numbers<[1], [0], [0], [1], [0, 0, 1, 1], [], []>} : vector<84x32xbf16>, vector<32x32xbf16>, vector<84x32xf32> -> vector<84x32xf32>
    %255 = arith.addf %251, %254 : vector<84x32xf32>
    %c5_227 = arith.constant 5 : index
    %c0_228 = arith.constant 0 : index
    %c0_229 = arith.constant 0 : index
    %256 = vector.load %arg2[%c5_227, %c0_228, %c0_229] : memref<9x84x84xbf16, #tpu.memory_space<vmem>>, vector<1x84x84xbf16>
    %257 = vector.shape_cast %256 : vector<1x84x84xbf16> to vector<84x84xbf16>
    %cst_230 = arith.constant dense<0.000000e+00> : vector<84x32xf32>
    %258 = tpu.matmul %257, %220, %cst_230 {dimension_numbers = #tpu.dot_dimension_numbers<[1], [0], [0], [1], [0, 0, 1, 1], [], []>} : vector<84x84xbf16>, vector<84x32xbf16>, vector<84x32xf32> -> vector<84x32xf32>
    %259 = arith.truncf %258 : vector<84x32xf32> to vector<84x32xbf16>
    %c23 = arith.constant 23 : index
    %c0_231 = arith.constant 0 : index
    %c0_232 = arith.constant 0 : index
    %260 = vector.load %arg6[%c23, %c0_231, %c0_232] : memref<36x32x32xbf16, #tpu.memory_space<vmem>>, vector<1x32x32xbf16>
    %261 = vector.shape_cast %260 : vector<1x32x32xbf16> to vector<32x32xbf16>
    %cst_233 = arith.constant dense<0.000000e+00> : vector<84x32xf32>
    %262 = tpu.matmul %259, %261, %cst_233 {dimension_numbers = #tpu.dot_dimension_numbers<[1], [0], [0], [1], [0, 0, 1, 1], [], []>} : vector<84x32xbf16>, vector<32x32xbf16>, vector<84x32xf32> -> vector<84x32xf32>
    %263 = arith.addf %255, %262 : vector<84x32xf32>
    %c6_234 = arith.constant 6 : index
    %c0_235 = arith.constant 0 : index
    %c0_236 = arith.constant 0 : index
    %264 = vector.load %arg2[%c6_234, %c0_235, %c0_236] : memref<9x84x84xbf16, #tpu.memory_space<vmem>>, vector<1x84x84xbf16>
    %265 = vector.shape_cast %264 : vector<1x84x84xbf16> to vector<84x84xbf16>
    %cst_237 = arith.constant dense<0.000000e+00> : vector<84x32xf32>
    %266 = tpu.matmul %265, %220, %cst_237 {dimension_numbers = #tpu.dot_dimension_numbers<[1], [0], [0], [1], [0, 0, 1, 1], [], []>} : vector<84x84xbf16>, vector<84x32xbf16>, vector<84x32xf32> -> vector<84x32xf32>
    %267 = arith.truncf %266 : vector<84x32xf32> to vector<84x32xbf16>
    %c24 = arith.constant 24 : index
    %c0_238 = arith.constant 0 : index
    %c0_239 = arith.constant 0 : index
    %268 = vector.load %arg6[%c24, %c0_238, %c0_239] : memref<36x32x32xbf16, #tpu.memory_space<vmem>>, vector<1x32x32xbf16>
    %269 = vector.shape_cast %268 : vector<1x32x32xbf16> to vector<32x32xbf16>
    %cst_240 = arith.constant dense<0.000000e+00> : vector<84x32xf32>
    %270 = tpu.matmul %267, %269, %cst_240 {dimension_numbers = #tpu.dot_dimension_numbers<[1], [0], [0], [1], [0, 0, 1, 1], [], []>} : vector<84x32xbf16>, vector<32x32xbf16>, vector<84x32xf32> -> vector<84x32xf32>
    %271 = arith.addf %263, %270 : vector<84x32xf32>
    %c7_241 = arith.constant 7 : index
    %c0_242 = arith.constant 0 : index
    %c0_243 = arith.constant 0 : index
    %272 = vector.load %arg2[%c7_241, %c0_242, %c0_243] : memref<9x84x84xbf16, #tpu.memory_space<vmem>>, vector<1x84x84xbf16>
    %273 = vector.shape_cast %272 : vector<1x84x84xbf16> to vector<84x84xbf16>
    %cst_244 = arith.constant dense<0.000000e+00> : vector<84x32xf32>
    %274 = tpu.matmul %273, %220, %cst_244 {dimension_numbers = #tpu.dot_dimension_numbers<[1], [0], [0], [1], [0, 0, 1, 1], [], []>} : vector<84x84xbf16>, vector<84x32xbf16>, vector<84x32xf32> -> vector<84x32xf32>
    %275 = arith.truncf %274 : vector<84x32xf32> to vector<84x32xbf16>
    %c25 = arith.constant 25 : index
    %c0_245 = arith.constant 0 : index
    %c0_246 = arith.constant 0 : index
    %276 = vector.load %arg6[%c25, %c0_245, %c0_246] : memref<36x32x32xbf16, #tpu.memory_space<vmem>>, vector<1x32x32xbf16>
    %277 = vector.shape_cast %276 : vector<1x32x32xbf16> to vector<32x32xbf16>
    %cst_247 = arith.constant dense<0.000000e+00> : vector<84x32xf32>
    %278 = tpu.matmul %275, %277, %cst_247 {dimension_numbers = #tpu.dot_dimension_numbers<[1], [0], [0], [1], [0, 0, 1, 1], [], []>} : vector<84x32xbf16>, vector<32x32xbf16>, vector<84x32xf32> -> vector<84x32xf32>
    %279 = arith.addf %271, %278 : vector<84x32xf32>
    %c8_248 = arith.constant 8 : index
    %c0_249 = arith.constant 0 : index
    %c0_250 = arith.constant 0 : index
    %280 = vector.load %arg2[%c8_248, %c0_249, %c0_250] : memref<9x84x84xbf16, #tpu.memory_space<vmem>>, vector<1x84x84xbf16>
    %281 = vector.shape_cast %280 : vector<1x84x84xbf16> to vector<84x84xbf16>
    %cst_251 = arith.constant dense<0.000000e+00> : vector<84x32xf32>
    %282 = tpu.matmul %281, %220, %cst_251 {dimension_numbers = #tpu.dot_dimension_numbers<[1], [0], [0], [1], [0, 0, 1, 1], [], []>} : vector<84x84xbf16>, vector<84x32xbf16>, vector<84x32xf32> -> vector<84x32xf32>
    %283 = arith.truncf %282 : vector<84x32xf32> to vector<84x32xbf16>
    %c26 = arith.constant 26 : index
    %c0_252 = arith.constant 0 : index
    %c0_253 = arith.constant 0 : index
    %284 = vector.load %arg6[%c26, %c0_252, %c0_253] : memref<36x32x32xbf16, #tpu.memory_space<vmem>>, vector<1x32x32xbf16>
    %285 = vector.shape_cast %284 : vector<1x32x32xbf16> to vector<32x32xbf16>
    %cst_254 = arith.constant dense<0.000000e+00> : vector<84x32xf32>
    %286 = tpu.matmul %283, %285, %cst_254 {dimension_numbers = #tpu.dot_dimension_numbers<[1], [0], [0], [1], [0, 0, 1, 1], [], []>} : vector<84x32xbf16>, vector<32x32xbf16>, vector<84x32xf32> -> vector<84x32xf32>
    %287 = arith.addf %279, %286 : vector<84x32xf32>
    %c2_255 = arith.constant 2 : index
    %c0_256 = arith.constant 0 : index
    %288 = vector.load %arg7[%c2_255, %c0_256] : memref<4x32xf32, #tpu.memory_space<vmem>>, vector<1x32xf32>
    %289 = vector.broadcast %288 : vector<1x32xf32> to vector<84x32xf32>
    %290 = arith.addf %287, %289 : vector<84x32xf32>
    %cst_257 = arith.constant 0.000000e+00 : f32
    %291 = vector.broadcast %cst_257 : f32 to vector<84x32xf32>
    %292 = arith.maximumf %290, %291 : vector<84x32xf32>
    %293 = arith.truncf %292 : vector<84x32xf32> to vector<84x32xbf16>
    %c0_258 = arith.constant 0 : index
    %c0_259 = arith.constant 0 : index
    %c0_260 = arith.constant 0 : index
    %294 = vector.load %arg2[%c0_258, %c0_259, %c0_260] : memref<9x84x84xbf16, #tpu.memory_space<vmem>>, vector<1x84x84xbf16>
    %295 = vector.shape_cast %294 : vector<1x84x84xbf16> to vector<84x84xbf16>
    %cst_261 = arith.constant dense<0.000000e+00> : vector<84x32xf32>
    %296 = tpu.matmul %295, %293, %cst_261 {dimension_numbers = #tpu.dot_dimension_numbers<[1], [0], [0], [1], [0, 0, 1, 1], [], []>} : vector<84x84xbf16>, vector<84x32xbf16>, vector<84x32xf32> -> vector<84x32xf32>
    %297 = arith.truncf %296 : vector<84x32xf32> to vector<84x32xbf16>
    %c27 = arith.constant 27 : index
    %c0_262 = arith.constant 0 : index
    %c0_263 = arith.constant 0 : index
    %298 = vector.load %arg6[%c27, %c0_262, %c0_263] : memref<36x32x32xbf16, #tpu.memory_space<vmem>>, vector<1x32x32xbf16>
    %299 = vector.shape_cast %298 : vector<1x32x32xbf16> to vector<32x32xbf16>
    %cst_264 = arith.constant dense<0.000000e+00> : vector<84x32xf32>
    %300 = tpu.matmul %297, %299, %cst_264 {dimension_numbers = #tpu.dot_dimension_numbers<[1], [0], [0], [1], [0, 0, 1, 1], [], []>} : vector<84x32xbf16>, vector<32x32xbf16>, vector<84x32xf32> -> vector<84x32xf32>
    %c1_265 = arith.constant 1 : index
    %c0_266 = arith.constant 0 : index
    %c0_267 = arith.constant 0 : index
    %301 = vector.load %arg2[%c1_265, %c0_266, %c0_267] : memref<9x84x84xbf16, #tpu.memory_space<vmem>>, vector<1x84x84xbf16>
    %302 = vector.shape_cast %301 : vector<1x84x84xbf16> to vector<84x84xbf16>
    %cst_268 = arith.constant dense<0.000000e+00> : vector<84x32xf32>
    %303 = tpu.matmul %302, %293, %cst_268 {dimension_numbers = #tpu.dot_dimension_numbers<[1], [0], [0], [1], [0, 0, 1, 1], [], []>} : vector<84x84xbf16>, vector<84x32xbf16>, vector<84x32xf32> -> vector<84x32xf32>
    %304 = arith.truncf %303 : vector<84x32xf32> to vector<84x32xbf16>
    %c28 = arith.constant 28 : index
    %c0_269 = arith.constant 0 : index
    %c0_270 = arith.constant 0 : index
    %305 = vector.load %arg6[%c28, %c0_269, %c0_270] : memref<36x32x32xbf16, #tpu.memory_space<vmem>>, vector<1x32x32xbf16>
    %306 = vector.shape_cast %305 : vector<1x32x32xbf16> to vector<32x32xbf16>
    %cst_271 = arith.constant dense<0.000000e+00> : vector<84x32xf32>
    %307 = tpu.matmul %304, %306, %cst_271 {dimension_numbers = #tpu.dot_dimension_numbers<[1], [0], [0], [1], [0, 0, 1, 1], [], []>} : vector<84x32xbf16>, vector<32x32xbf16>, vector<84x32xf32> -> vector<84x32xf32>
    %308 = arith.addf %300, %307 : vector<84x32xf32>
    %c2_272 = arith.constant 2 : index
    %c0_273 = arith.constant 0 : index
    %c0_274 = arith.constant 0 : index
    %309 = vector.load %arg2[%c2_272, %c0_273, %c0_274] : memref<9x84x84xbf16, #tpu.memory_space<vmem>>, vector<1x84x84xbf16>
    %310 = vector.shape_cast %309 : vector<1x84x84xbf16> to vector<84x84xbf16>
    %cst_275 = arith.constant dense<0.000000e+00> : vector<84x32xf32>
    %311 = tpu.matmul %310, %293, %cst_275 {dimension_numbers = #tpu.dot_dimension_numbers<[1], [0], [0], [1], [0, 0, 1, 1], [], []>} : vector<84x84xbf16>, vector<84x32xbf16>, vector<84x32xf32> -> vector<84x32xf32>
    %312 = arith.truncf %311 : vector<84x32xf32> to vector<84x32xbf16>
    %c29 = arith.constant 29 : index
    %c0_276 = arith.constant 0 : index
    %c0_277 = arith.constant 0 : index
    %313 = vector.load %arg6[%c29, %c0_276, %c0_277] : memref<36x32x32xbf16, #tpu.memory_space<vmem>>, vector<1x32x32xbf16>
    %314 = vector.shape_cast %313 : vector<1x32x32xbf16> to vector<32x32xbf16>
    %cst_278 = arith.constant dense<0.000000e+00> : vector<84x32xf32>
    %315 = tpu.matmul %312, %314, %cst_278 {dimension_numbers = #tpu.dot_dimension_numbers<[1], [0], [0], [1], [0, 0, 1, 1], [], []>} : vector<84x32xbf16>, vector<32x32xbf16>, vector<84x32xf32> -> vector<84x32xf32>
    %316 = arith.addf %308, %315 : vector<84x32xf32>
    %c3_279 = arith.constant 3 : index
    %c0_280 = arith.constant 0 : index
    %c0_281 = arith.constant 0 : index
    %317 = vector.load %arg2[%c3_279, %c0_280, %c0_281] : memref<9x84x84xbf16, #tpu.memory_space<vmem>>, vector<1x84x84xbf16>
    %318 = vector.shape_cast %317 : vector<1x84x84xbf16> to vector<84x84xbf16>
    %cst_282 = arith.constant dense<0.000000e+00> : vector<84x32xf32>
    %319 = tpu.matmul %318, %293, %cst_282 {dimension_numbers = #tpu.dot_dimension_numbers<[1], [0], [0], [1], [0, 0, 1, 1], [], []>} : vector<84x84xbf16>, vector<84x32xbf16>, vector<84x32xf32> -> vector<84x32xf32>
    %320 = arith.truncf %319 : vector<84x32xf32> to vector<84x32xbf16>
    %c30 = arith.constant 30 : index
    %c0_283 = arith.constant 0 : index
    %c0_284 = arith.constant 0 : index
    %321 = vector.load %arg6[%c30, %c0_283, %c0_284] : memref<36x32x32xbf16, #tpu.memory_space<vmem>>, vector<1x32x32xbf16>
    %322 = vector.shape_cast %321 : vector<1x32x32xbf16> to vector<32x32xbf16>
    %cst_285 = arith.constant dense<0.000000e+00> : vector<84x32xf32>
    %323 = tpu.matmul %320, %322, %cst_285 {dimension_numbers = #tpu.dot_dimension_numbers<[1], [0], [0], [1], [0, 0, 1, 1], [], []>} : vector<84x32xbf16>, vector<32x32xbf16>, vector<84x32xf32> -> vector<84x32xf32>
    %324 = arith.addf %316, %323 : vector<84x32xf32>
    %c31 = arith.constant 31 : index
    %c0_286 = arith.constant 0 : index
    %c0_287 = arith.constant 0 : index
    %325 = vector.load %arg6[%c31, %c0_286, %c0_287] : memref<36x32x32xbf16, #tpu.memory_space<vmem>>, vector<1x32x32xbf16>
    %326 = vector.shape_cast %325 : vector<1x32x32xbf16> to vector<32x32xbf16>
    %cst_288 = arith.constant dense<0.000000e+00> : vector<84x32xf32>
    %327 = tpu.matmul %293, %326, %cst_288 {dimension_numbers = #tpu.dot_dimension_numbers<[1], [0], [0], [1], [0, 0, 1, 1], [], []>} : vector<84x32xbf16>, vector<32x32xbf16>, vector<84x32xf32> -> vector<84x32xf32>
    %328 = arith.addf %324, %327 : vector<84x32xf32>
    %c5_289 = arith.constant 5 : index
    %c0_290 = arith.constant 0 : index
    %c0_291 = arith.constant 0 : index
    %329 = vector.load %arg2[%c5_289, %c0_290, %c0_291] : memref<9x84x84xbf16, #tpu.memory_space<vmem>>, vector<1x84x84xbf16>
    %330 = vector.shape_cast %329 : vector<1x84x84xbf16> to vector<84x84xbf16>
    %cst_292 = arith.constant dense<0.000000e+00> : vector<84x32xf32>
    %331 = tpu.matmul %330, %293, %cst_292 {dimension_numbers = #tpu.dot_dimension_numbers<[1], [0], [0], [1], [0, 0, 1, 1], [], []>} : vector<84x84xbf16>, vector<84x32xbf16>, vector<84x32xf32> -> vector<84x32xf32>
    %332 = arith.truncf %331 : vector<84x32xf32> to vector<84x32xbf16>
    %c32 = arith.constant 32 : index
    %c0_293 = arith.constant 0 : index
    %c0_294 = arith.constant 0 : index
    %333 = vector.load %arg6[%c32, %c0_293, %c0_294] : memref<36x32x32xbf16, #tpu.memory_space<vmem>>, vector<1x32x32xbf16>
    %334 = vector.shape_cast %333 : vector<1x32x32xbf16> to vector<32x32xbf16>
    %cst_295 = arith.constant dense<0.000000e+00> : vector<84x32xf32>
    %335 = tpu.matmul %332, %334, %cst_295 {dimension_numbers = #tpu.dot_dimension_numbers<[1], [0], [0], [1], [0, 0, 1, 1], [], []>} : vector<84x32xbf16>, vector<32x32xbf16>, vector<84x32xf32> -> vector<84x32xf32>
    %336 = arith.addf %328, %335 : vector<84x32xf32>
    %c6_296 = arith.constant 6 : index
    %c0_297 = arith.constant 0 : index
    %c0_298 = arith.constant 0 : index
    %337 = vector.load %arg2[%c6_296, %c0_297, %c0_298] : memref<9x84x84xbf16, #tpu.memory_space<vmem>>, vector<1x84x84xbf16>
    %338 = vector.shape_cast %337 : vector<1x84x84xbf16> to vector<84x84xbf16>
    %cst_299 = arith.constant dense<0.000000e+00> : vector<84x32xf32>
    %339 = tpu.matmul %338, %293, %cst_299 {dimension_numbers = #tpu.dot_dimension_numbers<[1], [0], [0], [1], [0, 0, 1, 1], [], []>} : vector<84x84xbf16>, vector<84x32xbf16>, vector<84x32xf32> -> vector<84x32xf32>
    %340 = arith.truncf %339 : vector<84x32xf32> to vector<84x32xbf16>
    %c33 = arith.constant 33 : index
    %c0_300 = arith.constant 0 : index
    %c0_301 = arith.constant 0 : index
    %341 = vector.load %arg6[%c33, %c0_300, %c0_301] : memref<36x32x32xbf16, #tpu.memory_space<vmem>>, vector<1x32x32xbf16>
    %342 = vector.shape_cast %341 : vector<1x32x32xbf16> to vector<32x32xbf16>
    %cst_302 = arith.constant dense<0.000000e+00> : vector<84x32xf32>
    %343 = tpu.matmul %340, %342, %cst_302 {dimension_numbers = #tpu.dot_dimension_numbers<[1], [0], [0], [1], [0, 0, 1, 1], [], []>} : vector<84x32xbf16>, vector<32x32xbf16>, vector<84x32xf32> -> vector<84x32xf32>
    %344 = arith.addf %336, %343 : vector<84x32xf32>
    %c7_303 = arith.constant 7 : index
    %c0_304 = arith.constant 0 : index
    %c0_305 = arith.constant 0 : index
    %345 = vector.load %arg2[%c7_303, %c0_304, %c0_305] : memref<9x84x84xbf16, #tpu.memory_space<vmem>>, vector<1x84x84xbf16>
    %346 = vector.shape_cast %345 : vector<1x84x84xbf16> to vector<84x84xbf16>
    %cst_306 = arith.constant dense<0.000000e+00> : vector<84x32xf32>
    %347 = tpu.matmul %346, %293, %cst_306 {dimension_numbers = #tpu.dot_dimension_numbers<[1], [0], [0], [1], [0, 0, 1, 1], [], []>} : vector<84x84xbf16>, vector<84x32xbf16>, vector<84x32xf32> -> vector<84x32xf32>
    %348 = arith.truncf %347 : vector<84x32xf32> to vector<84x32xbf16>
    %c34 = arith.constant 34 : index
    %c0_307 = arith.constant 0 : index
    %c0_308 = arith.constant 0 : index
    %349 = vector.load %arg6[%c34, %c0_307, %c0_308] : memref<36x32x32xbf16, #tpu.memory_space<vmem>>, vector<1x32x32xbf16>
    %350 = vector.shape_cast %349 : vector<1x32x32xbf16> to vector<32x32xbf16>
    %cst_309 = arith.constant dense<0.000000e+00> : vector<84x32xf32>
    %351 = tpu.matmul %348, %350, %cst_309 {dimension_numbers = #tpu.dot_dimension_numbers<[1], [0], [0], [1], [0, 0, 1, 1], [], []>} : vector<84x32xbf16>, vector<32x32xbf16>, vector<84x32xf32> -> vector<84x32xf32>
    %352 = arith.addf %344, %351 : vector<84x32xf32>
    %c8_310 = arith.constant 8 : index
    %c0_311 = arith.constant 0 : index
    %c0_312 = arith.constant 0 : index
    %353 = vector.load %arg2[%c8_310, %c0_311, %c0_312] : memref<9x84x84xbf16, #tpu.memory_space<vmem>>, vector<1x84x84xbf16>
    %354 = vector.shape_cast %353 : vector<1x84x84xbf16> to vector<84x84xbf16>
    %cst_313 = arith.constant dense<0.000000e+00> : vector<84x32xf32>
    %355 = tpu.matmul %354, %293, %cst_313 {dimension_numbers = #tpu.dot_dimension_numbers<[1], [0], [0], [1], [0, 0, 1, 1], [], []>} : vector<84x84xbf16>, vector<84x32xbf16>, vector<84x32xf32> -> vector<84x32xf32>
    %356 = arith.truncf %355 : vector<84x32xf32> to vector<84x32xbf16>
    %c35 = arith.constant 35 : index
    %c0_314 = arith.constant 0 : index
    %c0_315 = arith.constant 0 : index
    %357 = vector.load %arg6[%c35, %c0_314, %c0_315] : memref<36x32x32xbf16, #tpu.memory_space<vmem>>, vector<1x32x32xbf16>
    %358 = vector.shape_cast %357 : vector<1x32x32xbf16> to vector<32x32xbf16>
    %cst_316 = arith.constant dense<0.000000e+00> : vector<84x32xf32>
    %359 = tpu.matmul %356, %358, %cst_316 {dimension_numbers = #tpu.dot_dimension_numbers<[1], [0], [0], [1], [0, 0, 1, 1], [], []>} : vector<84x32xbf16>, vector<32x32xbf16>, vector<84x32xf32> -> vector<84x32xf32>
    %360 = arith.addf %352, %359 : vector<84x32xf32>
    %c3_317 = arith.constant 3 : index
    %c0_318 = arith.constant 0 : index
    %361 = vector.load %arg7[%c3_317, %c0_318] : memref<4x32xf32, #tpu.memory_space<vmem>>, vector<1x32xf32>
    %362 = vector.broadcast %361 : vector<1x32xf32> to vector<84x32xf32>
    %363 = arith.addf %360, %362 : vector<84x32xf32>
    %364 = arith.addf %363, %219 : vector<84x32xf32>
    %cst_319 = arith.constant 0.000000e+00 : f32
    %365 = vector.broadcast %cst_319 : f32 to vector<84x32xf32>
    %366 = arith.maximumf %364, %365 : vector<84x32xf32>
    %367 = arith.truncf %366 : vector<84x32xf32> to vector<84x32xbf16>
    %c0_320 = arith.constant 0 : index
    %c0_321 = arith.constant 0 : index
    %368 = vector.load %arg8[%c0_320, %c0_321] : memref<32x3xbf16, #tpu.memory_space<vmem>>, vector<32x3xbf16>
    %cst_322 = arith.constant dense<0.000000e+00> : vector<84x3xf32>
    %369 = tpu.matmul %367, %368, %cst_322 {dimension_numbers = #tpu.dot_dimension_numbers<[1], [0], [0], [1], [0, 0, 1, 1], [], []>} : vector<84x32xbf16>, vector<32x3xbf16>, vector<84x3xf32> -> vector<84x3xf32>
    %c0_323 = arith.constant 0 : index
    %c0_324 = arith.constant 0 : index
    %370 = vector.load %arg9[%c0_323, %c0_324] : memref<1x3xf32, #tpu.memory_space<vmem>>, vector<1x3xf32>
    %371 = vector.broadcast %370 : vector<1x3xf32> to vector<84x3xf32>
    %372 = arith.addf %369, %371 : vector<84x3xf32>
    %cst_325 = arith.constant 0.000000e+00 : f32
    %373 = vector.broadcast %cst_325 : f32 to vector<84x3xf32>
    %374 = arith.maximumf %372, %373 : vector<84x3xf32>
    %375 = vector.extract_strided_slice %374 {offsets = [0, 0], sizes = [84, 1], strides = [1, 1]} : vector<84x3xf32> to vector<84x1xf32>
    %c0_326 = arith.constant 0 : index
    %c0_327 = arith.constant 0 : index
    %c0_328 = arith.constant 0 : index
    %376 = vector.load %arg10[%c0_326, %c0_327, %c0_328] : memref<2x84x7xf32, #tpu.memory_space<vmem>>, vector<1x84x7xf32>
    %377 = vector.shape_cast %376 : vector<1x84x7xf32> to vector<84x7xf32>
    %378 = vector.broadcast %375 : vector<84x1xf32> to vector<84x7xf32>
    %379 = arith.mulf %378, %377 : vector<84x7xf32>
    %380 = vector.extract_strided_slice %374 {offsets = [0, 1], sizes = [84, 1], strides = [1, 1]} : vector<84x3xf32> to vector<84x1xf32>
    %c1_329 = arith.constant 1 : index
    %c0_330 = arith.constant 0 : index
    %c0_331 = arith.constant 0 : index
    %381 = vector.load %arg10[%c1_329, %c0_330, %c0_331] : memref<2x84x7xf32, #tpu.memory_space<vmem>>, vector<1x84x7xf32>
    %382 = vector.shape_cast %381 : vector<1x84x7xf32> to vector<84x7xf32>
    %383 = vector.broadcast %380 : vector<84x1xf32> to vector<84x7xf32>
    %384 = arith.mulf %383, %382 : vector<84x7xf32>
    %385 = arith.addf %379, %384 : vector<84x7xf32>
    %c0_332 = arith.constant 0 : index
    %c0_333 = arith.constant 0 : index
    %386 = vector.load %arg3[%c0_332, %c0_333] : memref<2x84xf32, #tpu.memory_space<vmem>>, vector<2x84xf32>
    %cst_334 = arith.constant dense<0.000000e+00> : vector<2x7xf32>
    %387 = tpu.matmul %386, %385, %cst_334 {dimension_numbers = #tpu.dot_dimension_numbers<[1], [0], [0], [1], [0, 0, 1, 1], [], []>} : vector<2x84xf32>, vector<84x7xf32>, vector<2x7xf32> -> vector<2x7xf32>
    %c0_335 = arith.constant 0 : index
    %c0_336 = arith.constant 0 : index
    %388 = vector.load %arg11[%c0_335, %c0_336] : memref<1x7xf32, #tpu.memory_space<vmem>>, vector<1x7xf32>
    %389 = vector.broadcast %388 : vector<1x7xf32> to vector<2x7xf32>
    %390 = arith.addf %387, %389 : vector<2x7xf32>
    %c0_337 = arith.constant 0 : index
    %c0_338 = arith.constant 0 : index
    %391 = vector.load %arg3[%c0_337, %c0_338] : memref<2x84xf32, #tpu.memory_space<vmem>>, vector<2x84xf32>
    %392 = vector.extract_strided_slice %374 {offsets = [0, 2], sizes = [84, 1], strides = [1, 1]} : vector<84x3xf32> to vector<84x1xf32>
    %c0_339 = arith.constant 0 : index
    %c0_340 = arith.constant 0 : index
    %393 = vector.load %arg12[%c0_339, %c0_340] : memref<84x256xf32, #tpu.memory_space<vmem>>, vector<84x256xf32>
    %394 = vector.broadcast %392 : vector<84x1xf32> to vector<84x256xf32>
    %395 = arith.mulf %394, %393 : vector<84x256xf32>
    %cst_341 = arith.constant dense<0.000000e+00> : vector<2x256xf32>
    %396 = tpu.matmul %391, %395, %cst_341 {dimension_numbers = #tpu.dot_dimension_numbers<[1], [0], [0], [1], [0, 0, 1, 1], [], []>} : vector<2x84xf32>, vector<84x256xf32>, vector<2x256xf32> -> vector<2x256xf32>
    %c0_342 = arith.constant 0 : index
    %c0_343 = arith.constant 0 : index
    %397 = vector.load %arg13[%c0_342, %c0_343] : memref<1x256xf32, #tpu.memory_space<vmem>>, vector<1x256xf32>
    %398 = vector.broadcast %397 : vector<1x256xf32> to vector<2x256xf32>
    %399 = arith.addf %396, %398 : vector<2x256xf32>
    %cst_344 = arith.constant 0.000000e+00 : f32
    %400 = vector.broadcast %cst_344 : f32 to vector<2x256xf32>
    %401 = arith.maximumf %399, %400 : vector<2x256xf32>
    %c0_345 = arith.constant 0 : index
    %c0_346 = arith.constant 0 : index
    %402 = vector.load %arg14[%c0_345, %c0_346] : memref<256x1xf32, #tpu.memory_space<vmem>>, vector<256x1xf32>
    %cst_347 = arith.constant dense<0.000000e+00> : vector<2x1xf32>
    %403 = tpu.matmul %401, %402, %cst_347 {dimension_numbers = #tpu.dot_dimension_numbers<[1], [0], [0], [1], [0, 0, 1, 1], [], []>} : vector<2x256xf32>, vector<256x1xf32>, vector<2x1xf32> -> vector<2x1xf32>
    %c0_348 = arith.constant 0 : index
    %c0_349 = arith.constant 0 : index
    %404 = vector.load %arg15[%c0_348, %c0_349] : memref<1x1xf32, #tpu.memory_space<vmem>>, vector<1x1xf32>
    %405 = vector.broadcast %404 : vector<1x1xf32> to vector<2x1xf32>
    %406 = arith.addf %403, %405 : vector<2x1xf32>
    %407 = math.tanh %406 : vector<2x1xf32>
    %cst_350 = arith.constant 0.000000e+00 : f32
    %408 = vector.broadcast %cst_350 : f32 to vector<2x128xf32>
    %c0_351 = arith.constant 0 : index
    %c0_352 = arith.constant 0 : index
    %409 = vector.load %arg16[%c0_351, %c0_352] : memref<2x128xf32, #tpu.memory_space<vmem>>, vector<2x128xf32>
    tpu.vector_store %arg16[%c0_351, %c0_352], %408 {strides = array<i32>} : memref<2x128xf32, #tpu.memory_space<vmem>>, vector<2x128xf32>,
    %c0_353 = arith.constant 0 : index
    %c0_354 = arith.constant 0 : index
    %410 = vector.load %arg16[%c0_353, %c0_354] : memref<2x128xf32, #tpu.memory_space<vmem>>, vector<2x7xf32>
    tpu.vector_store %arg16[%c0_353, %c0_354], %390 {strides = array<i32>} : memref<2x128xf32, #tpu.memory_space<vmem>>, vector<2x7xf32>,
    %c0_355 = arith.constant 0 : index
    %c7_356 = arith.constant 7 : index
    %411 = vector.load %arg16[%c0_355, %c7_356] : memref<2x128xf32, #tpu.memory_space<vmem>>, vector<2x1xf32>
    tpu.vector_store %arg16[%c0_355, %c7_356], %407 {strides = array<i32>} : memref<2x128xf32, #tpu.memory_space<vmem>>, vector<2x1xf32>,
    return
  }
  func.func @transform_0(%arg0: i32) -> (i32, i32) {
    %c0_i32 = arith.constant 0 : i32
    %c0_i32_0 = arith.constant 0 : i32
    %c0_i32_1 = arith.constant 0 : i32
    return %c0_i32, %c0_i32_0 : i32, i32
  }
  func.func @transform_1(%arg0: i32) -> (i32, i32, i32) {
    %c0_i32 = arith.constant 0 : i32
    %c0_i32_0 = arith.constant 0 : i32
    %c0_i32_1 = arith.constant 0 : i32
    %c0_i32_2 = arith.constant 0 : i32
    return %c0_i32, %c0_i32_0, %c0_i32_1 : i32, i32, i32
  }
  func.func @transform_2(%arg0: i32) -> (i32, i32) {
    %c0_i32 = arith.constant 0 : i32
    %c0_i32_0 = arith.constant 0 : i32
    %c0_i32_1 = arith.constant 0 : i32
    return %c0_i32, %c0_i32_0 : i32, i32
  }
  func.func @transform_3(%arg0: i32) -> (i32, i32, i32) {
    %c0_i32 = arith.constant 0 : i32
    %c0_i32_0 = arith.constant 0 : i32
    %c0_i32_1 = arith.constant 0 : i32
    %c0_i32_2 = arith.constant 0 : i32
    return %c0_i32, %c0_i32_0, %c0_i32_1 : i32, i32, i32
  }
  func.func @transform_4(%arg0: i32) -> (i32, i32) {
    %c0_i32 = arith.constant 0 : i32
    %c0_i32_0 = arith.constant 0 : i32
    %c0_i32_1 = arith.constant 0 : i32
    return %c0_i32, %c0_i32_0 : i32, i32
  }
  func.func @transform_5(%arg0: i32) -> (i32, i32, i32) {
    %c0_i32 = arith.constant 0 : i32
    %c0_i32_0 = arith.constant 0 : i32
    %c0_i32_1 = arith.constant 0 : i32
    %c0_i32_2 = arith.constant 0 : i32
    return %c0_i32, %c0_i32_0, %c0_i32_1 : i32, i32, i32
  }
  func.func @transform_6(%arg0: i32) -> (i32, i32) {
    %c0_i32 = arith.constant 0 : i32
    %c0_i32_0 = arith.constant 0 : i32
    %c0_i32_1 = arith.constant 0 : i32
    return %c0_i32, %c0_i32_0 : i32, i32
  }
  func.func @transform_7(%arg0: i32) -> (i32, i32) {
    %c0_i32 = arith.constant 0 : i32
    %c0_i32_0 = arith.constant 0 : i32
    %c0_i32_1 = arith.constant 0 : i32
    return %c0_i32, %c0_i32_0 : i32, i32
  }
  func.func @transform_8(%arg0: i32) -> (i32, i32) {
    %c0_i32 = arith.constant 0 : i32
    %c0_i32_0 = arith.constant 0 : i32
    %c0_i32_1 = arith.constant 0 : i32
    return %c0_i32, %c0_i32_0 : i32, i32
  }
  func.func @transform_9(%arg0: i32) -> (i32, i32, i32) {
    %c0_i32 = arith.constant 0 : i32
    %c0_i32_0 = arith.constant 0 : i32
    %c0_i32_1 = arith.constant 0 : i32
    %c0_i32_2 = arith.constant 0 : i32
    return %c0_i32, %c0_i32_0, %c0_i32_1 : i32, i32, i32
  }
  func.func @transform_10(%arg0: i32) -> (i32, i32) {
    %c0_i32 = arith.constant 0 : i32
    %c0_i32_0 = arith.constant 0 : i32
    %c0_i32_1 = arith.constant 0 : i32
    return %c0_i32, %c0_i32_0 : i32, i32
  }
  func.func @transform_11(%arg0: i32) -> (i32, i32) {
    %c0_i32 = arith.constant 0 : i32
    %c0_i32_0 = arith.constant 0 : i32
    %c0_i32_1 = arith.constant 0 : i32
    return %c0_i32, %c0_i32_0 : i32, i32
  }
  func.func @transform_12(%arg0: i32) -> (i32, i32) {
    %c0_i32 = arith.constant 0 : i32
    %c0_i32_0 = arith.constant 0 : i32
    %c0_i32_1 = arith.constant 0 : i32
    return %c0_i32, %c0_i32_0 : i32, i32
  }
  func.func @transform_13(%arg0: i32) -> (i32, i32) {
    %c0_i32 = arith.constant 0 : i32
    %c0_i32_0 = arith.constant 0 : i32
    %c0_i32_1 = arith.constant 0 : i32
    return %c0_i32, %c0_i32_0 : i32, i32
  }
  func.func @transform_14(%arg0: i32) -> (i32, i32) {
    %c0_i32 = arith.constant 0 : i32
    %c0_i32_0 = arith.constant 0 : i32
    %c0_i32_1 = arith.constant 0 : i32
    return %c0_i32, %c0_i32_0 : i32, i32
  }
  func.func @transform_15(%arg0: i32) -> (i32, i32) {
    %c0_i32 = arith.constant 0 : i32
    %c0_i32_0 = arith.constant 0 : i32
    %c0_i32_1 = arith.constant 0 : i32
    return %c0_i32, %c0_i32_0 : i32, i32
  }
}

</mosaic_0001>

<bundles_post_ra>
// kernel: alpha_connect4_forward.1
= control target key start
LH: loop header
LB: loop body
LE: loop exit
PB: predicated region body
PF: predicated region fallthrough
CT: control target
= control target key end

     0   :  { %vm136_vm0 = vcmask 687104   ;;  %vm155_vm1 = vcmask 1041408   ;;  %vm411_vm2 = vcmask 1040384   ;;  %vm392_vm3 = vcmask 15360   ;;  %s18514_s0 = inlined_call_operand.vmem [shape: bf16[84,2], index: 0, kind: input, shape index: {}]   ;;  %s18515_s1 = inlined_call_operand.vmem [shape: bf16[9,84,84], index: 1, kind: input, shape index: {}]   ;;  %s18516_s3 = inlined_call_operand.vmem [shape: bf16[9,2,32], index: 3, kind: input, shape index: {}]   ;;  %s18517_s4 = inlined_call_operand.vmem [shape: f32[1,32], index: 4, kind: input, shape index: {}]   ;;  %s18518_s5 = inlined_call_operand.vmem [shape: bf16[36,32,32], index: 5, kind: input, shape index: {}]   ;;  %s18519_s6 = inlined_call_operand.vmem [shape: f32[4,32], index: 6, kind: input, shape index: {}]   ;;  %s18520_s7 = inlined_call_operand.vmem [shape: bf16[32,3], index: 7, kind: input, shape index: {}]   ;;  %s18521_s8 = inlined_call_operand.vmem [shape: f32[1,3], index: 8, kind: input, shape index: {}]   ;;  %s18522_s15 = inlined_call_operand.vmem [shape: f32[2,128], index: 15, kind: output, shape index: {}]   ;;  %s18523_s11 = inlined_call_operand.vmem [shape: f32[84,256], index: 11, kind: input, shape index: {}]   ;;  %s18524_s13 = inlined_call_operand.vmem [shape: f32[256,1], index: 13, kind: input, shape index: {}]   ;;  %s18525_s2 = inlined_call_operand.vmem [shape: f32[2,84], index: 2, kind: input, shape index: {}]   ;;  %s18526_s9 = inlined_call_operand.vmem [shape: f32[2,84,7], index: 9, kind: input, shape index: {}]   ;;  %s18527_s12 = inlined_call_operand.vmem [shape: f32[1,256], index: 12, kind: input, shape index: {}]   ;;  %s18528_s14 = inlined_call_operand.<no memory space> [shape: f32[1,1], index: 14, kind: input, shape index: {}]   ;;  %s18529_s10 = inlined_call_operand.vmem [shape: f32[1,7], index: 10, kind: input, shape index: {}]  }
   0x1   :  { %v14604_v0 = vld [vmem:[%s18514_s0] sm:$0xff]   ;;  %v14609_v1 = vld [vmem:[%s18514_s0 + $0x8] sm:$0xff]   ;;  %v14619_v2 = vld [vmem:[%s18514_s0 + $0x10] sm:$0xff]   ;;  %vm2488_vm4 = vcmask 261120   ;;  %vm9952_vm5 = vcmask 1043456   ;;  %vm14519_vm6 = vmmov 0  }
   0x2   :  { %12131 = vmatprep.subr.bf16.mxu1 %v14604_v0  ;;  %12107 = vmatprep.subr.bf16.mxu0 %v14604_v0  ;;  %v14274_v3 = vld [vmem:[%s18515_s1 + $0x2c] sm:$0xff]   ;;  %v14631_v4 = vld [vmem:[%s18514_s0 + $0x18] sm:$0xff]   ;;  %v14639_v5 = vld [vmem:[%s18514_s0 + $0x20] sm:$0xff]   ;;  %vm10316_vm7 = vcmask 50176   ;;  %vm10322_vm8 = vcmask 58424  }
   0x3   :  { %12132 = vmatpush3.bf16.msra.mxu1 %v14604_v0  ;;  %12108 = vmatpush3.bf16.msra.mxu0 %v14604_v0  ;;  %v14644_v6 = vld [vmem:[%s18515_s1] sm:$0xff]   ;;  %v14656_v7 = vld [vmem:[%s18514_s0 + $0x28] ss:$0 sps:$4 sm:$0x33]   ;;  %v14275_v9 = vld [vmem:[%s18515_s1 + $0x34] sm:$0xff]  }
   0x4   :  { %12133 = vmatprep.subr.bf16.mxu1 %v14609_v1  ;;  %12109 = vmatprep.subr.bf16.mxu0 %v14609_v1  ;;  %v14665_v8 = vsel %vm155_vm1, %v14656_v7, 0  ;;  %v14276_v10 = vld [vmem:[%s18515_s1 + $0x3c] sm:$0xff]   ;;  %v14281_v11 = vld [vmem:[%s18515_s1 + $0x8] sm:$0xff]   ;;  %v14282_v12 = vld [vmem:[%s18515_s1 + $0x10] sm:$0xff]  }
   0x5   :  { %12143 = vmatprep.mubr.msk.bf16.mxu1 %vm136_vm0, %v14274_v3  ;;  %12119 = vmatprep.mubr.msk.bf16.mxu0 %vm136_vm0, %v14644_v6  ;;  %v14277_v13 = vld [vmem:[%s18515_s1 + $0x44] sm:$0xff]   ;;  %v14278_v14 = vld [vmem:[%s18515_s1 + $0x4c] sm:$0xff]   ;;  %v14283_v15 = vld [vmem:[%s18515_s1 + $0x18] sm:$0xff]  }
   0x6   :  { %v14284_v16 = vld [vmem:[%s18515_s1 + $0x20] sm:$0xff]   ;;  %v14279_v17 = vld [vmem:[%s18515_s1 + $0x54] ss:$0 sps:$4 sm:$0x33]   ;;  %v14720_v19 = vld [vmem:[%s18515_s1 + $0x58] sm:$0xff]  }
   0x7   :  { %12134 = vmatpush3.bf16.msra.mxu1 %v14609_v1  ;;  %12110 = vmatpush3.bf16.msra.mxu0 %v14609_v1  ;;  %v14285_v18 = vld [vmem:[%s18515_s1 + $0x28] ss:$0 sps:$4 sm:$0x33]   ;;  %v14734_v20 = vld [vmem:[%s18515_s1 + $0x60] sm:$0xff]   ;;  %v14757_v24 = vld [vmem:[%s18515_s1 + $0x70] sm:$0xff]  }
   0x8   :  { %12135 = vmatprep.subr.bf16.mxu1 %v14619_v2  ;;  %12111 = vmatprep.subr.bf16.mxu0 %v14619_v2  ;;  %v10369_v21 = vld [vmem:[%s18516_s3 + $0x1] sm:$0x1]  ;;  %v14743_v22 = vld [vmem:[%s18515_s1 + $0x68] sm:$0xff]   ;;  %v14763_v25 = vld [vmem:[%s18515_s1 + $0x78] sm:$0xff]  }
   0x9   :  { %v413_v23 = vsel %vm411_vm2, %v10369_v21, 0  ;;  %v14775_v26 = vld [vmem:[%s18515_s1 + $0x80] ss:$0 sps:$4 sm:$0x33]   ;;  %v14781_v27 = vld [vmem:[%s18515_s1 + $0x84] sm:$0xff]   ;;  %v14794_v28 = vld [vmem:[%s18515_s1 + $0x8c] sm:$0xff]  }
   0xa   :  { %v14800_v29 = vld [vmem:[%s18515_s1 + $0x94] sm:$0xff]   ;;  %v14812_v30 = vld [vmem:[%s18515_s1 + $0x9c] sm:$0xff]   ;;  %v14817_v31 = vld [vmem:[%s18515_s1 + $0xa4] sm:$0xff]  }
   0xb   :  { %12136 = vmatpush3.bf16.msra.mxu1 %v14619_v2  ;;  %12112 = vmatpush3.bf16.msra.mxu0 %v14619_v2  ;;  %v14830_v32 = vld [vmem:[%s18515_s1 + $0xac] ss:$0 sps:$4 sm:$0x33]   ;;  %v14836_v33 = vld [vmem:[%s18515_s1 + $0xdc] sm:$0xff]   ;;  %v14849_v34 = vld [vmem:[%s18515_s1 + $0xe4] sm:$0xff]  }
   0xc   :  { %12137 = vmatprep.subr.bf16.mxu1 %v14631_v4  ;;  %12113 = vmatprep.subr.bf16.mxu0 %v14631_v4  ;;  %v14855_v35 = vld [vmem:[%s18515_s1 + $0xec] sm:$0xff]   ;;  %v14867_v36 = vld [vmem:[%s18515_s1 + $0xf4] sm:$0xff]   ;;  %v14873_v37 = vld [vmem:[%s18515_s1 + $0xfc] sm:$0xff]  }
   0xd   :  { %v14885_v38 = vld [vmem:[%s18515_s1 + $0x104] ss:$0 sps:$4 sm:$0x33]   ;;  %v14891_v39 = vld [vmem:[%s18515_s1 + $0x108] sm:$0xff]   ;;  %v14904_v40 = vld [vmem:[%s18516_s3] sm:$0x1] }
   0xe   :  { %v14909_v41 = vld [vmem:[%s18515_s1 + $0x110] sm:$0xff]   ;;  %v14917_v42 = vld [vmem:[%s18515_s1 + $0x118] sm:$0xff]   ;;  %v14929_v43 = vld [vmem:[%s18515_s1 + $0x120] sm:$0xff]  }
   0xf   :  { %12138 = vmatpush3.bf16.msra.mxu1 %v14631_v4  ;;  %12114 = vmatpush3.bf16.msra.mxu0 %v14631_v4  ;;  %v14935_v44 = vld [vmem:[%s18515_s1 + $0x128] sm:$0xff]   ;;  %v14947_v45 = vld [vmem:[%s18515_s1 + $0x130] ss:$0 sps:$4 sm:$0x33]   ;;  %v14953_v46 = vld [vmem:[%s18515_s1 + $0x134] sm:$0xff]  }
  0x10   :  { %12139 = vmatprep.subr.bf16.mxu1 %v14639_v5  ;;  %12115 = vmatprep.subr.bf16.mxu0 %v14639_v5  ;;  %v14966_v47 = vld [vmem:[%s18515_s1 + $0x13c] sm:$0xff]   ;;  %v14972_v48 = vld [vmem:[%s18515_s1 + $0x144] sm:$0xff]   ;;  %v14313_v49 = vld [vmem:[%s18515_s1 + $0x14c] sm:$0xff]  }
  0x11   :  { %v14314_v50 = vld [vmem:[%s18515_s1 + $0x154] sm:$0xff]   ;;  %v14315_v51 = vld [vmem:[%s18515_s1 + $0x15c] ss:$0 sps:$4 sm:$0x33]   ;;  %v14316_v52 = vld [vmem:[%s18515_s1 + $0x160] sm:$0xff]  }
  0x12   :  { %v14317_v53 = vld [vmem:[%s18515_s1 + $0x168] sm:$0xff]   ;;  %v14318_v54 = vld [vmem:[%s18515_s1 + $0x170] sm:$0xff]   ;;  %v14319_v55 = vld [vmem:[%s18515_s1 + $0x178] sm:$0xff]  }
  0x13   :  { %12140 = vmatpush3.bf16.msra.mxu1 %v14639_v5  ;;  %12116 = vmatpush3.bf16.msra.mxu0 %v14639_v5  ;;  %v14320_v56 = vld [vmem:[%s18515_s1 + $0x180] sm:$0xff]   ;;  %v14321_v57 = vld [vmem:[%s18515_s1 + $0x188] ss:$0 sps:$4 sm:$0x33]  }
  0x14   :  { %14198 = vmatprep.subr.msk.bf16.mxu1 %vm155_vm1, %v14656_v7  ;;  %14197 = vmatprep.subr.msk.bf16.mxu0 %vm155_vm1, %v14656_v7 }
  0x17   :  { %12142 = vmatpush3.bf16.msra.mxu1 %v14665_v8  ;;  %12118 = vmatpush3.bf16.msra.mxu0 %v14665_v8 }
  0x18   :  { %12183 = vmatprep.subr.bf16.mxu1 %v14604_v0  ;;  %14199 = vmatprep.subr.msk.bf16.mxu0 %vm411_vm2, %v10369_v21 }
  0x1a   :  { %12144 = vmatmul.mubr.msk.bf16.vlgmr.msra.gmra.mrb[0].mxu1 %vm136_vm0, %v14275_v9  ;;  %12120 = vmatmul.mubr.msk.bf16.vlgmr.msra.gmra.mrb[0].mxu0 %vm136_vm0, %v14281_v11 }
  0x1b   :  { %12147 = vmatprep.mubr.msk.bf16.mxu1 %vm136_vm0, %v14276_v10  ;;  %12184 = vmatpush3.bf16.msra.mxu1 %v14604_v0 }
  0x1c   :  { %12123 = vmatprep.mubr.msk.bf16.mxu0 %vm136_vm0, %v14282_v12  ;;  %12185 = vmatprep.subr.bf16.mxu1 %v14609_v1  ;;  %v514_v12 = vsel %vm411_vm2, %v14904_v40, 0 }
  0x1d   :  { %12156 = vmatpush3.bf16.msra.mxu0 %v413_v23 }
  0x1e   :  { %14200 = vmatprep.subr.msk.bf16.mxu0 %vm411_vm2, %v14904_v40 }
  0x1f   :  { %12186 = vmatpush3.bf16.msra.mxu1 %v14609_v1 }
  0x20   :  { %12187 = vmatprep.subr.bf16.mxu1 %v14619_v2 }
  0x22   :  { %12148 = vmatmul.mubr.msk.bf16.gmra.mrb[4].mxu1 %vm136_vm0, %v14277_v13  ;;  %12124 = vmatmul.mubr.msk.bf16.gmra.mrb[4].mxu0 %vm136_vm0, %v14283_v15 }
  0x23   :  { %12151 = vmatprep.mubr.msk.bf16.mxu1 %vm136_vm0, %v14278_v14  ;;  %12188 = vmatpush3.bf16.msra.mxu1 %v14619_v2 }
  0x24   :  { %12127 = vmatprep.mubr.msk.bf16.mxu0 %vm136_vm0, %v14284_v16  ;;  %12189 = vmatprep.subr.bf16.mxu1 %v14631_v4 }
  0x27   :  { %12190 = vmatpush3.bf16.msra.mxu1 %v14631_v4 }
  0x28   :  { %12191 = vmatprep.subr.bf16.mxu1 %v14639_v5 }
  0x2a   :  { %12152 = vmatmul.mubr.msk.bf16.gmra.mrb[8].mxu1 %vm136_vm0, %v14279_v17  ;;  %12128 = vmatmul.mubr.msk.bf16.gmra.mrb[8].mxu0 %vm136_vm0, %v14285_v18 }
  0x2b   :  { %12195 = vmatprep.mubr.msk.bf16.mxu1 %vm136_vm0, %v14720_v19  ;;  %12192 = vmatpush3.bf16.msra.mxu1 %v14639_v5 }
  0x2c   :  { %14201 = vmatprep.subr.msk.bf16.mxu1 %vm155_vm1, %v14656_v7 }
  0x2f   :  { %12194 = vmatpush3.bf16.msra.mxu1 %v14665_v8 }
  0x30   :  { %12221 = vmatprep.subr.bf16.mxu1 %v14604_v0 }
  0x32   :  { %12196 = vmatmul.mubr.msk.bf16.vlgmr.msra.gmra.mrb[12].mxu1 %vm136_vm0, %v14734_v20 }
  0x33   :  { %12222 = vmatpush3.bf16.msra.mxu1 %v14604_v0  ;;  %12199 = vmatprep.mubr.msk.bf16.mxu1 %vm136_vm0, %v14743_v22 }
  0x34   :  { %12223 = vmatprep.subr.bf16.mxu1 %v14609_v1 }
  0x37   :  { %12224 = vmatpush3.bf16.msra.mxu1 %v14609_v1 }
  0x38   :  { %12225 = vmatprep.subr.bf16.mxu1 %v14619_v2 }
  0x3a   :  { %12200 = vmatmul.mubr.msk.bf16.gmra.mrb[16].mxu1 %vm136_vm0, %v14757_v24 }
  0x3b   :  { %12226 = vmatpush3.bf16.msra.mxu1 %v14619_v2  ;;  %12203 = vmatprep.mubr.msk.bf16.mxu1 %vm136_vm0, %v14763_v25 }
  0x3c   :  { %12227 = vmatprep.subr.bf16.mxu1 %v14631_v4 }
  0x3f   :  { %12228 = vmatpush3.bf16.msra.mxu1 %v14631_v4 }
  0x40   :  { %12229 = vmatprep.subr.bf16.mxu1 %v14639_v5 }
  0x42   :  { %12204 = vmatmul.mubr.msk.bf16.gmra.mrb[20].mxu1 %vm136_vm0, %v14775_v26 }
  0x43   :  { %12230 = vmatpush3.bf16.msra.mxu1 %v14639_v5  ;;  %12233 = vmatprep.mubr.msk.bf16.mxu1 %vm136_vm0, %v14781_v27 }
  0x44   :  { %14203 = vmatprep.subr.msk.bf16.mxu1 %vm155_vm1, %v14656_v7 }
  0x47   :  { %12232 = vmatpush3.bf16.msra.mxu1 %v14665_v8 }
  0x48   :  { %12273 = vmatprep.subr.bf16.mxu1 %v14604_v0 }
  0x4a   :  { %12234 = vmatmul.mubr.msk.bf16.vlgmr.msra.gmra.mrb[24].mxu1 %vm136_vm0, %v14794_v28 }
  0x4b   :  { %12237 = vmatprep.mubr.msk.bf16.mxu1 %vm136_vm0, %v14800_v29  ;;  %12274 = vmatpush3.bf16.msra.mxu1 %v14604_v0 }
  0x4c   :  { %12275 = vmatprep.subr.bf16.mxu1 %v14609_v1 }
  0x4f   :  { %12276 = vmatpush3.bf16.msra.mxu1 %v14609_v1 }
  0x50   :  { %12277 = vmatprep.subr.bf16.mxu1 %v14619_v2 }
  0x52   :  { %12238 = vmatmul.mubr.msk.bf16.gmra.mrb[28].mxu1 %vm136_vm0, %v14812_v30 }
  0x53   :  { %12241 = vmatprep.mubr.msk.bf16.mxu1 %vm136_vm0, %v14817_v31  ;;  %12278 = vmatpush3.bf16.msra.mxu1 %v14619_v2 }
  0x54   :  { %12279 = vmatprep.subr.bf16.mxu1 %v14631_v4 }
  0x57   :  { %12280 = vmatpush3.bf16.msra.mxu1 %v14631_v4 }
  0x58   :  { %12281 = vmatprep.subr.bf16.mxu1 %v14639_v5 }
  0x5a   :  { %12242 = vmatmul.mubr.msk.bf16.gmra.mrb[32].mxu1 %vm136_vm0, %v14830_v32 }
  0x5b   :  { %12282 = vmatpush3.bf16.msra.mxu1 %v14639_v5  ;;  %12285 = vmatprep.mubr.msk.bf16.mxu1 %vm136_vm0, %v14836_v33 }
  0x5c   :  { %14206 = vmatprep.subr.msk.bf16.mxu1 %vm155_vm1, %v14656_v7 }
  0x5f   :  { %12284 = vmatpush3.bf16.msra.mxu1 %v14665_v8 }
  0x60   :  { %12311 = vmatprep.subr.bf16.mxu1 %v14604_v0 }
  0x62   :  { %12286 = vmatmul.mubr.msk.bf16.vlgmr.msra.gmra.mrb[36].mxu1 %vm136_vm0, %v14849_v34 }
  0x63   :  { %12312 = vmatpush3.bf16.msra.mxu1 %v14604_v0  ;;  %12289 = vmatprep.mubr.msk.bf16.mxu1 %vm136_vm0, %v14855_v35 }
  0x64   :  { %12313 = vmatprep.subr.bf16.mxu1 %v14609_v1 }
  0x67   :  { %12314 = vmatpush3.bf16.msra.mxu1 %v14609_v1 }
  0x68   :  { %12315 = vmatprep.subr.bf16.mxu1 %v14619_v2 }
  0x6a   :  { %12290 = vmatmul.mubr.msk.bf16.gmra.mrb[40].mxu1 %vm136_vm0, %v14867_v36 }
  0x6b   :  { %12316 = vmatpush3.bf16.msra.mxu1 %v14619_v2  ;;  %12293 = vmatprep.mubr.msk.bf16.mxu1 %vm136_vm0, %v14873_v37 }
  0x6c   :  { %12317 = vmatprep.subr.bf16.mxu1 %v14631_v4 }
  0x6f   :  { %12318 = vmatpush3.bf16.msra.mxu1 %v14631_v4 }
  0x70   :  { %12319 = vmatprep.subr.bf16.mxu1 %v14639_v5 }
  0x72   :  { %12294 = vmatmul.mubr.msk.bf16.gmra.mrb[44].mxu1 %vm136_vm0, %v14885_v38 }
  0x73   :  { %12320 = vmatpush3.bf16.msra.mxu1 %v14639_v5  ;;  %12323 = vmatprep.mubr.msk.bf16.mxu1 %vm136_vm0, %v14891_v39 }
  0x74   :  { %14208 = vmatprep.subr.msk.bf16.mxu1 %vm155_vm1, %v14656_v7 }
  0x77   :  { %12322 = vmatpush3.bf16.msra.mxu1 %v14665_v8 }
  0x78   :  { %12349 = vmatprep.subr.bf16.mxu1 %v14604_v0 }
  0x7a   :  { %12324 = vmatmul.mubr.msk.bf16.vlgmr.msra.gmra.mrb[48].mxu1 %vm136_vm0, %v14909_v41 }
  0x7b   :  { %12350 = vmatpush3.bf16.msra.mxu1 %v14604_v0  ;;  %12327 = vmatprep.mubr.msk.bf16.mxu1 %vm136_vm0, %v14917_v42 }
  0x7c   :  { %12351 = vmatprep.subr.bf16.mxu1 %v14609_v1 }
  0x7f   :  { %12352 = vmatpush3.bf16.msra.mxu1 %v14609_v1 }
  0x80   :  { %12353 = vmatprep.subr.bf16.mxu1 %v14619_v2 }
  0x82   :  { %12328 = vmatmul.mubr.msk.bf16.gmra.mrb[52].mxu1 %vm136_vm0, %v14929_v43 }
  0x83   :  { %12354 = vmatpush3.bf16.msra.mxu1 %v14619_v2  ;;  %12331 = vmatprep.mubr.msk.bf16.mxu1 %vm136_vm0, %v14935_v44 }
  0x84   :  { %12355 = vmatprep.subr.bf16.mxu1 %v14631_v4 }
  0x87   :  { %12356 = vmatpush3.bf16.msra.mxu1 %v14631_v4 }
  0x88   :  { %12357 = vmatprep.subr.bf16.mxu1 %v14639_v5 }
  0x8a   :  { %12332 = vmatmul.mubr.msk.bf16.gmra.mrb[56].mxu1 %vm136_vm0, %v14947_v45 }
  0x8b   :  { %12358 = vmatpush3.bf16.msra.mxu1 %v14639_v5  ;;  %12361 = vmatprep.mubr.msk.bf16.mxu1 %vm136_vm0, %v14953_v46 }
  0x8c   :  { %14210 = vmatprep.subr.msk.bf16.mxu1 %vm155_vm1, %v14656_v7 }
  0x8f   :  { %12360 = vmatpush3.bf16.msra.mxu1 %v14665_v8 }
  0x90   :  { %12387 = vmatprep.subr.bf16.mxu1 %v14604_v0 }
  0x92   :  { %12362 = vmatmul.mubr.msk.bf16.vlgmr.msra.gmra.mrb[60].mxu1 %vm136_vm0, %v14966_v47 }
  0x93   :  { %12388 = vmatpush3.bf16.msra.mxu1 %v14604_v0  ;;  %12365 = vmatprep.mubr.msk.bf16.mxu1 %vm136_vm0, %v14972_v48 }
  0x94   :  { %12389 = vmatprep.subr.bf16.mxu1 %v14609_v1 }
  0x97   :  { %12390 = vmatpush3.bf16.msra.mxu1 %v14609_v1 }
  0x98   :  { %12391 = vmatprep.subr.bf16.mxu1 %v14619_v2 }
  0x9a   :  { %12366 = vmatmul.mubr.msk.bf16.gmra.mrb[64].mxu1 %vm136_vm0, %v14313_v49 }
  0x9b   :  { %12392 = vmatpush3.bf16.msra.mxu1 %v14619_v2  ;;  %12369 = vmatprep.mubr.msk.bf16.mxu1 %vm136_vm0, %v14314_v50 }
  0x9c   :  { %12393 = vmatprep.subr.bf16.mxu1 %v14631_v4 }
  0x9f   :  { %12394 = vmatpush3.bf16.msra.mxu1 %v14631_v4 }
  0xa0   :  { %12395 = vmatprep.subr.bf16.mxu1 %v14639_v5 }
  0xa2   :  { %12370 = vmatmul.mubr.msk.bf16.gmra.mrb[68].mxu1 %vm136_vm0, %v14315_v51 }
  0xa3   :  { %12396 = vmatpush3.bf16.msra.mxu1 %v14639_v5  ;;  %12399 = vmatprep.mubr.msk.bf16.mxu1 %vm136_vm0, %v14316_v52 }
  0xa4   :  { %14212 = vmatprep.subr.msk.bf16.mxu1 %vm155_vm1, %v14656_v7 }
  0xa7   :  { %12398 = vmatpush3.bf16.msra.mxu1 %v14665_v8 }
  0xaa   :  { %12400 = vmatmul.mubr.msk.bf16.vlgmr.msra.gmra.mrb[72].mxu1 %vm136_vm0, %v14317_v53 }
  0xab   :  { %12403 = vmatprep.mubr.msk.bf16.mxu1 %vm136_vm0, %v14318_v54 }
  0xb2   :  { %12404 = vmatmul.mubr.msk.bf16.gmra.mrb[76].mxu1 %vm136_vm0, %v14319_v55 }
  0xb3   :  { %12407 = vmatprep.mubr.msk.bf16.mxu1 %vm136_vm0, %v14320_v56 }
  0xba   :  { %12408 = vmatmul.mubr.msk.bf16.gmra.mrb[80].mxu1 %vm136_vm0, %v14321_v57 }
  0xbb   :  { %12437 = vmatprep.mubr.msk.bf16.mxu1 %vm136_vm0, %v14644_v6  ;;  %v10405_v6 = vld [vmem:[%s18516_s3 + $0x2] sm:$0x1] }
  0xed   :  { %v12145_v58 = vpop.f32.mrb[0].mxu1  ;;  %v12121_v60 = vpop.f32.mrb[0].mxu0 }
  0xee   :  { %v338_v59 = vpop.f32.mrb[1].mxu1  ;;  %v193_v62 = vpop.f32.mrb[1].mxu0 }
  0xef   :  { %v12146_v61 = vpop.f32.mrb[2].mxu1  ;;  %v12122_v8 = vpop.f32.mrb[2].mxu0 }
  0xf0   :  { %v385_v63 = vpack.c.bf16 %v12146_v61, %v12145_v58  ;;  %v341_v3 = vpop.f32.mrb[3].mxu1  ;;  %v240_v10 = vpack.c.bf16 %v12122_v8, %v12121_v60  ;;  %v196_v11 = vpop.f32.mrb[3].mxu0 }
  0xf1   :  { %v384_v9 = vpack.c.bf16 %v341_v3, %v338_v59  ;;  %v239_v13 = vpack.c.bf16 %v196_v11, %v193_v62 }
  0xf3   :  { %12157 = vmatprep.mubr.msk.bf16.mxu0 %vm392_vm3, %v384_v9 }
  0xf4   :  { %12158 = vmatmul.mubr.msk.bf16.vlgmr.msra.gmra.mrb[12].mxu0 %vm392_vm3, %v385_v63 }
  0xf5   :  { %v12149_v14 = vpop.f32.mrb[4].mxu1  ;;  %12170 = vmatpush3.bf16.msra.mxu0 %v514_v12  ;;  %v12125_v16 = vpop.f32.mrb[4].mxu0 }
  0xf6   :  { %v354_v15 = vpop.f32.mrb[5].mxu1  ;;  %14202 = vmatprep.subr.msk.bf16.mxu0 %vm411_vm2, %v10405_v6  ;;  %v209_v18 = vpop.f32.mrb[5].mxu0 }
  0xf7   :  { %v12150_v17 = vpop.f32.mrb[6].mxu1  ;;  %v12126_v40 = vpop.f32.mrb[6].mxu0 }
  0xf8   :  { %v387_v21 = vpack.c.bf16 %v12150_v17, %v12149_v14  ;;  %v357_v23 = vpop.f32.mrb[7].mxu1  ;;  %v242_v50 = vpack.c.bf16 %v12126_v40, %v12125_v16  ;;  %v212_v51 = vpop.f32.mrb[7].mxu0  ;;  %v761_v14 = vsel %vm411_vm2, %v10405_v6, 0  ;;  %v10435_v16 = vld [vmem:[%s18516_s3 + $0x3] sm:$0x1] }
  0xf9   :  { %v386_v49 = vpack.c.bf16 %v357_v23, %v354_v15  ;;  %v241_v52 = vpack.c.bf16 %v212_v51, %v209_v18 }
  0xfb   :  { %12161 = vmatprep.mubr.msk.bf16.mxu0 %vm392_vm3, %v386_v49 }
  0xfc   :  { %12162 = vmatmul.mubr.msk.bf16.gmra.mrb[16].mxu0 %vm392_vm3, %v387_v21 }
  0xfd   :  { %v12153_v53 = vpop.f32.mrb[8].mxu1  ;;  %v12129_v55 = vpop.f32.mrb[8].mxu0 }
  0xfe   :  { %v370_v54 = vpop.f32.mrb[9].mxu1  ;;  %v225_v57 = vpop.f32.mrb[9].mxu0  ;;  %v389_v62 = vpack.c.bf16 %v12153_v53, %v12153_v53 }
  0xff   :  { %v12154_v56 = vpop.f32.mrb[10].mxu1  ;;  %v12130_v59 = vpop.f32.mrb[10].mxu0 }
 0x100   :  { %v373_v58 = vpop.f32.mrb[11].mxu1  ;;  %v228_v61 = vpop.f32.mrb[11].mxu0 }
 0x101   :  { %v388_v60 = vpack.c.bf16 %v373_v58, %v370_v54  ;;  %v243_v63 = vpack.c.bf16 %v228_v61, %v225_v57  ;;  %v10442_v61 = vld [vmem:[%s18516_s3 + $0x4] sm:$0x1] }
 0x103   :  { %12165 = vmatprep.mubr.msk.bf16.mxu0 %vm392_vm3, %v388_v60  ;;  %v1019_v60 = vsel %vm411_vm2, %v10435_v16, 0 }
 0x104   :  { %12166 = vmatmul.mubr.msk.bf16.gmra.mrb[20].mxu0 %vm392_vm3, %v389_v62 }
 0x105   :  { %12171 = vmatprep.mubr.msk.bf16.mxu0 %vm392_vm3, %v239_v13  ;;  %v12197_v3 = vpop.f32.mrb[12].mxu1 }
 0x106   :  { %v688_v8 = vpop.f32.mrb[13].mxu1 }
 0x107   :  { %v12198_v9 = vpop.f32.mrb[14].mxu1 }
 0x108   :  { %v735_v11 = vpack.c.bf16 %v12198_v9, %v12197_v3  ;;  %v691_v12 = vpop.f32.mrb[15].mxu1 }
 0x109   :  { %v734_v15 = vpack.c.bf16 %v691_v12, %v688_v8 }
 0x10c   :  { %12172 = vmatmul.mubr.msk.bf16.vlgmr.msra.gmra.mrb[12].mxu0 %vm392_vm3, %v240_v10  ;;  %v244_v10 = vpack.c.bf16 %v12129_v55, %v12129_v55 }
 0x10d   :  { %12208 = vmatpush3.bf16.msra.mxu0 %v761_v14  ;;  %12175 = vmatprep.mubr.msk.bf16.mxu0 %vm392_vm3, %v241_v52  ;;  %v12201_v17 = vpop.f32.mrb[16].mxu1 }
 0x10e   :  { %14204 = vmatprep.subr.msk.bf16.mxu0 %vm411_vm2, %v10435_v16  ;;  %v704_v13 = vpop.f32.mrb[17].mxu1 }
 0x10f   :  { %v12202_v18 = vpop.f32.mrb[18].mxu1 }
 0x110   :  { %v737_v21 = vpack.c.bf16 %v12202_v18, %v12201_v17  ;;  %v707_v23 = vpop.f32.mrb[19].mxu1 }
 0x111   :  { %v736_v40 = vpack.c.bf16 %v707_v23, %v704_v13 }
 0x114   :  { %12176 = vmatmul.mubr.msk.bf16.gmra.mrb[16].mxu0 %vm392_vm3, %v242_v50 }
 0x115   :  { %12179 = vmatprep.mubr.msk.bf16.mxu0 %vm392_vm3, %v243_v63  ;;  %v12205_v6 = vpop.f32.mrb[20].mxu1 }
 0x116   :  { %v720_v49 = vpop.f32.mrb[21].mxu1 }
 0x117   :  { %v12206_v51 = vpop.f32.mrb[22].mxu1 }
 0x118   :  { %v723_v53 = vpop.f32.mrb[23].mxu1 }
 0x119   :  { %v738_v54 = vpack.c.bf16 %v723_v53, %v720_v49  ;;  %v10472_v53 = vld [vmem:[%s18516_s3 + $0x5] sm:$0x1] }
 0x11c   :  { %12180 = vmatmul.mubr.msk.bf16.gmra.mrb[24].mxu0 %vm392_vm3, %v244_v10 }
 0x11d   :  { %12209 = vmatprep.mubr.msk.bf16.mxu0 %vm392_vm3, %v734_v15  ;;  %v12235_v52 = vpop.f32.mrb[24].mxu1 }
 0x11e   :  { %v946_v56 = vpop.f32.mrb[25].mxu1 }
 0x11f   :  { %v12236_v57 = vpop.f32.mrb[26].mxu1 }
 0x120   :  { %v993_v58 = vpack.c.bf16 %v12236_v57, %v12235_v52  ;;  %v949_v59 = vpop.f32.mrb[27].mxu1 }
 0x121   :  { %v992_v50 = vpack.c.bf16 %v949_v59, %v946_v56 }
 0x124   :  { %12210 = vmatmul.mubr.msk.bf16.vlgmr.msra.gmra.mrb[12].mxu0 %vm392_vm3, %v735_v11  ;;  %v739_v11 = vpack.c.bf16 %v12205_v6, %v12205_v6 }
 0x125   :  { %12246 = vmatpush3.bf16.msra.mxu0 %v1019_v60  ;;  %12213 = vmatprep.mubr.msk.bf16.mxu0 %vm392_vm3, %v736_v40  ;;  %v12239_v55 = vpop.f32.mrb[28].mxu1 }
 0x126   :  { %14205 = vmatprep.subr.msk.bf16.mxu0 %vm411_vm2, %v10442_v61  ;;  %v962_v62 = vpop.f32.mrb[29].mxu1 }
 0x127   :  { %v12240_v63 = vpop.f32.mrb[30].mxu1 }
 0x128   :  { %v995_v3 = vpack.c.bf16 %v12240_v63, %v12239_v55  ;;  %v965_v8 = vpop.f32.mrb[31].mxu1 }
 0x129   :  { %v994_v9 = vpack.c.bf16 %v965_v8, %v962_v62 }
 0x12c   :  { %12214 = vmatmul.mubr.msk.bf16.gmra.mrb[16].mxu0 %vm392_vm3, %v737_v21  ;;  %v1132_v21 = vsel %vm411_vm2, %v10442_v61, 0 }
 0x12d   :  { %12217 = vmatprep.mubr.msk.bf16.mxu0 %vm392_vm3, %v738_v54  ;;  %v12243_v12 = vpop.f32.mrb[32].mxu1 }
 0x12e   :  { %v978_v14 = vpop.f32.mrb[33].mxu1 }
 0x12f   :  { %v12244_v15 = vpop.f32.mrb[34].mxu1 }
 0x130   :  { %v981_v16 = vpop.f32.mrb[35].mxu1 }
 0x131   :  { %v996_v17 = vpack.c.bf16 %v981_v16, %v978_v14  ;;  %v1390_v14 = vsel %vm411_vm2, %v10472_v53, 0 }
 0x134   :  { %12218 = vmatmul.mubr.msk.bf16.gmra.mrb[28].mxu0 %vm392_vm3, %v739_v11 }
 0x135   :  { %12247 = vmatprep.mubr.msk.bf16.mxu0 %vm392_vm3, %v992_v50  ;;  %v15064_v13 = vpop.f32.mrb[36].mxu1 }
 0x136   :  { %v1317_v18 = vpop.f32.mrb[37].mxu1 }
 0x137   :  { %v12288_v23 = vpop.f32.mrb[38].mxu1 }
 0x138   :  { %v1364_v40 = vpack.c.bf16 %v12288_v23, %v15064_v13  ;;  %v1320_v49 = vpop.f32.mrb[39].mxu1 }
 0x139   :  { %v1363_v51 = vpack.c.bf16 %v1320_v49, %v1317_v18 }
 0x13c   :  { %12248 = vmatmul.mubr.msk.bf16.vlgmr.msra.gmra.mrb[12].mxu0 %vm392_vm3, %v993_v58  ;;  %v997_v58 = vpack.c.bf16 %v12243_v12, %v12243_v12  ;;  %v10502_v12 = vld [vmem:[%s18516_s3 + $0x6] sm:$0x1] }
 0x13d   :  { %12260 = vmatpush3.bf16.msra.mxu0 %v1132_v21  ;;  %12251 = vmatprep.mubr.msk.bf16.mxu0 %vm392_vm3, %v994_v9  ;;  %v12291_v6 = vpop.f32.mrb[40].mxu1 }
 0x13e   :  { %14207 = vmatprep.subr.msk.bf16.mxu0 %vm411_vm2, %v10472_v53  ;;  %v1333_v10 = vpop.f32.mrb[41].mxu1 }
 0x13f   :  { %v12292_v54 = vpop.f32.mrb[42].mxu1 }
 0x140   :  { %v1366_v52 = vpack.c.bf16 %v12292_v54, %v12291_v6  ;;  %v1336_v56 = vpop.f32.mrb[43].mxu1 }
 0x141   :  { %v1365_v57 = vpack.c.bf16 %v1336_v56, %v1333_v10 }
 0x144   :  { %12252 = vmatmul.mubr.msk.bf16.gmra.mrb[16].mxu0 %vm392_vm3, %v995_v3 }
 0x145   :  { %12255 = vmatprep.mubr.msk.bf16.mxu0 %vm392_vm3, %v996_v17  ;;  %v12295_v59 = vpop.f32.mrb[44].mxu1 }
 0x146   :  { %v1349_v60 = vpop.f32.mrb[45].mxu1 }
 0x147   :  { %v12296_v50 = vpop.f32.mrb[46].mxu1 }
 0x148   :  { %v1352_v61 = vpop.f32.mrb[47].mxu1 }
 0x149   :  { %v1367_v55 = vpack.c.bf16 %v1352_v61, %v1349_v60 }
 0x14c   :  { %12256 = vmatmul.mubr.msk.bf16.gmra.mrb[32].mxu0 %vm392_vm3, %v997_v58 }
 0x14d   :  { %12261 = vmatprep.mubr.msk.bf16.mxu0 %vm392_vm3, %v14604_v0  ;;  %v15079_v62 = vpop.f32.mrb[48].mxu1 }
 0x14e   :  { %v1575_v63 = vpop.f32.mrb[49].mxu1 }
 0x14f   :  { %v12326_v8 = vpop.f32.mrb[50].mxu1 }
 0x150   :  { %v1622_v9 = vpack.c.bf16 %v12326_v8, %v15079_v62  ;;  %v1578_v3 = vpop.f32.mrb[51].mxu1 }
 0x151   :  { %v1621_v15 = vpack.c.bf16 %v1578_v3, %v1575_v63 }
 0x154   :  { %12262 = vmatmul.mubr.msk.bf16.vlgmr.msra.gmra.mrb[12].mxu0 %vm392_vm3, %v14609_v1 }
 0x155   :  { %12298 = vmatpush3.bf16.msra.mxu0 %v1390_v14  ;;  %12265 = vmatprep.mubr.msk.bf16.mxu0 %vm392_vm3, %v14619_v2  ;;  %v12329_v0 = vpop.f32.mrb[52].mxu1 }
 0x156   :  { %14209 = vmatprep.subr.msk.bf16.mxu0 %vm411_vm2, %v10502_v12  ;;  %v1591_v16 = vpop.f32.mrb[53].mxu1 }
 0x157   :  { %v12330_v11 = vpop.f32.mrb[54].mxu1 }
 0x158   :  { %v1624_v17 = vpack.c.bf16 %v12330_v11, %v12329_v0  ;;  %v1594_v13 = vpop.f32.mrb[55].mxu1 }
 0x159   :  { %v1623_v18 = vpack.c.bf16 %v1594_v13, %v1591_v16 }
 0x15c   :  { %12266 = vmatmul.mubr.msk.bf16.gmra.mrb[16].mxu0 %vm392_vm3, %v14631_v4  ;;  %v1648_v4 = vsel %vm411_vm2, %v10502_v12, 0 }
 0x15d   :  { %12269 = vmatprep.mubr.msk.bf16.mxu0 %vm392_vm3, %v14639_v5  ;;  %v12333_v23 = vpop.f32.mrb[56].mxu1  ;;  %v10532_v5 = vld [vmem:[%s18516_s3 + $0x7] sm:$0x1] }
 0x15e   :  { %v1607_v1 = vpop.f32.mrb[57].mxu1 }
 0x15f   :  { %v12334_v49 = vpop.f32.mrb[58].mxu1 }
 0x160   :  { %v1610_v21 = vpop.f32.mrb[59].mxu1 }
 0x161   :  { %v1625_v53 = vpack.c.bf16 %v1610_v21, %v1607_v1  ;;  %v1906_v1 = vsel %vm411_vm2, %v10532_v5, 0 }
 0x164   :  { %12270 = vmatmul.mubr.msk.bf16.gmra.mrb[36].mxu0 %vm392_vm3, %v14656_v7 }
 0x165   :  { %12299 = vmatprep.mubr.msk.bf16.mxu0 %vm392_vm3, %v1363_v51  ;;  %v12363_v2 = vpop.f32.mrb[60].mxu1 }
 0x166   :  { %v1833_v6 = vpop.f32.mrb[61].mxu1 }
 0x167   :  { %v12364_v10 = vpop.f32.mrb[62].mxu1 }
 0x168   :  { %v1880_v54 = vpack.c.bf16 %v12364_v10, %v12363_v2  ;;  %v1836_v56 = vpop.f32.mrb[63].mxu1 }
 0x169   :  { %v1879_v60 = vpack.c.bf16 %v1836_v56, %v1833_v6 }
 0x16c   :  { %12300 = vmatmul.mubr.msk.bf16.vlgmr.msra.gmra.mrb[12].mxu0 %vm392_vm3, %v1364_v40  ;;  %v1368_v40 = vpack.c.bf16 %v12295_v59, %v12295_v59 }
 0x16d   :  { %12336 = vmatpush3.bf16.msra.mxu0 %v1648_v4  ;;  %12303 = vmatprep.mubr.msk.bf16.mxu0 %vm392_vm3, %v1365_v57  ;;  %v12367_v7 = vpop.f32.mrb[64].mxu1 }
 0x16e   :  { %14211 = vmatprep.subr.msk.bf16.mxu0 %vm411_vm2, %v10532_v5  ;;  %v1849_v51 = vpop.f32.mrb[65].mxu1 }
 0x16f   :  { %v12368_v50 = vpop.f32.mrb[66].mxu1 }
 0x170   :  { %v1882_v61 = vpack.c.bf16 %v12368_v50, %v12367_v7  ;;  %v1852_v58 = vpop.f32.mrb[67].mxu1 }
 0x171   :  { %v1881_v62 = vpack.c.bf16 %v1852_v58, %v1849_v51 }
 0x174   :  { %12304 = vmatmul.mubr.msk.bf16.gmra.mrb[16].mxu0 %vm392_vm3, %v1366_v52 }
 0x175   :  { %12307 = vmatprep.mubr.msk.bf16.mxu0 %vm392_vm3, %v1367_v55  ;;  %v12371_v63 = vpop.f32.mrb[68].mxu1  ;;  %v10562_v55 = vld [vmem:[%s18516_s3 + $0x8] sm:$0x1] }
 0x176   :  { %v1865_v8 = vpop.f32.mrb[69].mxu1 }
 0x177   :  { %v12372_v3 = vpop.f32.mrb[70].mxu1 }
 0x178   :  { %v1868_v14 = vpop.f32.mrb[71].mxu1 }
 0x179   :  { %v1883_v12 = vpack.c.bf16 %v1868_v14, %v1865_v8 }
 0x17c   :  { %12308 = vmatmul.mubr.msk.bf16.gmra.mrb[40].mxu0 %vm392_vm3, %v1368_v40 }
 0x17d   :  { %12337 = vmatprep.mubr.msk.bf16.mxu0 %vm392_vm3, %v1621_v15  ;;  %v12401_v57 = vpop.f32.mrb[72].mxu1 }
 0x17e   :  { %v2091_v0 = vpop.f32.mrb[73].mxu1 }
 0x17f   :  { %v12402_v16 = vpop.f32.mrb[74].mxu1 }
 0x180   :  { %v2138_v11 = vpack.c.bf16 %v12402_v16, %v12401_v57  ;;  %v2094_v13 = vpop.f32.mrb[75].mxu1 }
 0x181   :  { %v2137_v52 = vpack.c.bf16 %v2094_v13, %v2091_v0 }
 0x184   :  { %12338 = vmatmul.mubr.msk.bf16.vlgmr.msra.gmra.mrb[12].mxu0 %vm392_vm3, %v1622_v9  ;;  %v1626_v9 = vpack.c.bf16 %v12333_v23, %v12333_v23 }
 0x185   :  { %12374 = vmatpush3.bf16.msra.mxu0 %v1906_v1  ;;  %12341 = vmatprep.mubr.msk.bf16.mxu0 %vm392_vm3, %v1623_v18  ;;  %v12405_v59 = vpop.f32.mrb[76].mxu1  ;;  %v2164_v18 = vsel %vm411_vm2, %v10562_v55, 0 }
 0x186   :  { %14213 = vmatprep.subr.msk.bf16.mxu0 %vm411_vm2, %v10562_v55  ;;  %v2107_v15 = vpop.f32.mrb[77].mxu1 }
 0x187   :  { %v12406_v49 = vpop.f32.mrb[78].mxu1 }
 0x188   :  { %v2140_v21 = vpack.c.bf16 %v12406_v49, %v12405_v59  ;;  %v2110_v2 = vpop.f32.mrb[79].mxu1 }
 0x189   :  { %v2139_v6 = vpack.c.bf16 %v2110_v2, %v2107_v15 }
 0x18c   :  { %12342 = vmatmul.mubr.msk.bf16.gmra.mrb[16].mxu0 %vm392_vm3, %v1624_v17  ;;  %v1884_v17 = vpack.c.bf16 %v12371_v63, %v12371_v63 }
 0x18d   :  { %12345 = vmatprep.mubr.msk.bf16.mxu0 %vm392_vm3, %v1625_v53  ;;  %v12409_v10 = vpop.f32.mrb[80].mxu1 }
 0x18e   :  { %v2123_v56 = vpop.f32.mrb[81].mxu1  ;;  %v2142_v23 = vpack.c.bf16 %v12409_v10, %v12409_v10 }
 0x18f   :  { %v12410_v4 = vpop.f32.mrb[82].mxu1 }
 0x190   :  { %v2126_v5 = vpop.f32.mrb[83].mxu1 }
 0x191   :  { %v2141_v7 = vpack.c.bf16 %v2126_v5, %v2123_v56 }
 0x194   :  { %12346 = vmatmul.mubr.msk.bf16.gmra.mrb[44].mxu0 %vm392_vm3, %v1626_v9 }
 0x195   :  { %12375 = vmatprep.mubr.msk.bf16.mxu0 %vm392_vm3, %v1879_v60 }
 0x19c   :  { %12376 = vmatmul.mubr.msk.bf16.vlgmr.msra.gmra.mrb[12].mxu0 %vm392_vm3, %v1880_v54 }
 0x19d   :  { %12412 = vmatpush3.bf16.msra.mxu0 %v2164_v18  ;;  %12379 = vmatprep.mubr.msk.bf16.mxu0 %vm392_vm3, %v1881_v62 }
 0x1a4   :  { %12380 = vmatmul.mubr.msk.bf16.gmra.mrb[16].mxu0 %vm392_vm3, %v1882_v61 }
 0x1a5   :  { %12383 = vmatprep.mubr.msk.bf16.mxu0 %vm392_vm3, %v1883_v12 }
 0x1ac   :  { %12384 = vmatmul.mubr.msk.bf16.gmra.mrb[48].mxu0 %vm392_vm3, %v1884_v17 }
 0x1ad   :  { %12413 = vmatprep.mubr.msk.bf16.mxu0 %vm392_vm3, %v2137_v52 }
 0x1b4   :  { %12414 = vmatmul.mubr.msk.bf16.vlgmr.msra.gmra.mrb[12].mxu0 %vm392_vm3, %v2138_v11 }
 0x1b5   :  { %12417 = vmatprep.mubr.msk.bf16.mxu0 %vm392_vm3, %v2139_v6 }
 0x1bc   :  { %12418 = vmatmul.mubr.msk.bf16.gmra.mrb[16].mxu0 %vm392_vm3, %v2140_v21 }
 0x1bd   :  { %12421 = vmatprep.mubr.msk.bf16.mxu0 %vm392_vm3, %v2141_v7 }
 0x1c4   :  { %12422 = vmatmul.mubr.msk.bf16.gmra.mrb[52].mxu0 %vm392_vm3, %v2142_v23 }
 0x1c5   :  { %12517 = vmatprep.mubr.msk.bf16.mxu0 %vm136_vm0, %v14720_v19 }
 0x1d7   :  { %v12167_v53 = vpop.f32.mrb[20].mxu0 }
 0x1d8   :  { %v481_v54 = vpop.f32.mrb[21].mxu0 }
 0x1d9   :  { %v12168_v60 = vpop.f32.mrb[22].mxu0 }
 0x1da   :  { %v484_v51 = vpop.f32.mrb[23].mxu0 }
 0x1ef   :  { %v12181_v50 = vpop.f32.mrb[24].mxu0 }
 0x1f0   :  { %v591_v61 = vadd.f32 %v12181_v50, %v12167_v53  ;;  %v582_v58 = vpop.f32.mrb[25].mxu0 }
 0x1f1   :  { %v583_v62 = vadd.f32 %v582_v58, %v481_v54  ;;  %v12182_v63 = vpop.f32.mrb[26].mxu0 }
 0x1f2   :  { %v585_v8 = vpop.f32.mrb[27].mxu0 }
 0x1f3   :  { %v586_v3 = vadd.f32 %v585_v8, %v484_v51 }
 0x207   :  { %v12219_v14 = vpop.f32.mrb[28].mxu0 }
 0x208   :  { %v853_v40 = vadd.f32 %v12219_v14, %v591_v61  ;;  %v829_v12 = vpop.f32.mrb[29].mxu0 }
 0x209   :  { %v851_v57 = vadd.f32 %v829_v12, %v583_v62  ;;  %v12220_v0 = vpop.f32.mrb[30].mxu0 }
 0x20a   :  { %v832_v16 = vpop.f32.mrb[31].mxu0  ;;  %v10569_v0 = vld [vmem:[%s18517_s4] ss:$0 sm:$0xff] }
 0x20b   :  { %v852_v11 = vadd.f32 %v832_v16, %v586_v3 }
 0x21f   :  { %v12257_v13 = vpop.f32.mrb[32].mxu0 }
 0x220   :  { %v1111_v19 = vadd.f32 %v12257_v13, %v853_v40  ;;  %v1087_v1 = vpop.f32.mrb[33].mxu0 }
 0x221   :  { %v1109_v52 = vadd.f32 %v1087_v1, %v851_v57  ;;  %v12258_v55 = vpop.f32.mrb[34].mxu0 }
 0x222   :  { %v1090_v59 = vpop.f32.mrb[35].mxu0 }
 0x223   :  { %v1110_v15 = vadd.f32 %v1090_v59, %v852_v11 }
 0x237   :  { %v12271_v49 = vpop.f32.mrb[36].mxu0 }
 0x238   :  { %v1224_v21 = vadd.f32 %v12271_v49, %v1111_v19  ;;  %v1200_v2 = vpop.f32.mrb[37].mxu0 }
 0x239   :  { %v1222_v6 = vadd.f32 %v1200_v2, %v1109_v52  ;;  %v12272_v10 = vpop.f32.mrb[38].mxu0 }
 0x23a   :  { %v1203_v56 = vpop.f32.mrb[39].mxu0 }
 0x23b   :  { %v1223_v4 = vadd.f32 %v1203_v56, %v1110_v15 }
 0x24f   :  { %v12309_v5 = vpop.f32.mrb[40].mxu0 }
 0x250   :  { %v1482_v9 = vadd.f32 %v12309_v5, %v1224_v21  ;;  %v1458_v7 = vpop.f32.mrb[41].mxu0 }
 0x251   :  { %v1480_v18 = vadd.f32 %v1458_v7, %v1222_v6  ;;  %v12310_v17 = vpop.f32.mrb[42].mxu0 }
 0x252   :  { %v1461_v23 = vpop.f32.mrb[43].mxu0 }
 0x253   :  { %v1481_v53 = vadd.f32 %v1461_v23, %v1223_v4 }
 0x267   :  { %v12347_v54 = vpop.f32.mrb[44].mxu0 }
 0x268   :  { %v1716_v60 = vpop.f32.mrb[45].mxu0  ;;  %v1740_v51 = vadd.f32 %v12347_v54, %v1482_v9 }
 0x269   :  { %v12348_v50 = vpop.f32.mrb[46].mxu0  ;;  %v1738_v61 = vadd.f32 %v1716_v60, %v1480_v18 }
 0x26a   :  { %v1719_v58 = vpop.f32.mrb[47].mxu0 }
 0x26b   :  { %v1739_v62 = vadd.f32 %v1719_v58, %v1481_v53 }
 0x27f   :  { %v12385_v63 = vpop.f32.mrb[48].mxu0 }
 0x280   :  { %v1974_v8 = vpop.f32.mrb[49].mxu0  ;;  %v1998_v3 = vadd.f32 %v12385_v63, %v1740_v51 }
 0x281   :  { %v12386_v14 = vpop.f32.mrb[50].mxu0  ;;  %v1996_v40 = vadd.f32 %v1974_v8, %v1738_v61 }
 0x282   :  { %v1977_v12 = vpop.f32.mrb[51].mxu0 }
 0x283   :  { %v1997_v57 = vadd.f32 %v1977_v12, %v1739_v62 }
 0x287   :  { %v12415_v16 = vpop.f32.mrb[12].mxu0 }
 0x288   :  { %v2200_v11 = vpop.f32.mrb[13].mxu0  ;;  %v15141_v55 = vadd.f32 %v12415_v16, %v10569_v0 }
 0x289   :  { %v15137_v13 = vadd.f32 %v10569_v0, %v2200_v11  ;;  %v12416_v19 = vpop.f32.mrb[14].mxu0 }
 0x28a   :  { %v15139_v1 = vadd.f32 %v12416_v19, %v10569_v0  ;;  %v2203_v52 = vpop.f32.mrb[15].mxu0  ;;  %v18537_v2 = vmax.f32 %v15141_v55, 0.0 }
 0x28b   :  { %v15143_v59 = vadd.f32 %v10569_v0, %v2203_v52  ;;  %v18539_v15 = vmax.f32 %v15137_v13, 0.0 }
 0x28c   :  { %v18538_v49 = vmax.f32 %v15139_v1, 0.0 }
 0x28d   :  { %v18536_v21 = vmax.f32 %v15143_v59, 0.0 }
 0x28e   :  { %v15159_v4 = vpack.c.bf16 %v18538_v49, %v18537_v2  ;;  %v14325_v49 = vld [vmem:[%s18518_s5 + $0x8] sm:$0xff]  }
 0x28f   :  { %v15153_v6 = vpack.c.bf16 %v18536_v21, %v18539_v15  ;;  %v12419_v10 = vpop.f32.mrb[16].mxu0 }
 0x290   :  { %v2216_v56 = vpop.f32.mrb[17].mxu0  ;;  %v15169_v17 = vadd.f32 %v12419_v10, %v10569_v0 }
 0x291   :  { %v15161_v5 = vadd.f32 %v10569_v0, %v2216_v56  ;;  %v12420_v9 = vpop.f32.mrb[18].mxu0  ;;  %12425 = vmatprep.subr.bf16.mxu1 %v15153_v6  ;;  %12505 = vmatprep.subr.bf16.mxu0 %v15153_v6 }
 0x292   :  { %v15165_v7 = vadd.f32 %v12420_v9, %v10569_v0  ;;  %v2219_v18 = vpop.f32.mrb[19].mxu0  ;;  %12426 = vmatpush3.bf16.msra.mxu1 %v15153_v6  ;;  %12506 = vmatpush3.bf16.msra.mxu0 %v15153_v6  ;;  %v18533_v51 = vmax.f32 %v15169_v17, 0.0  ;;  %v14398_v9 = vld [vmem:[%s18515_s1 + $0x8] sm:$0xff]  }
 0x293   :  { %v15171_v23 = vadd.f32 %v10569_v0, %v2219_v18  ;;  %12427 = vmatprep.subr.bf16.mxu1 %v15159_v4  ;;  %12507 = vmatprep.subr.bf16.mxu0 %v15159_v4  ;;  %v18535_v53 = vmax.f32 %v15161_v5, 0.0  ;;  %v14399_v18 = vld [vmem:[%s18515_s1 + $0x10] sm:$0xff]  }
 0x294   :  { %v18534_v54 = vmax.f32 %v15165_v7, 0.0 }
 0x295   :  { %v18532_v60 = vmax.f32 %v15171_v23, 0.0 }
 0x296   :  { %12428 = vmatpush3.bf16.msra.mxu1 %v15159_v4  ;;  %12508 = vmatpush3.bf16.msra.mxu0 %v15159_v4  ;;  %v15191_v63 = vpack.c.bf16 %v18534_v54, %v18533_v51 }
 0x297   :  { %v15185_v50 = vpack.c.bf16 %v18532_v60, %v18535_v53  ;;  %v12423_v61 = vpop.f32.mrb[52].mxu0 }
 0x298   :  { %v2256_v58 = vadd.f32 %v12423_v61, %v1998_v3  ;;  %v2232_v62 = vpop.f32.mrb[53].mxu0  ;;  %v14407_v61 = vld [vmem:[%s18515_s1 + $0x4c] sm:$0xff]  }
 0x299   :  { %v2254_v8 = vadd.f32 %v2232_v62, %v1996_v40  ;;  %v12424_v14 = vpop.f32.mrb[54].mxu0  ;;  %12429 = vmatprep.subr.bf16.mxu1 %v15185_v50  ;;  %12509 = vmatprep.subr.bf16.mxu0 %v15185_v50 }
 0x29a   :  { %v2235_v12 = vpop.f32.mrb[55].mxu0  ;;  %12430 = vmatpush3.bf16.msra.mxu1 %v15185_v50  ;;  %12510 = vmatpush3.bf16.msra.mxu0 %v15185_v50  ;;  %v2274_v16 = vadd.f32 %v10569_v0, %v2256_v58 }
 0x29b   :  { %v15197_v3 = vadd.f32 %v10569_v0, %v2254_v8  ;;  %v2255_v11 = vadd.f32 %v2235_v12, %v1997_v57  ;;  %12431 = vmatprep.subr.bf16.mxu1 %v15191_v63  ;;  %12511 = vmatprep.subr.bf16.mxu0 %v15191_v63 }
 0x29c   :  { %v15205_v40 = vmax.f32 %v2274_v16, 0.0 }
 0x29d   :  { %v15201_v19 = vadd.f32 %v10569_v0, %v2255_v11  ;;  %v18531_v52 = vmax.f32 %v15197_v3, 0.0 }
 0x29e   :  { %12432 = vmatpush3.bf16.msra.mxu1 %v15191_v63  ;;  %12512 = vmatpush3.bf16.msra.mxu0 %v15191_v63  ;;  %v15217_v0 = vpack.c.bf16 %v15205_v40, %v15205_v40 }
 0x29f   :  { %v18530_v10 = vmax.f32 %v15201_v19, 0.0 }
 0x2a0   :  { %v15229_v56 = vsel %vm155_vm1, %v15217_v0, 0 }
 0x2a1   :  { %v15213_v57 = vpack.c.bf16 %v18530_v10, %v18531_v52 }
 0x2a3   :  { %12433 = vmatprep.subr.bf16.mxu1 %v15213_v57  ;;  %12513 = vmatprep.subr.bf16.mxu0 %v15213_v57 }
 0x2a4   :  { %12434 = vmatpush3.bf16.msra.mxu1 %v15213_v57  ;;  %12514 = vmatpush3.bf16.msra.mxu0 %v15213_v57 }
 0x2a5   :  { %14214 = vmatprep.subr.msk.bf16.mxu1 %vm155_vm1, %v15217_v0  ;;  %14216 = vmatprep.subr.msk.bf16.mxu0 %vm155_vm1, %v15217_v0 }
 0x2a8   :  { %12436 = vmatpush3.bf16.msra.mxu1 %v15229_v56  ;;  %12516 = vmatpush3.bf16.msra.mxu0 %v15229_v56 }
 0x2a9   :  { %12449 = vmatprep.subr.bf16.mxu1 %v15153_v6  ;;  %12545 = vmatprep.subr.bf16.mxu0 %v15153_v6 }
 0x2ab   :  { %12438 = vmatmul.mubr.msk.bf16.vlgmr.msra.gmra.mrb[84].mxu1 %vm136_vm0, %v14398_v9  ;;  %12518 = vmatmul.mubr.msk.bf16.vlgmr.msra.gmra.mrb[56].mxu0 %vm136_vm0, %v14734_v20  ;;  %v14400_v20 = vld [vmem:[%s18515_s1 + $0x18] sm:$0xff]  }
 0x2ac   :  { %12450 = vmatpush3.bf16.msra.mxu1 %v15153_v6  ;;  %12546 = vmatpush3.bf16.msra.mxu0 %v15153_v6 }
 0x2ad   :  { %12451 = vmatprep.subr.bf16.mxu1 %v15159_v4  ;;  %12547 = vmatprep.subr.bf16.mxu0 %v15159_v4 }
 0x2ae   :  { %12441 = vmatprep.mubr.msk.bf16.mxu1 %vm136_vm0, %v14399_v18  ;;  %12521 = vmatprep.mubr.msk.bf16.mxu0 %vm136_vm0, %v14743_v22  ;;  %v14401_v22 = vld [vmem:[%s18515_s1 + $0x20] sm:$0xff]  }
 0x2b0   :  { %12452 = vmatpush3.bf16.msra.mxu1 %v15159_v4  ;;  %12548 = vmatpush3.bf16.msra.mxu0 %v15159_v4 }
 0x2b1   :  { %12453 = vmatprep.subr.bf16.mxu1 %v15185_v50  ;;  %12549 = vmatprep.subr.bf16.mxu0 %v15185_v50 }
 0x2b3   :  { %12442 = vmatmul.mubr.msk.bf16.gmra.mrb[88].mxu1 %vm136_vm0, %v14400_v20  ;;  %12522 = vmatmul.mubr.msk.bf16.gmra.mrb[60].mxu0 %vm136_vm0, %v14757_v24  ;;  %v14402_v24 = vld [vmem:[%s18515_s1 + $0x28] ss:$0 sps:$4 sm:$0x33]  }
 0x2b4   :  { %12454 = vmatpush3.bf16.msra.mxu1 %v15185_v50  ;;  %12550 = vmatpush3.bf16.msra.mxu0 %v15185_v50 }
 0x2b5   :  { %12455 = vmatprep.subr.bf16.mxu1 %v15191_v63  ;;  %12551 = vmatprep.subr.bf16.mxu0 %v15191_v63 }
 0x2b6   :  { %12445 = vmatprep.mubr.msk.bf16.mxu1 %vm136_vm0, %v14401_v22  ;;  %12525 = vmatprep.mubr.msk.bf16.mxu0 %vm136_vm0, %v14763_v25  ;;  %v14403_v25 = vld [vmem:[%s18515_s1 + $0x2c] sm:$0xff]  }
 0x2b8   :  { %12456 = vmatpush3.bf16.msra.mxu1 %v15191_v63  ;;  %12552 = vmatpush3.bf16.msra.mxu0 %v15191_v63 }
 0x2b9   :  { %12457 = vmatprep.subr.bf16.mxu1 %v15213_v57  ;;  %12553 = vmatprep.subr.bf16.mxu0 %v15213_v57 }
 0x2bb   :  { %12446 = vmatmul.mubr.msk.bf16.gmra.mrb[92].mxu1 %vm136_vm0, %v14402_v24  ;;  %12526 = vmatmul.mubr.msk.bf16.gmra.mrb[64].mxu0 %vm136_vm0, %v14775_v26  ;;  %v14404_v26 = vld [vmem:[%s18515_s1 + $0x34] sm:$0xff]  }
 0x2bc   :  { %12458 = vmatpush3.bf16.msra.mxu1 %v15213_v57  ;;  %12554 = vmatpush3.bf16.msra.mxu0 %v15213_v57 }
 0x2bd   :  { %14215 = vmatprep.subr.msk.bf16.mxu1 %vm155_vm1, %v15217_v0  ;;  %14217 = vmatprep.subr.msk.bf16.mxu0 %vm155_vm1, %v15217_v0 }
 0x2be   :  { %12461 = vmatprep.mubr.msk.bf16.mxu1 %vm136_vm0, %v14403_v25  ;;  %12557 = vmatprep.mubr.msk.bf16.mxu0 %vm136_vm0, %v14781_v27  ;;  %v14405_v27 = vld [vmem:[%s18515_s1 + $0x3c] sm:$0xff]  }
 0x2c0   :  { %12460 = vmatpush3.bf16.msra.mxu1 %v15229_v56  ;;  %12556 = vmatpush3.bf16.msra.mxu0 %v15229_v56 }
 0x2c1   :  { %12601 = vmatprep.subr.bf16.mxu0 %v15153_v6 }
 0x2c3   :  { %12462 = vmatmul.mubr.msk.bf16.vlgmr.msra.gmra.mrb[96].mxu1 %vm136_vm0, %v14404_v26  ;;  %12558 = vmatmul.mubr.msk.bf16.vlgmr.msra.gmra.mrb[68].mxu0 %vm136_vm0, %v14794_v28  ;;  %v14406_v28 = vld [vmem:[%s18515_s1 + $0x44] sm:$0xff]  }
 0x2c4   :  { %12602 = vmatpush3.bf16.msra.mxu0 %v15153_v6  ;;  %12465 = vmatprep.mubr.msk.bf16.mxu1 %vm136_vm0, %v14405_v27 }
 0x2c5   :  { %12603 = vmatprep.subr.bf16.mxu0 %v15159_v4  ;;  %12561 = vmatprep.mubr.msk.bf16.mxu0 %vm136_vm0, %v14800_v29  ;;  %v14408_v29 = vld [vmem:[%s18515_s1 + $0x54] ss:$0 sps:$4 sm:$0x33]  }
 0x2c8   :  { %12604 = vmatpush3.bf16.msra.mxu0 %v15159_v4 }
 0x2c9   :  { %12605 = vmatprep.subr.bf16.mxu0 %v15185_v50 }
 0x2cb   :  { %12466 = vmatmul.mubr.msk.bf16.gmra.mrb[100].mxu1 %vm136_vm0, %v14406_v28  ;;  %12562 = vmatmul.mubr.msk.bf16.gmra.mrb[72].mxu0 %vm136_vm0, %v14812_v30  ;;  %v14322_v30 = vld [vmem:[%s18518_s5 + $0x10] sm:$0xff]  }
 0x2cc   :  { %12606 = vmatpush3.bf16.msra.mxu0 %v15185_v50  ;;  %12469 = vmatprep.mubr.msk.bf16.mxu1 %vm136_vm0, %v14407_v61 }
 0x2cd   :  { %12607 = vmatprep.subr.bf16.mxu0 %v15191_v63  ;;  %12565 = vmatprep.mubr.msk.bf16.mxu0 %vm136_vm0, %v14817_v31  ;;  %v14323_v31 = vld [vmem:[%s18518_s5 + $0x18] sm:$0xff]  }
 0x2ce   :  { %12473 = vmatprep.subr.bf16.mxu1 %v14322_v30 }
 0x2cf   :  { %12474 = vmatpush3.bf16.msra.mxu1 %v14322_v30 }
 0x2d0   :  { %12608 = vmatpush3.bf16.msra.mxu0 %v15191_v63  ;;  %12475 = vmatprep.subr.bf16.mxu1 %v14323_v31 }
 0x2d1   :  { %12609 = vmatprep.subr.bf16.mxu0 %v15213_v57 }
 0x2d3   :  { %12470 = vmatmul.mubr.msk.bf16.gmra.mrb[104].mxu1 %vm136_vm0, %v14408_v29  ;;  %12566 = vmatmul.mubr.msk.bf16.gmra.mrb[76].mxu0 %vm136_vm0, %v14830_v32  ;;  %v14409_v32 = vld [vmem:[%s18515_s1 + $0x14c] sm:$0xff]  }
 0x2d4   :  { %12610 = vmatpush3.bf16.msra.mxu0 %v15213_v57  ;;  %12613 = vmatprep.mubr.msk.bf16.mxu0 %vm136_vm0, %v14836_v33  ;;  %v14410_v33 = vld [vmem:[%s18515_s1 + $0x154] sm:$0xff]  }
 0x2d5   :  { %14218 = vmatprep.subr.msk.bf16.mxu0 %vm155_vm1, %v15217_v0  ;;  %12476 = vmatpush3.bf16.msra.mxu1 %v14323_v31 }
 0x2d8   :  { %12612 = vmatpush3.bf16.msra.mxu0 %v15229_v56 }
 0x2d9   :  { %12641 = vmatprep.subr.bf16.mxu0 %v15153_v6 }
 0x2db   :  { %12614 = vmatmul.mubr.msk.bf16.vlgmr.msra.gmra.mrb[80].mxu0 %vm136_vm0, %v14849_v34  ;;  %v14411_v34 = vld [vmem:[%s18515_s1 + $0x15c] ss:$0 sps:$4 sm:$0x33]  }
 0x2dc   :  { %12642 = vmatpush3.bf16.msra.mxu0 %v15153_v6  ;;  %12617 = vmatprep.mubr.msk.bf16.mxu0 %vm136_vm0, %v14855_v35  ;;  %v14412_v35 = vld [vmem:[%s18515_s1 + $0x160] sm:$0xff]  }
 0x2dd   :  { %12643 = vmatprep.subr.bf16.mxu0 %v15159_v4 }
 0x2e0   :  { %12644 = vmatpush3.bf16.msra.mxu0 %v15159_v4 }
 0x2e1   :  { %12645 = vmatprep.subr.bf16.mxu0 %v15185_v50 }
 0x2e3   :  { %12618 = vmatmul.mubr.msk.bf16.gmra.mrb[84].mxu0 %vm136_vm0, %v14867_v36  ;;  %v15431_v36 = vld [vmem:[%s18518_s5] sm:$0xff]  }
 0x2e4   :  { %12646 = vmatpush3.bf16.msra.mxu0 %v15185_v50  ;;  %12621 = vmatprep.mubr.msk.bf16.mxu0 %vm136_vm0, %v14873_v37  ;;  %v14413_v37 = vld [vmem:[%s18515_s1 + $0x168] sm:$0xff]  }
 0x2e5   :  { %12647 = vmatprep.subr.bf16.mxu0 %v15191_v63  ;;  %12489 = vmatprep.subr.bf16.mxu1 %v15431_v36 }
 0x2e8   :  { %12648 = vmatpush3.bf16.msra.mxu0 %v15191_v63 }
 0x2e9   :  { %12649 = vmatprep.subr.bf16.mxu0 %v15213_v57 }
 0x2eb   :  { %12622 = vmatmul.mubr.msk.bf16.gmra.mrb[88].mxu0 %vm136_vm0, %v14885_v38  ;;  %v14414_v38 = vld [vmem:[%s18515_s1 + $0x170] sm:$0xff]  }
 0x2ec   :  { %12650 = vmatpush3.bf16.msra.mxu0 %v15213_v57  ;;  %12653 = vmatprep.mubr.msk.bf16.mxu0 %vm136_vm0, %v14891_v39  ;;  %v14415_v39 = vld [vmem:[%s18515_s1 + $0x178] sm:$0xff]  }
 0x2ed   :  { %14219 = vmatprep.subr.msk.bf16.mxu0 %vm155_vm1, %v15217_v0 }
 0x2f0   :  { %12652 = vmatpush3.bf16.msra.mxu0 %v15229_v56 }
 0x2f1   :  { %12681 = vmatprep.subr.bf16.mxu0 %v15153_v6 }
 0x2f3   :  { %12654 = vmatmul.mubr.msk.bf16.vlgmr.msra.gmra.mrb[92].mxu0 %vm136_vm0, %v14909_v41  ;;  %v14416_v41 = vld [vmem:[%s18515_s1 + $0x180] sm:$0xff]  }
 0x2f4   :  { %12682 = vmatpush3.bf16.msra.mxu0 %v15153_v6  ;;  %12657 = vmatprep.mubr.msk.bf16.mxu0 %vm136_vm0, %v14917_v42  ;;  %v14417_v42 = vld [vmem:[%s18515_s1 + $0x188] ss:$0 sps:$4 sm:$0x33]  }
 0x2f5   :  { %12683 = vmatprep.subr.bf16.mxu0 %v15159_v4 }
 0x2f8   :  { %12684 = vmatpush3.bf16.msra.mxu0 %v15159_v4 }
 0x2f9   :  { %12685 = vmatprep.subr.bf16.mxu0 %v15185_v50 }
 0x2fb   :  { %12658 = vmatmul.mubr.msk.bf16.gmra.mrb[96].mxu0 %vm136_vm0, %v14929_v43  ;;  %v14418_v43 = vld [vmem:[%s18515_s1] sm:$0xff]  }
 0x2fc   :  { %12686 = vmatpush3.bf16.msra.mxu0 %v15185_v50  ;;  %12661 = vmatprep.mubr.msk.bf16.mxu0 %vm136_vm0, %v14935_v44 }
 0x2fd   :  { %12687 = vmatprep.subr.bf16.mxu0 %v15191_v63 }
 0x300   :  { %12688 = vmatpush3.bf16.msra.mxu0 %v15191_v63 }
 0x301   :  { %12689 = vmatprep.subr.bf16.mxu0 %v15213_v57 }
 0x303   :  { %12662 = vmatmul.mubr.msk.bf16.gmra.mrb[100].mxu0 %vm136_vm0, %v14947_v45 }
 0x304   :  { %12690 = vmatpush3.bf16.msra.mxu0 %v15213_v57  ;;  %12693 = vmatprep.mubr.msk.bf16.mxu0 %vm136_vm0, %v14953_v46 }
 0x305   :  { %14220 = vmatprep.subr.msk.bf16.mxu0 %vm155_vm1, %v15217_v0 }
 0x308   :  { %12692 = vmatpush3.bf16.msra.mxu0 %v15229_v56 }
 0x309   :  { %12721 = vmatprep.subr.bf16.mxu0 %v15153_v6 }
 0x30b   :  { %12694 = vmatmul.mubr.msk.bf16.vlgmr.msra.gmra.mrb[104].mxu0 %vm136_vm0, %v14966_v47 }
 0x30c   :  { %12722 = vmatpush3.bf16.msra.mxu0 %v15153_v6  ;;  %12697 = vmatprep.mubr.msk.bf16.mxu0 %vm136_vm0, %v14972_v48 }
 0x30d   :  { %12723 = vmatprep.subr.bf16.mxu0 %v15159_v4 }
 0x310   :  { %12724 = vmatpush3.bf16.msra.mxu0 %v15159_v4 }
 0x311   :  { %12725 = vmatprep.subr.bf16.mxu0 %v15185_v50 }
 0x313   :  { %12698 = vmatmul.mubr.msk.bf16.gmra.mrb[108].mxu0 %vm136_vm0, %v14409_v32 }
 0x314   :  { %12726 = vmatpush3.bf16.msra.mxu0 %v15185_v50  ;;  %12701 = vmatprep.mubr.msk.bf16.mxu0 %vm136_vm0, %v14410_v33 }
 0x315   :  { %12727 = vmatprep.subr.bf16.mxu0 %v15191_v63 }
 0x318   :  { %12728 = vmatpush3.bf16.msra.mxu0 %v15191_v63 }
 0x319   :  { %12729 = vmatprep.subr.bf16.mxu0 %v15213_v57 }
 0x31b   :  { %12702 = vmatmul.mubr.msk.bf16.gmra.mrb[112].mxu0 %vm136_vm0, %v14411_v34 }
 0x31c   :  { %12730 = vmatpush3.bf16.msra.mxu0 %v15213_v57  ;;  %12733 = vmatprep.mubr.msk.bf16.mxu0 %vm136_vm0, %v14412_v35 }
 0x31d   :  { %14221 = vmatprep.subr.msk.bf16.mxu0 %vm155_vm1, %v15217_v0 }
 0x320   :  { %12732 = vmatpush3.bf16.msra.mxu0 %v15229_v56 }
 0x323   :  { %12734 = vmatmul.mubr.msk.bf16.vlgmr.msra.gmra.mrb[116].mxu0 %vm136_vm0, %v14413_v37 }
 0x324   :  { %12737 = vmatprep.mubr.msk.bf16.mxu0 %vm136_vm0, %v14414_v38 }
 0x32b   :  { %12738 = vmatmul.mubr.msk.bf16.gmra.mrb[120].mxu0 %vm136_vm0, %v14415_v39 }
 0x32c   :  { %12741 = vmatprep.mubr.msk.bf16.mxu0 %vm136_vm0, %v14416_v41 }
 0x333   :  { %12742 = vmatmul.mubr.msk.bf16.gmra.mrb[124].mxu0 %vm136_vm0, %v14417_v42 }
 0x334   :  { %12773 = vmatprep.mubr.msk.bf16.mxu0 %vm136_vm0, %v14418_v43 }
 0x37e   :  { %v15459_v44 = vpop.f32.mrb[84].mxu1  ;;  %v15461_v45 = vpop.f32.mrb[56].mxu0 }
 0x37f   :  { %v15463_v46 = vpop.f32.mrb[85].mxu1  ;;  %v15465_v47 = vpop.f32.mrb[57].mxu0 }
 0x380   :  { %v15467_v48 = vpop.f32.mrb[86].mxu1  ;;  %v15469_v58 = vpop.f32.mrb[58].mxu0 }
 0x381   :  { %v2376_v62 = vpack.c.bf16 %v15467_v48, %v15459_v44  ;;  %v15473_v8 = vpop.f32.mrb[87].mxu1  ;;  %v15477_v12 = vpop.f32.mrb[59].mxu0 }
 0x382   :  { %v2375_v16 = vpack.c.bf16 %v15473_v8, %v15463_v46  ;;  %v14327_v46 = vld [vmem:[%s18518_s5 + $0x28] sm:$0xff]  }
 0x386   :  { %v15483_v56 = vpop.f32.mrb[88].mxu1  ;;  %v15485_v9 = vpop.f32.mrb[60].mxu0 }
 0x387   :  { %v15487_v18 = vpop.f32.mrb[89].mxu1  ;;  %v15489_v20 = vpop.f32.mrb[61].mxu0 }
 0x388   :  { %v15491_v22 = vpop.f32.mrb[90].mxu1  ;;  %v15493_v24 = vpop.f32.mrb[62].mxu0 }
 0x389   :  { %v15497_v26 = vpop.f32.mrb[91].mxu1  ;;  %v15501_v28 = vpop.f32.mrb[63].mxu0 }
 0x38a   :  { %v18597_v8 = vpack.c.bf16 %v15497_v26, %v15487_v18  ;;  %v18598_v18 = vpack.c.bf16 %v15491_v22, %v15483_v56  ;;  %v18600_v22 = vpack.c.bf16 %v15477_v12, %v15465_v47  ;;  %v14329_v47 = vld [vmem:[%s18518_s5 + $0x38] sm:$0xff]   ;;  %v18601_v12 = vpack.c.bf16 %v15469_v58, %v15461_v45 }
 0x38e   :  { %v15507_v30 = vpop.f32.mrb[92].mxu1  ;;  %v15509_v31 = vpop.f32.mrb[64].mxu0 }
 0x38f   :  { %v15511_v32 = vpop.f32.mrb[93].mxu1  ;;  %v15513_v33 = vpop.f32.mrb[65].mxu0  ;;  %v2380_v56 = vpack.c.bf16 %v15507_v30, %v15507_v30 }
 0x390   :  { %v12448_v34 = vpop.f32.mrb[94].mxu1  ;;  %v12528_v35 = vpop.f32.mrb[66].mxu0 }
 0x391   :  { %v15515_v37 = vpop.f32.mrb[95].mxu1  ;;  %v15517_v38 = vpop.f32.mrb[67].mxu0 }
 0x392   :  { %v18599_v26 = vpack.c.bf16 %v15515_v37, %v15511_v32 }
 0x396   :  { %v12463_v42 = vpop.f32.mrb[96].mxu1  ;;  %v15523_v43 = vpop.f32.mrb[68].mxu0 }
 0x397   :  { %v2419_v10 = vpop.f32.mrb[97].mxu1  ;;  %v15525_v52 = vpop.f32.mrb[69].mxu0 }
 0x398   :  { %v12464_v60 = vpop.f32.mrb[98].mxu1  ;;  %v15527_v51 = vpop.f32.mrb[70].mxu0 }
 0x399   :  { %v2466_v34 = vpack.c.bf16 %v12464_v60, %v12463_v42  ;;  %v2422_v35 = vpop.f32.mrb[99].mxu1  ;;  %v15531_v53 = vpop.f32.mrb[71].mxu0 }
 0x39a   :  { %v2465_v21 = vpack.c.bf16 %v2422_v35, %v2419_v10  ;;  %v14326_v10 = vld [vmem:[%s18518_s5 + $0x20] sm:$0xff]  }
 0x39c   :  { %12477 = vmatprep.mubr.msk.bf16.mxu1 %vm2488_vm4, %v2465_v21 }
 0x39d   :  { %12478 = vmatmul.mubr.msk.bf16.vlgmr.msra.gmra.mrb[108].mxu1 %vm2488_vm4, %v2466_v34 }
 0x39e   :  { %v12467_v60 = vpop.f32.mrb[100].mxu1  ;;  %12490 = vmatpush3.bf16.msra.mxu1 %v15431_v36  ;;  %v15541_v42 = vpop.f32.mrb[72].mxu0 }
 0x39f   :  { %v2435_v15 = vpop.f32.mrb[101].mxu1  ;;  %12491 = vmatprep.subr.bf16.mxu1 %v14325_v49  ;;  %v15546_v35 = vpop.f32.mrb[73].mxu0 }
 0x3a0   :  { %v12468_v54 = vpop.f32.mrb[102].mxu1  ;;  %v15548_v2 = vpop.f32.mrb[74].mxu0 }
 0x3a1   :  { %v2468_v41 = vpack.c.bf16 %v12468_v54, %v12467_v60  ;;  %v2438_v21 = vpop.f32.mrb[103].mxu1  ;;  %v15552_v27 = vpop.f32.mrb[75].mxu0 }
 0x3a2   :  { %v2467_v36 = vpack.c.bf16 %v2438_v21, %v2435_v15  ;;  %12492 = vmatpush3.bf16.msra.mxu1 %v14325_v49  ;;  %v2991_v29 = vpack.c.bf16 %v15552_v27, %v15546_v35 }
 0x3a3   :  { %12529 = vmatprep.subr.bf16.mxu1 %v14326_v10 }
 0x3a4   :  { %12481 = vmatprep.mubr.msk.bf16.mxu1 %vm2488_vm4, %v2467_v36 }
 0x3a5   :  { %12482 = vmatmul.mubr.msk.bf16.gmra.mrb[112].mxu1 %vm2488_vm4, %v2468_v41 }
 0x3a6   :  { %v12471_v14 = vpop.f32.mrb[104].mxu1  ;;  %v15558_v11 = vpop.f32.mrb[76].mxu0 }
 0x3a7   :  { %v2451_v54 = vpop.f32.mrb[105].mxu1  ;;  %v15560_v60 = vpop.f32.mrb[77].mxu0  ;;  %v2470_v21 = vpack.c.bf16 %v12471_v14, %v12471_v14 }
 0x3a8   :  { %v12472_v39 = vpop.f32.mrb[106].mxu1  ;;  %v12568_v34 = vpop.f32.mrb[78].mxu0 }
 0x3a9   :  { %v2454_v25 = vpop.f32.mrb[107].mxu1  ;;  %v15562_v61 = vpop.f32.mrb[79].mxu0 }
 0x3aa   :  { %v2469_v15 = vpack.c.bf16 %v2454_v25, %v2451_v54  ;;  %v2993_v49 = vpack.c.bf16 %v15562_v61, %v15560_v60  ;;  %v14328_v54 = vld [vmem:[%s18518_s5 + $0x30] sm:$0xff]  }
 0x3ac   :  { %12485 = vmatprep.mubr.msk.bf16.mxu1 %vm2488_vm4, %v2469_v15 }
 0x3ad   :  { %12486 = vmatmul.mubr.msk.bf16.gmra.mrb[116].mxu1 %vm2488_vm4, %v2470_v21 }
 0x3ae   :  { %12493 = vmatprep.mubr.msk.bf16.mxu1 %vm2488_vm4, %v2375_v16  ;;  %v15572_v41 = vpop.f32.mrb[80].mxu0 }
 0x3af   :  { %v15574_v39 = vpop.f32.mrb[81].mxu0 }
 0x3b0   :  { %v15576_v34 = vpop.f32.mrb[82].mxu0 }
 0x3b1   :  { %v15580_v36 = vpop.f32.mrb[83].mxu0 }
 0x3b2   :  { %v3326_v14 = vpack.c.bf16 %v15580_v36, %v15574_v39 }
 0x3b5   :  { %12494 = vmatmul.mubr.msk.bf16.vlgmr.msra.gmra.mrb[108].mxu1 %vm2488_vm4, %v2376_v62 }
 0x3b6   :  { %12497 = vmatprep.mubr.msk.bf16.mxu1 %vm2488_vm4, %v18597_v8  ;;  %12530 = vmatpush3.bf16.msra.mxu1 %v14326_v10  ;;  %v15595_v16 = vpop.f32.mrb[84].mxu0 }
 0x3b7   :  { %12531 = vmatprep.subr.bf16.mxu1 %v14327_v46  ;;  %v15600_v15 = vpop.f32.mrb[85].mxu0 }
 0x3b8   :  { %v15602_v21 = vpop.f32.mrb[86].mxu0 }
 0x3b9   :  { %v15606_v48 = vpop.f32.mrb[87].mxu0  ;;  %v18610_v39 = vpack.c.bf16 %v15602_v21, %v15595_v16  ;;  %v14338_v21 = vld [vmem:[%s18518_s5 + $0x80] sm:$0xff]  }
 0x3ba   :  { %12532 = vmatpush3.bf16.msra.mxu1 %v14327_v46 }
 0x3bb   :  { %12569 = vmatprep.subr.bf16.mxu1 %v14328_v54 }
 0x3bd   :  { %12498 = vmatmul.mubr.msk.bf16.gmra.mrb[112].mxu1 %vm2488_vm4, %v18598_v18  ;;  %v14330_v18 = vld [vmem:[%s18518_s5 + $0x40] sm:$0xff]  }
 0x3be   :  { %12501 = vmatprep.mubr.msk.bf16.mxu1 %vm2488_vm4, %v18599_v26  ;;  %v15618_v10 = vpop.f32.mrb[88].mxu0 }
 0x3bf   :  { %v15620_v8 = vpop.f32.mrb[89].mxu0 }
 0x3c0   :  { %v12624_v44 = vpop.f32.mrb[90].mxu0 }
 0x3c1   :  { %v15622_v46 = vpop.f32.mrb[91].mxu0 }
 0x3c5   :  { %12502 = vmatmul.mubr.msk.bf16.gmra.mrb[120].mxu1 %vm2488_vm4, %v2380_v56  ;;  %v18602_v56 = vpack.c.bf16 %v15501_v28, %v15489_v20  ;;  %v18603_v28 = vpack.c.bf16 %v15493_v24, %v15485_v9  ;;  %v2782_v9 = vpack.c.bf16 %v15509_v31, %v15509_v31  ;;  %v18605_v24 = vpack.c.bf16 %v15531_v53, %v15525_v52  ;;  %v14331_v53 = vld [vmem:[%s18518_s5 + $0x48] sm:$0xff]  }
 0x3c6   :  { %12533 = vmatprep.mubr.msk.bf16.mxu1 %vm2488_vm4, %v18600_v22  ;;  %v15633_v32 = vpop.f32.mrb[92].mxu0  ;;  %v18606_v52 = vpack.c.bf16 %v15527_v51, %v15523_v43 }
 0x3c7   :  { %v15635_v37 = vpop.f32.mrb[93].mxu0 }
 0x3c8   :  { %v15637_v44 = vpop.f32.mrb[94].mxu0 }
 0x3c9   :  { %v15641_v26 = vpop.f32.mrb[95].mxu0  ;;  %v18613_v16 = vpack.c.bf16 %v15637_v44, %v15633_v32 }
 0x3ca   :  { %v18612_v36 = vpack.c.bf16 %v15641_v26, %v15635_v37 }
 0x3cd   :  { %12534 = vmatmul.mubr.msk.bf16.vlgmr.msra.gmra.mrb[108].mxu1 %vm2488_vm4, %v18601_v12 }
 0x3ce   :  { %12570 = vmatpush3.bf16.msra.mxu1 %v14328_v54  ;;  %12537 = vmatprep.mubr.msk.bf16.mxu1 %vm2488_vm4, %v18602_v56  ;;  %v15656_v22 = vpop.f32.mrb[96].mxu0  ;;  %v18604_v54 = vpack.c.bf16 %v15517_v38, %v15513_v33 }
 0x3cf   :  { %12571 = vmatprep.subr.bf16.mxu1 %v14329_v47  ;;  %v15661_v30 = vpop.f32.mrb[97].mxu0 }
 0x3d0   :  { %v15663_v62 = vpop.f32.mrb[98].mxu0 }
 0x3d1   :  { %v15667_v58 = vpop.f32.mrb[99].mxu0 }
 0x3d2   :  { %12572 = vmatpush3.bf16.msra.mxu1 %v14329_v47 }
 0x3d3   :  { %12585 = vmatprep.subr.bf16.mxu1 %v14330_v18 }
 0x3d5   :  { %12538 = vmatmul.mubr.msk.bf16.gmra.mrb[112].mxu1 %vm2488_vm4, %v18603_v28 }
 0x3d6   :  { %12541 = vmatprep.mubr.msk.bf16.mxu1 %vm2488_vm4, %v18604_v54  ;;  %v15679_v12 = vpop.f32.mrb[100].mxu0 }
 0x3d7   :  { %v15681_v56 = vpop.f32.mrb[101].mxu0 }
 0x3d8   :  { %v12664_v45 = vpop.f32.mrb[102].mxu0 }
 0x3d9   :  { %v15683_v47 = vpop.f32.mrb[103].mxu0 }
 0x3dd   :  { %12542 = vmatmul.mubr.msk.bf16.gmra.mrb[124].mxu1 %vm2488_vm4, %v2782_v9 }
 0x3de   :  { %12573 = vmatprep.mubr.msk.bf16.mxu1 %vm2488_vm4, %v18605_v24  ;;  %v15694_v33 = vpop.f32.mrb[104].mxu0  ;;  %v14332_v24 = vld [vmem:[%s18518_s5 + $0x50] sm:$0xff]  }
 0x3df   :  { %v15696_v38 = vpop.f32.mrb[105].mxu0 }
 0x3e0   :  { %v15698_v45 = vpop.f32.mrb[106].mxu0 }
 0x3e1   :  { %v15702_v54 = vpop.f32.mrb[107].mxu0  ;;  %v18618_v32 = vpack.c.bf16 %v15698_v45, %v15694_v33 }
 0x3e5   :  { %12574 = vmatmul.mubr.msk.bf16.vlgmr.msra.gmra.mrb[108].mxu1 %vm2488_vm4, %v18606_v52 }
 0x3e6   :  { %12586 = vmatpush3.bf16.msra.mxu1 %v14330_v18  ;;  %12577 = vmatprep.mubr.msk.bf16.mxu1 %vm2488_vm4, %v2991_v29  ;;  %v15717_v9 = vpop.f32.mrb[108].mxu0  ;;  %v18607_v29 = vpack.c.bf16 %v15548_v2, %v15541_v42  ;;  %v2994_v2 = vpack.c.bf16 %v15558_v11, %v15558_v11  ;;  %v14333_v11 = vld [vmem:[%s18518_s5 + $0x58] sm:$0xff]  }
 0x3e7   :  { %12587 = vmatprep.subr.bf16.mxu1 %v14331_v53  ;;  %v15722_v28 = vpop.f32.mrb[109].mxu0 }
 0x3e8   :  { %v15724_v31 = vpop.f32.mrb[110].mxu0 }
 0x3e9   :  { %v15728_v43 = vpop.f32.mrb[111].mxu0  ;;  %v18620_v44 = vpack.c.bf16 %v15724_v31, %v15717_v9 }
 0x3ea   :  { %12588 = vmatpush3.bf16.msra.mxu1 %v14331_v53  ;;  %v18619_v37 = vpack.c.bf16 %v15728_v43, %v15722_v28 }
 0x3eb   :  { %12625 = vmatprep.subr.bf16.mxu1 %v14332_v24 }
 0x3ed   :  { %12578 = vmatmul.mubr.msk.bf16.gmra.mrb[112].mxu1 %vm2488_vm4, %v18607_v29 }
 0x3ee   :  { %12581 = vmatprep.mubr.msk.bf16.mxu1 %vm2488_vm4, %v2993_v49  ;;  %v15740_v35 = vpop.f32.mrb[112].mxu0 }
 0x3ef   :  { %v15742_v18 = vpop.f32.mrb[113].mxu0 }
 0x3f0   :  { %v12704_v52 = vpop.f32.mrb[114].mxu0 }
 0x3f1   :  { %v15744_v53 = vpop.f32.mrb[115].mxu0 }
 0x3f2   :  { %v18621_v26 = vpack.c.bf16 %v15744_v53, %v15742_v18 }
 0x3f5   :  { %12582 = vmatmul.mubr.msk.bf16.gmra.mrb[128].mxu1 %vm2488_vm4, %v2994_v2  ;;  %v14334_v2 = vld [vmem:[%s18518_s5 + $0x60] sm:$0xff]  }
 0x3f6   :  { %12589 = vmatprep.mubr.msk.bf16.mxu1 %vm2488_vm4, %v15153_v6  ;;  %v15753_v61 = vpop.f32.mrb[116].mxu0 }
 0x3f7   :  { %v15755_v42 = vpop.f32.mrb[117].mxu0 }
 0x3f8   :  { %v15757_v60 = vpop.f32.mrb[118].mxu0 }
 0x3f9   :  { %v3919_v29 = vpop.f32.mrb[119].mxu0 }
 0x3fa   :  { %v3962_v52 = vpack.c.bf16 %v3919_v29, %v15755_v42 }
 0x3fd   :  { %12590 = vmatmul.mubr.msk.bf16.vlgmr.msra.gmra.mrb[108].mxu1 %vm2488_vm4, %v15159_v4 }
 0x3fe   :  { %12593 = vmatprep.mubr.msk.bf16.mxu1 %vm2488_vm4, %v15185_v50  ;;  %12626 = vmatpush3.bf16.msra.mxu1 %v14332_v24  ;;  %v12739_v6 = vpop.f32.mrb[120].mxu0 }
 0x3ff   :  { %12627 = vmatprep.subr.bf16.mxu1 %v14333_v11  ;;  %v3932_v49 = vpop.f32.mrb[121].mxu0 }
 0x400   :  { %v12740_v51 = vpop.f32.mrb[122].mxu0 }
 0x401   :  { %v3965_v42 = vpack.c.bf16 %v12740_v51, %v12739_v6  ;;  %v3935_v29 = vpop.f32.mrb[123].mxu0 }
 0x402   :  { %12628 = vmatpush3.bf16.msra.mxu1 %v14333_v11  ;;  %v3964_v27 = vpack.c.bf16 %v3935_v29, %v3932_v49 }
 0x403   :  { %12665 = vmatprep.subr.bf16.mxu1 %v14334_v2 }
 0x405   :  { %12594 = vmatmul.mubr.msk.bf16.gmra.mrb[112].mxu1 %vm2488_vm4, %v15191_v63  ;;  %v14335_v63 = vld [vmem:[%s18518_s5 + $0x68] sm:$0xff]  }
 0x406   :  { %12597 = vmatprep.mubr.msk.bf16.mxu1 %vm2488_vm4, %v15213_v57  ;;  %v12743_v4 = vpop.f32.mrb[124].mxu0  ;;  %v18608_v57 = vpack.c.bf16 %v15576_v34, %v15572_v41  ;;  %v18611_v41 = vpack.c.bf16 %v15622_v46, %v15620_v8  ;;  %v3331_v34 = vpack.c.bf16 %v15618_v10, %v15618_v10  ;;  %v18616_v10 = vpack.c.bf16 %v15683_v47, %v15681_v56 }
 0x407   :  { %v3948_v50 = vpop.f32.mrb[125].mxu0  ;;  %v3543_v8 = vpack.c.bf16 %v15679_v12, %v15679_v12  ;;  %v18617_v46 = vpack.c.bf16 %v15702_v54, %v15696_v38  ;;  %v15874_v12 = vld [vmem:[%s18515_s1 + $0x58] sm:$0xff]  }
 0x408   :  { %v12744_v24 = vpop.f32.mrb[126].mxu0 }
 0x409   :  { %v3951_v20 = vpop.f32.mrb[127].mxu0 }
 0x40a   :  { %v3966_v25 = vpack.c.bf16 %v3951_v20, %v3948_v50  ;;  %v18609_v20 = vpack.c.bf16 %v15606_v48, %v15600_v15  ;;  %v18614_v15 = vpack.c.bf16 %v15667_v58, %v15661_v30  ;;  %v18615_v48 = vpack.c.bf16 %v15663_v62, %v15656_v22  ;;  %v14339_v62 = vld [vmem:[%s18518_s5 + $0x88] sm:$0xff]  }
 0x40b   :  { %v3755_v30 = vpack.c.bf16 %v15740_v35, %v15740_v35  ;;  %v18622_v22 = vpack.c.bf16 %v15757_v60, %v15753_v61  ;;  %v3967_v58 = vpack.c.bf16 %v12743_v4, %v12743_v4 }
 0x40d   :  { %12598 = vmatmul.mubr.msk.bf16.gmra.mrb[132].mxu1 %vm2488_vm4, %v15217_v0  ;;  %v14336_v0 = vld [vmem:[%s18518_s5 + $0x70] sm:$0xff]  }
 0x40e   :  { %12629 = vmatprep.mubr.msk.bf16.mxu1 %vm2488_vm4, %v3326_v14  ;;  %v14337_v14 = vld [vmem:[%s18518_s5 + $0x78] sm:$0xff]  }
 0x415   :  { %12630 = vmatmul.mubr.msk.bf16.vlgmr.msra.gmra.mrb[108].mxu1 %vm2488_vm4, %v18608_v57 }
 0x416   :  { %12666 = vmatpush3.bf16.msra.mxu1 %v14334_v2  ;;  %12633 = vmatprep.mubr.msk.bf16.mxu1 %vm2488_vm4, %v18609_v20 }
 0x417   :  { %12667 = vmatprep.subr.bf16.mxu1 %v14335_v63 }
 0x41a   :  { %12668 = vmatpush3.bf16.msra.mxu1 %v14335_v63 }
 0x41b   :  { %12705 = vmatprep.subr.bf16.mxu1 %v14336_v0 }
 0x41d   :  { %12634 = vmatmul.mubr.msk.bf16.gmra.mrb[112].mxu1 %vm2488_vm4, %v18610_v39 }
 0x41e   :  { %12637 = vmatprep.mubr.msk.bf16.mxu1 %vm2488_vm4, %v18611_v41 }
 0x425   :  { %12638 = vmatmul.mubr.msk.bf16.gmra.mrb[136].mxu1 %vm2488_vm4, %v3331_v34 }
 0x426   :  { %12669 = vmatprep.mubr.msk.bf16.mxu1 %vm2488_vm4, %v18612_v36 }
 0x42d   :  { %12670 = vmatmul.mubr.msk.bf16.vlgmr.msra.gmra.mrb[108].mxu1 %vm2488_vm4, %v18613_v16 }
 0x42e   :  { %12706 = vmatpush3.bf16.msra.mxu1 %v14336_v0  ;;  %12673 = vmatprep.mubr.msk.bf16.mxu1 %vm2488_vm4, %v18614_v15 }
 0x42f   :  { %12707 = vmatprep.subr.bf16.mxu1 %v14337_v14 }
 0x432   :  { %12708 = vmatpush3.bf16.msra.mxu1 %v14337_v14 }
 0x433   :  { %12745 = vmatprep.subr.bf16.mxu1 %v14338_v21 }
 0x435   :  { %12674 = vmatmul.mubr.msk.bf16.gmra.mrb[112].mxu1 %vm2488_vm4, %v18615_v48 }
 0x436   :  { %12677 = vmatprep.mubr.msk.bf16.mxu1 %vm2488_vm4, %v18616_v10 }
 0x43d   :  { %12678 = vmatmul.mubr.msk.bf16.gmra.mrb[140].mxu1 %vm2488_vm4, %v3543_v8 }
 0x43e   :  { %12709 = vmatprep.mubr.msk.bf16.mxu1 %vm2488_vm4, %v18617_v46 }
 0x445   :  { %12710 = vmatmul.mubr.msk.bf16.vlgmr.msra.gmra.mrb[108].mxu1 %vm2488_vm4, %v18618_v32 }
 0x446   :  { %12746 = vmatpush3.bf16.msra.mxu1 %v14338_v21  ;;  %12713 = vmatprep.mubr.msk.bf16.mxu1 %vm2488_vm4, %v18619_v37 }
 0x447   :  { %12747 = vmatprep.subr.bf16.mxu1 %v14339_v62 }
 0x44a   :  { %12748 = vmatpush3.bf16.msra.mxu1 %v14339_v62 }
 0x44d   :  { %12714 = vmatmul.mubr.msk.bf16.gmra.mrb[112].mxu1 %vm2488_vm4, %v18620_v44 }
 0x44e   :  { %12717 = vmatprep.mubr.msk.bf16.mxu1 %vm2488_vm4, %v18621_v26 }
 0x455   :  { %12718 = vmatmul.mubr.msk.bf16.gmra.mrb[144].mxu1 %vm2488_vm4, %v3755_v30 }
 0x456   :  { %12749 = vmatprep.mubr.msk.bf16.mxu1 %vm2488_vm4, %v3962_v52 }
 0x45d   :  { %12750 = vmatmul.mubr.msk.bf16.vlgmr.msra.gmra.mrb[108].mxu1 %vm2488_vm4, %v18622_v22 }
 0x45e   :  { %12753 = vmatprep.mubr.msk.bf16.mxu1 %vm2488_vm4, %v3964_v27 }
 0x465   :  { %12754 = vmatmul.mubr.msk.bf16.gmra.mrb[112].mxu1 %vm2488_vm4, %v3965_v42 }
 0x466   :  { %12757 = vmatprep.mubr.msk.bf16.mxu1 %vm2488_vm4, %v3966_v25 }
 0x46d   :  { %12758 = vmatmul.mubr.msk.bf16.gmra.mrb[148].mxu1 %vm2488_vm4, %v3967_v58 }
 0x46e   :  { %12853 = vmatprep.mubr.msk.bf16.mxu1 %vm136_vm0, %v15874_v12 }
 0x480   :  { %v12487_v56 = vpop.f32.mrb[116].mxu1 }
 0x481   :  { %v2573_v47 = vpop.f32.mrb[117].mxu1 }
 0x482   :  { %v12488_v33 = vpop.f32.mrb[118].mxu1 }
 0x483   :  { %v2576_v38 = vpop.f32.mrb[119].mxu1 }
 0x498   :  { %v12503_v45 = vpop.f32.mrb[120].mxu1 }
 0x499   :  { %v2692_v28 = vadd.f32 %v12503_v45, %v12487_v56  ;;  %v2683_v54 = vpop.f32.mrb[121].mxu1 }
 0x49a   :  { %v2684_v31 = vadd.f32 %v2683_v54, %v2573_v47  ;;  %v12504_v25 = vpop.f32.mrb[122].mxu1  ;;  %v10722_v47 = vld [vmem:[%s18519_s6] ss:$0 sm:$0xff] }
 0x49b   :  { %v2686_v9 = vpop.f32.mrb[123].mxu1 }
 0x49c   :  { %v2687_v51 = vadd.f32 %v2686_v9, %v2576_v38 }
 0x4b0   :  { %v12543_v43 = vpop.f32.mrb[124].mxu1 }
 0x4b1   :  { %v2908_v27 = vadd.f32 %v12543_v43, %v2692_v28  ;;  %v2884_v35 = vpop.f32.mrb[125].mxu1 }
 0x4b2   :  { %v2906_v18 = vadd.f32 %v2884_v35, %v2684_v31  ;;  %v12544_v53 = vpop.f32.mrb[126].mxu1 }
 0x4b3   :  { %v2887_v61 = vpop.f32.mrb[127].mxu1 }
 0x4b4   :  { %v2907_v60 = vadd.f32 %v2887_v61, %v2687_v51 }
 0x4c8   :  { %v12583_v49 = vpop.f32.mrb[128].mxu1 }
 0x4c9   :  { %v3096_v52 = vpop.f32.mrb[129].mxu1  ;;  %v3120_v11 = vadd.f32 %v12583_v49, %v2908_v27 }
 0x4ca   :  { %v12584_v6 = vpop.f32.mrb[130].mxu1  ;;  %v3118_v2 = vadd.f32 %v3096_v52, %v2906_v18 }
 0x4cb   :  { %v3099_v42 = vpop.f32.mrb[131].mxu1 }
 0x4cc   :  { %v3119_v29 = vadd.f32 %v3099_v42, %v2907_v60 }
 0x4e0   :  { %v12599_v4 = vpop.f32.mrb[132].mxu1 }
 0x4e1   :  { %v3245_v50 = vadd.f32 %v12599_v4, %v3120_v11  ;;  %v3221_v24 = vpop.f32.mrb[133].mxu1 }
 0x4e2   :  { %v3243_v63 = vadd.f32 %v3221_v24, %v3118_v2  ;;  %v12600_v57 = vpop.f32.mrb[134].mxu1 }
 0x4e3   :  { %v3224_v20 = vpop.f32.mrb[135].mxu1 }
 0x4e4   :  { %v3244_v0 = vadd.f32 %v3224_v20, %v3119_v29 }
 0x4f8   :  { %v12639_v39 = vpop.f32.mrb[136].mxu1 }
 0x4f9   :  { %v3457_v41 = vadd.f32 %v12639_v39, %v3245_v50  ;;  %v3433_v34 = vpop.f32.mrb[137].mxu1 }
 0x4fa   :  { %v3455_v36 = vadd.f32 %v3433_v34, %v3243_v63  ;;  %v12640_v14 = vpop.f32.mrb[138].mxu1 }
 0x4fb   :  { %v3436_v16 = vpop.f32.mrb[139].mxu1 }
 0x4fc   :  { %v3456_v15 = vadd.f32 %v3436_v16, %v3244_v0 }
 0x510   :  { %v12679_v21 = vpop.f32.mrb[140].mxu1 }
 0x511   :  { %v3669_v48 = vadd.f32 %v12679_v21, %v3457_v41  ;;  %v3645_v10 = vpop.f32.mrb[141].mxu1 }
 0x512   :  { %v3667_v8 = vadd.f32 %v3645_v10, %v3455_v36  ;;  %v12680_v46 = vpop.f32.mrb[142].mxu1 }
 0x513   :  { %v3648_v62 = vpop.f32.mrb[143].mxu1 }
 0x514   :  { %v3668_v32 = vadd.f32 %v3648_v62, %v3456_v15 }
 0x528   :  { %v12719_v37 = vpop.f32.mrb[144].mxu1 }
 0x529   :  { %v3881_v44 = vadd.f32 %v12719_v37, %v3669_v48  ;;  %v3857_v26 = vpop.f32.mrb[145].mxu1  ;;  %v15928_v37 = vld [vmem:[%s18515_s1 + $0x8] sm:$0xff]  }
 0x52a   :  { %v3879_v30 = vadd.f32 %v3857_v26, %v3667_v8  ;;  %v12720_v22 = vpop.f32.mrb[146].mxu1  ;;  %18623 = vst [vmem:[#allocation3_spill] sm:$0xff] %v15928_v37  ;;  %v15946_v26 = vld [vmem:[%s18515_s1 + $0x10] sm:$0xff]  }
 0x52b   :  { %v3860_v58 = vpop.f32.mrb[147].mxu1  ;;  %18625 = vst [vmem:[#allocation5_spill] sm:$0xff] %v15946_v26  ;;  %v15964_v22 = vld [vmem:[%s18515_s1 + $0x18] sm:$0xff]  }
 0x52c   :  { %v3880_v56 = vadd.f32 %v3860_v58, %v3668_v32  ;;  %18627 = vst [vmem:[#allocation7_spill] sm:$0xff] %v15964_v22  ;;  %v15971_v58 = vld [vmem:[%s18515_s1 + $0x70] sm:$0xff]  }
 0x52d   :  { %18628 = vst [vmem:[#allocation8_spill] sm:$0xff] %v15971_v58 }
 0x530   :  { %v12751_v33 = vpop.f32.mrb[108].mxu1 }
 0x531   :  { %v4101_v38 = vadd.f32 %v12751_v33, %v10722_v47  ;;  %v4037_v45 = vpop.f32.mrb[109].mxu1  ;;  %v16000_v33 = vld [vmem:[%s18515_s1 + $0x28] ss:$0 sps:$4 sm:$0x33]  }
 0x532   :  { %v4099_v28 = vadd.f32 %v10722_v47, %v4037_v45  ;;  %v12752_v54 = vpop.f32.mrb[110].mxu1  ;;  %18631 = vst [vmem:[#allocation11_spill] sm:$0xff] %v16000_v33  ;;  %v16020_v45 = vld [vmem:[%s18515_s1 + $0x2c] sm:$0xff]  }
 0x533   :  { %v4102_v31 = vadd.f32 %v12752_v54, %v10722_v47  ;;  %v4040_v25 = vpop.f32.mrb[111].mxu1  ;;  %v4112_v51 = vmax.f32 %v4101_v38, 0.0  ;;  %v16007_v38 = vld [vmem:[%s18515_s1 + $0x80] ss:$0 sps:$4 sm:$0x33]   ;;  %18633 = vst [vmem:[#allocation13_spill] sm:$0xff] %v16020_v45 }
 0x534   :  { %v4100_v9 = vadd.f32 %v10722_v47, %v4040_v25  ;;  %v4110_v27 = vmax.f32 %v4099_v28, 0.0  ;;  %18632 = vst [vmem:[#allocation12_spill] sm:$0xff] %v16007_v38  ;;  %v16027_v28 = vld [vmem:[%s18515_s1 + $0x84] sm:$0xff]   ;;  %v16037_v54 = vld [vmem:[%s18515_s1 + $0x34] sm:$0xff]   ;;  %v16052_v25 = vld [vmem:[%s18515_s1 + $0x3c] sm:$0xff]  }
 0x535   :  { %v4113_v43 = vmax.f32 %v4102_v31, 0.0  ;;  %18634 = vst [vmem:[#allocation14_spill] sm:$0xff] %v16027_v28  ;;  %18635 = vst [vmem:[#allocation15_spill] sm:$0xff] %v16037_v54  ;;  %v16044_v31 = vld [vmem:[%s18515_s1 + $0x8c] sm:$0xff]  }
 0x536   :  { %v4111_v35 = vmax.f32 %v4100_v9, 0.0  ;;  %18636 = vst [vmem:[#allocation16_spill] sm:$0xff] %v16044_v31  ;;  %18637 = vst [vmem:[#allocation17_spill] sm:$0xff] %v16052_v25  ;;  %v16060_v9 = vld [vmem:[%s18515_s1 + $0x94] sm:$0xff]  }
 0x537   :  { %v15881_v18 = vpack.c.bf16 %v4113_v43, %v4112_v51  ;;  %18638 = vst [vmem:[#allocation18_spill] sm:$0xff] %v16060_v9  ;;  %v16069_v51 = vld [vmem:[%s18515_s1 + $0x44] sm:$0xff]   ;;  %v16076_v43 = vld [vmem:[%s18515_s1 + $0x9c] sm:$0xff]  }
 0x538   :  { %v15883_v53 = vpack.c.bf16 %v4111_v35, %v4110_v27  ;;  %v12755_v61 = vpop.f32.mrb[112].mxu1  ;;  %18639 = vst [vmem:[#allocation19_spill] sm:$0xff] %v16069_v51  ;;  %18640 = vst [vmem:[#allocation20_spill] sm:$0xff] %v16076_v43  ;;  %v16084_v27 = vld [vmem:[%s18515_s1 + $0x4c] sm:$0xff]   ;;  %v16092_v35 = vld [vmem:[%s18515_s1 + $0xa4] sm:$0xff]  }
 0x539   :  { %v4105_v60 = vadd.f32 %v12755_v61, %v10722_v47  ;;  %v4053_v49 = vpop.f32.mrb[113].mxu1  ;;  %18641 = vst [vmem:[#allocation21_spill] sm:$0xff] %v16084_v27  ;;  %18642 = vst [vmem:[#allocation22_spill] sm:$0xff] %v16092_v35  ;;  %v16101_v61 = vld [vmem:[%s18515_s1 + $0x54] ss:$0 sps:$4 sm:$0x33]  }
 0x53a   :  { %v4103_v52 = vadd.f32 %v10722_v47, %v4053_v49  ;;  %v12756_v11 = vpop.f32.mrb[114].mxu1  ;;  %12761 = vmatprep.subr.bf16.mxu0 %v15883_v53  ;;  %12841 = vmatprep.subr.bf16.mxu1 %v15883_v53  ;;  %18643 = vst [vmem:[#allocation23_spill] sm:$0xff] %v16101_v61  ;;  %v16116_v49 = vld [vmem:[%s18515_s1 + $0xdc] sm:$0xff]  }
 0x53b   :  { %v4106_v6 = vadd.f32 %v12756_v11, %v10722_v47  ;;  %v4056_v2 = vpop.f32.mrb[115].mxu1  ;;  %12762 = vmatpush3.bf16.msra.mxu0 %v15883_v53  ;;  %12842 = vmatpush3.bf16.msra.mxu1 %v15883_v53  ;;  %v4116_v29 = vmax.f32 %v4105_v60, 0.0  ;;  %v16108_v60 = vld [vmem:[%s18515_s1 + $0xac] ss:$0 sps:$4 sm:$0x33]   ;;  %18645 = vst [vmem:[#allocation25_spill] sm:$0xff] %v16116_v49 }
 0x53c   :  { %v4104_v42 = vadd.f32 %v10722_v47, %v4056_v2  ;;  %12763 = vmatprep.subr.bf16.mxu0 %v15881_v18  ;;  %12843 = vmatprep.subr.bf16.mxu1 %v15881_v18  ;;  %v4114_v50 = vmax.f32 %v4103_v52, 0.0  ;;  %18644 = vst [vmem:[#allocation24_spill] sm:$0xff] %v16108_v60  ;;  %v16127_v52 = vld [vmem:[%s18515_s1 + $0xe4] sm:$0xff]   ;;  %v16135_v11 = vld [vmem:[%s18515_s1 + $0xec] sm:$0xff]   ;;  %v16153_v2 = vld [vmem:[%s18515_s1 + $0xfc] sm:$0xff]  }
 0x53d   :  { %v4117_v4 = vmax.f32 %v4106_v6, 0.0  ;;  %18646 = vst [vmem:[#allocation26_spill] sm:$0xff] %v16127_v52  ;;  %18647 = vst [vmem:[#allocation27_spill] sm:$0xff] %v16135_v11  ;;  %v16145_v6 = vld [vmem:[%s18515_s1 + $0xf4] sm:$0xff]  }
 0x53e   :  { %v4115_v24 = vmax.f32 %v4104_v42, 0.0  ;;  %18648 = vst [vmem:[#allocation28_spill] sm:$0xff] %v16145_v6  ;;  %18649 = vst [vmem:[#allocation29_spill] sm:$0xff] %v16153_v2  ;;  %v16163_v42 = vld [vmem:[%s18515_s1 + $0x104] ss:$0 sps:$4 sm:$0x33]  }
 0x53f   :  { %v15891_v63 = vpack.c.bf16 %v4117_v4, %v4116_v29  ;;  %12764 = vmatpush3.bf16.msra.mxu0 %v15881_v18  ;;  %12844 = vmatpush3.bf16.msra.mxu1 %v15881_v18  ;;  %18650 = vst [vmem:[#allocation30_spill] sm:$0xff] %v16163_v42  ;;  %v16171_v29 = vld [vmem:[%s18515_s1 + $0x108] sm:$0xff]   ;;  %v16182_v4 = vld [vmem:[%s18515_s1 + $0x110] sm:$0xff]  }
 0x540   :  { %v15895_v57 = vpack.c.bf16 %v4115_v24, %v4114_v50  ;;  %v12759_v20 = vpop.f32.mrb[148].mxu1  ;;  %18651 = vst [vmem:[#allocation31_spill] sm:$0xff] %v16171_v29  ;;  %18652 = vst [vmem:[#allocation32_spill] sm:$0xff] %v16182_v4  ;;  %v16190_v50 = vld [vmem:[%s18515_s1 + $0x118] sm:$0xff]   ;;  %v16200_v24 = vld [vmem:[%s18515_s1 + $0x120] sm:$0xff]  }
 0x541   :  { %v4093_v0 = vadd.f32 %v12759_v20, %v3881_v44  ;;  %v4069_v39 = vpop.f32.mrb[149].mxu1  ;;  %v15935_v44 = vld [vmem:[%s18515_s1 + $0x60] sm:$0xff]   ;;  %18653 = vst [vmem:[#allocation33_spill] sm:$0xff] %v16190_v50  ;;  %18654 = vst [vmem:[#allocation34_spill] sm:$0xff] %v16200_v24  ;;  %v16208_v20 = vld [vmem:[%s18515_s1 + $0x128] sm:$0xff]  }
 0x542   :  { %v4091_v41 = vadd.f32 %v4069_v39, %v3879_v30  ;;  %v12760_v34 = vpop.f32.mrb[150].mxu1  ;;  %12765 = vmatprep.subr.bf16.mxu0 %v15895_v57  ;;  %12845 = vmatprep.subr.bf16.mxu1 %v15895_v57  ;;  %18624 = vst [vmem:[#allocation4_spill] sm:$0xff] %v15935_v44  ;;  %v15953_v30 = vld [vmem:[%s18515_s1 + $0x68] sm:$0xff]   ;;  %18655 = vst [vmem:[#allocation35_spill] sm:$0xff] %v16208_v20  ;;  %v16226_v39 = vld [vmem:[%s18515_s1 + $0x134] sm:$0xff]  }
 0x543   :  { %v4072_v36 = vpop.f32.mrb[151].mxu1  ;;  %12766 = vmatpush3.bf16.msra.mxu0 %v15895_v57  ;;  %12846 = vmatpush3.bf16.msra.mxu1 %v15895_v57  ;;  %v4109_v14 = vadd.f32 %v10722_v47, %v4093_v0  ;;  %18626 = vst [vmem:[#allocation6_spill] sm:$0xff] %v15953_v30  ;;  %v16218_v0 = vld [vmem:[%s18515_s1 + $0x130] ss:$0 sps:$4 sm:$0x33]   ;;  %18657 = vst [vmem:[#allocation37_spill] sm:$0xff] %v16226_v39 }
 0x544   :  { %v4107_v16 = vadd.f32 %v10722_v47, %v4091_v41  ;;  %v4092_v15 = vadd.f32 %v4072_v36, %v3880_v56  ;;  %12767 = vmatprep.subr.bf16.mxu0 %v15891_v63  ;;  %12847 = vmatprep.subr.bf16.mxu1 %v15891_v63  ;;  %v15982_v56 = vld [vmem:[%s18515_s1 + $0x20] sm:$0xff]   ;;  %18656 = vst [vmem:[#allocation36_spill] sm:$0xff] %v16218_v0 }
 0x545   :  { %v4120_v48 = vmax.f32 %v4109_v14, 0.0  ;;  %18629 = vst [vmem:[#allocation9_spill] sm:$0xff] %v15982_v56  ;;  %v14340_v41 = vld [vmem:[%s18518_s5 + $0xa0] sm:$0xff]   ;;  %v14341_v14 = vld [vmem:[%s18518_s5 + $0xa8] sm:$0xff]  }
 0x546   :  { %v4108_v21 = vadd.f32 %v10722_v47, %v4092_v15  ;;  %v4118_v10 = vmax.f32 %v4107_v16, 0.0  ;;  %v15989_v47 = vld [vmem:[%s18515_s1 + $0x78] sm:$0xff]   ;;  %v16248_v36 = vld [vmem:[%s18515_s1 + $0x144] sm:$0xff]   ;;  %v16261_v16 = vld [vmem:[%s18515_s1 + $0x14c] sm:$0xff]  }
 0x547   :  { %12768 = vmatpush3.bf16.msra.mxu0 %v15891_v63  ;;  %12848 = vmatpush3.bf16.msra.mxu1 %v15891_v63  ;;  %v15907_v62 = vpack.c.bf16 %v4120_v48, %v4120_v48  ;;  %18630 = vst [vmem:[#allocation10_spill] sm:$0xff] %v15989_v47  ;;  %v16240_v34 = vld [vmem:[%s18515_s1 + $0x13c] sm:$0xff]   ;;  %18659 = vst [vmem:[#allocation39_spill] sm:$0xff] %v16248_v36  ;;  %v16269_v15 = vld [vmem:[%s18515_s1 + $0x154] sm:$0xff]  }
 0x548   :  { %v4119_v8 = vmax.f32 %v4108_v21, 0.0  ;;  %18658 = vst [vmem:[#allocation38_spill] sm:$0xff] %v16240_v34  ;;  %18660 = vst [vmem:[#allocation40_spill] sm:$0xff] %v16261_v16  ;;  %v16279_v21 = vld [vmem:[%s18515_s1 + $0x15c] ss:$0 sps:$4 sm:$0x33]  }
 0x549   :  { %v15919_v32 = vsel %vm155_vm1, %v15907_v62, 0  ;;  %18661 = vst [vmem:[#allocation41_spill] sm:$0xff] %v16269_v15  ;;  %18662 = vst [vmem:[#allocation42_spill] sm:$0xff] %v16279_v21  ;;  %v16287_v48 = vld [vmem:[%s18515_s1 + $0x160] sm:$0xff]  }
 0x54a   :  { %v15905_v46 = vpack.c.bf16 %v4119_v8, %v4118_v10  ;;  %18663 = vst [vmem:[#allocation43_spill] sm:$0xff] %v16287_v48  ;;  %v16296_v10 = vld [vmem:[%s18518_s5 + $0x90] sm:$0xff]   ;;  %v16303_v8 = vld [vmem:[%s18515_s1 + $0x168] sm:$0xff]  }
 0x54b   :  { %18664 = vst [vmem:[#allocation44_spill] sm:$0xff] %v16303_v8 }
 0x54c   :  { %12769 = vmatprep.subr.bf16.mxu0 %v15905_v46  ;;  %12849 = vmatprep.subr.bf16.mxu1 %v15905_v46 }
 0x54d   :  { %12770 = vmatpush3.bf16.msra.mxu0 %v15905_v46  ;;  %12850 = vmatpush3.bf16.msra.mxu1 %v15905_v46 }
 0x54e   :  { %14222 = vmatprep.subr.msk.bf16.mxu0 %vm155_vm1, %v15907_v62  ;;  %14224 = vmatprep.subr.msk.bf16.mxu1 %vm155_vm1, %v15907_v62 }
 0x551   :  { %12772 = vmatpush3.bf16.msra.mxu0 %v15919_v32  ;;  %12852 = vmatpush3.bf16.msra.mxu1 %v15919_v32 }
 0x552   :  { %12785 = vmatprep.subr.bf16.mxu0 %v15883_v53  ;;  %12881 = vmatprep.subr.bf16.mxu1 %v15883_v53 }
 0x554   :  { %12774 = vmatmul.mubr.msk.bf16.vlgmr.msra.gmra.mrb[128].mxu0 %vm136_vm0, %v15928_v37  ;;  %12854 = vmatmul.mubr.msk.bf16.vlgmr.msra.gmra.mrb[152].mxu1 %vm136_vm0, %v15935_v44 }
 0x555   :  { %12786 = vmatpush3.bf16.msra.mxu0 %v15883_v53  ;;  %12882 = vmatpush3.bf16.msra.mxu1 %v15883_v53 }
 0x556   :  { %12787 = vmatprep.subr.bf16.mxu0 %v15881_v18  ;;  %12883 = vmatprep.subr.bf16.mxu1 %v15881_v18 }
 0x557   :  { %12777 = vmatprep.mubr.msk.bf16.mxu0 %vm136_vm0, %v15946_v26  ;;  %12857 = vmatprep.mubr.msk.bf16.mxu1 %vm136_vm0, %v15953_v30 }
 0x559   :  { %12788 = vmatpush3.bf16.msra.mxu0 %v15881_v18  ;;  %12884 = vmatpush3.bf16.msra.mxu1 %v15881_v18 }
 0x55a   :  { %12789 = vmatprep.subr.bf16.mxu0 %v15895_v57  ;;  %12885 = vmatprep.subr.bf16.mxu1 %v15895_v57 }
 0x55c   :  { %12778 = vmatmul.mubr.msk.bf16.gmra.mrb[132].mxu0 %vm136_vm0, %v15964_v22  ;;  %12858 = vmatmul.mubr.msk.bf16.gmra.mrb[156].mxu1 %vm136_vm0, %v15971_v58 }
 0x55d   :  { %12790 = vmatpush3.bf16.msra.mxu0 %v15895_v57  ;;  %12886 = vmatpush3.bf16.msra.mxu1 %v15895_v57 }
 0x55e   :  { %12791 = vmatprep.subr.bf16.mxu0 %v15891_v63  ;;  %12887 = vmatprep.subr.bf16.mxu1 %v15891_v63 }
 0x55f   :  { %12781 = vmatprep.mubr.msk.bf16.mxu0 %vm136_vm0, %v15982_v56  ;;  %12861 = vmatprep.mubr.msk.bf16.mxu1 %vm136_vm0, %v15989_v47 }
 0x561   :  { %12792 = vmatpush3.bf16.msra.mxu0 %v15891_v63  ;;  %12888 = vmatpush3.bf16.msra.mxu1 %v15891_v63 }
 0x562   :  { %12793 = vmatprep.subr.bf16.mxu0 %v15905_v46  ;;  %12889 = vmatprep.subr.bf16.mxu1 %v15905_v46 }
 0x564   :  { %12782 = vmatmul.mubr.msk.bf16.gmra.mrb[136].mxu0 %vm136_vm0, %v16000_v33  ;;  %12862 = vmatmul.mubr.msk.bf16.gmra.mrb[160].mxu1 %vm136_vm0, %v16007_v38 }
 0x565   :  { %12794 = vmatpush3.bf16.msra.mxu0 %v15905_v46  ;;  %12890 = vmatpush3.bf16.msra.mxu1 %v15905_v46 }
 0x566   :  { %14223 = vmatprep.subr.msk.bf16.mxu0 %vm155_vm1, %v15907_v62  ;;  %14225 = vmatprep.subr.msk.bf16.mxu1 %vm155_vm1, %v15907_v62 }
 0x567   :  { %12797 = vmatprep.mubr.msk.bf16.mxu0 %vm136_vm0, %v16020_v45  ;;  %12893 = vmatprep.mubr.msk.bf16.mxu1 %vm136_vm0, %v16027_v28  ;;  %v14343_v45 = vld [vmem:[%s18518_s5 + $0x98] sm:$0xff]  }
 0x569   :  { %12796 = vmatpush3.bf16.msra.mxu0 %v15919_v32  ;;  %12892 = vmatpush3.bf16.msra.mxu1 %v15919_v32 }
 0x56a   :  { %12937 = vmatprep.subr.bf16.mxu1 %v15883_v53  ;;  %12809 = vmatprep.subr.bf16.mxu0 %v14340_v41 }
 0x56c   :  { %12798 = vmatmul.mubr.msk.bf16.vlgmr.msra.gmra.mrb[140].mxu0 %vm136_vm0, %v16037_v54  ;;  %12894 = vmatmul.mubr.msk.bf16.vlgmr.msra.gmra.mrb[164].mxu1 %vm136_vm0, %v16044_v31 }
 0x56d   :  { %12938 = vmatpush3.bf16.msra.mxu1 %v15883_v53  ;;  %12801 = vmatprep.mubr.msk.bf16.mxu0 %vm136_vm0, %v16052_v25 }
 0x56e   :  { %12939 = vmatprep.subr.bf16.mxu1 %v15881_v18  ;;  %12897 = vmatprep.mubr.msk.bf16.mxu1 %vm136_vm0, %v16060_v9 }
 0x56f   :  { %12810 = vmatpush3.bf16.msra.mxu0 %v14340_v41  ;;  %v16310_v41 = vld [vmem:[%s18515_s1 + $0x170] sm:$0xff]  }
 0x570   :  { %12811 = vmatprep.subr.bf16.mxu0 %v14341_v14  ;;  %18665 = vst [vmem:[#allocation45_spill] sm:$0xff] %v16310_v41 }
 0x571   :  { %12940 = vmatpush3.bf16.msra.mxu1 %v15881_v18 }
 0x572   :  { %12941 = vmatprep.subr.bf16.mxu1 %v15895_v57 }
 0x573   :  { %12812 = vmatpush3.bf16.msra.mxu0 %v14341_v14  ;;  %v16324_v14 = vld [vmem:[%s18515_s1 + $0x180] sm:$0xff]  }
 0x574   :  { %12802 = vmatmul.mubr.msk.bf16.gmra.mrb[144].mxu0 %vm136_vm0, %v16069_v51  ;;  %12898 = vmatmul.mubr.msk.bf16.gmra.mrb[168].mxu1 %vm136_vm0, %v16076_v43  ;;  %18667 = vst [vmem:[#allocation47_spill] sm:$0xff] %v16324_v14 }
 0x575   :  { %12942 = vmatpush3.bf16.msra.mxu1 %v15895_v57  ;;  %12805 = vmatprep.mubr.msk.bf16.mxu0 %vm136_vm0, %v16084_v27 }
 0x576   :  { %12943 = vmatprep.subr.bf16.mxu1 %v15891_v63  ;;  %12901 = vmatprep.mubr.msk.bf16.mxu1 %vm136_vm0, %v16092_v35 }
 0x577   :  { %12825 = vmatprep.subr.bf16.mxu0 %v16296_v10 }
 0x579   :  { %12944 = vmatpush3.bf16.msra.mxu1 %v15891_v63 }
 0x57a   :  { %12945 = vmatprep.subr.bf16.mxu1 %v15905_v46 }
 0x57c   :  { %12806 = vmatmul.mubr.msk.bf16.gmra.mrb[148].mxu0 %vm136_vm0, %v16101_v61  ;;  %12902 = vmatmul.mubr.msk.bf16.gmra.mrb[172].mxu1 %vm136_vm0, %v16108_v60 }
 0x57d   :  { %12946 = vmatpush3.bf16.msra.mxu1 %v15905_v46  ;;  %12949 = vmatprep.mubr.msk.bf16.mxu1 %vm136_vm0, %v16116_v49 }
 0x57e   :  { %14226 = vmatprep.subr.msk.bf16.mxu1 %vm155_vm1, %v15907_v62 }
 0x581   :  { %12948 = vmatpush3.bf16.msra.mxu1 %v15919_v32 }
 0x582   :  { %12977 = vmatprep.subr.bf16.mxu1 %v15883_v53 }
 0x584   :  { %12950 = vmatmul.mubr.msk.bf16.vlgmr.msra.gmra.mrb[176].mxu1 %vm136_vm0, %v16127_v52 }
 0x585   :  { %12978 = vmatpush3.bf16.msra.mxu1 %v15883_v53  ;;  %12953 = vmatprep.mubr.msk.bf16.mxu1 %vm136_vm0, %v16135_v11 }
 0x586   :  { %12979 = vmatprep.subr.bf16.mxu1 %v15881_v18 }
 0x589   :  { %12980 = vmatpush3.bf16.msra.mxu1 %v15881_v18 }
 0x58a   :  { %12981 = vmatprep.subr.bf16.mxu1 %v15895_v57 }
 0x58c   :  { %12954 = vmatmul.mubr.msk.bf16.gmra.mrb[180].mxu1 %vm136_vm0, %v16145_v6 }
 0x58d   :  { %12982 = vmatpush3.bf16.msra.mxu1 %v15895_v57  ;;  %12957 = vmatprep.mubr.msk.bf16.mxu1 %vm136_vm0, %v16153_v2 }
 0x58e   :  { %12983 = vmatprep.subr.bf16.mxu1 %v15891_v63 }
 0x591   :  { %12984 = vmatpush3.bf16.msra.mxu1 %v15891_v63 }
 0x592   :  { %12985 = vmatprep.subr.bf16.mxu1 %v15905_v46 }
 0x594   :  { %12958 = vmatmul.mubr.msk.bf16.gmra.mrb[184].mxu1 %vm136_vm0, %v16163_v42 }
 0x595   :  { %12986 = vmatpush3.bf16.msra.mxu1 %v15905_v46  ;;  %12989 = vmatprep.mubr.msk.bf16.mxu1 %vm136_vm0, %v16171_v29 }
 0x596   :  { %14227 = vmatprep.subr.msk.bf16.mxu1 %vm155_vm1, %v15907_v62 }
 0x599   :  { %12988 = vmatpush3.bf16.msra.mxu1 %v15919_v32 }
 0x59a   :  { %13017 = vmatprep.subr.bf16.mxu1 %v15883_v53 }
 0x59c   :  { %12990 = vmatmul.mubr.msk.bf16.vlgmr.msra.gmra.mrb[188].mxu1 %vm136_vm0, %v16182_v4 }
 0x59d   :  { %13018 = vmatpush3.bf16.msra.mxu1 %v15883_v53  ;;  %12993 = vmatprep.mubr.msk.bf16.mxu1 %vm136_vm0, %v16190_v50 }
 0x59e   :  { %13019 = vmatprep.subr.bf16.mxu1 %v15881_v18 }
 0x5a1   :  { %13020 = vmatpush3.bf16.msra.mxu1 %v15881_v18 }
 0x5a2   :  { %13021 = vmatprep.subr.bf16.mxu1 %v15895_v57 }
 0x5a4   :  { %12994 = vmatmul.mubr.msk.bf16.gmra.mrb[192].mxu1 %vm136_vm0, %v16200_v24 }
 0x5a5   :  { %13022 = vmatpush3.bf16.msra.mxu1 %v15895_v57  ;;  %12997 = vmatprep.mubr.msk.bf16.mxu1 %vm136_vm0, %v16208_v20 }
 0x5a6   :  { %13023 = vmatprep.subr.bf16.mxu1 %v15891_v63 }
 0x5a9   :  { %13024 = vmatpush3.bf16.msra.mxu1 %v15891_v63 }
 0x5aa   :  { %13025 = vmatprep.subr.bf16.mxu1 %v15905_v46 }
 0x5ac   :  { %12998 = vmatmul.mubr.msk.bf16.gmra.mrb[196].mxu1 %vm136_vm0, %v16218_v0 }
 0x5ad   :  { %13026 = vmatpush3.bf16.msra.mxu1 %v15905_v46  ;;  %13029 = vmatprep.mubr.msk.bf16.mxu1 %vm136_vm0, %v16226_v39 }
 0x5ae   :  { %14228 = vmatprep.subr.msk.bf16.mxu1 %vm155_vm1, %v15907_v62 }
 0x5b1   :  { %13028 = vmatpush3.bf16.msra.mxu1 %v15919_v32 }
 0x5b2   :  { %13057 = vmatprep.subr.bf16.mxu1 %v15883_v53 }
 0x5b4   :  { %13030 = vmatmul.mubr.msk.bf16.vlgmr.msra.gmra.mrb[200].mxu1 %vm136_vm0, %v16240_v34 }
 0x5b5   :  { %13058 = vmatpush3.bf16.msra.mxu1 %v15883_v53  ;;  %13033 = vmatprep.mubr.msk.bf16.mxu1 %vm136_vm0, %v16248_v36 }
 0x5b6   :  { %13059 = vmatprep.subr.bf16.mxu1 %v15881_v18 }
 0x5b9   :  { %13060 = vmatpush3.bf16.msra.mxu1 %v15881_v18 }
 0x5ba   :  { %13061 = vmatprep.subr.bf16.mxu1 %v15895_v57 }
 0x5bc   :  { %13034 = vmatmul.mubr.msk.bf16.gmra.mrb[204].mxu1 %vm136_vm0, %v16261_v16 }
 0x5bd   :  { %13062 = vmatpush3.bf16.msra.mxu1 %v15895_v57  ;;  %13037 = vmatprep.mubr.msk.bf16.mxu1 %vm136_vm0, %v16269_v15 }
 0x5be   :  { %13063 = vmatprep.subr.bf16.mxu1 %v15891_v63 }
 0x5c1   :  { %13064 = vmatpush3.bf16.msra.mxu1 %v15891_v63 }
 0x5c2   :  { %13065 = vmatprep.subr.bf16.mxu1 %v15905_v46 }
 0x5c4   :  { %13038 = vmatmul.mubr.msk.bf16.gmra.mrb[208].mxu1 %vm136_vm0, %v16279_v21 }
 0x5c5   :  { %13066 = vmatpush3.bf16.msra.mxu1 %v15905_v46  ;;  %13069 = vmatprep.mubr.msk.bf16.mxu1 %vm136_vm0, %v16287_v48 }
 0x5c6   :  { %14229 = vmatprep.subr.msk.bf16.mxu1 %vm155_vm1, %v15907_v62 }
 0x5c9   :  { %13068 = vmatpush3.bf16.msra.mxu1 %v15919_v32  ;;  %v16317_v32 = vld [vmem:[%s18515_s1 + $0x178] sm:$0xff]  }
 0x5ca   :  { %18666 = vst [vmem:[#allocation46_spill] sm:$0xff] %v16317_v32 }
 0x5cc   :  { %13070 = vmatmul.mubr.msk.bf16.vlgmr.msra.gmra.mrb[212].mxu1 %vm136_vm0, %v16303_v8 }
 0x5cd   :  { %13073 = vmatprep.mubr.msk.bf16.mxu1 %vm136_vm0, %v16310_v41  ;;  %v16331_v41 = vld [vmem:[%s18515_s1 + $0x188] ss:$0 sps:$4 sm:$0x33]  }
 0x5ce   :  { %18668 = vst [vmem:[#allocation48_spill] sm:$0xff] %v16331_v41 }
 0x5d4   :  { %13074 = vmatmul.mubr.msk.bf16.gmra.mrb[216].mxu1 %vm136_vm0, %v16317_v32  ;;  %v16338_v32 = vld [vmem:[%s18515_s1] sm:$0xff]  }
 0x5d5   :  { %13077 = vmatprep.mubr.msk.bf16.mxu1 %vm136_vm0, %v16324_v14  ;;  %18669 = vst [vmem:[#allocation49_spill] sm:$0xff] %v16338_v32 }
 0x5dc   :  { %13078 = vmatmul.mubr.msk.bf16.gmra.mrb[220].mxu1 %vm136_vm0, %v16331_v41 }
 0x5dd   :  { %13109 = vmatprep.mubr.msk.bf16.mxu1 %vm136_vm0, %v16338_v32 }
 0x627   :  { %v16342_v8 = vpop.f32.mrb[128].mxu0  ;;  %v16344_v48 = vpop.f32.mrb[152].mxu1 }
 0x628   :  { %v16346_v14 = vpop.f32.mrb[129].mxu0  ;;  %v16348_v21 = vpop.f32.mrb[153].mxu1 }
 0x629   :  { %v16350_v15 = vpop.f32.mrb[130].mxu0  ;;  %v16352_v16 = vpop.f32.mrb[154].mxu1 }
 0x62a   :  { %v16356_v36 = vpop.f32.mrb[131].mxu0  ;;  %v16360_v34 = vpop.f32.mrb[155].mxu1 }
 0x62f   :  { %v16366_v20 = vpop.f32.mrb[132].mxu0  ;;  %v16368_v24 = vpop.f32.mrb[156].mxu1 }
 0x630   :  { %v16370_v50 = vpop.f32.mrb[133].mxu0  ;;  %v16372_v41 = vpop.f32.mrb[157].mxu1 }
 0x631   :  { %v16374_v4 = vpop.f32.mrb[134].mxu0  ;;  %v16376_v29 = vpop.f32.mrb[158].mxu1 }
 0x632   :  { %v16380_v42 = vpop.f32.mrb[135].mxu0  ;;  %v16384_v39 = vpop.f32.mrb[159].mxu1 }
 0x637   :  { %v16390_v11 = vpop.f32.mrb[136].mxu0  ;;  %v16392_v52 = vpop.f32.mrb[160].mxu1 }
 0x638   :  { %v16394_v49 = vpop.f32.mrb[137].mxu0  ;;  %v16396_v32 = vpop.f32.mrb[161].mxu1 }
 0x639   :  { %v12784_v60 = vpop.f32.mrb[138].mxu0  ;;  %v12864_v61 = vpop.f32.mrb[162].mxu1 }
 0x63a   :  { %v16398_v35 = vpop.f32.mrb[139].mxu0  ;;  %v16400_v0 = vpop.f32.mrb[163].mxu1 }
 0x63f   :  { %v12799_v27 = vpop.f32.mrb[140].mxu0  ;;  %v16406_v43 = vpop.f32.mrb[164].mxu1 }
 0x640   :  { %v4255_v51 = vpop.f32.mrb[141].mxu0  ;;  %v16408_v9 = vpop.f32.mrb[165].mxu1 }
 0x641   :  { %v12800_v25 = vpop.f32.mrb[142].mxu0  ;;  %v16410_v31 = vpop.f32.mrb[166].mxu1 }
 0x642   :  { %v4302_v61 = vpack.c.bf16 %v12800_v25, %v12799_v27  ;;  %v4258_v60 = vpop.f32.mrb[143].mxu0  ;;  %v16414_v28 = vpop.f32.mrb[167].mxu1 }
 0x643   :  { %v4301_v2 = vpack.c.bf16 %v4258_v60, %v4255_v51  ;;  %v14344_v51 = vld [vmem:[%s18518_s5 + $0xb0] sm:$0xff]  }
 0x645   :  { %12813 = vmatprep.mubr.msk.bf16.mxu0 %vm2488_vm4, %v4301_v2 }
 0x646   :  { %12814 = vmatmul.mubr.msk.bf16.vlgmr.msra.gmra.mrb[152].mxu0 %vm2488_vm4, %v4302_v61 }
 0x647   :  { %v12803_v38 = vpop.f32.mrb[144].mxu0  ;;  %12826 = vmatpush3.bf16.msra.mxu0 %v16296_v10  ;;  %v16424_v25 = vpop.f32.mrb[168].mxu1 }
 0x648   :  { %v4271_v27 = vpop.f32.mrb[145].mxu0  ;;  %12827 = vmatprep.subr.bf16.mxu0 %v14343_v45  ;;  %v16429_v60 = vpop.f32.mrb[169].mxu1 }
 0x649   :  { %v12804_v54 = vpop.f32.mrb[146].mxu0  ;;  %v16431_v6 = vpop.f32.mrb[170].mxu1 }
 0x64a   :  { %v4304_v33 = vpack.c.bf16 %v12804_v54, %v12803_v38  ;;  %v4274_v2 = vpop.f32.mrb[147].mxu0  ;;  %v16435_v47 = vpop.f32.mrb[171].mxu1 }
 0x64b   :  { %v4303_v10 = vpack.c.bf16 %v4274_v2, %v4271_v27  ;;  %12828 = vmatpush3.bf16.msra.mxu0 %v14343_v45  ;;  %v4826_v56 = vpack.c.bf16 %v16435_v47, %v16429_v60  ;;  %v18682_v47 = vpack.c.bf16 %v16431_v6, %v16424_v25 }
 0x64c   :  { %12865 = vmatprep.subr.bf16.mxu0 %v14344_v51 }
 0x64d   :  { %12817 = vmatprep.mubr.msk.bf16.mxu0 %vm2488_vm4, %v4303_v10 }
 0x64e   :  { %12818 = vmatmul.mubr.msk.bf16.gmra.mrb[156].mxu0 %vm2488_vm4, %v4304_v33  ;;  %v18670_v33 = vpack.c.bf16 %v16356_v36, %v16346_v14  ;;  %v14345_v36 = vld [vmem:[%s18518_s5 + $0xb8] sm:$0xff]   ;;  %v18671_v14 = vpack.c.bf16 %v16350_v15, %v16342_v8 }
 0x64f   :  { %v12807_v58 = vpop.f32.mrb[148].mxu0  ;;  %v16441_v22 = vpop.f32.mrb[172].mxu1 }
 0x650   :  { %v4287_v38 = vpop.f32.mrb[149].mxu0  ;;  %v16443_v54 = vpop.f32.mrb[173].mxu1  ;;  %v4306_v2 = vpack.c.bf16 %v12807_v58, %v12807_v58  ;;  %v4829_v6 = vpack.c.bf16 %v16441_v22, %v16441_v22  ;;  %v14351_v22 = vld [vmem:[%s18518_s5 + $0xe8] sm:$0xff]  }
 0x651   :  { %v12808_v30 = vpop.f32.mrb[150].mxu0  ;;  %v12904_v61 = vpop.f32.mrb[174].mxu1 }
 0x652   :  { %v4290_v26 = vpop.f32.mrb[151].mxu0  ;;  %v16445_v44 = vpop.f32.mrb[175].mxu1 }
 0x653   :  { %v4305_v45 = vpack.c.bf16 %v4290_v26, %v4287_v38  ;;  %v4828_v27 = vpack.c.bf16 %v16445_v44, %v16443_v54 }
 0x655   :  { %12821 = vmatprep.mubr.msk.bf16.mxu0 %vm2488_vm4, %v4305_v45  ;;  %v18672_v45 = vpack.c.bf16 %v16380_v42, %v16370_v50  ;;  %v18673_v50 = vpack.c.bf16 %v16374_v4, %v16366_v20  ;;  %v4215_v4 = vpack.c.bf16 %v16390_v11, %v16390_v11 }
 0x656   :  { %12822 = vmatmul.mubr.msk.bf16.gmra.mrb[160].mxu0 %vm2488_vm4, %v4306_v2 }
 0x657   :  { %12829 = vmatprep.mubr.msk.bf16.mxu0 %vm2488_vm4, %v18670_v33  ;;  %v16455_v10 = vpop.f32.mrb[176].mxu1  ;;  %v14346_v33 = vld [vmem:[%s18518_s5 + $0xc0] sm:$0xff]  }
 0x658   :  { %v16457_v30 = vpop.f32.mrb[177].mxu1 }
 0x659   :  { %v16459_v61 = vpop.f32.mrb[178].mxu1 }
 0x65a   :  { %v16463_v38 = vpop.f32.mrb[179].mxu1 }
 0x65e   :  { %12830 = vmatmul.mubr.msk.bf16.vlgmr.msra.gmra.mrb[152].mxu0 %vm2488_vm4, %v18671_v14 }
 0x65f   :  { %12833 = vmatprep.mubr.msk.bf16.mxu0 %vm2488_vm4, %v18672_v45  ;;  %12866 = vmatpush3.bf16.msra.mxu0 %v14344_v51  ;;  %v16478_v2 = vpop.f32.mrb[180].mxu1  ;;  %v18674_v51 = vpack.c.bf16 %v16398_v35, %v16394_v49  ;;  %v18675_v35 = vpack.c.bf16 %v16360_v34, %v16348_v21  ;;  %v14347_v34 = vld [vmem:[%s18518_s5 + $0xc8] sm:$0xff]   ;;  %v18676_v21 = vpack.c.bf16 %v16352_v16, %v16344_v48 }
 0x660   :  { %12867 = vmatprep.subr.bf16.mxu0 %v14345_v36  ;;  %v16483_v26 = vpop.f32.mrb[181].mxu1 }
 0x661   :  { %v16485_v58 = vpop.f32.mrb[182].mxu1 }
 0x662   :  { %v16489_v8 = vpop.f32.mrb[183].mxu1 }
 0x663   :  { %12868 = vmatpush3.bf16.msra.mxu0 %v14345_v36 }
 0x664   :  { %12905 = vmatprep.subr.bf16.mxu0 %v14346_v33 }
 0x666   :  { %12834 = vmatmul.mubr.msk.bf16.gmra.mrb[156].mxu0 %vm2488_vm4, %v18673_v50  ;;  %v14348_v50 = vld [vmem:[%s18518_s5 + $0xd0] sm:$0xff]  }
 0x667   :  { %12837 = vmatprep.mubr.msk.bf16.mxu0 %vm2488_vm4, %v18674_v51  ;;  %v16501_v14 = vpop.f32.mrb[184].mxu1 }
 0x668   :  { %v16503_v45 = vpop.f32.mrb[185].mxu1 }
 0x669   :  { %v12960_v15 = vpop.f32.mrb[186].mxu1 }
 0x66a   :  { %v16505_v36 = vpop.f32.mrb[187].mxu1 }
 0x66e   :  { %12838 = vmatmul.mubr.msk.bf16.gmra.mrb[164].mxu0 %vm2488_vm4, %v4215_v4  ;;  %v18677_v4 = vpack.c.bf16 %v16384_v39, %v16372_v41  ;;  %v18678_v41 = vpack.c.bf16 %v16376_v29, %v16368_v24  ;;  %v4617_v29 = vpack.c.bf16 %v16392_v52, %v16392_v52  ;;  %v18680_v24 = vpack.c.bf16 %v16414_v28, %v16408_v9  ;;  %v14349_v28 = vld [vmem:[%s18518_s5 + $0xd8] sm:$0xff]  }
 0x66f   :  { %12869 = vmatprep.mubr.msk.bf16.mxu0 %vm2488_vm4, %v18675_v35  ;;  %v16516_v49 = vpop.f32.mrb[188].mxu1  ;;  %v18681_v9 = vpack.c.bf16 %v16410_v31, %v16406_v43 }
 0x670   :  { %v16518_v20 = vpop.f32.mrb[189].mxu1 }
 0x671   :  { %v16520_v15 = vpop.f32.mrb[190].mxu1 }
 0x672   :  { %v16524_v51 = vpop.f32.mrb[191].mxu1 }
 0x676   :  { %12870 = vmatmul.mubr.msk.bf16.vlgmr.msra.gmra.mrb[152].mxu0 %vm2488_vm4, %v18676_v21 }
 0x677   :  { %12906 = vmatpush3.bf16.msra.mxu0 %v14346_v33  ;;  %12873 = vmatprep.mubr.msk.bf16.mxu0 %vm2488_vm4, %v18677_v4  ;;  %v16539_v35 = vpop.f32.mrb[192].mxu1  ;;  %v18679_v33 = vpack.c.bf16 %v16400_v0, %v16396_v32 }
 0x678   :  { %12907 = vmatprep.subr.bf16.mxu0 %v14347_v34  ;;  %v16544_v11 = vpop.f32.mrb[193].mxu1 }
 0x679   :  { %v16546_v42 = vpop.f32.mrb[194].mxu1 }
 0x67a   :  { %v16550_v48 = vpop.f32.mrb[195].mxu1 }
 0x67b   :  { %12908 = vmatpush3.bf16.msra.mxu0 %v14347_v34 }
 0x67c   :  { %12921 = vmatprep.subr.bf16.mxu0 %v14348_v50 }
 0x67e   :  { %12874 = vmatmul.mubr.msk.bf16.gmra.mrb[156].mxu0 %vm2488_vm4, %v18678_v41 }
 0x67f   :  { %12877 = vmatprep.mubr.msk.bf16.mxu0 %vm2488_vm4, %v18679_v33  ;;  %v16562_v21 = vpop.f32.mrb[196].mxu1 }
 0x680   :  { %v16564_v4 = vpop.f32.mrb[197].mxu1 }
 0x681   :  { %v13000_v16 = vpop.f32.mrb[198].mxu1 }
 0x682   :  { %v16566_v34 = vpop.f32.mrb[199].mxu1 }
 0x686   :  { %12878 = vmatmul.mubr.msk.bf16.gmra.mrb[168].mxu0 %vm2488_vm4, %v4617_v29 }
 0x687   :  { %12909 = vmatprep.mubr.msk.bf16.mxu0 %vm2488_vm4, %v18680_v24  ;;  %v16577_v0 = vpop.f32.mrb[200].mxu1  ;;  %v14350_v24 = vld [vmem:[%s18518_s5 + $0xe0] sm:$0xff]  }
 0x688   :  { %v16579_v32 = vpop.f32.mrb[201].mxu1 }
 0x689   :  { %v16581_v16 = vpop.f32.mrb[202].mxu1 }
 0x68a   :  { %v16585_v33 = vpop.f32.mrb[203].mxu1 }
 0x68e   :  { %12910 = vmatmul.mubr.msk.bf16.vlgmr.msra.gmra.mrb[152].mxu0 %vm2488_vm4, %v18681_v9 }
 0x68f   :  { %12922 = vmatpush3.bf16.msra.mxu0 %v14348_v50  ;;  %12913 = vmatprep.mubr.msk.bf16.mxu0 %vm2488_vm4, %v4826_v56  ;;  %v16600_v29 = vpop.f32.mrb[204].mxu1 }
 0x690   :  { %12923 = vmatprep.subr.bf16.mxu0 %v14349_v28  ;;  %v16605_v41 = vpop.f32.mrb[205].mxu1 }
 0x691   :  { %v16607_v52 = vpop.f32.mrb[206].mxu1 }
 0x692   :  { %v16611_v43 = vpop.f32.mrb[207].mxu1 }
 0x693   :  { %12924 = vmatpush3.bf16.msra.mxu0 %v14349_v28 }
 0x694   :  { %12961 = vmatprep.subr.bf16.mxu0 %v14350_v24 }
 0x696   :  { %12914 = vmatmul.mubr.msk.bf16.gmra.mrb[156].mxu0 %vm2488_vm4, %v18682_v47 }
 0x697   :  { %12917 = vmatprep.mubr.msk.bf16.mxu0 %vm2488_vm4, %v4828_v27  ;;  %v16623_v60 = vpop.f32.mrb[208].mxu1 }
 0x698   :  { %v16625_v50 = vpop.f32.mrb[209].mxu1 }
 0x699   :  { %v13040_v9 = vpop.f32.mrb[210].mxu1 }
 0x69a   :  { %v16627_v28 = vpop.f32.mrb[211].mxu1 }
 0x69e   :  { %12918 = vmatmul.mubr.msk.bf16.gmra.mrb[172].mxu0 %vm2488_vm4, %v4829_v6  ;;  %v14352_v6 = vld [vmem:[%s18518_s5 + $0xf0] sm:$0xff]  }
 0x69f   :  { %12925 = vmatprep.mubr.msk.bf16.mxu0 %vm2488_vm4, %v15883_v53  ;;  %v16636_v44 = vpop.f32.mrb[212].mxu1 }
 0x6a0   :  { %v16638_v25 = vpop.f32.mrb[213].mxu1 }
 0x6a1   :  { %v16640_v54 = vpop.f32.mrb[214].mxu1 }
 0x6a2   :  { %v5754_v47 = vpop.f32.mrb[215].mxu1 }
 0x6a3   :  { %v5797_v9 = vpack.c.bf16 %v5754_v47, %v16638_v25 }
 0x6a6   :  { %12926 = vmatmul.mubr.msk.bf16.vlgmr.msra.gmra.mrb[152].mxu0 %vm2488_vm4, %v15881_v18 }
 0x6a7   :  { %12929 = vmatprep.mubr.msk.bf16.mxu0 %vm2488_vm4, %v15895_v57  ;;  %12962 = vmatpush3.bf16.msra.mxu0 %v14350_v24  ;;  %v13075_v53 = vpop.f32.mrb[216].mxu1 }
 0x6a8   :  { %12963 = vmatprep.subr.bf16.mxu0 %v14351_v22  ;;  %v5767_v27 = vpop.f32.mrb[217].mxu1 }
 0x6a9   :  { %v13076_v31 = vpop.f32.mrb[218].mxu1 }
 0x6aa   :  { %v5800_v25 = vpack.c.bf16 %v13076_v31, %v13075_v53  ;;  %v5770_v47 = vpop.f32.mrb[219].mxu1  ;;  %v18683_v31 = vpack.c.bf16 %v16463_v38, %v16457_v30  ;;  %v18686_v30 = vpack.c.bf16 %v16485_v58, %v16478_v2  ;;  %v14355_v38 = vld [vmem:[%s18518_s5 + $0x108] sm:$0xff]   ;;  %v18689_v58 = vpack.c.bf16 %v16520_v15, %v16516_v49 }
 0x6ab   :  { %12964 = vmatpush3.bf16.msra.mxu0 %v14351_v22  ;;  %v5799_v56 = vpack.c.bf16 %v5770_v47, %v5767_v27  ;;  %v18690_v2 = vpack.c.bf16 %v16550_v48, %v16544_v11  ;;  %v18693_v49 = vpack.c.bf16 %v16585_v33, %v16579_v32  ;;  %v18695_v15 = vpack.c.bf16 %v16611_v43, %v16605_v41 }
 0x6ac   :  { %13001 = vmatprep.subr.bf16.mxu0 %v14352_v6  ;;  %v18697_v11 = vpack.c.bf16 %v16627_v28, %v16625_v50  ;;  %v18698_v48 = vpack.c.bf16 %v16640_v54, %v16636_v44 }
 0x6ae   :  { %12930 = vmatmul.mubr.msk.bf16.gmra.mrb[156].mxu0 %vm2488_vm4, %v15891_v63  ;;  %v14353_v63 = vld [vmem:[%s18518_s5 + $0xf8] sm:$0xff]  }
 0x6af   :  { %12933 = vmatprep.mubr.msk.bf16.mxu0 %vm2488_vm4, %v15905_v46  ;;  %v13079_v18 = vpop.f32.mrb[220].mxu1  ;;  %v18684_v46 = vpack.c.bf16 %v16459_v61, %v16455_v10  ;;  %v18687_v10 = vpack.c.bf16 %v16505_v36, %v16503_v45  ;;  %v5166_v61 = vpack.c.bf16 %v16501_v14, %v16501_v14  ;;  %v18691_v14 = vpack.c.bf16 %v16546_v42, %v16539_v35  ;;  %v14357_v42 = vld [vmem:[%s18518_s5 + $0x118] sm:$0xff]  }
 0x6b0   :  { %v5783_v57 = vpop.f32.mrb[221].mxu1  ;;  %v18692_v45 = vpack.c.bf16 %v16566_v34, %v16564_v4  ;;  %v5378_v36 = vpack.c.bf16 %v16562_v21, %v16562_v21  ;;  %v5590_v35 = vpack.c.bf16 %v16623_v60, %v16623_v60  ;;  %v5802_v21 = vpack.c.bf16 %v13079_v18, %v13079_v18 }
 0x6b1   :  { %v13080_v24 = vpop.f32.mrb[222].mxu1 }
 0x6b2   :  { %v5786_v39 = vpop.f32.mrb[223].mxu1 }
 0x6b3   :  { %v5801_v37 = vpack.c.bf16 %v5786_v39, %v5783_v57  ;;  %v18685_v39 = vpack.c.bf16 %v16489_v8, %v16483_v26  ;;  %v18688_v26 = vpack.c.bf16 %v16524_v51, %v16518_v20  ;;  %v14356_v8 = vld [vmem:[%s18518_s5 + $0x110] sm:$0xff]   ;;  %v18694_v20 = vpack.c.bf16 %v16581_v16, %v16577_v0 }
 0x6b4   :  { %v18696_v51 = vpack.c.bf16 %v16607_v52, %v16600_v29 }
 0x6b6   :  { %12934 = vmatmul.mubr.msk.bf16.gmra.mrb[176].mxu0 %vm2488_vm4, %v15907_v62  ;;  %v14354_v62 = vld [vmem:[%s18518_s5 + $0x100] sm:$0xff]  }
 0x6b7   :  { %12965 = vmatprep.mubr.msk.bf16.mxu0 %vm2488_vm4, %v18683_v31 }
 0x6be   :  { %12966 = vmatmul.mubr.msk.bf16.vlgmr.msra.gmra.mrb[152].mxu0 %vm2488_vm4, %v18684_v46 }
 0x6bf   :  { %13002 = vmatpush3.bf16.msra.mxu0 %v14352_v6  ;;  %12969 = vmatprep.mubr.msk.bf16.mxu0 %vm2488_vm4, %v18685_v39 }
 0x6c0   :  { %13003 = vmatprep.subr.bf16.mxu0 %v14353_v63 }
 0x6c3   :  { %13004 = vmatpush3.bf16.msra.mxu0 %v14353_v63 }
 0x6c4   :  { %13041 = vmatprep.subr.bf16.mxu0 %v14354_v62 }
 0x6c6   :  { %12970 = vmatmul.mubr.msk.bf16.gmra.mrb[156].mxu0 %vm2488_vm4, %v18686_v30 }
 0x6c7   :  { %12973 = vmatprep.mubr.msk.bf16.mxu0 %vm2488_vm4, %v18687_v10 }
 0x6ce   :  { %12974 = vmatmul.mubr.msk.bf16.gmra.mrb[180].mxu0 %vm2488_vm4, %v5166_v61 }
 0x6cf   :  { %13005 = vmatprep.mubr.msk.bf16.mxu0 %vm2488_vm4, %v18688_v26 }
 0x6d6   :  { %13006 = vmatmul.mubr.msk.bf16.vlgmr.msra.gmra.mrb[152].mxu0 %vm2488_vm4, %v18689_v58 }
 0x6d7   :  { %13042 = vmatpush3.bf16.msra.mxu0 %v14354_v62  ;;  %13009 = vmatprep.mubr.msk.bf16.mxu0 %vm2488_vm4, %v18690_v2 }
 0x6d8   :  { %13043 = vmatprep.subr.bf16.mxu0 %v14355_v38 }
 0x6db   :  { %13044 = vmatpush3.bf16.msra.mxu0 %v14355_v38 }
 0x6dc   :  { %13081 = vmatprep.subr.bf16.mxu0 %v14356_v8 }
 0x6de   :  { %13010 = vmatmul.mubr.msk.bf16.gmra.mrb[156].mxu0 %vm2488_vm4, %v18691_v14 }
 0x6df   :  { %13013 = vmatprep.mubr.msk.bf16.mxu0 %vm2488_vm4, %v18692_v45 }
 0x6e6   :  { %13014 = vmatmul.mubr.msk.bf16.gmra.mrb[184].mxu0 %vm2488_vm4, %v5378_v36 }
 0x6e7   :  { %13045 = vmatprep.mubr.msk.bf16.mxu0 %vm2488_vm4, %v18693_v49 }
 0x6ee   :  { %13046 = vmatmul.mubr.msk.bf16.vlgmr.msra.gmra.mrb[152].mxu0 %vm2488_vm4, %v18694_v20 }
 0x6ef   :  { %13082 = vmatpush3.bf16.msra.mxu0 %v14356_v8  ;;  %13049 = vmatprep.mubr.msk.bf16.mxu0 %vm2488_vm4, %v18695_v15 }
 0x6f0   :  { %13083 = vmatprep.subr.bf16.mxu0 %v14357_v42 }
 0x6f3   :  { %13084 = vmatpush3.bf16.msra.mxu0 %v14357_v42 }
 0x6f6   :  { %13050 = vmatmul.mubr.msk.bf16.gmra.mrb[156].mxu0 %vm2488_vm4, %v18696_v51 }
 0x6f7   :  { %13053 = vmatprep.mubr.msk.bf16.mxu0 %vm2488_vm4, %v18697_v11 }
 0x6fe   :  { %13054 = vmatmul.mubr.msk.bf16.gmra.mrb[188].mxu0 %vm2488_vm4, %v5590_v35 }
 0x6ff   :  { %13085 = vmatprep.mubr.msk.bf16.mxu0 %vm2488_vm4, %v5797_v9 }
 0x706   :  { %13086 = vmatmul.mubr.msk.bf16.vlgmr.msra.gmra.mrb[152].mxu0 %vm2488_vm4, %v18698_v48 }
 0x707   :  { %13089 = vmatprep.mubr.msk.bf16.mxu0 %vm2488_vm4, %v5799_v56 }
 0x70e   :  { %13090 = vmatmul.mubr.msk.bf16.gmra.mrb[156].mxu0 %vm2488_vm4, %v5800_v25 }
 0x70f   :  { %13093 = vmatprep.mubr.msk.bf16.mxu0 %vm2488_vm4, %v5801_v37 }
 0x716   :  { %13094 = vmatmul.mubr.msk.bf16.gmra.mrb[192].mxu0 %vm2488_vm4, %v5802_v21 }
 0x717   :  { %13189 = vmatprep.mubr.msk.bf16.mxu0 %vm136_vm0, %v15874_v12 }
 0x729   :  { %v12823_v4 = vpop.f32.mrb[160].mxu0 }
 0x72a   :  { %v4408_v34 = vpop.f32.mrb[161].mxu0 }
 0x72b   :  { %v12824_v0 = vpop.f32.mrb[162].mxu0 }
 0x72c   :  { %v4411_v32 = vpop.f32.mrb[163].mxu0 }
 0x741   :  { %v12839_v16 = vpop.f32.mrb[164].mxu0 }
 0x742   :  { %v4527_v41 = vadd.f32 %v12839_v16, %v12823_v4  ;;  %v4518_v33 = vpop.f32.mrb[165].mxu0  ;;  %v10879_v4 = vld [vmem:[%s18519_s6 + $0x1] ss:$0 sm:$0xff] }
 0x743   :  { %v4519_v52 = vadd.f32 %v4518_v33, %v4408_v34  ;;  %v12840_v29 = vpop.f32.mrb[166].mxu0 }
 0x744   :  { %v4521_v43 = vpop.f32.mrb[167].mxu0  ;;  %v18699_v29 = vmax.f32 %v15137_v13, 0.0 }
 0x745   :  { %v4522_v56 = vadd.f32 %v4521_v43, %v4411_v32 }
 0x759   :  { %v12879_v60 = vpop.f32.mrb[168].mxu0 }
 0x75a   :  { %v4743_v50 = vadd.f32 %v12879_v60, %v4527_v41  ;;  %v4719_v37 = vpop.f32.mrb[169].mxu0  ;;  %v18700_v60 = vmax.f32 %v15139_v1, 0.0 }
 0x75b   :  { %v4741_v28 = vadd.f32 %v4719_v37, %v4519_v52  ;;  %v12880_v44 = vpop.f32.mrb[170].mxu0  ;;  %v18701_v37 = vmax.f32 %v15141_v55, 0.0 }
 0x75c   :  { %v4722_v54 = vpop.f32.mrb[171].mxu0  ;;  %v18702_v44 = vmax.f32 %v15143_v59, 0.0 }
 0x75d   :  { %v4742_v27 = vadd.f32 %v4722_v54, %v4522_v56 }
 0x771   :  { %v12919_v9 = vpop.f32.mrb[172].mxu0 }
 0x772   :  { %v4955_v12 = vadd.f32 %v12919_v9, %v4743_v50  ;;  %v4931_v22 = vpop.f32.mrb[173].mxu0 }
 0x773   :  { %v4953_v53 = vadd.f32 %v4931_v22, %v4741_v28  ;;  %v12920_v6 = vpop.f32.mrb[174].mxu0 }
 0x774   :  { %v4934_v25 = vpop.f32.mrb[175].mxu0 }
 0x775   :  { %v4954_v47 = vadd.f32 %v4934_v25, %v4742_v27 }
 0x789   :  { %v12935_v18 = vpop.f32.mrb[176].mxu0 }
 0x78a   :  { %v5080_v57 = vadd.f32 %v12935_v18, %v4955_v12  ;;  %v5056_v24 = vpop.f32.mrb[177].mxu0 }
 0x78b   :  { %v5078_v31 = vadd.f32 %v5056_v24, %v4953_v53  ;;  %v12936_v63 = vpop.f32.mrb[178].mxu0 }
 0x78c   :  { %v5059_v46 = vpop.f32.mrb[179].mxu0  ;;  %v18704_v63 = vmax.f32 %v15165_v7, 0.0 }
 0x78d   :  { %v5079_v39 = vadd.f32 %v5059_v46, %v4954_v47 }
 0x7a1   :  { %v12975_v62 = vpop.f32.mrb[180].mxu0 }
 0x7a2   :  { %v5292_v30 = vadd.f32 %v12975_v62, %v5080_v57  ;;  %v5268_v10 = vpop.f32.mrb[181].mxu0  ;;  %v18703_v57 = vmax.f32 %v15161_v5, 0.0  ;;  %v18706_v5 = vmax.f32 %v15171_v23, 0.0 }
 0x7a3   :  { %v5290_v61 = vadd.f32 %v5268_v10, %v5078_v31  ;;  %v12976_v26 = vpop.f32.mrb[182].mxu0 }
 0x7a4   :  { %v5271_v38 = vpop.f32.mrb[183].mxu0 }
 0x7a5   :  { %v5291_v58 = vadd.f32 %v5271_v38, %v5079_v39  ;;  %v18705_v39 = vmax.f32 %v15169_v17, 0.0 }
 0x7b9   :  { %v13015_v2 = vpop.f32.mrb[184].mxu0 }
 0x7ba   :  { %v5504_v8 = vadd.f32 %v13015_v2, %v5292_v30  ;;  %v5480_v14 = vpop.f32.mrb[185].mxu0 }
 0x7bb   :  { %v5502_v45 = vadd.f32 %v5480_v14, %v5290_v61  ;;  %v13016_v36 = vpop.f32.mrb[186].mxu0 }
 0x7bc   :  { %v5483_v49 = vpop.f32.mrb[187].mxu0 }
 0x7bd   :  { %v5503_v42 = vadd.f32 %v5483_v49, %v5291_v58 }
 0x7d1   :  { %v13055_v20 = vpop.f32.mrb[188].mxu0 }
 0x7d2   :  { %v5716_v15 = vadd.f32 %v13055_v20, %v5504_v8  ;;  %v5692_v51 = vpop.f32.mrb[189].mxu0 }
 0x7d3   :  { %v5714_v11 = vadd.f32 %v5692_v51, %v5502_v45  ;;  %v13056_v35 = vpop.f32.mrb[190].mxu0 }
 0x7d4   :  { %v5695_v48 = vpop.f32.mrb[191].mxu0  ;;  %v18708_v35 = vmax.f32 %v15201_v19, 0.0 }
 0x7d5   :  { %v5715_v21 = vadd.f32 %v5695_v48, %v5503_v42 }
 0x7d9   :  { %v13087_v34 = vpop.f32.mrb[152].mxu0 }
 0x7da   :  { %v5872_v0 = vpop.f32.mrb[153].mxu0  ;;  %v5936_v32 = vadd.f32 %v13087_v34, %v10879_v4 }
 0x7db   :  { %v5934_v16 = vadd.f32 %v10879_v4, %v5872_v0  ;;  %v13088_v41 = vpop.f32.mrb[154].mxu0  ;;  %v18709_v0 = vld [vmem:[#allocation3_spill] sm:$0xff] }
 0x7dc   :  { %v5937_v33 = vadd.f32 %v13088_v41, %v10879_v4  ;;  %v5875_v52 = vpop.f32.mrb[155].mxu0  ;;  %v16769_v28 = vadd.f32 %v5936_v32, %v18701_v37  ;;  %v18710_v32 = vld [vmem:[#allocation4_spill] sm:$0xff]  ;;  %v18712_v41 = vld [vmem:[#allocation6_spill] sm:$0xff] }
 0x7dd   :  { %v16761_v43 = vadd.f32 %v5934_v16, %v18699_v29  ;;  %v5935_v56 = vadd.f32 %v10879_v4, %v5875_v52  ;;  %v18711_v16 = vld [vmem:[#allocation5_spill] sm:$0xff]  ;;  %v18714_v52 = vld [vmem:[#allocation8_spill] sm:$0xff] }
 0x7de   :  { %v16765_v50 = vadd.f32 %v5937_v33, %v18700_v60  ;;  %v18596_v1 = vmax.f32 %v16769_v28, 0.0  ;;  %v18713_v33 = vld [vmem:[#allocation7_spill] sm:$0xff]  ;;  %v18715_v29 = vld [vmem:[#allocation9_spill] sm:$0xff]  ;;  %v18718_v37 = vld [vmem:[#allocation12_spill] sm:$0xff] }
 0x7df   :  { %v16773_v54 = vadd.f32 %v5935_v56, %v18702_v44  ;;  %v18595_v27 = vmax.f32 %v16761_v43, 0.0  ;;  %v18716_v56 = vld [vmem:[#allocation10_spill] sm:$0xff]  ;;  %v18717_v60 = vld [vmem:[#allocation11_spill] sm:$0xff]  ;;  %v18719_v44 = vld [vmem:[#allocation13_spill] sm:$0xff] }
 0x7e0   :  { %v18594_v9 = vmax.f32 %v16765_v50, 0.0 }
 0x7e1   :  { %v18593_v13 = vmax.f32 %v16773_v54, 0.0  ;;  %v13091_v12 = vpop.f32.mrb[156].mxu0 }
 0x7e2   :  { %v5888_v22 = vpop.f32.mrb[157].mxu0  ;;  %v5940_v53 = vadd.f32 %v13091_v12, %v10879_v4  ;;  %v16789_v18 = vpack.c.bf16 %v18594_v9, %v18596_v1  ;;  %v18720_v12 = vld [vmem:[#allocation14_spill] sm:$0xff] }
 0x7e3   :  { %v16783_v55 = vpack.c.bf16 %v18593_v13, %v18595_v27  ;;  %v5938_v59 = vadd.f32 %v10879_v4, %v5888_v22  ;;  %v13092_v6 = vpop.f32.mrb[158].mxu0  ;;  %v18721_v22 = vld [vmem:[#allocation15_spill] sm:$0xff] }
 0x7e4   :  { %v5941_v25 = vadd.f32 %v13092_v6, %v10879_v4  ;;  %v5891_v47 = vpop.f32.mrb[159].mxu0  ;;  %v16805_v62 = vadd.f32 %v5940_v53, %v18705_v39  ;;  %v18722_v53 = vld [vmem:[#allocation16_spill] sm:$0xff]  ;;  %v18724_v6 = vld [vmem:[#allocation18_spill] sm:$0xff] }
 0x7e5   :  { %v16793_v24 = vadd.f32 %v5938_v59, %v18703_v57  ;;  %v5939_v31 = vadd.f32 %v10879_v4, %v5891_v47  ;;  %13097 = vmatprep.subr.bf16.mxu1 %v16783_v55  ;;  %13177 = vmatprep.subr.bf16.mxu0 %v16783_v55  ;;  %v18723_v59 = vld [vmem:[#allocation17_spill] sm:$0xff]  ;;  %v18726_v47 = vld [vmem:[#allocation20_spill] sm:$0xff] }
 0x7e6   :  { %v16799_v46 = vadd.f32 %v5941_v25, %v18704_v63  ;;  %13098 = vmatpush3.bf16.msra.mxu1 %v16783_v55  ;;  %13178 = vmatpush3.bf16.msra.mxu0 %v16783_v55  ;;  %v18592_v17 = vmax.f32 %v16805_v62, 0.0  ;;  %v18725_v25 = vld [vmem:[#allocation19_spill] sm:$0xff]  ;;  %v18727_v57 = vld [vmem:[#allocation21_spill] sm:$0xff]  ;;  %v18730_v39 = vld [vmem:[#allocation24_spill] sm:$0xff] }
 0x7e7   :  { %v16809_v30 = vadd.f32 %v5939_v31, %v18706_v5  ;;  %13099 = vmatprep.subr.bf16.mxu1 %v16789_v18  ;;  %13179 = vmatprep.subr.bf16.mxu0 %v16789_v18  ;;  %v18591_v7 = vmax.f32 %v16793_v24, 0.0  ;;  %v18728_v31 = vld [vmem:[#allocation22_spill] sm:$0xff]  ;;  %v18729_v63 = vld [vmem:[#allocation23_spill] sm:$0xff]  ;;  %v18731_v5 = vld [vmem:[#allocation25_spill] sm:$0xff] }
 0x7e8   :  { %v18590_v10 = vmax.f32 %v16799_v46, 0.0  ;;  %v14361_v27 = vld [vmem:[%s18518_s5 + $0x128] sm:$0xff]  }
 0x7e9   :  { %v18589_v61 = vmax.f32 %v16809_v30, 0.0  ;;  %v13095_v26 = vpop.f32.mrb[192].mxu0 }
 0x7ea   :  { %v5928_v38 = vadd.f32 %v13095_v26, %v5716_v15  ;;  %v5904_v58 = vpop.f32.mrb[193].mxu0  ;;  %13100 = vmatpush3.bf16.msra.mxu1 %v16789_v18  ;;  %13180 = vmatpush3.bf16.msra.mxu0 %v16789_v18  ;;  %v16829_v36 = vpack.c.bf16 %v18590_v10, %v18592_v17  ;;  %v18707_v15 = vmax.f32 %v15197_v3, 0.0  ;;  %v18732_v26 = vld [vmem:[#allocation26_spill] sm:$0xff] }
 0x7eb   :  { %v16823_v23 = vpack.c.bf16 %v18589_v61, %v18591_v7  ;;  %v5926_v2 = vadd.f32 %v5904_v58, %v5714_v11  ;;  %v13096_v8 = vpop.f32.mrb[194].mxu0  ;;  %v18734_v58 = vld [vmem:[#allocation28_spill] sm:$0xff] }
 0x7ec   :  { %v5944_v14 = vadd.f32 %v10879_v4, %v5928_v38  ;;  %v5907_v45 = vpop.f32.mrb[195].mxu0  ;;  %v18733_v38 = vld [vmem:[#allocation27_spill] sm:$0xff]  ;;  %v18736_v8 = vld [vmem:[#allocation30_spill] sm:$0xff] }
 0x7ed   :  { %v5942_v49 = vadd.f32 %v10879_v4, %v5926_v2  ;;  %v5927_v42 = vadd.f32 %v5907_v45, %v5715_v21  ;;  %13101 = vmatprep.subr.bf16.mxu1 %v16823_v23  ;;  %13181 = vmatprep.subr.bf16.mxu0 %v16823_v23  ;;  %v18735_v2 = vld [vmem:[#allocation29_spill] sm:$0xff]  ;;  %v18738_v45 = vld [vmem:[#allocation32_spill] sm:$0xff] }
 0x7ee   :  { %13102 = vmatpush3.bf16.msra.mxu1 %v16823_v23  ;;  %13182 = vmatpush3.bf16.msra.mxu0 %v16823_v23  ;;  %v5955_v20 = vadd.f32 %v5944_v14, %v15205_v40  ;;  %v18737_v14 = vld [vmem:[#allocation31_spill] sm:$0xff] }
 0x7ef   :  { %v16838_v51 = vadd.f32 %v5942_v49, %v18707_v15  ;;  %v5943_v11 = vadd.f32 %v10879_v4, %v5927_v42  ;;  %13103 = vmatprep.subr.bf16.mxu1 %v16829_v36  ;;  %13183 = vmatprep.subr.bf16.mxu0 %v16829_v36  ;;  %v18739_v49 = vld [vmem:[#allocation33_spill] sm:$0xff]  ;;  %v18740_v42 = vld [vmem:[#allocation34_spill] sm:$0xff]  ;;  %v18742_v15 = vld [vmem:[#allocation36_spill] sm:$0xff] }
 0x7f0   :  { %v16848_v21 = vmax.f32 %v5955_v20, 0.0  ;;  %v18741_v20 = vld [vmem:[#allocation35_spill] sm:$0xff] }
 0x7f1   :  { %v16844_v48 = vadd.f32 %v5943_v11, %v18708_v35  ;;  %v18588_v40 = vmax.f32 %v16838_v51, 0.0  ;;  %v18743_v11 = vld [vmem:[#allocation37_spill] sm:$0xff] }
 0x7f2   :  { %13104 = vmatpush3.bf16.msra.mxu1 %v16829_v36  ;;  %13184 = vmatpush3.bf16.msra.mxu0 %v16829_v36  ;;  %v16860_v19 = vpack.c.bf16 %v16848_v21, %v16848_v21  ;;  %v14358_v35 = vld [vmem:[%s18518_s5 + $0x130] sm:$0xff]  }
 0x7f3   :  { %v18587_v3 = vmax.f32 %v16844_v48, 0.0 }
 0x7f4   :  { %v16872_v34 = vsel %vm155_vm1, %v16860_v19, 0 }
 0x7f5   :  { %v16856_v4 = vpack.c.bf16 %v18587_v3, %v18588_v40 }
 0x7f7   :  { %13105 = vmatprep.subr.bf16.mxu1 %v16856_v4  ;;  %13185 = vmatprep.subr.bf16.mxu0 %v16856_v4 }
 0x7f8   :  { %13106 = vmatpush3.bf16.msra.mxu1 %v16856_v4  ;;  %13186 = vmatpush3.bf16.msra.mxu0 %v16856_v4 }
 0x7f9   :  { %14230 = vmatprep.subr.msk.bf16.mxu1 %vm155_vm1, %v16860_v19  ;;  %14232 = vmatprep.subr.msk.bf16.mxu0 %vm155_vm1, %v16860_v19 }
 0x7fc   :  { %13108 = vmatpush3.bf16.msra.mxu1 %v16872_v34  ;;  %13188 = vmatpush3.bf16.msra.mxu0 %v16872_v34 }
 0x7fd   :  { %13121 = vmatprep.subr.bf16.mxu1 %v16783_v55  ;;  %13217 = vmatprep.subr.bf16.mxu0 %v16783_v55 }
 0x7ff   :  { %13110 = vmatmul.mubr.msk.bf16.vlgmr.msra.gmra.mrb[224].mxu1 %vm136_vm0, %v18709_v0  ;;  %13190 = vmatmul.mubr.msk.bf16.vlgmr.msra.gmra.mrb[196].mxu0 %vm136_vm0, %v18710_v32  ;;  %v18744_v0 = vld [vmem:[#allocation38_spill] sm:$0xff]  ;;  %v18745_v32 = vld [vmem:[#allocation39_spill] sm:$0xff] }
 0x800   :  { %13122 = vmatpush3.bf16.msra.mxu1 %v16783_v55  ;;  %13218 = vmatpush3.bf16.msra.mxu0 %v16783_v55 }
 0x801   :  { %13123 = vmatprep.subr.bf16.mxu1 %v16789_v18  ;;  %13219 = vmatprep.subr.bf16.mxu0 %v16789_v18 }
 0x802   :  { %13113 = vmatprep.mubr.msk.bf16.mxu1 %vm136_vm0, %v18711_v16  ;;  %13193 = vmatprep.mubr.msk.bf16.mxu0 %vm136_vm0, %v18712_v41  ;;  %v14359_v16 = vld [vmem:[%s18518_s5 + $0x138] sm:$0xff]   ;;  %v18746_v41 = vld [vmem:[#allocation40_spill] sm:$0xff] }
 0x804   :  { %13124 = vmatpush3.bf16.msra.mxu1 %v16789_v18  ;;  %13220 = vmatpush3.bf16.msra.mxu0 %v16789_v18 }
 0x805   :  { %13125 = vmatprep.subr.bf16.mxu1 %v16823_v23  ;;  %13221 = vmatprep.subr.bf16.mxu0 %v16823_v23 }
 0x807   :  { %13114 = vmatmul.mubr.msk.bf16.gmra.mrb[228].mxu1 %vm136_vm0, %v18713_v33  ;;  %13194 = vmatmul.mubr.msk.bf16.gmra.mrb[200].mxu0 %vm136_vm0, %v18714_v52  ;;  %v18747_v33 = vld [vmem:[#allocation41_spill] sm:$0xff]  ;;  %v18748_v52 = vld [vmem:[#allocation42_spill] sm:$0xff] }
 0x808   :  { %13126 = vmatpush3.bf16.msra.mxu1 %v16823_v23  ;;  %13222 = vmatpush3.bf16.msra.mxu0 %v16823_v23 }
 0x809   :  { %13127 = vmatprep.subr.bf16.mxu1 %v16829_v36  ;;  %13223 = vmatprep.subr.bf16.mxu0 %v16829_v36 }
 0x80a   :  { %13117 = vmatprep.mubr.msk.bf16.mxu1 %vm136_vm0, %v18715_v29  ;;  %13197 = vmatprep.mubr.msk.bf16.mxu0 %vm136_vm0, %v18716_v56  ;;  %v18749_v29 = vld [vmem:[#allocation43_spill] sm:$0xff] }
 0x80b   :  { %v14360_v56 = vld [vmem:[%s18518_s5 + $0x120] sm:$0xff]  }
 0x80c   :  { %13128 = vmatpush3.bf16.msra.mxu1 %v16829_v36  ;;  %13224 = vmatpush3.bf16.msra.mxu0 %v16829_v36 }
 0x80d   :  { %13129 = vmatprep.subr.bf16.mxu1 %v16856_v4  ;;  %13225 = vmatprep.subr.bf16.mxu0 %v16856_v4 }
 0x80f   :  { %13118 = vmatmul.mubr.msk.bf16.gmra.mrb[232].mxu1 %vm136_vm0, %v18717_v60  ;;  %13198 = vmatmul.mubr.msk.bf16.gmra.mrb[204].mxu0 %vm136_vm0, %v18718_v37  ;;  %v18750_v60 = vld [vmem:[#allocation44_spill] sm:$0xff]  ;;  %v18751_v37 = vld [vmem:[#allocation45_spill] sm:$0xff] }
 0x810   :  { %13130 = vmatpush3.bf16.msra.mxu1 %v16856_v4  ;;  %13226 = vmatpush3.bf16.msra.mxu0 %v16856_v4 }
 0x811   :  { %14231 = vmatprep.subr.msk.bf16.mxu1 %vm155_vm1, %v16860_v19  ;;  %14233 = vmatprep.subr.msk.bf16.mxu0 %vm155_vm1, %v16860_v19 }
 0x812   :  { %13133 = vmatprep.mubr.msk.bf16.mxu1 %vm136_vm0, %v18719_v44  ;;  %13229 = vmatprep.mubr.msk.bf16.mxu0 %vm136_vm0, %v18720_v12  ;;  %v18752_v44 = vld [vmem:[#allocation46_spill] sm:$0xff]  ;;  %v18753_v12 = vld [vmem:[#allocation47_spill] sm:$0xff] }
 0x814   :  { %13132 = vmatpush3.bf16.msra.mxu1 %v16872_v34  ;;  %13228 = vmatpush3.bf16.msra.mxu0 %v16872_v34 }
 0x815   :  { %13273 = vmatprep.subr.bf16.mxu0 %v16783_v55  ;;  %13145 = vmatprep.subr.bf16.mxu1 %v14358_v35 }
 0x817   :  { %13134 = vmatmul.mubr.msk.bf16.vlgmr.msra.gmra.mrb[236].mxu1 %vm136_vm0, %v18721_v22  ;;  %13230 = vmatmul.mubr.msk.bf16.vlgmr.msra.gmra.mrb[208].mxu0 %vm136_vm0, %v18722_v53  ;;  %v18754_v22 = vld [vmem:[#allocation48_spill] sm:$0xff]  ;;  %v18755_v53 = vld [vmem:[#allocation49_spill] sm:$0xff] }
 0x818   :  { %13274 = vmatpush3.bf16.msra.mxu0 %v16783_v55  ;;  %13137 = vmatprep.mubr.msk.bf16.mxu1 %vm136_vm0, %v18723_v59 }
 0x819   :  { %13275 = vmatprep.subr.bf16.mxu0 %v16789_v18  ;;  %13233 = vmatprep.mubr.msk.bf16.mxu0 %vm136_vm0, %v18724_v6 }
 0x81a   :  { %13146 = vmatpush3.bf16.msra.mxu1 %v14358_v35 }
 0x81b   :  { %13147 = vmatprep.subr.bf16.mxu1 %v14359_v16 }
 0x81c   :  { %13276 = vmatpush3.bf16.msra.mxu0 %v16789_v18 }
 0x81d   :  { %13277 = vmatprep.subr.bf16.mxu0 %v16823_v23 }
 0x81e   :  { %13148 = vmatpush3.bf16.msra.mxu1 %v14359_v16 }
 0x81f   :  { %13138 = vmatmul.mubr.msk.bf16.gmra.mrb[240].mxu1 %vm136_vm0, %v18725_v25  ;;  %13234 = vmatmul.mubr.msk.bf16.gmra.mrb[212].mxu0 %vm136_vm0, %v18726_v47 }
 0x820   :  { %13278 = vmatpush3.bf16.msra.mxu0 %v16823_v23  ;;  %13141 = vmatprep.mubr.msk.bf16.mxu1 %vm136_vm0, %v18727_v57 }
 0x821   :  { %13279 = vmatprep.subr.bf16.mxu0 %v16829_v36  ;;  %13237 = vmatprep.mubr.msk.bf16.mxu0 %vm136_vm0, %v18728_v31 }
 0x822   :  { %13161 = vmatprep.subr.bf16.mxu1 %v14360_v56 }
 0x824   :  { %13280 = vmatpush3.bf16.msra.mxu0 %v16829_v36 }
 0x825   :  { %13281 = vmatprep.subr.bf16.mxu0 %v16856_v4 }
 0x827   :  { %13142 = vmatmul.mubr.msk.bf16.gmra.mrb[244].mxu1 %vm136_vm0, %v18729_v63  ;;  %13238 = vmatmul.mubr.msk.bf16.gmra.mrb[216].mxu0 %vm136_vm0, %v18730_v39 }
 0x828   :  { %13282 = vmatpush3.bf16.msra.mxu0 %v16856_v4  ;;  %13285 = vmatprep.mubr.msk.bf16.mxu0 %vm136_vm0, %v18731_v5 }
 0x829   :  { %14234 = vmatprep.subr.msk.bf16.mxu0 %vm155_vm1, %v16860_v19 }
 0x82c   :  { %13284 = vmatpush3.bf16.msra.mxu0 %v16872_v34 }
 0x82d   :  { %13313 = vmatprep.subr.bf16.mxu0 %v16783_v55 }
 0x82f   :  { %13286 = vmatmul.mubr.msk.bf16.vlgmr.msra.gmra.mrb[220].mxu0 %vm136_vm0, %v18732_v26 }
 0x830   :  { %13314 = vmatpush3.bf16.msra.mxu0 %v16783_v55  ;;  %13289 = vmatprep.mubr.msk.bf16.mxu0 %vm136_vm0, %v18733_v38 }
 0x831   :  { %13315 = vmatprep.subr.bf16.mxu0 %v16789_v18 }
 0x834   :  { %13316 = vmatpush3.bf16.msra.mxu0 %v16789_v18 }
 0x835   :  { %13317 = vmatprep.subr.bf16.mxu0 %v16823_v23 }
 0x837   :  { %13290 = vmatmul.mubr.msk.bf16.gmra.mrb[224].mxu0 %vm136_vm0, %v18734_v58 }
 0x838   :  { %13318 = vmatpush3.bf16.msra.mxu0 %v16823_v23  ;;  %13293 = vmatprep.mubr.msk.bf16.mxu0 %vm136_vm0, %v18735_v2 }
 0x839   :  { %13319 = vmatprep.subr.bf16.mxu0 %v16829_v36 }
 0x83c   :  { %13320 = vmatpush3.bf16.msra.mxu0 %v16829_v36 }
 0x83d   :  { %13321 = vmatprep.subr.bf16.mxu0 %v16856_v4 }
 0x83f   :  { %13294 = vmatmul.mubr.msk.bf16.gmra.mrb[228].mxu0 %vm136_vm0, %v18736_v8 }
 0x840   :  { %13322 = vmatpush3.bf16.msra.mxu0 %v16856_v4  ;;  %13325 = vmatprep.mubr.msk.bf16.mxu0 %vm136_vm0, %v18737_v14 }
 0x841   :  { %14235 = vmatprep.subr.msk.bf16.mxu0 %vm155_vm1, %v16860_v19 }
 0x844   :  { %13324 = vmatpush3.bf16.msra.mxu0 %v16872_v34 }
 0x845   :  { %13353 = vmatprep.subr.bf16.mxu0 %v16783_v55 }
 0x847   :  { %13326 = vmatmul.mubr.msk.bf16.vlgmr.msra.gmra.mrb[232].mxu0 %vm136_vm0, %v18738_v45 }
 0x848   :  { %13354 = vmatpush3.bf16.msra.mxu0 %v16783_v55  ;;  %13329 = vmatprep.mubr.msk.bf16.mxu0 %vm136_vm0, %v18739_v49 }
 0x849   :  { %13355 = vmatprep.subr.bf16.mxu0 %v16789_v18 }
 0x84c   :  { %13356 = vmatpush3.bf16.msra.mxu0 %v16789_v18 }
 0x84d   :  { %13357 = vmatprep.subr.bf16.mxu0 %v16823_v23 }
 0x84f   :  { %13330 = vmatmul.mubr.msk.bf16.gmra.mrb[236].mxu0 %vm136_vm0, %v18740_v42 }
 0x850   :  { %13358 = vmatpush3.bf16.msra.mxu0 %v16823_v23  ;;  %13333 = vmatprep.mubr.msk.bf16.mxu0 %vm136_vm0, %v18741_v20 }
 0x851   :  { %13359 = vmatprep.subr.bf16.mxu0 %v16829_v36 }
 0x854   :  { %13360 = vmatpush3.bf16.msra.mxu0 %v16829_v36 }
 0x855   :  { %13361 = vmatprep.subr.bf16.mxu0 %v16856_v4 }
 0x857   :  { %13334 = vmatmul.mubr.msk.bf16.gmra.mrb[240].mxu0 %vm136_vm0, %v18742_v15 }
 0x858   :  { %13362 = vmatpush3.bf16.msra.mxu0 %v16856_v4  ;;  %13365 = vmatprep.mubr.msk.bf16.mxu0 %vm136_vm0, %v18743_v11 }
 0x859   :  { %14236 = vmatprep.subr.msk.bf16.mxu0 %vm155_vm1, %v16860_v19 }
 0x85c   :  { %13364 = vmatpush3.bf16.msra.mxu0 %v16872_v34 }
 0x85d   :  { %13393 = vmatprep.subr.bf16.mxu0 %v16783_v55 }
 0x85f   :  { %13366 = vmatmul.mubr.msk.bf16.vlgmr.msra.gmra.mrb[244].mxu0 %vm136_vm0, %v18744_v0 }
 0x860   :  { %13394 = vmatpush3.bf16.msra.mxu0 %v16783_v55  ;;  %13369 = vmatprep.mubr.msk.bf16.mxu0 %vm136_vm0, %v18745_v32 }
 0x861   :  { %13395 = vmatprep.subr.bf16.mxu0 %v16789_v18 }
 0x864   :  { %13396 = vmatpush3.bf16.msra.mxu0 %v16789_v18 }
 0x865   :  { %13397 = vmatprep.subr.bf16.mxu0 %v16823_v23 }
 0x867   :  { %13370 = vmatmul.mubr.msk.bf16.gmra.mrb[248].mxu0 %vm136_vm0, %v18746_v41 }
 0x868   :  { %13398 = vmatpush3.bf16.msra.mxu0 %v16823_v23  ;;  %13373 = vmatprep.mubr.msk.bf16.mxu0 %vm136_vm0, %v18747_v33 }
 0x869   :  { %13399 = vmatprep.subr.bf16.mxu0 %v16829_v36 }
 0x86c   :  { %13400 = vmatpush3.bf16.msra.mxu0 %v16829_v36 }
 0x86d   :  { %13401 = vmatprep.subr.bf16.mxu0 %v16856_v4 }
 0x86f   :  { %13374 = vmatmul.mubr.msk.bf16.gmra.mrb[252].mxu0 %vm136_vm0, %v18748_v52 }
 0x870   :  { %13402 = vmatpush3.bf16.msra.mxu0 %v16856_v4  ;;  %13405 = vmatprep.mubr.msk.bf16.mxu0 %vm136_vm0, %v18749_v29 }
 0x871   :  { %14237 = vmatprep.subr.msk.bf16.mxu0 %vm155_vm1, %v16860_v19 }
 0x874   :  { %13404 = vmatpush3.bf16.msra.mxu0 %v16872_v34 }
 0x877   :  { %13406 = vmatmul.mubr.msk.bf16.vlgmr.msra.gmra.mrb[0].mxu0 %vm136_vm0, %v18750_v60 }
 0x878   :  { %13409 = vmatprep.mubr.msk.bf16.mxu0 %vm136_vm0, %v18751_v37 }
 0x87f   :  { %13410 = vmatmul.mubr.msk.bf16.gmra.mrb[4].mxu0 %vm136_vm0, %v18752_v44 }
 0x880   :  { %13413 = vmatprep.mubr.msk.bf16.mxu0 %vm136_vm0, %v18753_v12 }
 0x887   :  { %13414 = vmatmul.mubr.msk.bf16.gmra.mrb[8].mxu0 %vm136_vm0, %v18754_v22 }
 0x888   :  { %13445 = vmatprep.mubr.msk.bf16.mxu0 %vm136_vm0, %v18755_v53 }
 0x8d2   :  { %v17057_v34 = vpop.f32.mrb[224].mxu1  ;;  %v17059_v59 = vpop.f32.mrb[196].mxu0 }
 0x8d3   :  { %v17061_v6 = vpop.f32.mrb[225].mxu1  ;;  %v17063_v25 = vpop.f32.mrb[197].mxu0 }
 0x8d4   :  { %v17065_v47 = vpop.f32.mrb[226].mxu1  ;;  %v17067_v57 = vpop.f32.mrb[198].mxu0 }
 0x8d5   :  { %v6057_v31 = vpack.c.bf16 %v17065_v47, %v17057_v34  ;;  %v17071_v63 = vpop.f32.mrb[227].mxu1  ;;  %v17075_v5 = vpop.f32.mrb[199].mxu0 }
 0x8d6   :  { %v6056_v26 = vpack.c.bf16 %v17071_v63, %v17061_v6  ;;  %v14363_v6 = vld [vmem:[%s18518_s5 + $0x148] sm:$0xff]  }
 0x8da   :  { %v17081_v58 = vpop.f32.mrb[228].mxu1  ;;  %v17083_v2 = vpop.f32.mrb[200].mxu0 }
 0x8db   :  { %v17085_v8 = vpop.f32.mrb[229].mxu1  ;;  %v17087_v14 = vpop.f32.mrb[201].mxu0 }
 0x8dc   :  { %v17089_v45 = vpop.f32.mrb[230].mxu1  ;;  %v17091_v49 = vpop.f32.mrb[202].mxu0 }
 0x8dd   :  { %v17095_v20 = vpop.f32.mrb[231].mxu1  ;;  %v17099_v11 = vpop.f32.mrb[203].mxu0 }
 0x8de   :  { %v18756_v63 = vpack.c.bf16 %v17095_v20, %v17085_v8  ;;  %v18757_v8 = vpack.c.bf16 %v17089_v45, %v17081_v58  ;;  %v18759_v45 = vpack.c.bf16 %v17075_v5, %v17063_v25  ;;  %v14365_v25 = vld [vmem:[%s18518_s5 + $0x158] sm:$0xff]   ;;  %v18760_v5 = vpack.c.bf16 %v17067_v57, %v17059_v59 }
 0x8e2   :  { %v17105_v32 = vpop.f32.mrb[232].mxu1  ;;  %v17107_v16 = vpop.f32.mrb[204].mxu0 }
 0x8e3   :  { %v17109_v41 = vpop.f32.mrb[233].mxu1  ;;  %v17111_v33 = vpop.f32.mrb[205].mxu0  ;;  %v6061_v58 = vpack.c.bf16 %v17105_v32, %v17105_v32 }
 0x8e4   :  { %v13120_v52 = vpop.f32.mrb[234].mxu1  ;;  %v13200_v29 = vpop.f32.mrb[206].mxu0 }
 0x8e5   :  { %v17113_v60 = vpop.f32.mrb[235].mxu1  ;;  %v17115_v37 = vpop.f32.mrb[207].mxu0 }
 0x8e6   :  { %v18758_v20 = vpack.c.bf16 %v17113_v60, %v17109_v41 }
 0x8ea   :  { %v13135_v22 = vpop.f32.mrb[236].mxu1  ;;  %v17121_v53 = vpop.f32.mrb[208].mxu0 }
 0x8eb   :  { %v6101_v3 = vpop.f32.mrb[237].mxu1  ;;  %v17123_v40 = vpop.f32.mrb[209].mxu0 }
 0x8ec   :  { %v13136_v61 = vpop.f32.mrb[238].mxu1  ;;  %v17125_v10 = vpop.f32.mrb[210].mxu0 }
 0x8ed   :  { %v6148_v52 = vpack.c.bf16 %v13136_v61, %v13135_v22  ;;  %v6104_v29 = vpop.f32.mrb[239].mxu1  ;;  %v17129_v17 = vpop.f32.mrb[211].mxu0 }
 0x8ee   :  { %v6147_v13 = vpack.c.bf16 %v6104_v29, %v6101_v3  ;;  %v14362_v3 = vld [vmem:[%s18518_s5 + $0x140] sm:$0xff]  }
 0x8f0   :  { %13149 = vmatprep.mubr.msk.bf16.mxu1 %vm2488_vm4, %v6147_v13 }
 0x8f1   :  { %13150 = vmatmul.mubr.msk.bf16.vlgmr.msra.gmra.mrb[248].mxu1 %vm2488_vm4, %v6148_v52 }
 0x8f2   :  { %v13139_v1 = vpop.f32.mrb[240].mxu1  ;;  %13162 = vmatpush3.bf16.msra.mxu1 %v14360_v56  ;;  %v17138_v61 = vpop.f32.mrb[212].mxu0 }
 0x8f3   :  { %v6117_v22 = vpop.f32.mrb[241].mxu1  ;;  %13163 = vmatprep.subr.bf16.mxu1 %v14361_v27  ;;  %v17143_v29 = vpop.f32.mrb[213].mxu0 }
 0x8f4   :  { %v13140_v7 = vpop.f32.mrb[242].mxu1  ;;  %v17145_v9 = vpop.f32.mrb[214].mxu0 }
 0x8f5   :  { %v6150_v12 = vpack.c.bf16 %v13140_v7, %v13139_v1  ;;  %v6120_v15 = vpop.f32.mrb[243].mxu1  ;;  %v17149_v52 = vpop.f32.mrb[215].mxu0 }
 0x8f6   :  { %v6149_v56 = vpack.c.bf16 %v6120_v15, %v6117_v22  ;;  %13164 = vmatpush3.bf16.msra.mxu1 %v14361_v27  ;;  %v6672_v0 = vpack.c.bf16 %v17149_v52, %v17143_v29  ;;  %v18766_v29 = vpack.c.bf16 %v17145_v9, %v17138_v61 }
 0x8f7   :  { %13201 = vmatprep.subr.bf16.mxu1 %v14362_v3 }
 0x8f8   :  { %13153 = vmatprep.mubr.msk.bf16.mxu1 %vm2488_vm4, %v6149_v56 }
 0x8f9   :  { %13154 = vmatmul.mubr.msk.bf16.gmra.mrb[252].mxu1 %vm2488_vm4, %v6150_v12 }
 0x8fa   :  { %v13143_v39 = vpop.f32.mrb[244].mxu1  ;;  %v17155_v38 = vpop.f32.mrb[216].mxu0 }
 0x8fb   :  { %v6133_v1 = vpop.f32.mrb[245].mxu1  ;;  %v17157_v7 = vpop.f32.mrb[217].mxu0  ;;  %v6152_v22 = vpack.c.bf16 %v13143_v39, %v13143_v39  ;;  %v6675_v9 = vpack.c.bf16 %v17155_v38, %v17155_v38  ;;  %v14369_v38 = vld [vmem:[%s18518_s5 + $0x178] sm:$0xff]  }
 0x8fc   :  { %v13144_v44 = vpop.f32.mrb[246].mxu1  ;;  %v13240_v13 = vpop.f32.mrb[218].mxu0 }
 0x8fd   :  { %v6136_v42 = vpop.f32.mrb[247].mxu1  ;;  %v17159_v35 = vpop.f32.mrb[219].mxu0 }
 0x8fe   :  { %v6151_v27 = vpack.c.bf16 %v6136_v42, %v6133_v1  ;;  %v6674_v15 = vpack.c.bf16 %v17159_v35, %v17157_v7  ;;  %v14364_v1 = vld [vmem:[%s18518_s5 + $0x150] sm:$0xff]  }
 0x900   :  { %13157 = vmatprep.mubr.msk.bf16.mxu1 %vm2488_vm4, %v6151_v27 }
 0x901   :  { %13158 = vmatmul.mubr.msk.bf16.gmra.mrb[0].mxu1 %vm2488_vm4, %v6152_v22 }
 0x902   :  { %13165 = vmatprep.mubr.msk.bf16.mxu1 %vm2488_vm4, %v6056_v26  ;;  %v17169_v12 = vpop.f32.mrb[220].mxu0 }
 0x903   :  { %v17171_v44 = vpop.f32.mrb[221].mxu0 }
 0x904   :  { %v17173_v13 = vpop.f32.mrb[222].mxu0 }
 0x905   :  { %v17177_v56 = vpop.f32.mrb[223].mxu0 }
 0x906   :  { %v7007_v39 = vpack.c.bf16 %v17177_v56, %v17171_v44 }
 0x909   :  { %13166 = vmatmul.mubr.msk.bf16.vlgmr.msra.gmra.mrb[248].mxu1 %vm2488_vm4, %v6057_v31 }
 0x90a   :  { %13169 = vmatprep.mubr.msk.bf16.mxu1 %vm2488_vm4, %v18756_v63  ;;  %13202 = vmatpush3.bf16.msra.mxu1 %v14362_v3  ;;  %v17192_v26 = vpop.f32.mrb[224].mxu0 }
 0x90b   :  { %13203 = vmatprep.subr.bf16.mxu1 %v14363_v6  ;;  %v17197_v27 = vpop.f32.mrb[225].mxu0 }
 0x90c   :  { %v17199_v22 = vpop.f32.mrb[226].mxu0 }
 0x90d   :  { %v17203_v47 = vpop.f32.mrb[227].mxu0  ;;  %v18769_v44 = vpack.c.bf16 %v17199_v22, %v17192_v26  ;;  %v14374_v22 = vld [vmem:[%s18518_s5 + $0x1a0] sm:$0xff]  }
 0x90e   :  { %13204 = vmatpush3.bf16.msra.mxu1 %v14363_v6 }
 0x90f   :  { %13241 = vmatprep.subr.bf16.mxu1 %v14364_v1 }
 0x911   :  { %13170 = vmatmul.mubr.msk.bf16.gmra.mrb[252].mxu1 %vm2488_vm4, %v18757_v8  ;;  %v14366_v8 = vld [vmem:[%s18518_s5 + $0x160] sm:$0xff]  }
 0x912   :  { %13173 = vmatprep.mubr.msk.bf16.mxu1 %vm2488_vm4, %v18758_v20  ;;  %v17215_v3 = vpop.f32.mrb[228].mxu0 }
 0x913   :  { %v17217_v63 = vpop.f32.mrb[229].mxu0 }
 0x914   :  { %v13296_v34 = vpop.f32.mrb[230].mxu0 }
 0x915   :  { %v17219_v6 = vpop.f32.mrb[231].mxu0 }
 0x919   :  { %13174 = vmatmul.mubr.msk.bf16.gmra.mrb[4].mxu1 %vm2488_vm4, %v6061_v58  ;;  %v18761_v58 = vpack.c.bf16 %v17099_v11, %v17087_v14  ;;  %v18762_v11 = vpack.c.bf16 %v17091_v49, %v17083_v2  ;;  %v6463_v2 = vpack.c.bf16 %v17107_v16, %v17107_v16  ;;  %v18764_v49 = vpack.c.bf16 %v17129_v17, %v17123_v40  ;;  %v14367_v17 = vld [vmem:[%s18518_s5 + $0x168] sm:$0xff]  }
 0x91a   :  { %13205 = vmatprep.mubr.msk.bf16.mxu1 %vm2488_vm4, %v18759_v45  ;;  %v17230_v41 = vpop.f32.mrb[232].mxu0  ;;  %v18765_v40 = vpack.c.bf16 %v17125_v10, %v17121_v53 }
 0x91b   :  { %v17232_v60 = vpop.f32.mrb[233].mxu0 }
 0x91c   :  { %v17234_v34 = vpop.f32.mrb[234].mxu0 }
 0x91d   :  { %v17238_v20 = vpop.f32.mrb[235].mxu0  ;;  %v18772_v26 = vpack.c.bf16 %v17234_v34, %v17230_v41 }
 0x91e   :  { %v18771_v56 = vpack.c.bf16 %v17238_v20, %v17232_v60 }
 0x921   :  { %13206 = vmatmul.mubr.msk.bf16.vlgmr.msra.gmra.mrb[248].mxu1 %vm2488_vm4, %v18760_v5 }
 0x922   :  { %13242 = vmatpush3.bf16.msra.mxu1 %v14364_v1  ;;  %13209 = vmatprep.mubr.msk.bf16.mxu1 %vm2488_vm4, %v18761_v58  ;;  %v17253_v45 = vpop.f32.mrb[236].mxu0  ;;  %v18763_v1 = vpack.c.bf16 %v17115_v37, %v17111_v33 }
 0x923   :  { %13243 = vmatprep.subr.bf16.mxu1 %v14365_v25  ;;  %v17258_v32 = vpop.f32.mrb[237].mxu0 }
 0x924   :  { %v17260_v31 = vpop.f32.mrb[238].mxu0 }
 0x925   :  { %v17264_v57 = vpop.f32.mrb[239].mxu0 }
 0x926   :  { %13244 = vmatpush3.bf16.msra.mxu1 %v14365_v25 }
 0x927   :  { %13257 = vmatprep.subr.bf16.mxu1 %v14366_v8 }
 0x929   :  { %13210 = vmatmul.mubr.msk.bf16.gmra.mrb[252].mxu1 %vm2488_vm4, %v18762_v11 }
 0x92a   :  { %13213 = vmatprep.mubr.msk.bf16.mxu1 %vm2488_vm4, %v18763_v1  ;;  %v17276_v5 = vpop.f32.mrb[240].mxu0 }
 0x92b   :  { %v17278_v58 = vpop.f32.mrb[241].mxu0 }
 0x92c   :  { %v13336_v59 = vpop.f32.mrb[242].mxu0 }
 0x92d   :  { %v17280_v25 = vpop.f32.mrb[243].mxu0 }
 0x931   :  { %13214 = vmatmul.mubr.msk.bf16.gmra.mrb[8].mxu1 %vm2488_vm4, %v6463_v2 }
 0x932   :  { %13245 = vmatprep.mubr.msk.bf16.mxu1 %vm2488_vm4, %v18764_v49  ;;  %v17291_v33 = vpop.f32.mrb[244].mxu0  ;;  %v14368_v49 = vld [vmem:[%s18518_s5 + $0x170] sm:$0xff]  }
 0x933   :  { %v17293_v37 = vpop.f32.mrb[245].mxu0 }
 0x934   :  { %v17295_v59 = vpop.f32.mrb[246].mxu0 }
 0x935   :  { %v17299_v1 = vpop.f32.mrb[247].mxu0  ;;  %v18777_v41 = vpack.c.bf16 %v17295_v59, %v17291_v33 }
 0x939   :  { %13246 = vmatmul.mubr.msk.bf16.vlgmr.msra.gmra.mrb[248].mxu1 %vm2488_vm4, %v18765_v40 }
 0x93a   :  { %13258 = vmatpush3.bf16.msra.mxu1 %v14366_v8  ;;  %13249 = vmatprep.mubr.msk.bf16.mxu1 %vm2488_vm4, %v6672_v0  ;;  %v17314_v2 = vpop.f32.mrb[248].mxu0 }
 0x93b   :  { %13259 = vmatprep.subr.bf16.mxu1 %v14367_v17  ;;  %v17319_v11 = vpop.f32.mrb[249].mxu0 }
 0x93c   :  { %v17321_v16 = vpop.f32.mrb[250].mxu0 }
 0x93d   :  { %v17325_v53 = vpop.f32.mrb[251].mxu0  ;;  %v18779_v34 = vpack.c.bf16 %v17321_v16, %v17314_v2 }
 0x93e   :  { %13260 = vmatpush3.bf16.msra.mxu1 %v14367_v17  ;;  %v18778_v60 = vpack.c.bf16 %v17325_v53, %v17319_v11 }
 0x93f   :  { %13297 = vmatprep.subr.bf16.mxu1 %v14368_v49 }
 0x941   :  { %13250 = vmatmul.mubr.msk.bf16.gmra.mrb[252].mxu1 %vm2488_vm4, %v18766_v29 }
 0x942   :  { %13253 = vmatprep.mubr.msk.bf16.mxu1 %vm2488_vm4, %v6674_v15  ;;  %v17337_v52 = vpop.f32.mrb[252].mxu0 }
 0x943   :  { %v17339_v8 = vpop.f32.mrb[253].mxu0 }
 0x944   :  { %v13376_v40 = vpop.f32.mrb[254].mxu0 }
 0x945   :  { %v17341_v17 = vpop.f32.mrb[255].mxu0 }
 0x946   :  { %v18780_v20 = vpack.c.bf16 %v17341_v17, %v17339_v8 }
 0x949   :  { %13254 = vmatmul.mubr.msk.bf16.gmra.mrb[12].mxu1 %vm2488_vm4, %v6675_v9  ;;  %v14370_v9 = vld [vmem:[%s18518_s5 + $0x180] sm:$0xff]  }
 0x94a   :  { %13261 = vmatprep.mubr.msk.bf16.mxu1 %vm2488_vm4, %v16783_v55  ;;  %v17350_v35 = vpop.f32.mrb[0].mxu0 }
 0x94b   :  { %v17352_v61 = vpop.f32.mrb[1].mxu0 }
 0x94c   :  { %v17354_v7 = vpop.f32.mrb[2].mxu0 }
 0x94d   :  { %v7600_v29 = vpop.f32.mrb[3].mxu0 }
 0x94e   :  { %v7643_v40 = vpack.c.bf16 %v7600_v29, %v17352_v61 }
 0x951   :  { %13262 = vmatmul.mubr.msk.bf16.vlgmr.msra.gmra.mrb[248].mxu1 %vm2488_vm4, %v16789_v18 }
 0x952   :  { %13265 = vmatprep.mubr.msk.bf16.mxu1 %vm2488_vm4, %v16823_v23  ;;  %13298 = vmatpush3.bf16.msra.mxu1 %v14368_v49  ;;  %v13411_v55 = vpop.f32.mrb[4].mxu0 }
 0x953   :  { %13299 = vmatprep.subr.bf16.mxu1 %v14369_v38  ;;  %v7613_v15 = vpop.f32.mrb[5].mxu0 }
 0x954   :  { %v13412_v10 = vpop.f32.mrb[6].mxu0 }
 0x955   :  { %v7646_v61 = vpack.c.bf16 %v13412_v10, %v13411_v55  ;;  %v7616_v29 = vpop.f32.mrb[7].mxu0 }
 0x956   :  { %13300 = vmatpush3.bf16.msra.mxu1 %v14369_v38  ;;  %v7645_v0 = vpack.c.bf16 %v7616_v29, %v7613_v15 }
 0x957   :  { %13337 = vmatprep.subr.bf16.mxu1 %v14370_v9 }
 0x959   :  { %13266 = vmatmul.mubr.msk.bf16.gmra.mrb[252].mxu1 %vm2488_vm4, %v16829_v36  ;;  %v14371_v36 = vld [vmem:[%s18518_s5 + $0x188] sm:$0xff]  }
 0x95a   :  { %13269 = vmatprep.mubr.msk.bf16.mxu1 %vm2488_vm4, %v16856_v4  ;;  %v13415_v18 = vpop.f32.mrb[8].mxu0  ;;  %v18767_v4 = vpack.c.bf16 %v17173_v13, %v17169_v12  ;;  %v18770_v12 = vpack.c.bf16 %v17219_v6, %v17217_v63  ;;  %v7012_v13 = vpack.c.bf16 %v17215_v3, %v17215_v3  ;;  %v18775_v3 = vpack.c.bf16 %v17280_v25, %v17278_v58 }
 0x95b   :  { %v7629_v23 = vpop.f32.mrb[9].mxu0  ;;  %v7224_v63 = vpack.c.bf16 %v17276_v5, %v17276_v5  ;;  %v18776_v6 = vpack.c.bf16 %v17299_v1, %v17293_v37  ;;  %v14467_v5 = vld [vmem:[%s18515_s1 + $0x58] sm:$0xff]  }
 0x95c   :  { %v13416_v49 = vpop.f32.mrb[10].mxu0 }
 0x95d   :  { %v7632_v14 = vpop.f32.mrb[11].mxu0 }
 0x95e   :  { %v7647_v42 = vpack.c.bf16 %v7632_v14, %v7629_v23  ;;  %v18768_v14 = vpack.c.bf16 %v17203_v47, %v17197_v27  ;;  %v18773_v27 = vpack.c.bf16 %v17264_v57, %v17258_v32  ;;  %v18774_v47 = vpack.c.bf16 %v17260_v31, %v17253_v45  ;;  %v14375_v31 = vld [vmem:[%s18518_s5 + $0x1a8] sm:$0xff]  }
 0x95f   :  { %v7436_v32 = vpack.c.bf16 %v17337_v52, %v17337_v52  ;;  %v18781_v45 = vpack.c.bf16 %v17354_v7, %v17350_v35  ;;  %v7648_v57 = vpack.c.bf16 %v13415_v18, %v13415_v18 }
 0x961   :  { %13270 = vmatmul.mubr.msk.bf16.gmra.mrb[16].mxu1 %vm2488_vm4, %v16860_v19  ;;  %v14372_v19 = vld [vmem:[%s18518_s5 + $0x190] sm:$0xff]  }
 0x962   :  { %13301 = vmatprep.mubr.msk.bf16.mxu1 %vm2488_vm4, %v7007_v39  ;;  %v14373_v39 = vld [vmem:[%s18518_s5 + $0x198] sm:$0xff]  }
 0x969   :  { %13302 = vmatmul.mubr.msk.bf16.vlgmr.msra.gmra.mrb[248].mxu1 %vm2488_vm4, %v18767_v4 }
 0x96a   :  { %13338 = vmatpush3.bf16.msra.mxu1 %v14370_v9  ;;  %13305 = vmatprep.mubr.msk.bf16.mxu1 %vm2488_vm4, %v18768_v14 }
 0x96b   :  { %13339 = vmatprep.subr.bf16.mxu1 %v14371_v36 }
 0x96e   :  { %13340 = vmatpush3.bf16.msra.mxu1 %v14371_v36 }
 0x96f   :  { %13377 = vmatprep.subr.bf16.mxu1 %v14372_v19 }
 0x971   :  { %13306 = vmatmul.mubr.msk.bf16.gmra.mrb[252].mxu1 %vm2488_vm4, %v18769_v44 }
 0x972   :  { %13309 = vmatprep.mubr.msk.bf16.mxu1 %vm2488_vm4, %v18770_v12 }
 0x979   :  { %13310 = vmatmul.mubr.msk.bf16.gmra.mrb[20].mxu1 %vm2488_vm4, %v7012_v13 }
 0x97a   :  { %13341 = vmatprep.mubr.msk.bf16.mxu1 %vm2488_vm4, %v18771_v56 }
 0x981   :  { %13342 = vmatmul.mubr.msk.bf16.vlgmr.msra.gmra.mrb[248].mxu1 %vm2488_vm4, %v18772_v26 }
 0x982   :  { %13378 = vmatpush3.bf16.msra.mxu1 %v14372_v19  ;;  %13345 = vmatprep.mubr.msk.bf16.mxu1 %vm2488_vm4, %v18773_v27 }
 0x983   :  { %13379 = vmatprep.subr.bf16.mxu1 %v14373_v39 }
 0x986   :  { %13380 = vmatpush3.bf16.msra.mxu1 %v14373_v39 }
 0x987   :  { %13417 = vmatprep.subr.bf16.mxu1 %v14374_v22 }
 0x989   :  { %13346 = vmatmul.mubr.msk.bf16.gmra.mrb[252].mxu1 %vm2488_vm4, %v18774_v47 }
 0x98a   :  { %13349 = vmatprep.mubr.msk.bf16.mxu1 %vm2488_vm4, %v18775_v3 }
 0x991   :  { %13350 = vmatmul.mubr.msk.bf16.gmra.mrb[24].mxu1 %vm2488_vm4, %v7224_v63 }
 0x992   :  { %13381 = vmatprep.mubr.msk.bf16.mxu1 %vm2488_vm4, %v18776_v6 }
 0x999   :  { %13382 = vmatmul.mubr.msk.bf16.vlgmr.msra.gmra.mrb[248].mxu1 %vm2488_vm4, %v18777_v41 }
 0x99a   :  { %13418 = vmatpush3.bf16.msra.mxu1 %v14374_v22  ;;  %13385 = vmatprep.mubr.msk.bf16.mxu1 %vm2488_vm4, %v18778_v60 }
 0x99b   :  { %13419 = vmatprep.subr.bf16.mxu1 %v14375_v31 }
 0x99e   :  { %13420 = vmatpush3.bf16.msra.mxu1 %v14375_v31 }
 0x9a1   :  { %13386 = vmatmul.mubr.msk.bf16.gmra.mrb[252].mxu1 %vm2488_vm4, %v18779_v34 }
 0x9a2   :  { %13389 = vmatprep.mubr.msk.bf16.mxu1 %vm2488_vm4, %v18780_v20 }
 0x9a9   :  { %13390 = vmatmul.mubr.msk.bf16.gmra.mrb[28].mxu1 %vm2488_vm4, %v7436_v32 }
 0x9aa   :  { %13421 = vmatprep.mubr.msk.bf16.mxu1 %vm2488_vm4, %v7643_v40 }
 0x9b1   :  { %13422 = vmatmul.mubr.msk.bf16.vlgmr.msra.gmra.mrb[248].mxu1 %vm2488_vm4, %v18781_v45 }
 0x9b2   :  { %13425 = vmatprep.mubr.msk.bf16.mxu1 %vm2488_vm4, %v7645_v0 }
 0x9b9   :  { %13426 = vmatmul.mubr.msk.bf16.gmra.mrb[252].mxu1 %vm2488_vm4, %v7646_v61 }
 0x9ba   :  { %13429 = vmatprep.mubr.msk.bf16.mxu1 %vm2488_vm4, %v7647_v42 }
 0x9c1   :  { %13430 = vmatmul.mubr.msk.bf16.gmra.mrb[32].mxu1 %vm2488_vm4, %v7648_v57 }
 0x9c2   :  { %13525 = vmatprep.mubr.msk.bf16.mxu1 %vm136_vm0, %v14467_v5 }
 0x9d4   :  { %v13159_v58 = vpop.f32.mrb[0].mxu1 }
 0x9d5   :  { %v6254_v25 = vpop.f32.mrb[1].mxu1 }
 0x9d6   :  { %v13160_v33 = vpop.f32.mrb[2].mxu1 }
 0x9d7   :  { %v6257_v37 = vpop.f32.mrb[3].mxu1 }
 0x9ec   :  { %v13175_v59 = vpop.f32.mrb[4].mxu1 }
 0x9ed   :  { %v6373_v11 = vadd.f32 %v13175_v59, %v13159_v58  ;;  %v6364_v1 = vpop.f32.mrb[5].mxu1  ;;  %v11036_v58 = vld [vmem:[%s18519_s6 + $0x2] ss:$0 sm:$0xff] }
 0x9ee   :  { %v6365_v16 = vadd.f32 %v6364_v1, %v6254_v25  ;;  %v13176_v2 = vpop.f32.mrb[6].mxu1 }
 0x9ef   :  { %v6367_v10 = vpop.f32.mrb[7].mxu1 }
 0x9f0   :  { %v6368_v42 = vadd.f32 %v6367_v10, %v6257_v37 }
 0xa04   :  { %v13215_v53 = vpop.f32.mrb[8].mxu1 }
 0xa05   :  { %v6589_v0 = vadd.f32 %v13215_v53, %v6373_v11  ;;  %v6565_v52 = vpop.f32.mrb[9].mxu1 }
 0xa06   :  { %v6587_v8 = vadd.f32 %v6565_v52, %v6365_v16  ;;  %v13216_v17 = vpop.f32.mrb[10].mxu1 }
 0xa07   :  { %v6568_v35 = vpop.f32.mrb[11].mxu1 }
 0xa08   :  { %v6588_v7 = vadd.f32 %v6568_v35, %v6368_v42 }
 0xa1c   :  { %v13255_v15 = vpop.f32.mrb[12].mxu1 }
 0xa1d   :  { %v6801_v40 = vadd.f32 %v13255_v15, %v6589_v0  ;;  %v6777_v38 = vpop.f32.mrb[13].mxu1 }
 0xa1e   :  { %v6799_v55 = vadd.f32 %v6777_v38, %v6587_v8  ;;  %v13256_v9 = vpop.f32.mrb[14].mxu1 }
 0xa1f   :  { %v6780_v61 = vpop.f32.mrb[15].mxu1 }
 0xa20   :  { %v6800_v29 = vadd.f32 %v6780_v61, %v6588_v7 }
 0xa34   :  { %v13271_v18 = vpop.f32.mrb[16].mxu1 }
 0xa35   :  { %v6926_v23 = vadd.f32 %v13271_v18, %v6801_v40  ;;  %v6902_v49 = vpop.f32.mrb[17].mxu1 }
 0xa36   :  { %v6924_v36 = vadd.f32 %v6902_v49, %v6799_v55  ;;  %v13272_v4 = vpop.f32.mrb[18].mxu1 }
 0xa37   :  { %v6905_v14 = vpop.f32.mrb[19].mxu1 }
 0xa38   :  { %v6925_v19 = vadd.f32 %v6905_v14, %v6800_v29 }
 0xa4c   :  { %v13311_v44 = vpop.f32.mrb[20].mxu1 }
 0xa4d   :  { %v7138_v12 = vadd.f32 %v13311_v44, %v6926_v23  ;;  %v7114_v13 = vpop.f32.mrb[21].mxu1 }
 0xa4e   :  { %v7136_v56 = vadd.f32 %v7114_v13, %v6924_v36  ;;  %v13312_v39 = vpop.f32.mrb[22].mxu1 }
 0xa4f   :  { %v7117_v26 = vpop.f32.mrb[23].mxu1 }
 0xa50   :  { %v7137_v27 = vadd.f32 %v7117_v26, %v6925_v19 }
 0xa64   :  { %v13351_v22 = vpop.f32.mrb[24].mxu1 }
 0xa65   :  { %v7350_v47 = vadd.f32 %v13351_v22, %v7138_v12  ;;  %v7326_v3 = vpop.f32.mrb[25].mxu1 }
 0xa66   :  { %v7348_v63 = vadd.f32 %v7326_v3, %v7136_v56  ;;  %v13352_v6 = vpop.f32.mrb[26].mxu1 }
 0xa67   :  { %v7329_v31 = vpop.f32.mrb[27].mxu1 }
 0xa68   :  { %v7349_v41 = vadd.f32 %v7329_v31, %v7137_v27 }
 0xa7c   :  { %v13391_v60 = vpop.f32.mrb[28].mxu1 }
 0xa7d   :  { %v7562_v34 = vadd.f32 %v13391_v60, %v7350_v47  ;;  %v7538_v20 = vpop.f32.mrb[29].mxu1  ;;  %v14469_v60 = vld [vmem:[%s18515_s1 + $0x60] sm:$0xff]  }
 0xa7e   :  { %v7560_v32 = vadd.f32 %v7538_v20, %v7348_v63  ;;  %v13392_v45 = vpop.f32.mrb[30].mxu1  ;;  %v14471_v20 = vld [vmem:[%s18515_s1 + $0x68] sm:$0xff]  }
 0xa7f   :  { %v7541_v57 = vpop.f32.mrb[31].mxu1  ;;  %v14473_v45 = vld [vmem:[%s18515_s1 + $0x70] sm:$0xff]  }
 0xa80   :  { %v7561_v5 = vadd.f32 %v7541_v57, %v7349_v41  ;;  %v14468_v41 = vld [vmem:[%s18515_s1 + $0x8] sm:$0xff]   ;;  %v14474_v57 = vld [vmem:[%s18515_s1 + $0x20] sm:$0xff]  }
 0xa84   :  { %v13423_v25 = vpop.f32.mrb[248].mxu1 }
 0xa85   :  { %v7782_v33 = vadd.f32 %v13423_v25, %v11036_v58  ;;  %v7718_v37 = vpop.f32.mrb[249].mxu1  ;;  %v14477_v25 = vld [vmem:[%s18515_s1 + $0x80] ss:$0 sps:$4 sm:$0x33]  }
 0xa86   :  { %v7780_v59 = vadd.f32 %v11036_v58, %v7718_v37  ;;  %v13424_v11 = vpop.f32.mrb[250].mxu1  ;;  %v14479_v37 = vld [vmem:[%s18515_s1 + $0x84] sm:$0xff]  }
 0xa87   :  { %v7783_v1 = vadd.f32 %v13424_v11, %v11036_v58  ;;  %v7721_v16 = vpop.f32.mrb[251].mxu1  ;;  %v7793_v10 = vmax.f32 %v7782_v33, 0.0  ;;  %v14478_v33 = vld [vmem:[%s18515_s1 + $0x2c] sm:$0xff]  }
 0xa88   :  { %v7781_v2 = vadd.f32 %v11036_v58, %v7721_v16  ;;  %v7791_v53 = vmax.f32 %v7780_v59, 0.0  ;;  %v14480_v59 = vld [vmem:[%s18515_s1 + $0x34] sm:$0xff]   ;;  %v14481_v11 = vld [vmem:[%s18515_s1 + $0x8c] sm:$0xff]  }
 0xa89   :  { %v7794_v42 = vmax.f32 %v7783_v1, 0.0  ;;  %v14482_v1 = vld [vmem:[%s18515_s1 + $0x3c] sm:$0xff]   ;;  %v14483_v16 = vld [vmem:[%s18515_s1 + $0x94] sm:$0xff]  }
 0xa8a   :  { %v7792_v0 = vmax.f32 %v7781_v2, 0.0  ;;  %v14484_v2 = vld [vmem:[%s18515_s1 + $0x44] sm:$0xff]  }
 0xa8b   :  { %v17475_v52 = vpack.c.bf16 %v7794_v42, %v7793_v10  ;;  %v14485_v10 = vld [vmem:[%s18515_s1 + $0x9c] sm:$0xff]   ;;  %v14486_v42 = vld [vmem:[%s18515_s1 + $0x4c] sm:$0xff]  }
 0xa8c   :  { %v17477_v8 = vpack.c.bf16 %v7792_v0, %v7791_v53  ;;  %v13427_v17 = vpop.f32.mrb[252].mxu1  ;;  %v14487_v53 = vld [vmem:[%s18515_s1 + $0xa4] sm:$0xff]   ;;  %v14488_v0 = vld [vmem:[%s18515_s1 + $0x54] ss:$0 sps:$4 sm:$0x33]  }
 0xa8d   :  { %v7786_v35 = vadd.f32 %v13427_v17, %v11036_v58  ;;  %v7734_v7 = vpop.f32.mrb[253].mxu1  ;;  %v14489_v17 = vld [vmem:[%s18515_s1 + $0xac] ss:$0 sps:$4 sm:$0x33]  }
 0xa8e   :  { %v7784_v15 = vadd.f32 %v11036_v58, %v7734_v7  ;;  %v13428_v40 = vpop.f32.mrb[254].mxu1  ;;  %13433 = vmatprep.subr.bf16.mxu0 %v17477_v8  ;;  %13513 = vmatprep.subr.bf16.mxu1 %v17477_v8  ;;  %v14491_v7 = vld [vmem:[%s18515_s1 + $0xe4] sm:$0xff]  }
 0xa8f   :  { %v7787_v38 = vadd.f32 %v13428_v40, %v11036_v58  ;;  %v7737_v55 = vpop.f32.mrb[255].mxu1  ;;  %13434 = vmatpush3.bf16.msra.mxu0 %v17477_v8  ;;  %13514 = vmatpush3.bf16.msra.mxu1 %v17477_v8  ;;  %v7797_v61 = vmax.f32 %v7786_v35, 0.0  ;;  %v14490_v35 = vld [vmem:[%s18515_s1 + $0xdc] sm:$0xff]   ;;  %v14493_v40 = vld [vmem:[%s18515_s1 + $0xf4] sm:$0xff]  }
 0xa90   :  { %v7785_v9 = vadd.f32 %v11036_v58, %v7737_v55  ;;  %13435 = vmatprep.subr.bf16.mxu0 %v17475_v52  ;;  %13515 = vmatprep.subr.bf16.mxu1 %v17475_v52  ;;  %v7795_v18 = vmax.f32 %v7784_v15, 0.0  ;;  %v14492_v15 = vld [vmem:[%s18515_s1 + $0xec] sm:$0xff]   ;;  %v14495_v55 = vld [vmem:[%s18515_s1 + $0x104] ss:$0 sps:$4 sm:$0x33]  }
 0xa91   :  { %v7798_v29 = vmax.f32 %v7787_v38, 0.0  ;;  %v14494_v38 = vld [vmem:[%s18515_s1 + $0xfc] sm:$0xff]  }
 0xa92   :  { %v7796_v23 = vmax.f32 %v7785_v9, 0.0  ;;  %v14496_v9 = vld [vmem:[%s18515_s1 + $0x108] sm:$0xff]  }
 0xa93   :  { %v17485_v49 = vpack.c.bf16 %v7798_v29, %v7797_v61  ;;  %13436 = vmatpush3.bf16.msra.mxu0 %v17475_v52  ;;  %13516 = vmatpush3.bf16.msra.mxu1 %v17475_v52  ;;  %v14497_v61 = vld [vmem:[%s18515_s1 + $0x110] sm:$0xff]   ;;  %v14498_v29 = vld [vmem:[%s18515_s1 + $0x118] sm:$0xff]  }
 0xa94   :  { %v17489_v36 = vpack.c.bf16 %v7796_v23, %v7795_v18  ;;  %v13431_v4 = vpop.f32.mrb[32].mxu1  ;;  %v14499_v18 = vld [vmem:[%s18515_s1 + $0x120] sm:$0xff]   ;;  %v14500_v23 = vld [vmem:[%s18515_s1 + $0x128] sm:$0xff]  }
 0xa95   :  { %v7774_v14 = vadd.f32 %v13431_v4, %v7562_v34  ;;  %v7750_v19 = vpop.f32.mrb[33].mxu1  ;;  %v14470_v34 = vld [vmem:[%s18515_s1 + $0x10] sm:$0xff]  }
 0xa96   :  { %v7772_v44 = vadd.f32 %v7750_v19, %v7560_v32  ;;  %v13432_v12 = vpop.f32.mrb[34].mxu1  ;;  %13437 = vmatprep.subr.bf16.mxu0 %v17489_v36  ;;  %13517 = vmatprep.subr.bf16.mxu1 %v17489_v36  ;;  %v14472_v32 = vld [vmem:[%s18515_s1 + $0x18] sm:$0xff]   ;;  %v14501_v4 = vld [vmem:[%s18515_s1 + $0x130] ss:$0 sps:$4 sm:$0x33]   ;;  %v14376_v19 = vld [vmem:[%s18518_s5 + $0x1c0] sm:$0xff]  }
 0xa97   :  { %v7753_v13 = vpop.f32.mrb[35].mxu1  ;;  %13438 = vmatpush3.bf16.msra.mxu0 %v17489_v36  ;;  %13518 = vmatpush3.bf16.msra.mxu1 %v17489_v36  ;;  %v7790_v56 = vadd.f32 %v11036_v58, %v7774_v14  ;;  %v14502_v14 = vld [vmem:[%s18515_s1 + $0x134] sm:$0xff]   ;;  %v14504_v12 = vld [vmem:[%s18515_s1 + $0x144] sm:$0xff]  }
 0xa98   :  { %v7788_v39 = vadd.f32 %v11036_v58, %v7772_v44  ;;  %v7773_v26 = vadd.f32 %v7753_v13, %v7561_v5  ;;  %13439 = vmatprep.subr.bf16.mxu0 %v17485_v49  ;;  %13519 = vmatprep.subr.bf16.mxu1 %v17485_v49  ;;  %v14475_v5 = vld [vmem:[%s18515_s1 + $0x78] sm:$0xff]   ;;  %v14377_v13 = vld [vmem:[%s18518_s5 + $0x1c8] sm:$0xff]  }
 0xa99   :  { %v7801_v22 = vmax.f32 %v7790_v56, 0.0  ;;  %v14503_v44 = vld [vmem:[%s18515_s1 + $0x13c] sm:$0xff]   ;;  %v14505_v56 = vld [vmem:[%s18515_s1 + $0x14c] sm:$0xff]  }
 0xa9a   :  { %v7789_v27 = vadd.f32 %v11036_v58, %v7773_v26  ;;  %v7799_v47 = vmax.f32 %v7788_v39, 0.0  ;;  %v14476_v58 = vld [vmem:[%s18515_s1 + $0x28] ss:$0 sps:$4 sm:$0x33]   ;;  %v14506_v39 = vld [vmem:[%s18515_s1 + $0x154] sm:$0xff]  }
 0xa9b   :  { %13440 = vmatpush3.bf16.msra.mxu0 %v17485_v49  ;;  %13520 = vmatpush3.bf16.msra.mxu1 %v17485_v49  ;;  %v17501_v6 = vpack.c.bf16 %v7801_v22, %v7801_v22  ;;  %v14507_v26 = vld [vmem:[%s18515_s1 + $0x15c] ss:$0 sps:$4 sm:$0x33]   ;;  %v14378_v22 = vld [vmem:[%s18518_s5 + $0x1b0] sm:$0xff]  }
 0xa9c   :  { %v7800_v3 = vmax.f32 %v7789_v27, 0.0  ;;  %v14508_v27 = vld [vmem:[%s18515_s1 + $0x160] sm:$0xff]  }
 0xa9d   :  { %v17513_v31 = vsel %vm155_vm1, %v17501_v6, 0 }
 0xa9e   :  { %v17499_v63 = vpack.c.bf16 %v7800_v3, %v7799_v47  ;;  %v14509_v47 = vld [vmem:[%s18515_s1 + $0x168] sm:$0xff]   ;;  %v14510_v3 = vld [vmem:[%s18515_s1 + $0x170] sm:$0xff]  }
 0xaa0   :  { %13441 = vmatprep.subr.bf16.mxu0 %v17499_v63  ;;  %13521 = vmatprep.subr.bf16.mxu1 %v17499_v63 }
 0xaa1   :  { %13442 = vmatpush3.bf16.msra.mxu0 %v17499_v63  ;;  %13522 = vmatpush3.bf16.msra.mxu1 %v17499_v63 }
 0xaa2   :  { %14238 = vmatprep.subr.msk.bf16.mxu0 %vm155_vm1, %v17501_v6  ;;  %14240 = vmatprep.subr.msk.bf16.mxu1 %vm155_vm1, %v17501_v6 }
 0xaa5   :  { %13444 = vmatpush3.bf16.msra.mxu0 %v17513_v31  ;;  %13524 = vmatpush3.bf16.msra.mxu1 %v17513_v31 }
 0xaa6   :  { %13457 = vmatprep.subr.bf16.mxu0 %v17477_v8  ;;  %13553 = vmatprep.subr.bf16.mxu1 %v17477_v8 }
 0xaa8   :  { %13446 = vmatmul.mubr.msk.bf16.vlgmr.msra.gmra.mrb[20].mxu0 %vm136_vm0, %v14468_v41  ;;  %13526 = vmatmul.mubr.msk.bf16.vlgmr.msra.gmra.mrb[36].mxu1 %vm136_vm0, %v14469_v60  ;;  %v14511_v41 = vld [vmem:[%s18515_s1 + $0x178] sm:$0xff]   ;;  %v14513_v60 = vld [vmem:[%s18515_s1 + $0x188] ss:$0 sps:$4 sm:$0x33]  }
 0xaa9   :  { %13458 = vmatpush3.bf16.msra.mxu0 %v17477_v8  ;;  %13554 = vmatpush3.bf16.msra.mxu1 %v17477_v8 }
 0xaaa   :  { %13459 = vmatprep.subr.bf16.mxu0 %v17475_v52  ;;  %13555 = vmatprep.subr.bf16.mxu1 %v17475_v52 }
 0xaab   :  { %13449 = vmatprep.mubr.msk.bf16.mxu0 %vm136_vm0, %v14470_v34  ;;  %13529 = vmatprep.mubr.msk.bf16.mxu1 %vm136_vm0, %v14471_v20 }
 0xaad   :  { %13460 = vmatpush3.bf16.msra.mxu0 %v17475_v52  ;;  %13556 = vmatpush3.bf16.msra.mxu1 %v17475_v52 }
 0xaae   :  { %13461 = vmatprep.subr.bf16.mxu0 %v17489_v36  ;;  %13557 = vmatprep.subr.bf16.mxu1 %v17489_v36 }
 0xab0   :  { %13450 = vmatmul.mubr.msk.bf16.gmra.mrb[24].mxu0 %vm136_vm0, %v14472_v32  ;;  %13530 = vmatmul.mubr.msk.bf16.gmra.mrb[40].mxu1 %vm136_vm0, %v14473_v45 }
 0xab1   :  { %13462 = vmatpush3.bf16.msra.mxu0 %v17489_v36  ;;  %13558 = vmatpush3.bf16.msra.mxu1 %v17489_v36 }
 0xab2   :  { %13463 = vmatprep.subr.bf16.mxu0 %v17485_v49  ;;  %13559 = vmatprep.subr.bf16.mxu1 %v17485_v49 }
 0xab3   :  { %13453 = vmatprep.mubr.msk.bf16.mxu0 %vm136_vm0, %v14474_v57  ;;  %13533 = vmatprep.mubr.msk.bf16.mxu1 %vm136_vm0, %v14475_v5 }
 0xab5   :  { %13464 = vmatpush3.bf16.msra.mxu0 %v17485_v49  ;;  %13560 = vmatpush3.bf16.msra.mxu1 %v17485_v49 }
 0xab6   :  { %13465 = vmatprep.subr.bf16.mxu0 %v17499_v63  ;;  %13561 = vmatprep.subr.bf16.mxu1 %v17499_v63 }
 0xab8   :  { %13454 = vmatmul.mubr.msk.bf16.gmra.mrb[28].mxu0 %vm136_vm0, %v14476_v58  ;;  %13534 = vmatmul.mubr.msk.bf16.gmra.mrb[44].mxu1 %vm136_vm0, %v14477_v25 }
 0xab9   :  { %13466 = vmatpush3.bf16.msra.mxu0 %v17499_v63  ;;  %13562 = vmatpush3.bf16.msra.mxu1 %v17499_v63 }
 0xaba   :  { %14239 = vmatprep.subr.msk.bf16.mxu0 %vm155_vm1, %v17501_v6  ;;  %14241 = vmatprep.subr.msk.bf16.mxu1 %vm155_vm1, %v17501_v6 }
 0xabb   :  { %13469 = vmatprep.mubr.msk.bf16.mxu0 %vm136_vm0, %v14478_v33  ;;  %13565 = vmatprep.mubr.msk.bf16.mxu1 %vm136_vm0, %v14479_v37 }
 0xabd   :  { %13468 = vmatpush3.bf16.msra.mxu0 %v17513_v31  ;;  %13564 = vmatpush3.bf16.msra.mxu1 %v17513_v31 }
 0xabe   :  { %13609 = vmatprep.subr.bf16.mxu1 %v17477_v8  ;;  %13481 = vmatprep.subr.bf16.mxu0 %v14376_v19 }
 0xac0   :  { %13470 = vmatmul.mubr.msk.bf16.vlgmr.msra.gmra.mrb[32].mxu0 %vm136_vm0, %v14480_v59  ;;  %13566 = vmatmul.mubr.msk.bf16.vlgmr.msra.gmra.mrb[48].mxu1 %vm136_vm0, %v14481_v11 }
 0xac1   :  { %13610 = vmatpush3.bf16.msra.mxu1 %v17477_v8  ;;  %13473 = vmatprep.mubr.msk.bf16.mxu0 %vm136_vm0, %v14482_v1 }
 0xac2   :  { %13611 = vmatprep.subr.bf16.mxu1 %v17475_v52  ;;  %13569 = vmatprep.mubr.msk.bf16.mxu1 %vm136_vm0, %v14483_v16 }
 0xac3   :  { %13482 = vmatpush3.bf16.msra.mxu0 %v14376_v19 }
 0xac4   :  { %13483 = vmatprep.subr.bf16.mxu0 %v14377_v13 }
 0xac5   :  { %13612 = vmatpush3.bf16.msra.mxu1 %v17475_v52 }
 0xac6   :  { %13613 = vmatprep.subr.bf16.mxu1 %v17489_v36 }
 0xac7   :  { %13484 = vmatpush3.bf16.msra.mxu0 %v14377_v13 }
 0xac8   :  { %13474 = vmatmul.mubr.msk.bf16.gmra.mrb[36].mxu0 %vm136_vm0, %v14484_v2  ;;  %13570 = vmatmul.mubr.msk.bf16.gmra.mrb[52].mxu1 %vm136_vm0, %v14485_v10 }
 0xac9   :  { %13614 = vmatpush3.bf16.msra.mxu1 %v17489_v36  ;;  %13477 = vmatprep.mubr.msk.bf16.mxu0 %vm136_vm0, %v14486_v42 }
 0xaca   :  { %13615 = vmatprep.subr.bf16.mxu1 %v17485_v49  ;;  %13573 = vmatprep.mubr.msk.bf16.mxu1 %vm136_vm0, %v14487_v53 }
 0xacb   :  { %13497 = vmatprep.subr.bf16.mxu0 %v14378_v22 }
 0xacd   :  { %13616 = vmatpush3.bf16.msra.mxu1 %v17485_v49 }
 0xace   :  { %13617 = vmatprep.subr.bf16.mxu1 %v17499_v63 }
 0xad0   :  { %13478 = vmatmul.mubr.msk.bf16.gmra.mrb[40].mxu0 %vm136_vm0, %v14488_v0  ;;  %13574 = vmatmul.mubr.msk.bf16.gmra.mrb[56].mxu1 %vm136_vm0, %v14489_v17 }
 0xad1   :  { %13618 = vmatpush3.bf16.msra.mxu1 %v17499_v63  ;;  %13621 = vmatprep.mubr.msk.bf16.mxu1 %vm136_vm0, %v14490_v35 }
 0xad2   :  { %14242 = vmatprep.subr.msk.bf16.mxu1 %vm155_vm1, %v17501_v6 }
 0xad5   :  { %13620 = vmatpush3.bf16.msra.mxu1 %v17513_v31 }
 0xad6   :  { %13649 = vmatprep.subr.bf16.mxu1 %v17477_v8 }
 0xad8   :  { %13622 = vmatmul.mubr.msk.bf16.vlgmr.msra.gmra.mrb[60].mxu1 %vm136_vm0, %v14491_v7 }
 0xad9   :  { %13650 = vmatpush3.bf16.msra.mxu1 %v17477_v8  ;;  %13625 = vmatprep.mubr.msk.bf16.mxu1 %vm136_vm0, %v14492_v15 }
 0xada   :  { %13651 = vmatprep.subr.bf16.mxu1 %v17475_v52 }
 0xadd   :  { %13652 = vmatpush3.bf16.msra.mxu1 %v17475_v52 }
 0xade   :  { %13653 = vmatprep.subr.bf16.mxu1 %v17489_v36 }
 0xae0   :  { %13626 = vmatmul.mubr.msk.bf16.gmra.mrb[64].mxu1 %vm136_vm0, %v14493_v40 }
 0xae1   :  { %13654 = vmatpush3.bf16.msra.mxu1 %v17489_v36  ;;  %13629 = vmatprep.mubr.msk.bf16.mxu1 %vm136_vm0, %v14494_v38 }
 0xae2   :  { %13655 = vmatprep.subr.bf16.mxu1 %v17485_v49 }
 0xae5   :  { %13656 = vmatpush3.bf16.msra.mxu1 %v17485_v49 }
 0xae6   :  { %13657 = vmatprep.subr.bf16.mxu1 %v17499_v63 }
 0xae8   :  { %13630 = vmatmul.mubr.msk.bf16.gmra.mrb[68].mxu1 %vm136_vm0, %v14495_v55 }
 0xae9   :  { %13658 = vmatpush3.bf16.msra.mxu1 %v17499_v63  ;;  %13661 = vmatprep.mubr.msk.bf16.mxu1 %vm136_vm0, %v14496_v9 }
 0xaea   :  { %14243 = vmatprep.subr.msk.bf16.mxu1 %vm155_vm1, %v17501_v6 }
 0xaed   :  { %13660 = vmatpush3.bf16.msra.mxu1 %v17513_v31 }
 0xaee   :  { %13689 = vmatprep.subr.bf16.mxu1 %v17477_v8 }
 0xaf0   :  { %13662 = vmatmul.mubr.msk.bf16.vlgmr.msra.gmra.mrb[72].mxu1 %vm136_vm0, %v14497_v61 }
 0xaf1   :  { %13690 = vmatpush3.bf16.msra.mxu1 %v17477_v8  ;;  %13665 = vmatprep.mubr.msk.bf16.mxu1 %vm136_vm0, %v14498_v29 }
 0xaf2   :  { %13691 = vmatprep.subr.bf16.mxu1 %v17475_v52 }
 0xaf5   :  { %13692 = vmatpush3.bf16.msra.mxu1 %v17475_v52 }
 0xaf6   :  { %13693 = vmatprep.subr.bf16.mxu1 %v17489_v36 }
 0xaf8   :  { %13666 = vmatmul.mubr.msk.bf16.gmra.mrb[76].mxu1 %vm136_vm0, %v14499_v18 }
 0xaf9   :  { %13694 = vmatpush3.bf16.msra.mxu1 %v17489_v36  ;;  %13669 = vmatprep.mubr.msk.bf16.mxu1 %vm136_vm0, %v14500_v23 }
 0xafa   :  { %13695 = vmatprep.subr.bf16.mxu1 %v17485_v49 }
 0xafd   :  { %13696 = vmatpush3.bf16.msra.mxu1 %v17485_v49 }
 0xafe   :  { %13697 = vmatprep.subr.bf16.mxu1 %v17499_v63 }
 0xb00   :  { %13670 = vmatmul.mubr.msk.bf16.gmra.mrb[80].mxu1 %vm136_vm0, %v14501_v4 }
 0xb01   :  { %13698 = vmatpush3.bf16.msra.mxu1 %v17499_v63  ;;  %13701 = vmatprep.mubr.msk.bf16.mxu1 %vm136_vm0, %v14502_v14 }
 0xb02   :  { %14244 = vmatprep.subr.msk.bf16.mxu1 %vm155_vm1, %v17501_v6 }
 0xb05   :  { %13700 = vmatpush3.bf16.msra.mxu1 %v17513_v31 }
 0xb06   :  { %13729 = vmatprep.subr.bf16.mxu1 %v17477_v8 }
 0xb08   :  { %13702 = vmatmul.mubr.msk.bf16.vlgmr.msra.gmra.mrb[84].mxu1 %vm136_vm0, %v14503_v44 }
 0xb09   :  { %13730 = vmatpush3.bf16.msra.mxu1 %v17477_v8  ;;  %13705 = vmatprep.mubr.msk.bf16.mxu1 %vm136_vm0, %v14504_v12 }
 0xb0a   :  { %13731 = vmatprep.subr.bf16.mxu1 %v17475_v52 }
 0xb0d   :  { %13732 = vmatpush3.bf16.msra.mxu1 %v17475_v52 }
 0xb0e   :  { %13733 = vmatprep.subr.bf16.mxu1 %v17489_v36 }
 0xb10   :  { %13706 = vmatmul.mubr.msk.bf16.gmra.mrb[88].mxu1 %vm136_vm0, %v14505_v56 }
 0xb11   :  { %13734 = vmatpush3.bf16.msra.mxu1 %v17489_v36  ;;  %13709 = vmatprep.mubr.msk.bf16.mxu1 %vm136_vm0, %v14506_v39 }
 0xb12   :  { %13735 = vmatprep.subr.bf16.mxu1 %v17485_v49 }
 0xb15   :  { %13736 = vmatpush3.bf16.msra.mxu1 %v17485_v49 }
 0xb16   :  { %13737 = vmatprep.subr.bf16.mxu1 %v17499_v63 }
 0xb18   :  { %13710 = vmatmul.mubr.msk.bf16.gmra.mrb[92].mxu1 %vm136_vm0, %v14507_v26 }
 0xb19   :  { %13738 = vmatpush3.bf16.msra.mxu1 %v17499_v63  ;;  %13741 = vmatprep.mubr.msk.bf16.mxu1 %vm136_vm0, %v14508_v27 }
 0xb1a   :  { %14245 = vmatprep.subr.msk.bf16.mxu1 %vm155_vm1, %v17501_v6 }
 0xb1d   :  { %13740 = vmatpush3.bf16.msra.mxu1 %v17513_v31  ;;  %v14512_v31 = vld [vmem:[%s18515_s1 + $0x180] sm:$0xff]  }
 0xb20   :  { %13742 = vmatmul.mubr.msk.bf16.vlgmr.msra.gmra.mrb[96].mxu1 %vm136_vm0, %v14509_v47 }
 0xb21   :  { %13745 = vmatprep.mubr.msk.bf16.mxu1 %vm136_vm0, %v14510_v3 }
 0xb28   :  { %13746 = vmatmul.mubr.msk.bf16.gmra.mrb[100].mxu1 %vm136_vm0, %v14511_v41 }
 0xb29   :  { %13749 = vmatprep.mubr.msk.bf16.mxu1 %vm136_vm0, %v14512_v31 }
 0xb30   :  { %13750 = vmatmul.mubr.msk.bf16.gmra.mrb[104].mxu1 %vm136_vm0, %v14513_v60 }
 0xb7b   :  { %v17788_v34 = vpop.f32.mrb[20].mxu0  ;;  %v17790_v20 = vpop.f32.mrb[36].mxu1 }
 0xb7c   :  { %v17792_v32 = vpop.f32.mrb[21].mxu0  ;;  %v17794_v45 = vpop.f32.mrb[37].mxu1 }
 0xb7d   :  { %v17796_v57 = vpop.f32.mrb[22].mxu0  ;;  %v17798_v5 = vpop.f32.mrb[38].mxu1 }
 0xb7e   :  { %v7892_v58 = vpack.c.bf16 %v17796_v57, %v17788_v34  ;;  %v17802_v25 = vpop.f32.mrb[23].mxu0  ;;  %v17806_v37 = vpop.f32.mrb[39].mxu1 }
 0xb7f   :  { %v7891_v59 = vpack.c.bf16 %v17802_v25, %v17792_v32  ;;  %v14381_v32 = vld [vmem:[%s18518_s5 + $0x1d8] sm:$0xff]  }
 0xb83   :  { %v17812_v1 = vpop.f32.mrb[24].mxu0  ;;  %v17814_v16 = vpop.f32.mrb[40].mxu1 }
 0xb84   :  { %v17816_v2 = vpop.f32.mrb[25].mxu0  ;;  %v17818_v10 = vpop.f32.mrb[41].mxu1 }
 0xb85   :  { %v17820_v42 = vpop.f32.mrb[26].mxu0  ;;  %v17822_v53 = vpop.f32.mrb[42].mxu1 }
 0xb86   :  { %v17826_v17 = vpop.f32.mrb[27].mxu0  ;;  %v17830_v7 = vpop.f32.mrb[43].mxu1 }
 0xb87   :  { %v18782_v25 = vpack.c.bf16 %v17826_v17, %v17816_v2  ;;  %v18783_v2 = vpack.c.bf16 %v17820_v42, %v17812_v1  ;;  %v18785_v42 = vpack.c.bf16 %v17806_v37, %v17794_v45  ;;  %v14383_v45 = vld [vmem:[%s18518_s5 + $0x1e8] sm:$0xff]   ;;  %v18786_v37 = vpack.c.bf16 %v17798_v5, %v17790_v20 }
 0xb8b   :  { %v17836_v38 = vpop.f32.mrb[28].mxu0  ;;  %v17838_v55 = vpop.f32.mrb[44].mxu1 }
 0xb8c   :  { %v17840_v9 = vpop.f32.mrb[29].mxu0  ;;  %v17842_v61 = vpop.f32.mrb[45].mxu1  ;;  %v7896_v1 = vpack.c.bf16 %v17836_v38, %v17836_v38 }
 0xb8d   :  { %v13456_v29 = vpop.f32.mrb[30].mxu0  ;;  %v13536_v18 = vpop.f32.mrb[46].mxu1 }
 0xb8e   :  { %v17844_v23 = vpop.f32.mrb[31].mxu0  ;;  %v17846_v4 = vpop.f32.mrb[47].mxu1  ;;  %v14379_v29 = vld [vmem:[%s18518_s5 + $0x1b8] sm:$0xff]  }
 0xb8f   :  { %v18784_v17 = vpack.c.bf16 %v17844_v23, %v17840_v9 }
 0xb93   :  { %v13471_v44 = vpop.f32.mrb[32].mxu0  ;;  %v17852_v12 = vpop.f32.mrb[48].mxu1 }
 0xb94   :  { %v7936_v13 = vpop.f32.mrb[33].mxu0  ;;  %v17854_v56 = vpop.f32.mrb[49].mxu1 }
 0xb95   :  { %v13472_v39 = vpop.f32.mrb[34].mxu0  ;;  %v17856_v26 = vpop.f32.mrb[50].mxu1 }
 0xb96   :  { %v7983_v27 = vpack.c.bf16 %v13472_v39, %v13471_v44  ;;  %v7939_v47 = vpop.f32.mrb[35].mxu0  ;;  %v17860_v41 = vpop.f32.mrb[51].mxu1 }
 0xb97   :  { %v7982_v31 = vpack.c.bf16 %v7939_v47, %v7936_v13  ;;  %v14380_v13 = vld [vmem:[%s18518_s5 + $0x1d0] sm:$0xff]  }
 0xb99   :  { %13485 = vmatprep.mubr.msk.bf16.mxu0 %vm2488_vm4, %v7982_v31 }
 0xb9a   :  { %13486 = vmatmul.mubr.msk.bf16.vlgmr.msra.gmra.mrb[44].mxu0 %vm2488_vm4, %v7983_v27 }
 0xb9b   :  { %v13475_v18 = vpop.f32.mrb[36].mxu0  ;;  %13498 = vmatpush3.bf16.msra.mxu0 %v14378_v22  ;;  %v17869_v44 = vpop.f32.mrb[52].mxu1 }
 0xb9c   :  { %v7952_v39 = vpop.f32.mrb[37].mxu0  ;;  %13499 = vmatprep.subr.bf16.mxu0 %v14379_v29  ;;  %v17874_v47 = vpop.f32.mrb[53].mxu1 }
 0xb9d   :  { %v13476_v3 = vpop.f32.mrb[38].mxu0  ;;  %v17876_v60 = vpop.f32.mrb[54].mxu1 }
 0xb9e   :  { %v7985_v19 = vpack.c.bf16 %v13476_v3, %v13475_v18  ;;  %v7955_v35 = vpop.f32.mrb[39].mxu0  ;;  %v17880_v31 = vpop.f32.mrb[55].mxu1 }
 0xb9f   :  { %v7984_v22 = vpack.c.bf16 %v7955_v35, %v7952_v39  ;;  %13500 = vmatpush3.bf16.msra.mxu0 %v14379_v29  ;;  %v8507_v40 = vpack.c.bf16 %v17880_v31, %v17874_v47  ;;  %v18792_v47 = vpack.c.bf16 %v17876_v60, %v17869_v44 }
 0xba0   :  { %13537 = vmatprep.subr.bf16.mxu0 %v14380_v13 }
 0xba1   :  { %13489 = vmatprep.mubr.msk.bf16.mxu0 %vm2488_vm4, %v7984_v22 }
 0xba2   :  { %13490 = vmatmul.mubr.msk.bf16.gmra.mrb[48].mxu0 %vm2488_vm4, %v7985_v19 }
 0xba3   :  { %v13479_v33 = vpop.f32.mrb[40].mxu0  ;;  %v17886_v11 = vpop.f32.mrb[56].mxu1 }
 0xba4   :  { %v7968_v3 = vpop.f32.mrb[41].mxu0  ;;  %v17888_v18 = vpop.f32.mrb[57].mxu1  ;;  %v7987_v39 = vpack.c.bf16 %v13479_v33, %v13479_v33  ;;  %v8510_v60 = vpack.c.bf16 %v17886_v11, %v17886_v11  ;;  %v14387_v11 = vld [vmem:[%s18518_s5 + $0x208] sm:$0xff]  }
 0xba5   :  { %v13480_v14 = vpop.f32.mrb[42].mxu0  ;;  %v13576_v27 = vpop.f32.mrb[58].mxu1 }
 0xba6   :  { %v7971_v0 = vpop.f32.mrb[43].mxu0  ;;  %v17890_v15 = vpop.f32.mrb[59].mxu1 }
 0xba7   :  { %v7986_v35 = vpack.c.bf16 %v7971_v0, %v7968_v3  ;;  %v8509_v29 = vpack.c.bf16 %v17890_v15, %v17888_v18  ;;  %v14382_v3 = vld [vmem:[%s18518_s5 + $0x1e0] sm:$0xff]  }
 0xba9   :  { %13493 = vmatprep.mubr.msk.bf16.mxu0 %vm2488_vm4, %v7986_v35 }
 0xbaa   :  { %13494 = vmatmul.mubr.msk.bf16.gmra.mrb[12].mxu0 %vm2488_vm4, %v7987_v39 }
 0xbab   :  { %13501 = vmatprep.mubr.msk.bf16.mxu0 %vm2488_vm4, %v7891_v59  ;;  %v17900_v19 = vpop.f32.mrb[60].mxu1 }
 0xbac   :  { %v17902_v14 = vpop.f32.mrb[61].mxu1 }
 0xbad   :  { %v17904_v27 = vpop.f32.mrb[62].mxu1 }
 0xbae   :  { %v17908_v22 = vpop.f32.mrb[63].mxu1 }
 0xbaf   :  { %v8842_v33 = vpack.c.bf16 %v17908_v22, %v17902_v14 }
 0xbb2   :  { %13502 = vmatmul.mubr.msk.bf16.vlgmr.msra.gmra.mrb[44].mxu0 %vm2488_vm4, %v7892_v58 }
 0xbb3   :  { %13505 = vmatprep.mubr.msk.bf16.mxu0 %vm2488_vm4, %v18782_v25  ;;  %13538 = vmatpush3.bf16.msra.mxu0 %v14380_v13  ;;  %v17923_v59 = vpop.f32.mrb[64].mxu1 }
 0xbb4   :  { %13539 = vmatprep.subr.bf16.mxu0 %v14381_v32  ;;  %v17928_v35 = vpop.f32.mrb[65].mxu1 }
 0xbb5   :  { %v17930_v39 = vpop.f32.mrb[66].mxu1 }
 0xbb6   :  { %v17934_v57 = vpop.f32.mrb[67].mxu1  ;;  %v18795_v14 = vpack.c.bf16 %v17930_v39, %v17923_v59  ;;  %v14392_v39 = vld [vmem:[%s18518_s5 + $0x230] sm:$0xff]  }
 0xbb7   :  { %13540 = vmatpush3.bf16.msra.mxu0 %v14381_v32 }
 0xbb8   :  { %13577 = vmatprep.subr.bf16.mxu0 %v14382_v3 }
 0xbba   :  { %13506 = vmatmul.mubr.msk.bf16.gmra.mrb[48].mxu0 %vm2488_vm4, %v18783_v2  ;;  %v14384_v2 = vld [vmem:[%s18518_s5 + $0x1f0] sm:$0xff]  }
 0xbbb   :  { %13509 = vmatprep.mubr.msk.bf16.mxu0 %vm2488_vm4, %v18784_v17  ;;  %v17946_v13 = vpop.f32.mrb[68].mxu1 }
 0xbbc   :  { %v17948_v25 = vpop.f32.mrb[69].mxu1 }
 0xbbd   :  { %v13632_v34 = vpop.f32.mrb[70].mxu1 }
 0xbbe   :  { %v17950_v32 = vpop.f32.mrb[71].mxu1 }
 0xbc2   :  { %13510 = vmatmul.mubr.msk.bf16.gmra.mrb[16].mxu0 %vm2488_vm4, %v7896_v1  ;;  %v18787_v1 = vpack.c.bf16 %v17830_v7, %v17818_v10  ;;  %v18788_v7 = vpack.c.bf16 %v17822_v53, %v17814_v16  ;;  %v8298_v16 = vpack.c.bf16 %v17838_v55, %v17838_v55  ;;  %v18790_v53 = vpack.c.bf16 %v17860_v41, %v17854_v56  ;;  %v14385_v56 = vld [vmem:[%s18518_s5 + $0x1f8] sm:$0xff]  }
 0xbc3   :  { %13541 = vmatprep.mubr.msk.bf16.mxu0 %vm2488_vm4, %v18785_v42  ;;  %v17961_v9 = vpop.f32.mrb[72].mxu1  ;;  %v18791_v41 = vpack.c.bf16 %v17856_v26, %v17852_v12 }
 0xbc4   :  { %v17963_v23 = vpop.f32.mrb[73].mxu1 }
 0xbc5   :  { %v17965_v34 = vpop.f32.mrb[74].mxu1 }
 0xbc6   :  { %v17969_v17 = vpop.f32.mrb[75].mxu1  ;;  %v18798_v59 = vpack.c.bf16 %v17965_v34, %v17961_v9 }
 0xbc7   :  { %v18797_v22 = vpack.c.bf16 %v17969_v17, %v17963_v23 }
 0xbca   :  { %13542 = vmatmul.mubr.msk.bf16.vlgmr.msra.gmra.mrb[44].mxu0 %vm2488_vm4, %v18786_v37 }
 0xbcb   :  { %13578 = vmatpush3.bf16.msra.mxu0 %v14382_v3  ;;  %13545 = vmatprep.mubr.msk.bf16.mxu0 %vm2488_vm4, %v18787_v1  ;;  %v17984_v42 = vpop.f32.mrb[76].mxu1  ;;  %v18789_v3 = vpack.c.bf16 %v17846_v4, %v17842_v61 }
 0xbcc   :  { %13579 = vmatprep.subr.bf16.mxu0 %v14383_v45  ;;  %v17989_v38 = vpop.f32.mrb[77].mxu1 }
 0xbcd   :  { %v17991_v58 = vpop.f32.mrb[78].mxu1 }
 0xbce   :  { %v17995_v5 = vpop.f32.mrb[79].mxu1 }
 0xbcf   :  { %13580 = vmatpush3.bf16.msra.mxu0 %v14383_v45 }
 0xbd0   :  { %13593 = vmatprep.subr.bf16.mxu0 %v14384_v2 }
 0xbd2   :  { %13546 = vmatmul.mubr.msk.bf16.gmra.mrb[48].mxu0 %vm2488_vm4, %v18788_v7 }
 0xbd3   :  { %13549 = vmatprep.mubr.msk.bf16.mxu0 %vm2488_vm4, %v18789_v3  ;;  %v18007_v37 = vpop.f32.mrb[80].mxu1 }
 0xbd4   :  { %v18009_v1 = vpop.f32.mrb[81].mxu1 }
 0xbd5   :  { %v13672_v20 = vpop.f32.mrb[82].mxu1 }
 0xbd6   :  { %v18011_v45 = vpop.f32.mrb[83].mxu1 }
 0xbda   :  { %13550 = vmatmul.mubr.msk.bf16.gmra.mrb[52].mxu0 %vm2488_vm4, %v8298_v16 }
 0xbdb   :  { %13581 = vmatprep.mubr.msk.bf16.mxu0 %vm2488_vm4, %v18790_v53  ;;  %v18022_v61 = vpop.f32.mrb[84].mxu1  ;;  %v14386_v53 = vld [vmem:[%s18518_s5 + $0x200] sm:$0xff]  }
 0xbdc   :  { %v18024_v4 = vpop.f32.mrb[85].mxu1 }
 0xbdd   :  { %v18026_v20 = vpop.f32.mrb[86].mxu1 }
 0xbde   :  { %v18030_v3 = vpop.f32.mrb[87].mxu1  ;;  %v18803_v9 = vpack.c.bf16 %v18026_v20, %v18022_v61 }
 0xbe2   :  { %13582 = vmatmul.mubr.msk.bf16.vlgmr.msra.gmra.mrb[44].mxu0 %vm2488_vm4, %v18791_v41 }
 0xbe3   :  { %13594 = vmatpush3.bf16.msra.mxu0 %v14384_v2  ;;  %13585 = vmatprep.mubr.msk.bf16.mxu0 %vm2488_vm4, %v8507_v40  ;;  %v18045_v16 = vpop.f32.mrb[88].mxu1 }
 0xbe4   :  { %13595 = vmatprep.subr.bf16.mxu0 %v14385_v56  ;;  %v18050_v7 = vpop.f32.mrb[89].mxu1 }
 0xbe5   :  { %v18052_v55 = vpop.f32.mrb[90].mxu1 }
 0xbe6   :  { %v18056_v26 = vpop.f32.mrb[91].mxu1  ;;  %v18805_v34 = vpack.c.bf16 %v18052_v55, %v18045_v16 }
 0xbe7   :  { %13596 = vmatpush3.bf16.msra.mxu0 %v14385_v56  ;;  %v18804_v23 = vpack.c.bf16 %v18056_v26, %v18050_v7 }
 0xbe8   :  { %13633 = vmatprep.subr.bf16.mxu0 %v14386_v53 }
 0xbea   :  { %13586 = vmatmul.mubr.msk.bf16.gmra.mrb[48].mxu0 %vm2488_vm4, %v18792_v47 }
 0xbeb   :  { %13589 = vmatprep.mubr.msk.bf16.mxu0 %vm2488_vm4, %v8509_v29  ;;  %v18068_v31 = vpop.f32.mrb[92].mxu1 }
 0xbec   :  { %v18070_v2 = vpop.f32.mrb[93].mxu1 }
 0xbed   :  { %v13712_v41 = vpop.f32.mrb[94].mxu1 }
 0xbee   :  { %v18072_v56 = vpop.f32.mrb[95].mxu1 }
 0xbef   :  { %v18806_v17 = vpack.c.bf16 %v18072_v56, %v18070_v2 }
 0xbf2   :  { %13590 = vmatmul.mubr.msk.bf16.gmra.mrb[56].mxu0 %vm2488_vm4, %v8510_v60  ;;  %v14388_v60 = vld [vmem:[%s18518_s5 + $0x210] sm:$0xff]  }
 0xbf3   :  { %13597 = vmatprep.mubr.msk.bf16.mxu0 %vm2488_vm4, %v17477_v8  ;;  %v18081_v15 = vpop.f32.mrb[96].mxu1 }
 0xbf4   :  { %v18083_v44 = vpop.f32.mrb[97].mxu1 }
 0xbf5   :  { %v18085_v18 = vpop.f32.mrb[98].mxu1 }
 0xbf6   :  { %v9435_v47 = vpop.f32.mrb[99].mxu1 }
 0xbf7   :  { %v9478_v41 = vpack.c.bf16 %v9435_v47, %v18083_v44 }
 0xbfa   :  { %13598 = vmatmul.mubr.msk.bf16.vlgmr.msra.gmra.mrb[44].mxu0 %vm2488_vm4, %v17475_v52 }
 0xbfb   :  { %13601 = vmatprep.mubr.msk.bf16.mxu0 %vm2488_vm4, %v17489_v36  ;;  %13634 = vmatpush3.bf16.msra.mxu0 %v14386_v53  ;;  %v13747_v8 = vpop.f32.mrb[100].mxu1 }
 0xbfc   :  { %13635 = vmatprep.subr.bf16.mxu0 %v14387_v11  ;;  %v9448_v29 = vpop.f32.mrb[101].mxu1 }
 0xbfd   :  { %v13748_v12 = vpop.f32.mrb[102].mxu1 }
 0xbfe   :  { %v9481_v44 = vpack.c.bf16 %v13748_v12, %v13747_v8  ;;  %v9451_v47 = vpop.f32.mrb[103].mxu1 }
 0xbff   :  { %13636 = vmatpush3.bf16.msra.mxu0 %v14387_v11  ;;  %v9480_v40 = vpack.c.bf16 %v9451_v47, %v9448_v29  ;;  %v14395_v29 = vld [vmem:[%s18520_s7 + $0x8] sm:$0xff]  }
 0xc00   :  { %13673 = vmatprep.subr.bf16.mxu0 %v14388_v60 }
 0xc02   :  { %13602 = vmatmul.mubr.msk.bf16.gmra.mrb[48].mxu0 %vm2488_vm4, %v17485_v49  ;;  %v14389_v49 = vld [vmem:[%s18518_s5 + $0x218] sm:$0xff]  }
 0xc03   :  { %13605 = vmatprep.mubr.msk.bf16.mxu0 %vm2488_vm4, %v17499_v63  ;;  %v13751_v52 = vpop.f32.mrb[104].mxu1  ;;  %v18793_v63 = vpack.c.bf16 %v17904_v27, %v17900_v19  ;;  %v18796_v19 = vpack.c.bf16 %v17950_v32, %v17948_v25  ;;  %v8847_v27 = vpack.c.bf16 %v17946_v13, %v17946_v13  ;;  %v18801_v13 = vpack.c.bf16 %v18011_v45, %v18009_v1 }
 0xc04   :  { %v9464_v36 = vpop.f32.mrb[105].mxu1  ;;  %v9059_v25 = vpack.c.bf16 %v18007_v37, %v18007_v37  ;;  %v18802_v32 = vpack.c.bf16 %v18030_v3, %v18024_v4  ;;  %v14394_v4 = vld [vmem:[%s18520_s7] sm:$0xff]  }
 0xc05   :  { %v13752_v53 = vpop.f32.mrb[106].mxu1  ;;  %13769 = vmatprep.subr.bf16.mxu1 %v14394_v4 }
 0xc06   :  { %v9467_v10 = vpop.f32.mrb[107].mxu1  ;;  %13770 = vmatpush3.bf16.msra.mxu1 %v14394_v4 }
 0xc07   :  { %v9482_v0 = vpack.c.bf16 %v9467_v10, %v9464_v36  ;;  %v18794_v10 = vpack.c.bf16 %v17934_v57, %v17928_v35  ;;  %v18799_v35 = vpack.c.bf16 %v17995_v5, %v17989_v38  ;;  %v18800_v57 = vpack.c.bf16 %v17991_v58, %v17984_v42  ;;  %v14393_v58 = vld [vmem:[%s18518_s5 + $0x238] sm:$0xff]   ;;  %13771 = vmatprep.subr.bf16.mxu1 %v14395_v29 }
 0xc08   :  { %v9271_v38 = vpack.c.bf16 %v18068_v31, %v18068_v31  ;;  %v18807_v42 = vpack.c.bf16 %v18085_v18, %v18081_v15  ;;  %v9483_v5 = vpack.c.bf16 %v13751_v52, %v13751_v52 }
 0xc0a   :  { %13606 = vmatmul.mubr.msk.bf16.gmra.mrb[60].mxu0 %vm2488_vm4, %v17501_v6  ;;  %v14390_v6 = vld [vmem:[%s18518_s5 + $0x220] sm:$0xff]   ;;  %13772 = vmatpush3.bf16.msra.mxu1 %v14395_v29 }
 0xc0b   :  { %13637 = vmatprep.mubr.msk.bf16.mxu0 %vm2488_vm4, %v8842_v33  ;;  %v14391_v33 = vld [vmem:[%s18518_s5 + $0x228] sm:$0xff]  }
 0xc12   :  { %13638 = vmatmul.mubr.msk.bf16.vlgmr.msra.gmra.mrb[44].mxu0 %vm2488_vm4, %v18793_v63 }
 0xc13   :  { %13674 = vmatpush3.bf16.msra.mxu0 %v14388_v60  ;;  %13641 = vmatprep.mubr.msk.bf16.mxu0 %vm2488_vm4, %v18794_v10 }
 0xc14   :  { %13675 = vmatprep.subr.bf16.mxu0 %v14389_v49 }
 0xc17   :  { %13676 = vmatpush3.bf16.msra.mxu0 %v14389_v49 }
 0xc18   :  { %13713 = vmatprep.subr.bf16.mxu0 %v14390_v6 }
 0xc1a   :  { %13642 = vmatmul.mubr.msk.bf16.gmra.mrb[48].mxu0 %vm2488_vm4, %v18795_v14 }
 0xc1b   :  { %13645 = vmatprep.mubr.msk.bf16.mxu0 %vm2488_vm4, %v18796_v19 }
 0xc22   :  { %13646 = vmatmul.mubr.msk.bf16.gmra.mrb[64].mxu0 %vm2488_vm4, %v8847_v27 }
 0xc23   :  { %13677 = vmatprep.mubr.msk.bf16.mxu0 %vm2488_vm4, %v18797_v22 }
 0xc2a   :  { %13678 = vmatmul.mubr.msk.bf16.vlgmr.msra.gmra.mrb[44].mxu0 %vm2488_vm4, %v18798_v59 }
 0xc2b   :  { %13714 = vmatpush3.bf16.msra.mxu0 %v14390_v6  ;;  %13681 = vmatprep.mubr.msk.bf16.mxu0 %vm2488_vm4, %v18799_v35 }
 0xc2c   :  { %13715 = vmatprep.subr.bf16.mxu0 %v14391_v33 }
 0xc2f   :  { %13716 = vmatpush3.bf16.msra.mxu0 %v14391_v33 }
 0xc30   :  { %13753 = vmatprep.subr.bf16.mxu0 %v14392_v39 }
 0xc32   :  { %13682 = vmatmul.mubr.msk.bf16.gmra.mrb[48].mxu0 %vm2488_vm4, %v18800_v57 }
 0xc33   :  { %13685 = vmatprep.mubr.msk.bf16.mxu0 %vm2488_vm4, %v18801_v13 }
 0xc3a   :  { %13686 = vmatmul.mubr.msk.bf16.gmra.mrb[68].mxu0 %vm2488_vm4, %v9059_v25 }
 0xc3b   :  { %13717 = vmatprep.mubr.msk.bf16.mxu0 %vm2488_vm4, %v18802_v32 }
 0xc42   :  { %13718 = vmatmul.mubr.msk.bf16.vlgmr.msra.gmra.mrb[44].mxu0 %vm2488_vm4, %v18803_v9 }
 0xc43   :  { %13754 = vmatpush3.bf16.msra.mxu0 %v14392_v39  ;;  %13721 = vmatprep.mubr.msk.bf16.mxu0 %vm2488_vm4, %v18804_v23 }
 0xc44   :  { %13755 = vmatprep.subr.bf16.mxu0 %v14393_v58 }
 0xc47   :  { %13756 = vmatpush3.bf16.msra.mxu0 %v14393_v58 }
 0xc4a   :  { %13722 = vmatmul.mubr.msk.bf16.gmra.mrb[48].mxu0 %vm2488_vm4, %v18805_v34 }
 0xc4b   :  { %13725 = vmatprep.mubr.msk.bf16.mxu0 %vm2488_vm4, %v18806_v17 }
 0xc52   :  { %13726 = vmatmul.mubr.msk.bf16.gmra.mrb[72].mxu0 %vm2488_vm4, %v9271_v38 }
 0xc53   :  { %13757 = vmatprep.mubr.msk.bf16.mxu0 %vm2488_vm4, %v9478_v41 }
 0xc5a   :  { %13758 = vmatmul.mubr.msk.bf16.vlgmr.msra.gmra.mrb[44].mxu0 %vm2488_vm4, %v18807_v42 }
 0xc5b   :  { %13761 = vmatprep.mubr.msk.bf16.mxu0 %vm2488_vm4, %v9480_v40 }
 0xc62   :  { %13762 = vmatmul.mubr.msk.bf16.gmra.mrb[48].mxu0 %vm2488_vm4, %v9481_v44 }
 0xc63   :  { %13765 = vmatprep.mubr.msk.bf16.mxu0 %vm2488_vm4, %v9482_v0 }
 0xc6a   :  { %13766 = vmatmul.mubr.msk.bf16.gmra.mrb[76].mxu0 %vm2488_vm4, %v9483_v5 }
 0xc7d   :  { %v13495_v37 = vpop.f32.mrb[12].mxu0 }
 0xc7e   :  { %v8089_v1 = vpop.f32.mrb[13].mxu0 }
 0xc7f   :  { %v13496_v45 = vpop.f32.mrb[14].mxu0 }
 0xc80   :  { %v8092_v61 = vpop.f32.mrb[15].mxu0  ;;  %v11193_v45 = vld [vmem:[%s18519_s6 + $0x3] ss:$0 sm:$0xff] }
 0xc95   :  { %v13511_v20 = vpop.f32.mrb[16].mxu0 }
 0xc96   :  { %v8208_v7 = vadd.f32 %v13511_v20, %v13495_v37  ;;  %v8199_v3 = vpop.f32.mrb[17].mxu0 }
 0xc97   :  { %v8200_v55 = vadd.f32 %v8199_v3, %v8089_v1  ;;  %v13512_v16 = vpop.f32.mrb[18].mxu0 }
 0xc98   :  { %v8202_v12 = vpop.f32.mrb[19].mxu0 }
 0xc99   :  { %v8203_v0 = vadd.f32 %v8202_v12, %v8092_v61 }
 0xcad   :  { %v13551_v26 = vpop.f32.mrb[52].mxu0 }
 0xcae   :  { %v8424_v40 = vadd.f32 %v13551_v26, %v8208_v7  ;;  %v8400_v31 = vpop.f32.mrb[53].mxu0  ;;  %v18809_v26 = vmax.f32 %v16761_v43, 0.0  ;;  %v18812_v43 = vmax.f32 %v16805_v62, 0.0 }
 0xcaf   :  { %v8422_v2 = vadd.f32 %v8400_v31, %v8200_v55  ;;  %v13552_v56 = vpop.f32.mrb[54].mxu0  ;;  %v18808_v55 = vmax.f32 %v16769_v28, 0.0 }
 0xcb0   :  { %v8403_v15 = vpop.f32.mrb[55].mxu0 }
 0xcb1   :  { %v8423_v18 = vadd.f32 %v8403_v15, %v8203_v0  ;;  %v18811_v15 = vmax.f32 %v16773_v54, 0.0 }
 0xcc5   :  { %v13591_v41 = vpop.f32.mrb[56].mxu0 }
 0xcc6   :  { %v8636_v11 = vadd.f32 %v13591_v41, %v8424_v40  ;;  %v8612_v8 = vpop.f32.mrb[57].mxu0 }
 0xcc7   :  { %v8634_v60 = vadd.f32 %v8612_v8, %v8422_v2  ;;  %v13592_v44 = vpop.f32.mrb[58].mxu0  ;;  %v18810_v2 = vmax.f32 %v16765_v50, 0.0 }
 0xcc8   :  { %v8615_v47 = vpop.f32.mrb[59].mxu0 }
 0xcc9   :  { %v8635_v52 = vadd.f32 %v8615_v47, %v8423_v18 }
 0xcdd   :  { %v13607_v36 = vpop.f32.mrb[60].mxu0 }
 0xcde   :  { %v8761_v53 = vadd.f32 %v13607_v36, %v8636_v11  ;;  %v8737_v49 = vpop.f32.mrb[61].mxu0 }
 0xcdf   :  { %v8759_v63 = vadd.f32 %v8737_v49, %v8634_v60  ;;  %v13608_v10 = vpop.f32.mrb[62].mxu0 }
 0xce0   :  { %v8740_v6 = vpop.f32.mrb[63].mxu0  ;;  %v18813_v10 = vmax.f32 %v16793_v24, 0.0 }
 0xce1   :  { %v8760_v14 = vadd.f32 %v8740_v6, %v8635_v52 }
 0xcf5   :  { %v13647_v19 = vpop.f32.mrb[64].mxu0 }
 0xcf6   :  { %v8973_v27 = vadd.f32 %v13647_v19, %v8761_v53  ;;  %v8949_v22 = vpop.f32.mrb[65].mxu0 }
 0xcf7   :  { %v8971_v33 = vadd.f32 %v8949_v22, %v8759_v63  ;;  %v13648_v59 = vpop.f32.mrb[66].mxu0 }
 0xcf8   :  { %v8952_v35 = vpop.f32.mrb[67].mxu0 }
 0xcf9   :  { %v8972_v39 = vadd.f32 %v8952_v35, %v8760_v14  ;;  %v18814_v14 = vmax.f32 %v16799_v46, 0.0 }
 0xd0d   :  { %v13687_v57 = vpop.f32.mrb[68].mxu0 }
 0xd0e   :  { %v9185_v13 = vadd.f32 %v13687_v57, %v8973_v27  ;;  %v9161_v25 = vpop.f32.mrb[69].mxu0  ;;  %v18815_v27 = vmax.f32 %v16809_v30, 0.0 }
 0xd0f   :  { %v9183_v32 = vadd.f32 %v9161_v25, %v8971_v33  ;;  %v13688_v58 = vpop.f32.mrb[70].mxu0 }
 0xd10   :  { %v9164_v9 = vpop.f32.mrb[71].mxu0 }
 0xd11   :  { %v9184_v23 = vadd.f32 %v9164_v9, %v8972_v39 }
 0xd25   :  { %v13727_v34 = vpop.f32.mrb[72].mxu0 }
 0xd26   :  { %v9397_v17 = vadd.f32 %v13727_v34, %v9185_v13  ;;  %v9373_v38 = vpop.f32.mrb[73].mxu0 }
 0xd27   :  { %v9395_v42 = vadd.f32 %v9373_v38, %v9183_v32  ;;  %v13728_v5 = vpop.f32.mrb[74].mxu0  ;;  %v18816_v38 = vmax.f32 %v16838_v51, 0.0  ;;  %v11194_v51 = vld [vmem:[%s18521_s8] ss:$0 sm:$0xff] }
 0xd28   :  { %v9376_v37 = vpop.f32.mrb[75].mxu0 }
 0xd29   :  { %v9396_v1 = vadd.f32 %v9376_v37, %v9184_v23 }
 0xd2d   :  { %v13759_v61 = vpop.f32.mrb[44].mxu0 }
 0xd2e   :  { %v9617_v4 = vadd.f32 %v13759_v61, %v11193_v45  ;;  %v9553_v20 = vpop.f32.mrb[45].mxu0 }
 0xd2f   :  { %v9615_v7 = vadd.f32 %v11193_v45, %v9553_v20  ;;  %v13760_v3 = vpop.f32.mrb[46].mxu0 }
 0xd30   :  { %v9628_v16 = vadd.f32 %v9617_v4, %v18808_v55  ;;  %v9618_v12 = vadd.f32 %v13760_v3, %v11193_v45  ;;  %v9556_v0 = vpop.f32.mrb[47].mxu0 }
 0xd31   :  { %v9626_v40 = vadd.f32 %v9615_v7, %v18809_v26  ;;  %v9616_v31 = vadd.f32 %v11193_v45, %v9556_v0 }
 0xd32   :  { %v9629_v56 = vadd.f32 %v9618_v12, %v18810_v2  ;;  %v9639_v29 = vmax.f32 %v9628_v16, 0.0 }
 0xd33   :  { %v9627_v18 = vadd.f32 %v9616_v31, %v18811_v15  ;;  %v9637_v11 = vmax.f32 %v9626_v40, 0.0 }
 0xd34   :  { %v9640_v41 = vmax.f32 %v9629_v56, 0.0 }
 0xd35   :  { %v9638_v8 = vmax.f32 %v9627_v18, 0.0  ;;  %v13763_v60 = vpop.f32.mrb[48].mxu0 }
 0xd36   :  { %v9649_v44 = vpack.c.bf16 %v9640_v41, %v9639_v29  ;;  %v9621_v28 = vadd.f32 %v13763_v60, %v11193_v45  ;;  %v9569_v47 = vpop.f32.mrb[49].mxu0 }
 0xd37   :  { %v9648_v52 = vpack.c.bf16 %v9638_v8, %v9637_v11  ;;  %v9619_v36 = vadd.f32 %v11193_v45, %v9569_v47  ;;  %v13764_v53 = vpop.f32.mrb[50].mxu0 }
 0xd38   :  { %v9632_v49 = vadd.f32 %v9621_v28, %v18812_v43  ;;  %v9622_v63 = vadd.f32 %v13764_v53, %v11193_v45  ;;  %v9572_v50 = vpop.f32.mrb[51].mxu0 }
 0xd39   :  { %v9630_v54 = vadd.f32 %v9619_v36, %v18813_v10  ;;  %v9620_v6 = vadd.f32 %v11193_v45, %v9572_v50  ;;  %13773 = vmatprep.mubr.msk.bf16.mxu1 %vm2488_vm4, %v9648_v52 }
 0xd3a   :  { %v9633_v19 = vadd.f32 %v9622_v63, %v18814_v14  ;;  %13774 = vmatmul.mubr.msk.bf16.vlgmr.msra.gmra.mrb[116].mxu1 %vm2488_vm4, %v9649_v44  ;;  %v9643_v33 = vmax.f32 %v9632_v49, 0.0 }
 0xd3b   :  { %v9631_v22 = vadd.f32 %v9620_v6, %v18815_v27  ;;  %v9641_v62 = vmax.f32 %v9630_v54, 0.0  ;;  %v14515_v27 = vmov 0  }
 0xd3c   :  { %v9644_v59 = vmax.f32 %v9633_v19, 0.0 }
 0xd3d   :  { %v9642_v35 = vmax.f32 %v9631_v22, 0.0  ;;  %v13767_v39 = vpop.f32.mrb[76].mxu0  ;;  %v14516_v22 = vmov 1  }
 0xd3e   :  { %v9651_v57 = vpack.c.bf16 %v9644_v59, %v9643_v33  ;;  %v9609_v13 = vadd.f32 %v13767_v39, %v9397_v17  ;;  %v9585_v24 = vpop.f32.mrb[77].mxu0  ;;  %v18817_v17 = vmax.f32 %v16844_v48, 0.0  ;;  %v14517_v33 = vmov 0.0   ;;  %v10026_v39 = vld [vmem:[%s18523_s11] sm:$0xff] }
 0xd3f   :  { %v9650_v25 = vpack.c.bf16 %v9642_v35, %v9641_v62  ;;  %v9607_v32 = vadd.f32 %v9585_v24, %v9395_v42  ;;  %v13768_v58 = vpop.f32.mrb[78].mxu0  ;;  %10315 = vst [vmem:[%s18522_s15] sm:$0x3] %v14517_v33  ;;  %v14518_v59 = vmov 0.0|0.0   ;;  %v10028_v24 = vld [vmem:[%s18523_s11 + $0x10] sm:$0xff]  ;;  %13807 = vmatprep.mubr.msk.f32.mxu0 %vm14519_vm6, %v14517_v33 }
 0xd40   :  { %v9625_v9 = vadd.f32 %v11193_v45, %v9609_v13  ;;  %v9588_v23 = vpop.f32.mrb[79].mxu0  ;;  %13810 = vmatprep.subr.bf16.mxu0 %v14518_v59  ;;  %v10033_v13 = vld [vmem:[%s18523_s11 + $0x38] sm:$0xff]  ;;  %v10031_v58 = vld [vmem:[%s18523_s11 + $0x28] sm:$0xff] }
 0xd41   :  { %v9623_v46 = vadd.f32 %v11193_v45, %v9607_v32  ;;  %v9608_v34 = vadd.f32 %v9588_v23, %v9396_v1  ;;  %13777 = vmatprep.mubr.msk.bf16.mxu1 %vm2488_vm4, %v9650_v25  ;;  %v14514_v1 = vmov 2   ;;  %v10029_v25 = vld [vmem:[%s18523_s11 + $0x18] sm:$0xff] }
 0xd42   :  { %v9636_v30 = vadd.f32 %v9625_v9, %v16848_v21  ;;  %13778 = vmatmul.mubr.msk.bf16.gmra.mrb[120].mxu1 %vm2488_vm4, %v9651_v57  ;;  %14254 = vset.pattern.permute.xlu1 %v14514_v1  ;;  %v10027_v57 = vld [vmem:[%s18523_s11 + $0x8] sm:$0xff] }
 0xd43   :  { %v9634_v5 = vadd.f32 %v9623_v46, %v18816_v38  ;;  %v9624_v37 = vadd.f32 %v11193_v45, %v9608_v34  ;;  %14253 = vset.pattern.permute.xlu0 %v14514_v1  ;;  %v10032_v34 = vld [vmem:[%s18523_s11 + $0x30] sm:$0xff] }
 0xd44   :  { %v9647_v4 = vmax.f32 %v9636_v30, 0.0 }
 0xd45   :  { %v9635_v61 = vadd.f32 %v9624_v37, %v18817_v17  ;;  %v9645_v42 = vmax.f32 %v9634_v5, 0.0  ;;  %v10030_v37 = vld [vmem:[%s18523_s11 + $0x20] sm:$0xff] }
 0xd46   :  { %v9653_v3 = vpack.c.bf16 %v9647_v4, %v9647_v4 }
 0xd47   :  { %v9646_v20 = vmax.f32 %v9635_v61, 0.0 }
 0xd49   :  { %v9652_v7 = vpack.c.bf16 %v9646_v20, %v9645_v42  ;;  %v10035_v20 = vld [vmem:[%s18523_s11 + $0x48] sm:$0xff] }
 0xd4b   :  { %13781 = vmatprep.mubr.msk.bf16.mxu1 %vm2488_vm4, %v9652_v7 }
 0xd4c   :  { %13782 = vmatmul.mubr.msk.bf16.gmra.mrb[124].mxu1 %vm2488_vm4, %v9653_v3  ;;  %v10037_v3 = vld [vmem:[%s18523_s11 + $0x58] sm:$0xff] }
 0xd4d   :  { %10196 = vmatprep.mubr.f32.mxu1 %v14517_v33 }
 0xe0d   :  { %v13775_v48 = vpop.f32.mrb[116].mxu1 }
 0xe0e   :  { %v9738_v21 = vadd.f32 %v13775_v48, %v11194_v51  ;;  %v9729_v45 = vpop.f32.mrb[117].mxu1 }
 0xe0f   :  { %v9730_v55 = vadd.f32 %v11194_v51, %v9729_v45  ;;  %v13776_v16 = vpop.f32.mrb[118].mxu1  ;;  %v10034_v45 = vld [vmem:[%s18523_s11 + $0x40] sm:$0xff] }
 0xe10   :  { %v9777_v12 = vmax.f32 %v9738_v21, 0.0  ;;  %v9741_v0 = vadd.f32 %v13776_v16, %v11194_v51  ;;  %v9732_v26 = vpop.f32.mrb[119].mxu1 }
 0xe11   :  { %v9775_v40 = vmax.f32 %v9730_v55, 0.0  ;;  %v9733_v31 = vadd.f32 %v11194_v51, %v9732_v26  ;;  %v10039_v26 = vld [vmem:[%s18523_s11 + $0x68] sm:$0xff] }
 0xe12   :  { %10057 = vperm.xlu1 %14254, %v9777_v12   ;;  %v9778_v2 = vmax.f32 %v9741_v0, 0.0 }
 0xe13   :  { %10049 = vperm.xlu0 %14253, %v9775_v40   ;;  %v9776_v56 = vmax.f32 %v9733_v31, 0.0  ;;  %v10041_v31 = vld [vmem:[%s18523_s11 + $0x78] sm:$0xff] }
 0xe15   :  { %v13779_v15 = vpop.f32.mrb[120].mxu1 }
 0xe16   :  { %10061 = vperm.xlu1 %14254, %v9778_v2   ;;  %v9745_v18 = vpop.f32.mrb[121].mxu1  ;;  %v9754_v8 = vadd.f32 %v13779_v15, %v11194_v51 }
 0xe17   :  { %v9746_v29 = vadd.f32 %v11194_v51, %v9745_v18  ;;  %10053 = vperm.xlu0 %14253, %v9776_v56   ;;  %v13780_v41 = vpop.f32.mrb[122].mxu1 }
 0xe18   :  { %v9748_v11 = vpop.f32.mrb[123].mxu1  ;;  %v9757_v28 = vadd.f32 %v13780_v41, %v11194_v51  ;;  %v9781_v52 = vmax.f32 %v9754_v8, 0.0 }
 0xe19   :  { %v9779_v60 = vmax.f32 %v9746_v29, 0.0  ;;  %v9749_v44 = vadd.f32 %v11194_v51, %v9748_v11  ;;  %v10038_v29 = vld [vmem:[%s18523_s11 + $0x60] sm:$0xff] }
 0xe1a   :  { %v9782_v36 = vmax.f32 %v9757_v28, 0.0  ;;  %v10042_v28 = vld [vmem:[%s18523_s11 + $0x80] sm:$0xff] }
 0xe1b   :  { %v9780_v47 = vmax.f32 %v9749_v44, 0.0  ;;  %10065 = vperm.xlu0 %14253, %v9779_v60  }
 0xe1d   :  { %10069 = vperm.xlu1 %14254, %v9780_v47  }
 0xe1f   :  { %10073 = vperm.xlu0 %14253, %v9781_v52   ;;  %v13783_v53 = vpop.f32.mrb[124].mxu1 }
 0xe20   :  { %v9761_v43 = vpop.f32.mrb[125].mxu1  ;;  %v9770_v10 = vadd.f32 %v13783_v53, %v11194_v51  ;;  %v10044_v53 = vld [vmem:[%s18523_s11 + $0x90] sm:$0xff] }
 0xe21   :  { %v9762_v49 = vadd.f32 %v11194_v51, %v9761_v43  ;;  %10077 = vperm.xlu1 %14254, %v9782_v36   ;;  %v13784_v63 = vpop.f32.mrb[126].mxu1  ;;  %v10045_v43 = vld [vmem:[%s18523_s11 + $0x98] sm:$0xff] }
 0xe22   :  { %v9764_v50 = vpop.f32.mrb[127].mxu1  ;;  %v9785_v19 = vmax.f32 %v9770_v10, 0.0 }
 0xe23   :  { %v9783_v54 = vmax.f32 %v9762_v49, 0.0  ;;  %v9765_v6 = vadd.f32 %v11194_v51, %v9764_v50  ;;  %v10036_v51 = vld [vmem:[%s18523_s11 + $0x50] sm:$0xff] }
 0xe25   :  { %v9784_v14 = vmax.f32 %v9765_v6, 0.0  ;;  %10081 = vperm.xlu0 %14253, %v9783_v54  }
 0xe27   :  { %10085 = vperm.xlu1 %14254, %v9784_v14  }
 0xe29   :  { %10089 = vperm.xlu0 %14253, %v9785_v19  }
 0xe2b   :  { %14255 = vset.pattern.permute.xlu1 %v14515_v27 }
 0xe2c   :  { %9799 = vperm.xlu1 %14255, %v9775_v40  }
 0xe2d   :  { %14258 = vset.pattern.permute.xlu0 %v14516_v22 }
 0xe2e   :  { %9884 = vperm.xlu0 %14258, %v9777_v12  }
 0xe30   :  { %14256 = vset.pattern.permute.xlu1 %v14516_v22 }
 0xe31   :  { %9876 = vperm.xlu1 %14256, %v9775_v40  }
 0xe32   :  { %9900 = vperm.xlu0 %14258, %v9781_v52  }
 0xe35   :  { %9880 = vperm.xlu1 %14256, %v9776_v56  }
 0xe36   :  { %14263 = vset.pattern.permute.xlu0 %v14515_v27 }
 0xe37   :  { %9804 = vperm.xlu0 %14263, %v9776_v56   ;;  %v10040_v56 = vld [vmem:[%s18523_s11 + $0x70] sm:$0xff] }
 0xe39   :  { %14257 = vset.pattern.permute.xlu1 %v14515_v27 }
 0xe3a   :  { %9814 = vperm.xlu1 %14257, %v9778_v2  }
 0xe3b   :  { %9809 = vperm.xlu0 %14263, %v9777_v12  }
 0xe3e   :  { %14259 = vset.pattern.permute.xlu1 %v14516_v22 }
 0xe3f   :  { %9888 = vperm.xlu1 %14259, %v9778_v2   ;;  %9824 = vperm.xlu0 %14263, %v9780_v47  }
 0xe43   :  { %14260 = vset.pattern.permute.xlu1 %v14515_v27  ;;  %9829 = vperm.xlu0 %14263, %v9781_v52   ;;  %v10043_v52 = vld [vmem:[%s18523_s11 + $0x88] sm:$0xff] }
 0xe44   :  { %9819 = vperm.xlu1 %14260, %v9779_v60  }
 0xe47   :  { %9844 = vperm.xlu0 %14263, %v9784_v14  }
 0xe48   :  { %14261 = vset.pattern.permute.xlu1 %v14516_v22 }
 0xe49   :  { %9892 = vperm.xlu1 %14261, %v9779_v60  }
 0xe4b   :  { %9849 = vperm.xlu0 %14263, %v9785_v19  }
 0xe4d   :  { %9896 = vperm.xlu1 %14261, %v9780_v47  }
 0xe4f   :  { %14267 = vset.pattern.permute.xlu0 %v14514_v1 }
 0xe51   :  { %14262 = vset.pattern.permute.xlu1 %v14515_v27 }
 0xe52   :  { %9834 = vperm.xlu1 %14262, %v9782_v36  }
 0xe56   :  { %14264 = vset.pattern.permute.xlu1 %v14516_v22 }
 0xe57   :  { %9904 = vperm.xlu1 %14264, %v9782_v36  }
 0xe5b   :  { %14265 = vset.pattern.permute.xlu1 %v14515_v27 }
 0xe5c   :  { %9839 = vperm.xlu1 %14265, %v9783_v54  }
 0xe60   :  { %14266 = vset.pattern.permute.xlu1 %v14516_v22 }
 0xe61   :  { %9908 = vperm.xlu1 %14266, %v9783_v54  }
 0xe65   :  { %9912 = vperm.xlu1 %14266, %v9784_v14   ;;  %v10047_v14 = vld [vmem:[%s18523_s11 + $0xa8] sm:$0xf] }
 0xe69   :  { %9916 = vperm.xlu1 %14266, %v9785_v19  }
 0xe91   :  { %v10058_v62 = vpop.permute.xlu1 %10057 }
 0xe92   :  { %v10050_v35 = vpop.permute.xlu0 %10049  ;;  %v10097_v17 = vmul.f32 %v10058_v62, %v10031_v58  ;;  %v10096_v48 = vmul.f32 %v10058_v62, %v10030_v37  ;;  %v10221_v62 = vld [vmem:[%s18524_s13 + $0x80] sm:$0xff]  ;;  %v10224_v58 = vld [vmem:[%s18524_s13 + $0x98] sm:$0xff] }
 0xe93   :  { %v10092_v9 = vmul.f32 %v10050_v35, %v10026_v39  ;;  %v10093_v46 = vmul.f32 %v10050_v35, %v10027_v57  ;;  %v10222_v35 = vld [vmem:[%s18524_s13 + $0x88] sm:$0xff]  ;;  %v10046_v39 = vld [vmem:[%s18523_s11 + $0xa0] sm:$0xf]  ;;  %v10208_v37 = vld [vmem:[%s18524_s13 + $0x18] sm:$0xff] }
 0xe95   :  { %v10062_v32 = vpop.permute.xlu1 %10061 }
 0xe96   :  { %v10054_v23 = vpop.permute.xlu0 %10053  ;;  %v10099_v30 = vmul.f32 %v10062_v32, %v10033_v13  ;;  %v10098_v42 = vmul.f32 %v10062_v32, %v10032_v34  ;;  %v10223_v32 = vld [vmem:[%s18524_s13 + $0x90] sm:$0xff]  ;;  %v18337_v34 = vld [vmem:[%s18525_s2] sm:$0x3] }
 0xe97   :  { %v10094_v38 = vmul.f32 %v10054_v23, %v10028_v24  ;;  %v10095_v5 = vmul.f32 %v10054_v23, %v10029_v25  ;;  %v10205_v24 = vld [vmem:[%s18524_s13] sm:$0xff]  ;;  %v10206_v25 = vld [vmem:[%s18524_s13 + $0x8] sm:$0xff]  ;;  %v13845_v23 = vpack.c.bf16 %v10222_v35, %v10221_v62 }
 0xe98   :  { %v13829_v1 = vpack.c.bf16 %v10099_v30, %v10097_v17  ;;  %v13831_v12 = vpack.c.bf16 %v10098_v42, %v10096_v48  ;;  %v13847_v30 = vpack.c.bf16 %v10206_v25, %v10205_v24  ;;  %v10209_v48 = vld [vmem:[%s18524_s13 + $0x20] sm:$0xff]  ;;  %v10234_v25 = vld [vmem:[%s18524_s13 + $0xe8] sm:$0xff] }
 0xe99   :  { %v13825_v61 = vpack.c.bf16 %v10095_v5, %v10093_v46  ;;  %v13827_v4 = vpack.c.bf16 %v10094_v38, %v10092_v9  ;;  %v13849_v38 = vpack.c.bf16 %v10224_v58, %v10223_v32  ;;  %v10207_v5 = vld [vmem:[%s18524_s13 + $0x10] sm:$0xff]  ;;  %v10233_v24 = vld [vmem:[%s18524_s13 + $0xe0] sm:$0xff] }
 0xe9a   :  { %v10066_v7 = vpop.permute.xlu0 %10065 }
 0xe9b   :  { %13826 = vmatprep.subr.bf16.mxu1 %v13825_v61  ;;  %v10101_v55 = vmul.f32 %v10066_v7, %v10035_v20  ;;  %v10100_v15 = vmul.f32 %v10066_v7, %v10034_v45  ;;  %v10225_v61 = vld [vmem:[%s18524_s13 + $0xa0] sm:$0xff]  ;;  %v11203_v7 = vld [vmem:[%s18526_s9 + $0x58] sm:$0xff] }
 0xe9c   :  { %13828 = vmatpush1.bf16.msra.mxu1 %v13827_v4  ;;  %v10070_v21 = vpop.permute.xlu1 %10069  ;;  %v10226_v4 = vld [vmem:[%s18524_s13 + $0xa8] sm:$0xff]  ;;  %v9786_v20 = vld [vmem:[%s18526_s9] sm:$0xff] }
 0xe9d   :  { %v10103_v16 = vmul.f32 %v10070_v21, %v10037_v3  ;;  %13830 = vmatprep.subr.bf16.mxu1 %v13829_v1  ;;  %v10102_v0 = vmul.f32 %v10070_v21, %v10036_v51  ;;  %v13851_v3 = vpack.c.bf16 %v10208_v37, %v10207_v5  ;;  %v11204_v1 = vld [vmem:[%s18526_s9 + $0x60] sm:$0xff]  ;;  %v13853_v51 = vpack.c.bf16 %v10226_v4, %v10225_v61  ;;  %v10210_v21 = vld [vmem:[%s18524_s13 + $0x28] sm:$0xff] }
 0xe9e   :  { %v10074_v40 = vpop.permute.xlu0 %10073  ;;  %v9791_v37 = vld [vmem:[%s18526_s9 + $0x28] sm:$0xff]  ;;  %v9790_v61 = vld [vmem:[%s18526_s9 + $0x20] sm:$0xff] }
 0xe9f   :  { %v13833_v2 = vpack.c.bf16 %v10103_v16, %v10101_v55  ;;  %v10105_v41 = vmul.f32 %v10074_v40, %v10039_v26  ;;  %v13835_v8 = vpack.c.bf16 %v10102_v0, %v10100_v15  ;;  %v10104_v47 = vmul.f32 %v10074_v40, %v10038_v29  ;;  %v9787_v55 = vld [vmem:[%s18526_s9 + $0x8] sm:$0xff]  ;;  %v10227_v16 = vld [vmem:[%s18524_s13 + $0xb0] sm:$0xff]  ;;  %v10212_v29 = vld [vmem:[%s18524_s13 + $0x38] sm:$0xff] }
 0xea0   :  { %13832 = vmatpush1.bf16.msra.mxu1 %v13831_v12  ;;  %v10078_v18 = vpop.permute.xlu1 %10077  ;;  %v10228_v12 = vld [vmem:[%s18524_s13 + $0xb8] sm:$0xff]  ;;  %v13855_v40 = vpack.c.bf16 %v10210_v21, %v10209_v48  ;;  %v11208_v4 = vld [vmem:[%s18526_s9 + $0x80] sm:$0xff] }
 0xea1   :  { %v10107_v11 = vmul.f32 %v10078_v18, %v10041_v31  ;;  %13834 = vmatprep.subr.bf16.mxu1 %v13833_v2  ;;  %v10106_v60 = vmul.f32 %v10078_v18, %v10040_v56  ;;  %v13857_v15 = vpack.c.bf16 %v10228_v12, %v10227_v16  ;;  %v10211_v18 = vld [vmem:[%s18524_s13 + $0x30] sm:$0xff] }
 0xea2   :  { %v9792_v16 = vld [vmem:[%s18526_s9 + $0x30] sm:$0xff] }
 0xea3   :  { %v13837_v44 = vpack.c.bf16 %v10107_v11, %v10105_v41  ;;  %v13839_v49 = vpack.c.bf16 %v10106_v60, %v10104_v47  ;;  %v10229_v41 = vld [vmem:[%s18524_s13 + $0xc0] sm:$0xff]  ;;  %v10230_v11 = vld [vmem:[%s18524_s13 + $0xc8] sm:$0xff]  ;;  %v9788_v47 = vld [vmem:[%s18526_s9 + $0x10] sm:$0xff] }
 0xea4   :  { %13836 = vmatpush1.bf16.msra.mxu1 %v13835_v8  ;;  %v10082_v36 = vpop.permute.xlu0 %10081 }
 0xea5   :  { %13838 = vmatprep.subr.bf16.mxu1 %v13837_v44  ;;  %v10108_v50 = vmul.f32 %v10082_v36, %v10042_v28  ;;  %v10109_v10 = vmul.f32 %v10082_v36, %v10043_v52  ;;  %v11205_v28 = vld [vmem:[%s18526_s9 + $0x68] sm:$0xff]  ;;  %v13859_v36 = vpack.c.bf16 %v10212_v29, %v10211_v18 }
 0xea6   :  { %v10086_v63 = vpop.permute.xlu1 %10085 }
 0xea7   :  { %v10110_v54 = vmul.f32 %v10086_v63, %v10044_v53  ;;  %v10111_v6 = vmul.f32 %v10086_v63, %v10045_v43  ;;  %v9789_v43 = vld [vmem:[%s18526_s9 + $0x18] sm:$0xff]  ;;  %v10213_v63 = vld [vmem:[%s18524_s13 + $0x40] sm:$0xff] }
 0xea8   :  { %13840 = vmatpush1.bf16.msra.mxu1 %v13839_v49  ;;  %v10090_v19 = vpop.permute.xlu0 %10089  ;;  %v13861_v49 = vpack.c.bf16 %v10230_v11, %v10229_v41 }
 0xea9   :  { %v13841_v27 = vpack.c.bf16 %v10111_v6, %v10109_v10  ;;  %v13843_v22 = vpack.c.bf16 %v10110_v54, %v10108_v50  ;;  %v10113_v57 = vmul.f32 %v10090_v19, %v10047_v14  ;;  %v10112_v46 = vmul.f32 %v10090_v19, %v10046_v39  ;;  %v10214_v50 = vld [vmem:[%s18524_s13 + $0x48] sm:$0xff]  ;;  %v11206_v10 = vld [vmem:[%s18526_s9 + $0x70] sm:$0xff]  ;;  %v10232_v6 = vld [vmem:[%s18524_s13 + $0xd8] sm:$0xff] }
 0xeaa   :  { %v10231_v54 = vld [vmem:[%s18524_s13 + $0xd0] sm:$0xff] }
 0xeab   :  { %v9800_v13 = vpop.permute.xlu1 %9799  ;;  %13842 = vmatprep.subr.bf16.mxu1 %v13841_v27  ;;  %v13863_v27 = vpack.c.bf16 %v10214_v50, %v10213_v63  ;;  %v13865_v39 = vpack.c.bf16 %v10232_v6, %v10231_v54  ;;  %v11213_v63 = vld [vmem:[%s18526_s9 + $0xa8] sm:$0xf]  ;;  %v9796_v54 = vld [vmem:[%s18526_s9 + $0x50] sm:$0xf] }
 0xeac   :  { %13844 = vmatpush1.bf16.msra.mxu1 %v13843_v22  ;;  %v9852_v31 = vmul.f32 %v9800_v13, %v9786_v20  ;;  %v10216_v13 = vld [vmem:[%s18524_s13 + $0x58] sm:$0xff] }
 0xead   :  { %11217 = vmatprep.subr.msk.mxu1 %vm9952_vm5, %v10113_v57  ;;  %v18332_v9 = vpop.permute.xlu0 %9884  ;;  %v10215_v57 = vld [vmem:[%s18524_s13 + $0x50] sm:$0xff] }
 0xeae   :  { %v9921_v22 = vmul.f32 %v11205_v28, %v18332_v9  ;;  %v13867_v9 = vpack.c.bf16 %v10216_v13, %v10215_v57  ;;  %v9795_v28 = vld [vmem:[%s18526_s9 + $0x48] sm:$0xff]  ;;  %v10235_v13 = vld [vmem:[%s18524_s13 + $0xf0] sm:$0xff] }
 0xeb0   :  { %v9877_v17 = vpop.permute.xlu1 %9876  ;;  %11218 = vmatpush1.msk.msra.mxu1 %vm9952_vm5, %v10112_v46 }
 0xeb1   :  { %11219 = vmatmul.mubr.msk.f32.vlgmr.msra.gmra.mrb[128].mxu1 %vm136_vm0, %v18337_v34  ;;  %v18354_v42 = vpop.permute.xlu0 %9900  ;;  %13846 = vmatprep.subr.bf16.mxu1 %v13845_v23  ;;  %v9919_v0 = vmul.f32 %v11203_v7, %v9877_v17 }
 0xeb2   :  { %13848 = vmatpush3.bf16.msra.mxu1 %v13847_v30  ;;  %v13869_v30 = vpack.c.bf16 %v10234_v25, %v10233_v24  ;;  %v10236_v24 = vld [vmem:[%s18524_s13 + $0xf8] sm:$0xff] }
 0xeb3   :  { %13850 = vmatprep.subr.bf16.mxu1 %v13849_v38  ;;  %v9930_v8 = vadd.f32 %v9919_v0, %v9852_v31  ;;  %v11207_v38 = vld [vmem:[%s18526_s9 + $0x78] sm:$0xff]  ;;  %v11209_v0 = vld [vmem:[%s18526_s9 + $0x88] sm:$0xff]  ;;  %v13873_v25 = vpack.c.bf16 %v10236_v24, %v10235_v13 }
 0xeb4   :  { %v9881_v45 = vpop.permute.xlu1 %9880 }
 0xeb5   :  { %v9920_v2 = vmul.f32 %v11204_v1, %v9881_v45 }
 0xeb6   :  { %v9805_v26 = vpop.permute.xlu0 %9804  ;;  %13852 = vmatpush3.bf16.msra.mxu1 %v13851_v3 }
 0xeb7   :  { %v9853_v56 = vmul.f32 %v9805_v26, %v9787_v55  ;;  %13854 = vmatprep.subr.bf16.mxu1 %v13853_v51  ;;  %v9793_v26 = vld [vmem:[%s18526_s9 + $0x38] sm:$0xff] }
 0xeb9   :  { %v9931_v60 = vadd.f32 %v9920_v2, %v9853_v56  ;;  %v9815_v44 = vpop.permute.xlu1 %9814  ;;  %v9925_v56 = vmul.f32 %v11209_v0, %v18354_v42  ;;  %v9794_v42 = vld [vmem:[%s18526_s9 + $0x40] sm:$0xff] }
 0xeba   :  { %v9810_v52 = vpop.permute.xlu0 %9809  ;;  %13856 = vmatpush3.bf16.msra.mxu1 %v13855_v40  ;;  %v9855_v62 = vmul.f32 %v9815_v44, %v9789_v43  ;;  %v11210_v40 = vld [vmem:[%s18526_s9 + $0x90] sm:$0xff] }
 0xebb   :  { %v13811_v53 = vpack.c.bf16 %v9931_v60, %v9930_v8  ;;  %13858 = vmatprep.subr.bf16.mxu1 %v13857_v15  ;;  %v9854_v14 = vmul.f32 %v9810_v52, %v9788_v47  ;;  %v11211_v60 = vld [vmem:[%s18526_s9 + $0x98] sm:$0xff]  ;;  %v11212_v52 = vld [vmem:[%s18526_s9 + $0xa0] sm:$0xff] }
 0xebd   :  { %13812 = vmatpush3.bf16.msra.mxu0 %v13811_v53  ;;  %v9932_v32 = vadd.f32 %v9921_v22, %v9854_v14 }
 0xebe   :  { %v9889_v19 = vpop.permute.xlu1 %9888  ;;  %13813 = vmatprep.subr.bf16.mxu0 %v14518_v59  ;;  %13860 = vmatpush3.bf16.msra.mxu1 %v13859_v36  ;;  %v9825_v17 = vpop.permute.xlu0 %9824 }
 0xebf   :  { %v9922_v35 = vmul.f32 %v11206_v10, %v9889_v19  ;;  %13862 = vmatprep.subr.bf16.mxu1 %v13861_v49  ;;  %v9857_v3 = vmul.f32 %v9825_v17, %v9791_v37 }
 0xec1   :  { %v9933_v58 = vadd.f32 %v9922_v35, %v9855_v62  ;;  %v10217_v35 = vld [vmem:[%s18524_s13 + $0x60] sm:$0xff] }
 0xec2   :  { %13864 = vmatpush3.bf16.msra.mxu1 %v13863_v27  ;;  %v9830_v12 = vpop.permute.xlu0 %9829 }
 0xec3   :  { %v13814_v23 = vpack.c.bf16 %v9933_v58, %v9932_v32  ;;  %v9820_v46 = vpop.permute.xlu1 %9819  ;;  %13866 = vmatprep.subr.bf16.mxu1 %v13865_v39  ;;  %v9858_v31 = vmul.f32 %v9830_v12, %v9792_v16  ;;  %v10218_v39 = vld [vmem:[%s18524_s13 + $0x68] sm:$0xff]  ;;  %v10219_v32 = vld [vmem:[%s18524_s13 + $0x70] sm:$0xff]  ;;  %v10220_v58 = vld [vmem:[%s18524_s13 + $0x78] sm:$0xff] }
 0xec4   :  { %v9856_v1 = vmul.f32 %v9820_v46, %v9790_v61  ;;  %v13871_v57 = vpack.c.bf16 %v10218_v39, %v10217_v35 }
 0xec5   :  { %13815 = vmatpush3.bf16.msra.mxu0 %v13814_v23  ;;  %v9936_v29 = vadd.f32 %v9925_v56, %v9858_v31  ;;  %v10116_v23 = vlaneseq }
 0xec6   :  { %13816 = vmatprep.subr.bf16.mxu0 %v14518_v59  ;;  %13868 = vmatpush3.bf16.msra.mxu1 %v13867_v9  ;;  %v9845_v47 = vpop.permute.xlu0 %9844  ;;  %v13875_v9 = vpack.c.bf16 %v10220_v58, %v10219_v32 }
 0xec7   :  { %13870 = vmatprep.subr.bf16.mxu1 %v13869_v30  ;;  %v9861_v53 = vmul.f32 %v9845_v47, %v9795_v28  ;;  %v10117_v46 = vshrl.u32 %v10116_v23, 7 }
 0xec8   :  { %v9893_v5 = vpop.permute.xlu1 %9892 }
 0xec9   :  { %v9923_v20 = vmul.f32 %v11207_v38, %v9893_v5  ;;  %v10118_v30 = vsub.s32 0, %v10117_v46  ;;  %v10114_v38 = vld [vmem:[%s18527_s12] sm:$0x3]  ;;  %v10122_v5 = vsub.s32 1, %v10117_v46 }
 0xeca   :  { %v9850_v6 = vpop.permute.xlu0 %9849  ;;  %13872 = vmatpush3.bf16.msra.mxu1 %v13871_v57 }
 0xecb   :  { %v9934_v48 = vadd.f32 %v9923_v20, %v9856_v1  ;;  %v9862_v22 = vmul.f32 %v9850_v6, %v9796_v54  ;;  %13874 = vmatprep.subr.bf16.mxu1 %v13873_v25  ;;  %v10119_v37 = vrot.slane %v10114_v38, %v10118_v30  ;;  %v10123_v17 = vrot.slane %v10114_v38, %v10122_v5 }
 0xecc   :  { %v9897_v7 = vpop.permute.xlu1 %9896 }
 0xecd   :  { %v9924_v51 = vmul.f32 %v11208_v4, %v9897_v7 }
 0xece   :  { %13876 = vmatpush3.bf16.msra.mxu1 %v13875_v9 }
 0xecf   :  { %v9935_v21 = vadd.f32 %v9924_v51, %v9857_v3  ;;  %v11214_v51 = vld [vmem:[%s18529_s10] ss:$0 sm:$0xff] }
 0xed1   :  { %v13817_v45 = vpack.c.bf16 %v9935_v21, %v9934_v48  ;;  %v9835_v55 = vpop.permute.xlu1 %9834 }
 0xed2   :  { %v9859_v15 = vmul.f32 %v9835_v55, %v9793_v26 }
 0xed3   :  { %13818 = vmatpush3.bf16.msra.mxu0 %v13817_v45 }
 0xed4   :  { %13819 = vmatprep.subr.bf16.mxu0 %v14518_v59 }
 0xed6   :  { %v9905_v2 = vpop.permute.xlu1 %9904 }
 0xed7   :  { %v9926_v18 = vmul.f32 %v11210_v40, %v9905_v2 }
 0xed9   :  { %v9937_v41 = vadd.f32 %v9926_v18, %v9859_v15 }
 0xedb   :  { %v13820_v11 = vpack.c.bf16 %v9937_v41, %v9936_v29  ;;  %v9840_v8 = vpop.permute.xlu1 %9839 }
 0xedc   :  { %v9860_v43 = vmul.f32 %v9840_v8, %v9794_v42 }
 0xedd   :  { %13821 = vmatpush3.bf16.msra.mxu0 %v13820_v11 }
 0xede   :  { %13822 = vmatprep.subr.bf16.mxu0 %v14518_v59 }
 0xee0   :  { %v9909_v44 = vpop.permute.xlu1 %9908 }
 0xee1   :  { %v9927_v36 = vmul.f32 %v11211_v60, %v9909_v44 }
 0xee3   :  { %v9938_v50 = vadd.f32 %v9927_v36, %v9860_v43 }
 0xee4   :  { %v9913_v59 = vpop.permute.xlu1 %9912 }
 0xee5   :  { %v9928_v49 = vmul.f32 %v11212_v52, %v9913_v59 }
 0xee7   :  { %v9939_v10 = vadd.f32 %v9928_v49, %v9861_v53 }
 0xee8   :  { %v9917_v14 = vpop.permute.xlu1 %9916 }
 0xee9   :  { %v13823_v19 = vpack.c.bf16 %v9939_v10, %v9938_v50  ;;  %v9929_v27 = vmul.f32 %v11213_v63, %v9917_v14 }
 0xeeb   :  { %13824 = vmatpush3.bf16.msra.mxu0 %v13823_v19  ;;  %v9940_v62 = vadd.f32 %v9929_v27, %v9862_v22 }
 0xeec   :  { %13805 = vmatprep.subr.mxu0 %v14517_v33  ;;  %v20_v33 = vstv %s18528_s14  ;;  %s14520_s14 = smov 7  }
 0xeed   :  { %21 = vst [vmem:[#allocation2] sm:$0x1] %v20_v33 }
 0xeef   :  { %13806 = vmatpush3.msk.msra.mxu0 %vm9952_vm5, %v9940_v62 }
 0xef0   :  { %13808 = vmatmul.mubr.msk.f32.vlgmr.msra.gmra.mrb[80].mxu0 %vm136_vm0, %v18337_v34 }
 0xef4   :  { %v11220_v55 = vld [vmem:[#allocation2] ss:$0 sm:$0xff] }
 0xf84   :  { %v10198_v61 = vpop.f32.mrb[128].mxu1 }
 0xf85   :  { %v10199_v4 = vadd.f32 %v10198_v61, %v10119_v37  ;;  %v10200_v20 = vpop.f32.mrb[129].mxu1 }
 0xf86   :  { %v10201_v7 = vadd.f32 %v10200_v20, %v10123_v17 }
 0xf87   :  { %v10203_v1 = vmax.f32 %v10199_v4, 0.0 }
 0xf88   :  { %v10204_v3 = vmax.f32 %v10201_v7, 0.0 }
 0xf8a   :  { %10308 = vmatprep.mubr.f32.mxu1 %v10204_v3 }
 0xf8b   :  { %10309 = vmatmul.mubr.f32.vlgmr.msra.gmra.mrb[130].mxu1 %v10203_v1 }
 0xfc3   :  { %v10022_v34 = vpop.f32.mrb[80].mxu0 }
 0xfc4   :  { %v13809_v48 = vpop.f32.mrb[81].mxu0  ;;  %v10023_v21 = vadd.f32 %v11214_v51, %v10022_v34 }
 0xfc6   :  { %10317 = vst.msk [vmem:[%s18522_s15] sm:$0x3] %vm10316_vm7, %v10023_v21 }
0x105e   :  { %v12104_v45 = vpop.f32.mrb[130].mxu1 }
0x105f   :  { %v12105_v16 = vpop.f32.mrb[131].mxu1 }
0x1060   :  { %v12106_v12 = vadd.f32 %v12105_v16, %v12104_v45 }
0x1062   :  { %v10311_v0 = vadd.f32 %v12106_v12, %v11220_v55 }
0x1064   :  { %14396 = vtanh.f32 %v10311_v0 }
0x106e   :  { %v14397_v26 = vpop.eup %14396 }
0x106f   :  { %10319 = vrot.lane.b32.xlu0 %v14397_v26, %s14520_s14 }
0x10e1   :  { %v10320_v40 = vpop.permute.xlu0 %10319 }
0x10e2   :  { %10323 = vst.msk [vmem:[%s18522_s15] sm:$0x3] %vm10322_vm8, %v10320_v40 }

</bundles_post_ra>
